<compile_context>
chip_gen: v7x
topology: tpu7x:2x2x1
jax: 0.10.0
libtpu: 0.0.40
codegen_flags: <defaults>
</compile_context>

<pallas_src>
import jax
import jax.numpy as jnp
from jax import lax
from jax.experimental import pallas as pl
from jax.experimental.pallas import tpu as pltpu

BN_EPS = 1e-5
_VMEM_LIMIT = 48 * 1024 * 1024  # < v7x 64 MiB physical; plenty for v5e/v6e too


# ---------------------------------------------------------------------------
# Pass 1: per-channel statistics via X-side sums (conv output never hits HBM).
#   gram += X @ X^T        (Cin, Cin)
#   rsum += sum_p X[:, p]  (Cin, 1)
# ---------------------------------------------------------------------------
def _stats_kernel(x_ref, gram_ref, rsum_ref):
    first = jnp.logical_and(pl.program_id(0) == 0, pl.program_id(1) == 0)

    @pl.when(first)
    def _():
        gram_ref[...] = jnp.zeros_like(gram_ref)
        rsum_ref[...] = jnp.zeros_like(rsum_ref)

    x = x_ref[...]                                           # (Cin, THW) f32
    # X @ X^T : contract the spatial (lane) axis of both operands on the MXU.
    gram_ref[...] += lax.dot_general(
        x, x, (((1,), (1,)), ((), ())), preferred_element_type=jnp.float32)
    rsum_ref[...] += jnp.sum(x, axis=1, keepdims=True)


# ---------------------------------------------------------------------------
# Pass 2: fused 1x1-conv + folded-BN affine + residual add.
#   out = (W @ x) * scale + shift + res
# ---------------------------------------------------------------------------
def _apply_kernel(x_ref, w_ref, scale_ref, shift_ref, res_ref, o_ref):
    y = jnp.dot(w_ref[...], x_ref[...], preferred_element_type=jnp.float32)
    o_ref[...] = (y * scale_ref[...] + shift_ref[...]
                  + res_ref[...]).astype(o_ref.dtype)


@jax.jit
def conv_bn_add(x98, w, gamma, beta, x92):
    """x98: (N, Cin, H, W); w: (Cout, Cin, 1, 1); x92: (N, Cout, H, W)."""
    n, cin, h, wd = x98.shape
    cout = w.shape[0]
    hw = h * wd
    m_total = n * hw

    x3 = x98.reshape(n, cin, hw)          # free reshape, no transpose
    res3 = x92.reshape(n, cout, hw)       # free reshape, no transpose
    w_mat = w.reshape(cout, cin)

    # --- static tile sizes ---------------------------------------------------
    # Spatial tile must be a multiple of 128 or the full extent (784 here).
    thw = 512 if (hw % 512 == 0) else hw
    tco = 256 if (cout % 256 == 0) else cout
    g_hw = hw // thw
    g_co = cout // tco

    # --- pass 1: accumulate rowsum(X) and Gram(X) over (batch, spatial) -----
    gram, rsum = pl.pallas_call(
        _stats_kernel,
        out_shape=(
            jax.ShapeDtypeStruct((cin, cin), jnp.float32),
            jax.ShapeDtypeStruct((cin, 1), jnp.float32),
        ),
        grid=(n, g_hw),
        in_specs=[pl.BlockSpec((None, cin, thw), lambda i, t: (i, 0, t))],
        out_specs=(
            pl.BlockSpec((cin, cin), lambda i, t: (0, 0)),
            pl.BlockSpec((cin, 1), lambda i, t: (0, 0)),
        ),
        compiler_params=pltpu.CompilerParams(
            dimension_semantics=("arbitrary", "arbitrary"),
            vmem_limit_bytes=_VMEM_LIMIT,
        ),
        cost_estimate=pl.CostEstimate(
            flops=2 * m_total * cin * cin,
            transcendentals=0,
            bytes_accessed=4 * (n * cin * hw + cin * cin + cin),
        ),
    )(x3)

    # --- derive batch-norm stats, fold into per-channel scale/shift ---------
    inv_m = 1.0 / float(m_total)
    mean = (w_mat @ rsum).reshape(cout) * inv_m                  # (Cout,)
    ey2 = jnp.sum((w_mat @ (gram * inv_m)) * w_mat, axis=1)      # (Cout,)
    var = jnp.maximum(ey2 - mean * mean, 0.0)                    # biased var
    scale = gamma * lax.rsqrt(var + BN_EPS)
    shift = beta - mean * scale
    scale2 = scale.reshape(cout, 1).astype(jnp.float32)
    shift2 = shift.reshape(cout, 1).astype(jnp.float32)

    # --- pass 2: fused conv + affine + residual, all-parallel grid ----------
    out3 = pl.pallas_call(
        _apply_kernel,
        out_shape=jax.ShapeDtypeStruct((n, cout, hw), x92.dtype),
        grid=(n, g_hw, g_co),
        in_specs=[
            pl.BlockSpec((None, cin, thw), lambda i, t, c: (i, 0, t)),
            pl.BlockSpec((tco, cin), lambda i, t, c: (c, 0)),
            pl.BlockSpec((tco, 1), lambda i, t, c: (c, 0)),
            pl.BlockSpec((tco, 1), lambda i, t, c: (c, 0)),
            pl.BlockSpec((None, tco, thw), lambda i, t, c: (i, c, t)),
        ],
        out_specs=pl.BlockSpec((None, tco, thw), lambda i, t, c: (i, c, t)),
        compiler_params=pltpu.CompilerParams(
            dimension_semantics=("parallel", "parallel", "parallel"),
            vmem_limit_bytes=_VMEM_LIMIT,
        ),
        cost_estimate=pl.CostEstimate(
            flops=2 * m_total * cin * cout + 3 * m_total * cout,
            transcendentals=0,
            bytes_accessed=4 * (g_co * n * cin * hw + cout * cin
                                + 2 * cout + 2 * n * cout * hw),
        ),
    )(x3, w_mat, scale2, shift2, res3)

    # TODO(synk): BatchNorm2d running_mean/running_var buffer updates
    # (training-mode side effects) are not materialized here.
    return out3.reshape(n, cout, h, wd)


def _reference(x98, w, gamma, beta, x92):
    # Pure-JAX reference mirroring PyTorch training-mode Conv+BN+Add semantics.
    cout, cin = w.shape[0], w.shape[1]
    y = jnp.einsum("oc,nchw->nohw", w.reshape(cout, cin), x98)
    mean = jnp.mean(y, axis=(0, 2, 3), keepdims=True)
    var = jnp.mean((y - mean) ** 2, axis=(0, 2, 3), keepdims=True)
    yhat = (y - mean) * lax.rsqrt(var + BN_EPS)
    return yhat * gamma.reshape(1, -1, 1, 1) + beta.reshape(1, -1, 1, 1) + x92


if __name__ == "__main__":
    # Channel counts are fixed by the module (256 -> 1024); spatial/batch
    # follow the original spec (1, 28, 28) — small enough, realistic layout.
    N, CIN, COUT, H, W = 1, 256, 1024, 28, 28

    key = jax.random.PRNGKey(0)
    k_x98, k_x92, k_w, k_g, k_b = jax.random.split(key, 5)

    x98 = jax.random.normal(k_x98, (N, CIN, H, W), dtype=jnp.float32)
    x92 = jax.random.normal(k_x92, (N, COUT, H, W), dtype=jnp.float32)
    w = jax.random.normal(k_w, (COUT, CIN, 1, 1), dtype=jnp.float32) * 0.05
    gamma = 1.0 + 0.1 * jax.random.normal(k_g, (COUT,), dtype=jnp.float32)
    beta = 0.1 * jax.random.normal(k_b, (COUT,), dtype=jnp.float32)

    out = conv_bn_add(x98, w, gamma, beta, x92)
    out = jax.block_until_ready(out)

    ref = _reference(x98, w, gamma, beta, x92)
    assert out.shape == (N, COUT, H, W)
    max_err = float(jnp.max(jnp.abs(out - ref)))
    assert jnp.allclose(out, ref, atol=2e-3, rtol=2e-3), (
        f"mismatch vs reference, max abs err={max_err}")

    print("KERNEL_OK")
</pallas_src>

<mosaic_0001>
module attributes {stable_mosaic.version = 11 : i64} {
  func.func @_stats_kernel(%arg0: i32, %arg1: i32, %arg2: memref<1x256x784xf32, #tpu.memory_space<vmem>>, %arg3: memref<256x256xf32, #tpu.memory_space<vmem>>, %arg4: memref<256x1xf32, #tpu.memory_space<vmem>>) attributes {dimension_semantics = [#tpu.dimension_semantics<arbitrary>, #tpu.dimension_semantics<arbitrary>], iteration_bounds = array<i64: 1, 1>, scalar_prefetch = 0 : i64, scratch_operands = 0 : i64, tpu.core_type = #tpu.core_type<tc>, window_params = [{transform_indices = @transform_0, window_bounds = array<i64: 1, 256, 784>}, {pipeline_mode = #tpu.pipeline_mode<synchronous>, transform_indices = @transform_1, window_bounds = array<i64: 256, 256>}, {pipeline_mode = #tpu.pipeline_mode<synchronous>, transform_indices = @transform_2, window_bounds = array<i64: 256, 1>}]} {
    %c0_i32 = arith.constant 0 : i32
    %0 = arith.cmpi eq, %arg0, %c0_i32 : i32
    %c0_i32_0 = arith.constant 0 : i32
    %1 = arith.cmpi eq, %arg1, %c0_i32_0 : i32
    %2 = arith.andi %0, %1 : i1
    %3 = arith.extui %2 : i1 to i32
    %c0_i32_1 = arith.constant 0 : i32
    %4 = arith.cmpi ne, %3, %c0_i32_1 : i32
    scf.if %4 {
      %cst_13 = arith.constant 0.000000e+00 : f32
      %16 = vector.broadcast %cst_13 : f32 to vector<256x256xf32>
      %c0_14 = arith.constant 0 : index
      %c0_15 = arith.constant 0 : index
      %17 = vector.load %arg3[%c0_14, %c0_15] : memref<256x256xf32, #tpu.memory_space<vmem>>, vector<256x256xf32>
      tpu.vector_store %arg3[%c0_14, %c0_15], %16 {strides = array<i32>} : memref<256x256xf32, #tpu.memory_space<vmem>>, vector<256x256xf32>,
      %cst_16 = arith.constant 0.000000e+00 : f32
      %18 = vector.broadcast %cst_16 : f32 to vector<256x1xf32>
      %c0_17 = arith.constant 0 : index
      %c0_18 = arith.constant 0 : index
      %19 = vector.load %arg4[%c0_17, %c0_18] : memref<256x1xf32, #tpu.memory_space<vmem>>, vector<256x1xf32>
      tpu.vector_store %arg4[%c0_17, %c0_18], %18 {strides = array<i32>} : memref<256x1xf32, #tpu.memory_space<vmem>>, vector<256x1xf32>,
    } else {
    }
    %c0 = arith.constant 0 : index
    %c0_2 = arith.constant 0 : index
    %c0_3 = arith.constant 0 : index
    %5 = vector.load %arg2[%c0, %c0_2, %c0_3] : memref<1x256x784xf32, #tpu.memory_space<vmem>>, vector<1x256x784xf32>
    %6 = vector.shape_cast %5 : vector<1x256x784xf32> to vector<256x784xf32>
    %c0_4 = arith.constant 0 : index
    %c0_5 = arith.constant 0 : index
    %7 = vector.load %arg3[%c0_4, %c0_5] : memref<256x256xf32, #tpu.memory_space<vmem>>, vector<256x256xf32>
    %cst = arith.constant dense<0.000000e+00> : vector<256x256xf32>
    %8 = tpu.matmul %6, %6, %cst {dimension_numbers = #tpu.dot_dimension_numbers<[1], [1], [0], [0], [0, 0, 1, 0], [], []>} : vector<256x784xf32>, vector<256x784xf32>, vector<256x256xf32> -> vector<256x256xf32>
    %9 = arith.addf %7, %8 : vector<256x256xf32>
    %c0_6 = arith.constant 0 : index
    %c0_7 = arith.constant 0 : index
    %10 = vector.load %arg3[%c0_6, %c0_7] : memref<256x256xf32, #tpu.memory_space<vmem>>, vector<256x256xf32>
    tpu.vector_store %arg3[%c0_6, %c0_7], %9 {strides = array<i32>} : memref<256x256xf32, #tpu.memory_space<vmem>>, vector<256x256xf32>,
    %c0_8 = arith.constant 0 : index
    %c0_9 = arith.constant 0 : index
    %11 = vector.load %arg4[%c0_8, %c0_9] : memref<256x1xf32, #tpu.memory_space<vmem>>, vector<256x1xf32>
    %cst_10 = arith.constant dense<0.000000e+00> : vector<256xf32>
    %12 = vector.multi_reduction <add>, %6, %cst_10 [1] : vector<256x784xf32> to vector<256xf32>
    %13 = vector.shape_cast %12 : vector<256xf32> to vector<256x1xf32>
    %14 = arith.addf %11, %13 : vector<256x1xf32>
    %c0_11 = arith.constant 0 : index
    %c0_12 = arith.constant 0 : index
    %15 = vector.load %arg4[%c0_11, %c0_12] : memref<256x1xf32, #tpu.memory_space<vmem>>, vector<256x1xf32>
    tpu.vector_store %arg4[%c0_11, %c0_12], %14 {strides = array<i32>} : memref<256x1xf32, #tpu.memory_space<vmem>>, vector<256x1xf32>,
    return
  }
  func.func @transform_0(%arg0: i32, %arg1: i32) -> (i32, i32, i32) {
    %c0_i32 = arith.constant 0 : i32
    %c0_i32_0 = arith.constant 0 : i32
    return %arg0, %c0_i32, %arg1 : i32, i32, i32
  }
  func.func @transform_1(%arg0: i32, %arg1: i32) -> (i32, i32) {
    %c0_i32 = arith.constant 0 : i32
    %c0_i32_0 = arith.constant 0 : i32
    %c0_i32_1 = arith.constant 0 : i32
    return %c0_i32, %c0_i32_0 : i32, i32
  }
  func.func @transform_2(%arg0: i32, %arg1: i32) -> (i32, i32) {
    %c0_i32 = arith.constant 0 : i32
    %c0_i32_0 = arith.constant 0 : i32
    %c0_i32_1 = arith.constant 0 : i32
    return %c0_i32, %c0_i32_0 : i32, i32
  }
}

module attributes {stable_mosaic.version = 11 : i64} {
  func.func @_apply_kernel(%arg0: i32, %arg1: i32, %arg2: i32, %arg3: memref<1x256x784xf32, #tpu.memory_space<vmem>>, %arg4: memref<256x256xf32, #tpu.memory_space<vmem>>, %arg5: memref<256x1xf32, #tpu.memory_space<vmem>>, %arg6: memref<256x1xf32, #tpu.memory_space<vmem>>, %arg7: memref<1x256x784xf32, #tpu.memory_space<vmem>>, %arg8: memref<1x256x784xf32, #tpu.memory_space<vmem>>) attributes {dimension_semantics = [#tpu.dimension_semantics<parallel>, #tpu.dimension_semantics<parallel>, #tpu.dimension_semantics<parallel>], iteration_bounds = array<i64: 1, 1, 4>, scalar_prefetch = 0 : i64, scratch_operands = 0 : i64, tpu.core_type = #tpu.core_type<tc>, window_params = [{transform_indices = @transform_0, window_bounds = array<i64: 1, 256, 784>}, {transform_indices = @transform_1, window_bounds = array<i64: 256, 256>}, {transform_indices = @transform_2, window_bounds = array<i64: 256, 1>}, {transform_indices = @transform_3, window_bounds = array<i64: 256, 1>}, {transform_indices = @transform_4, window_bounds = array<i64: 1, 256, 784>}, {transform_indices = @transform_5, window_bounds = array<i64: 1, 256, 784>}]} {
    %c0 = arith.constant 0 : index
    %c0_0 = arith.constant 0 : index
    %0 = vector.load %arg4[%c0, %c0_0] : memref<256x256xf32, #tpu.memory_space<vmem>>, vector<256x256xf32>
    %c0_1 = arith.constant 0 : index
    %c0_2 = arith.constant 0 : index
    %c0_3 = arith.constant 0 : index
    %1 = vector.load %arg3[%c0_1, %c0_2, %c0_3] : memref<1x256x784xf32, #tpu.memory_space<vmem>>, vector<1x256x784xf32>
    %2 = vector.shape_cast %1 : vector<1x256x784xf32> to vector<256x784xf32>
    %cst = arith.constant dense<0.000000e+00> : vector<256x784xf32>
    %3 = tpu.matmul %0, %2, %cst {dimension_numbers = #tpu.dot_dimension_numbers<[1], [0], [0], [1], [0, 0, 1, 1], [], []>} : vector<256x256xf32>, vector<256x784xf32>, vector<256x784xf32> -> vector<256x784xf32>
    %c0_4 = arith.constant 0 : index
    %c0_5 = arith.constant 0 : index
    %4 = vector.load %arg5[%c0_4, %c0_5] : memref<256x1xf32, #tpu.memory_space<vmem>>, vector<256x1xf32>
    %5 = vector.broadcast %4 : vector<256x1xf32> to vector<256x784xf32>
    %6 = arith.mulf %3, %5 : vector<256x784xf32>
    %c0_6 = arith.constant 0 : index
    %c0_7 = arith.constant 0 : index
    %7 = vector.load %arg6[%c0_6, %c0_7] : memref<256x1xf32, #tpu.memory_space<vmem>>, vector<256x1xf32>
    %8 = vector.broadcast %7 : vector<256x1xf32> to vector<256x784xf32>
    %9 = arith.addf %6, %8 : vector<256x784xf32>
    %c0_8 = arith.constant 0 : index
    %c0_9 = arith.constant 0 : index
    %c0_10 = arith.constant 0 : index
    %10 = vector.load %arg7[%c0_8, %c0_9, %c0_10] : memref<1x256x784xf32, #tpu.memory_space<vmem>>, vector<1x256x784xf32>
    %11 = vector.shape_cast %10 : vector<1x256x784xf32> to vector<256x784xf32>
    %12 = arith.addf %9, %11 : vector<256x784xf32>
    %c0_11 = arith.constant 0 : index
    %c0_12 = arith.constant 0 : index
    %c0_13 = arith.constant 0 : index
    %13 = vector.load %arg8[%c0_11, %c0_12, %c0_13] : memref<1x256x784xf32, #tpu.memory_space<vmem>>, vector<1x256x784xf32>
    %14 = vector.shape_cast %13 : vector<1x256x784xf32> to vector<256x784xf32>
    %15 = vector.shape_cast %12 : vector<256x784xf32> to vector<1x256x784xf32>
    tpu.vector_store %arg8[%c0_11, %c0_12, %c0_13], %15 {strides = array<i32>} : memref<1x256x784xf32, #tpu.memory_space<vmem>>, vector<1x256x784xf32>,
    return
  }
  func.func @transform_0(%arg0: i32, %arg1: i32, %arg2: i32) -> (i32, i32, i32) {
    %c0_i32 = arith.constant 0 : i32
    %c0_i32_0 = arith.constant 0 : i32
    return %arg0, %c0_i32, %arg1 : i32, i32, i32
  }
  func.func @transform_1(%arg0: i32, %arg1: i32, %arg2: i32) -> (i32, i32) {
    %c0_i32 = arith.constant 0 : i32
    %c0_i32_0 = arith.constant 0 : i32
    return %arg2, %c0_i32 : i32, i32
  }
  func.func @transform_2(%arg0: i32, %arg1: i32, %arg2: i32) -> (i32, i32) {
    %c0_i32 = arith.constant 0 : i32
    %c0_i32_0 = arith.constant 0 : i32
    return %arg2, %c0_i32 : i32, i32
  }
  func.func @transform_3(%arg0: i32, %arg1: i32, %arg2: i32) -> (i32, i32) {
    %c0_i32 = arith.constant 0 : i32
    %c0_i32_0 = arith.constant 0 : i32
    return %arg2, %c0_i32 : i32, i32
  }
  func.func @transform_4(%arg0: i32, %arg1: i32, %arg2: i32) -> (i32, i32, i32) {
    %c0_i32 = arith.constant 0 : i32
    return %arg0, %arg2, %arg1 : i32, i32, i32
  }
  func.func @transform_5(%arg0: i32, %arg1: i32, %arg2: i32) -> (i32, i32, i32) {
    %c0_i32 = arith.constant 0 : i32
    return %arg0, %arg2, %arg1 : i32, i32, i32
  }
}

</mosaic_0001>

<bundles_post_ra>
// kernel: conv_bn_add.2
= control target key start
LH: loop header
LB: loop body
LE: loop exit
PB: predicated region body
PF: predicated region fallthrough
CT: control target
= control target key end

     0   :  { %vm401_vm0 = vcmask 130048   ;;  %vm80_vm2 = vcmask 7168   ;;  %s5560_s0 = inlined_call_operand.vmem [shape: f32[1,256,784], index: 0, kind: input, shape index: {}]   ;;  %s5561_s2 = inlined_call_operand.vmem [shape: f32[256,1], index: 2, kind: output, shape index: {1}]   ;;  %s5562_s1 = inlined_call_operand.vmem [shape: f32[256,256], index: 1, kind: output, shape index: {0}]  }
   0x1   :  { %v114_v0 = vld [vmem:[%s5560_s0 + $0x8] sm:$0xff]  ;;  %v2795_v1 = vld [vmem:[%s5560_s0 + $0x40] sm:$0xff]  ;;  %v2814_v6 = vld [vmem:[%s5560_s0 + $0x38] sm:$0xff] }
   0x2   :  { %v118_v2 = vld [vmem:[%s5560_s0 + $0x28] sm:$0xff]  ;;  %v2207_v3 = vpack.c.bf16 %v2795_v1, %v114_v0  ;;  %v2804_v4 = vld [vmem:[%s5560_s0 + $0x60] sm:$0xff]  ;;  %562 = vmatprep.mubr.f32.mxu1 %v114_v0  ;;  %v2827_v10 = vld [vmem:[%s5560_s0 + $0x58] sm:$0xff] }
   0x3   :  { %v2809_v5 = vld [vmem:[%s5560_s0] sm:$0xff]  ;;  %1076 = vmatprep.mubr.f32.mxu0 %v118_v2  ;;  %v2335_v7 = vpack.c.bf16 %v2804_v4, %v118_v2  ;;  %v2834_v12 = vld [vmem:[%s5560_s0 + $0x78] sm:$0xff]  ;;  %v2839_v13 = vld [vmem:[%s5560_s0 + $0xb0] sm:$0xff] }
   0x4   :  { %v2209_v8 = vpack.c.bf16 %v2814_v6, %v2809_v5  ;;  %v2822_v9 = vld [vmem:[%s5560_s0 + $0x20] sm:$0xff]  ;;  %2208 = vmatprep.subr.bf16.mxu1 %v2207_v3  ;;  %v2844_v14 = vld [vmem:[%s5560_s0 + $0x98] sm:$0xff]  ;;  %v2211_v15 = vpack.c.bf16 %v2839_v13, %v2834_v12  ;;  %v2851_v16 = vld [vmem:[%s5560_s0 + $0xd0] sm:$0xff] }
   0x5   :  { %v2337_v11 = vpack.c.bf16 %v2827_v10, %v2822_v9  ;;  %2336 = vmatprep.subr.bf16.mxu0 %v2335_v7  ;;  %v2339_v17 = vpack.c.bf16 %v2851_v16, %v2844_v14  ;;  %v2858_v18 = vld [vmem:[%s5560_s0 + $0x70] sm:$0xff]  ;;  %v2863_v19 = vld [vmem:[%s5560_s0 + $0xa8] sm:$0xff]  ;;  %v2883_v23 = vld [vmem:[%s5560_s0 + $0x120] sm:$0xff] }
   0x6   :  { %2210 = vmatpush1.bf16.xpose.msra.mxu1 %v2209_v8  ;;  %v2868_v20 = vld [vmem:[%s5560_s0 + $0x90] sm:$0xff]  ;;  %v2873_v21 = vld [vmem:[%s5560_s0 + $0xc8] sm:$0xff]  ;;  %v2893_v25 = vld [vmem:[%s5560_s0 + $0x140] sm:$0xff]  ;;  %v2213_v26 = vpack.c.bf16 %v2863_v19, %v2858_v18 }
   0x7   :  { %2338 = vmatpush1.bf16.xpose.msra.mxu0 %v2337_v11  ;;  %2212 = vmatprep.subr.bf16.mxu1 %v2211_v15  ;;  %v2878_v22 = vld [vmem:[%s5560_s0 + $0xe8] sm:$0xff]  ;;  %v2341_v27 = vpack.c.bf16 %v2873_v21, %v2868_v20  ;;  %v2906_v30 = vld [vmem:[%s5560_s0 + $0xe0] sm:$0xff]  ;;  %v2911_v31 = vld [vmem:[%s5560_s0 + $0x118] sm:$0xff] }
   0x8   :  { %2340 = vmatprep.subr.bf16.mxu0 %v2339_v17  ;;  %v2888_v24 = vld [vmem:[%s5560_s0 + $0x108] sm:$0xff]  ;;  %v2215_v28 = vpack.c.bf16 %v2883_v23, %v2878_v22  ;;  %v2916_v32 = vld [vmem:[%s5560_s0 + $0x100] sm:$0xff]  ;;  %v2921_v33 = vld [vmem:[%s5560_s0 + $0x138] sm:$0xff]  ;;  %v2217_v38 = vpack.c.bf16 %v2911_v31, %v2906_v30 }
   0x9   :  { %v2343_v29 = vpack.c.bf16 %v2893_v25, %v2888_v24  ;;  %v2926_v34 = vld [vmem:[%s5560_s0 + $0x158] sm:$0xff]  ;;  %v2931_v35 = vld [vmem:[%s5560_s0 + $0x190] sm:$0xff]  ;;  %v2345_v39 = vpack.c.bf16 %v2921_v33, %v2916_v32  ;;  %v2959_v43 = vld [vmem:[%s5560_s0 + $0x188] sm:$0xff] }
   0xa   :  { %v2936_v36 = vld [vmem:[%s5560_s0 + $0x178] sm:$0xff]  ;;  %v2941_v37 = vld [vmem:[%s5560_s0 + $0x1b0] sm:$0xff]  ;;  %v2219_v40 = vpack.c.bf16 %v2931_v35, %v2926_v34  ;;  %v2969_v45 = vld [vmem:[%s5560_s0 + $0x1a8] sm:$0xff] }
   0xb   :  { %v2347_v41 = vpack.c.bf16 %v2941_v37, %v2936_v36  ;;  %v2954_v42 = vld [vmem:[%s5560_s0 + $0x150] sm:$0xff]  ;;  %v2974_v46 = vld [vmem:[%s5560_s0 + $0x1c8] sm:$0xff]  ;;  %v2979_v47 = vld [vmem:[%s5560_s0 + $0x200] sm:$0xff] }
   0xc   :  { %v2964_v44 = vld [vmem:[%s5560_s0 + $0x170] sm:$0xff]  ;;  %v2984_v48 = vld [vmem:[%s5560_s0 + $0x1e8] sm:$0xff]  ;;  %v2989_v49 = vld [vmem:[%s5560_s0 + $0x220] sm:$0xff]  ;;  %v2221_v50 = vpack.c.bf16 %v2959_v43, %v2954_v42  ;;  %v2223_v52 = vpack.c.bf16 %v2979_v47, %v2974_v46 }
   0xd   :  { %v2349_v51 = vpack.c.bf16 %v2969_v45, %v2964_v44  ;;  %v2351_v53 = vpack.c.bf16 %v2989_v49, %v2984_v48  ;;  %v3002_v54 = vld [vmem:[%s5560_s0 + $0x1c0] sm:$0xff]  ;;  %v3007_v55 = vld [vmem:[%s5560_s0 + $0x1f8] sm:$0xff]  ;;  %v3027_v59 = vld [vmem:[%s5560_s0 + $0x270] sm:$0xff] }
   0xe   :  { %2214 = vmatpush1.bf16.xpose.msra.mxu1 %v2213_v26  ;;  %v3012_v56 = vld [vmem:[%s5560_s0 + $0x1e0] sm:$0xff]  ;;  %v3017_v57 = vld [vmem:[%s5560_s0 + $0x218] sm:$0xff]  ;;  %v3037_v61 = vld [vmem:[%s5560_s0 + $0x290] sm:$0xff]  ;;  %v2225_v62 = vpack.c.bf16 %v3007_v55, %v3002_v54 }
   0xf   :  { %2342 = vmatpush1.bf16.xpose.msra.mxu0 %v2341_v27  ;;  %2216 = vmatprep.subr.bf16.mxu1 %v2215_v28  ;;  %v3022_v58 = vld [vmem:[%s5560_s0 + $0x238] sm:$0xff]  ;;  %v2353_v63 = vpack.c.bf16 %v3017_v57, %v3012_v56  ;;  %v3050_v3 = vld [vmem:[%s5560_s0 + $0x230] sm:$0xff]  ;;  %v3055_v7 = vld [vmem:[%s5560_s0 + $0x268] sm:$0xff] }
  0x10   :  { %2344 = vmatprep.subr.bf16.mxu0 %v2343_v29  ;;  %v3032_v60 = vld [vmem:[%s5560_s0 + $0x258] sm:$0xff]  ;;  %v2227_v0 = vpack.c.bf16 %v3027_v59, %v3022_v58  ;;  %v3060_v8 = vld [vmem:[%s5560_s0 + $0x250] sm:$0xff]  ;;  %v3065_v11 = vld [vmem:[%s5560_s0 + $0x288] sm:$0xff]  ;;  %v2229_v28 = vpack.c.bf16 %v3055_v7, %v3050_v3 }
  0x11   :  { %v2355_v2 = vpack.c.bf16 %v3037_v61, %v3032_v60  ;;  %v3070_v15 = vld [vmem:[%s5560_s0 + $0x2a8] sm:$0xff]  ;;  %v3075_v17 = vld [vmem:[%s5560_s0 + $0x2e0] sm:$0xff]  ;;  %v2357_v29 = vpack.c.bf16 %v3065_v11, %v3060_v8  ;;  %vm3577_vm1 = vmpackc.low %vm401_vm0, %vm401_vm0 }
  0x12   :  { %v3080_v26 = vld [vmem:[%s5560_s0 + $0x2c8] sm:$0xff]  ;;  %v3085_v27 = vld [vmem:[%s5560_s0 + $0x300] sm:$0xff] }
  0x13   :  { %5747 = vst [vmem:[#allocation2_spill] sm:$0xff] %v3085_v27 }
  0x16   :  { %2218 = vmatpush1.bf16.xpose.msra.mxu1 %v2217_v38  ;;  %v2231_v38 = vpack.c.bf16 %v3075_v17, %v3070_v15 }
  0x17   :  { %2346 = vmatpush1.bf16.xpose.msra.mxu0 %v2345_v39  ;;  %2220 = vmatprep.subr.bf16.mxu1 %v2219_v40  ;;  %v2359_v39 = vpack.c.bf16 %v3085_v27, %v3080_v26  ;;  %v3098_v40 = vld [vmem:[%s5560_s0 + $0x2a0] sm:$0xff] }
  0x18   :  { %2348 = vmatprep.subr.bf16.mxu0 %v2347_v41  ;;  %v3103_v41 = vld [vmem:[%s5560_s0 + $0x2d8] sm:$0xff]  ;;  %v3194_v27 = vld [vmem:[%s5560_s0 + $0x380] sm:$0xff] }
  0x19   :  { %5748 = vst [vmem:[#allocation3_spill] sm:$0xff] %v3103_v41  ;;  %5762 = vst [vmem:[#allocation17_spill] sm:$0xff] %v3194_v27 }
  0x1e   :  { %2222 = vmatpush1.bf16.xpose.msra.mxu1 %v2221_v50  ;;  %v3108_v50 = vld [vmem:[%s5560_s0 + $0x2c0] sm:$0xff] }
  0x1f   :  { %2350 = vmatpush1.bf16.xpose.msra.mxu0 %v2349_v51  ;;  %2224 = vmatprep.subr.bf16.mxu1 %v2223_v52  ;;  %v3113_v51 = vld [vmem:[%s5560_s0 + $0x2f8] sm:$0xff] }
  0x20   :  { %2352 = vmatprep.subr.bf16.mxu0 %v2351_v53  ;;  %5749 = vst [vmem:[#allocation4_spill] sm:$0xff] %v3113_v51  ;;  %v3118_v52 = vld [vmem:[%s5560_s0 + $0x318] sm:$0xff]  ;;  %v3123_v53 = vld [vmem:[%s5560_s0 + $0x350] sm:$0xff] }
  0x21   :  { %5750 = vst [vmem:[#allocation5_spill] sm:$0xff] %v3118_v52  ;;  %5751 = vst [vmem:[#allocation6_spill] sm:$0xff] %v3123_v53 }
  0x26   :  { %2226 = vmatpush1.bf16.xpose.msra.mxu1 %v2225_v62  ;;  %v3128_v62 = vld [vmem:[%s5560_s0 + $0x338] sm:$0xff] }
  0x27   :  { %2354 = vmatpush1.bf16.xpose.msra.mxu0 %v2353_v63  ;;  %2228 = vmatprep.subr.bf16.mxu1 %v2227_v0  ;;  %5752 = vst [vmem:[#allocation7_spill] sm:$0xff] %v3128_v62  ;;  %v3133_v63 = vld [vmem:[%s5560_s0 + $0x370] sm:$0xff]  ;;  %v2233_v0 = vpack.c.bf16 %v3103_v41, %v3098_v40 }
  0x28   :  { %2356 = vmatprep.subr.bf16.mxu0 %v2355_v2  ;;  %5753 = vst [vmem:[#allocation8_spill] sm:$0xff] %v3133_v63  ;;  %v2361_v2 = vpack.c.bf16 %v3113_v51, %v3108_v50 }
  0x2e   :  { %2230 = vmatpush1.bf16.xpose.msra.mxu1 %v2229_v28  ;;  %v2235_v28 = vpack.c.bf16 %v3123_v53, %v3118_v52  ;;  %v3156_v53 = vld [vmem:[%s5560_s0 + $0x330] sm:$0xff] }
  0x2f   :  { %2358 = vmatpush1.bf16.xpose.msra.mxu0 %v2357_v29  ;;  %2232 = vmatprep.subr.bf16.mxu1 %v2231_v38  ;;  %v2363_v29 = vpack.c.bf16 %v3133_v63, %v3128_v62  ;;  %v3146_v38 = vld [vmem:[%s5560_s0 + $0x310] sm:$0xff]  ;;  %5756 = vst [vmem:[#allocation11_spill] sm:$0xff] %v3156_v53  ;;  %v3176_v63 = vld [vmem:[%s5560_s0 + $0x3a8] sm:$0xff] }
  0x30   :  { %2360 = vmatprep.subr.bf16.mxu0 %v2359_v39  ;;  %5754 = vst [vmem:[#allocation9_spill] sm:$0xff] %v3146_v38  ;;  %v3151_v39 = vld [vmem:[%s5560_s0 + $0x348] sm:$0xff]  ;;  %5760 = vst [vmem:[#allocation15_spill] sm:$0xff] %v3176_v63 }
  0x31   :  { %5755 = vst [vmem:[#allocation10_spill] sm:$0xff] %v3151_v39  ;;  %v2237_v62 = vpack.c.bf16 %v3151_v39, %v3146_v38  ;;  %v3199_v39 = vld [vmem:[%s5560_s0 + $0x3b8] sm:$0xff]  ;;  %v3242_v38 = vld [vmem:[%s5560_s0 + $0x3f0] sm:$0xff] }
  0x32   :  { %5763 = vst [vmem:[#allocation18_spill] sm:$0xff] %v3199_v39  ;;  %5770 = vst [vmem:[#allocation25_spill] sm:$0xff] %v3242_v38 }
  0x36   :  { %2234 = vmatpush1.bf16.xpose.msra.mxu1 %v2233_v0  ;;  %v3161_v0 = vld [vmem:[%s5560_s0 + $0x368] sm:$0xff] }
  0x37   :  { %2362 = vmatpush1.bf16.xpose.msra.mxu0 %v2361_v2  ;;  %2236 = vmatprep.subr.bf16.mxu1 %v2235_v28  ;;  %5757 = vst [vmem:[#allocation12_spill] sm:$0xff] %v3161_v0  ;;  %v3166_v2 = vld [vmem:[%s5560_s0 + $0x388] sm:$0xff]  ;;  %v3171_v28 = vld [vmem:[%s5560_s0 + $0x3c0] sm:$0xff]  ;;  %v2365_v52 = vpack.c.bf16 %v3161_v0, %v3156_v53 }
  0x38   :  { %2364 = vmatprep.subr.bf16.mxu0 %v2363_v29  ;;  %5758 = vst [vmem:[#allocation13_spill] sm:$0xff] %v3166_v2  ;;  %5759 = vst [vmem:[#allocation14_spill] sm:$0xff] %v3171_v28  ;;  %v3181_v29 = vld [vmem:[%s5560_s0 + $0x3e0] sm:$0xff]  ;;  %v2239_v51 = vpack.c.bf16 %v3171_v28, %v3166_v2 }
  0x39   :  { %5761 = vst [vmem:[#allocation16_spill] sm:$0xff] %v3181_v29  ;;  %v2367_v41 = vpack.c.bf16 %v3181_v29, %v3176_v63  ;;  %v3204_v28 = vld [vmem:[%s5560_s0 + $0x3a0] sm:$0xff]  ;;  %v3224_v29 = vld [vmem:[%s5560_s0 + $0x418] sm:$0xff]  ;;  %v2241_v63 = vpack.c.bf16 %v3199_v39, %v3194_v27  ;;  %v3247_v39 = vld [vmem:[%s5560_s0 + $0x428] sm:$0xff] }
  0x3a   :  { %5764 = vst [vmem:[#allocation19_spill] sm:$0xff] %v3204_v28  ;;  %5768 = vst [vmem:[#allocation23_spill] sm:$0xff] %v3224_v29  ;;  %v3290_v27 = vld [vmem:[%s5560_s0 + $0x460] sm:$0xff] }
  0x3b   :  { %5771 = vst [vmem:[#allocation26_spill] sm:$0xff] %v3247_v39  ;;  %5778 = vst [vmem:[#allocation33_spill] sm:$0xff] %v3290_v27 }
  0x3e   :  { %2238 = vmatpush1.bf16.xpose.msra.mxu1 %v2237_v62  ;;  %v3219_v62 = vld [vmem:[%s5560_s0 + $0x430] sm:$0xff] }
  0x3f   :  { %2366 = vmatpush1.bf16.xpose.msra.mxu0 %v2365_v52  ;;  %2240 = vmatprep.subr.bf16.mxu1 %v2239_v51  ;;  %v3209_v51 = vld [vmem:[%s5560_s0 + $0x3d8] sm:$0xff]  ;;  %5767 = vst [vmem:[#allocation22_spill] sm:$0xff] %v3219_v62 }
  0x40   :  { %2368 = vmatprep.subr.bf16.mxu0 %v2367_v41  ;;  %5765 = vst [vmem:[#allocation20_spill] sm:$0xff] %v3209_v51  ;;  %v3214_v52 = vld [vmem:[%s5560_s0 + $0x3f8] sm:$0xff]  ;;  %v3229_v41 = vld [vmem:[%s5560_s0 + $0x450] sm:$0xff]  ;;  %v2369_v2 = vpack.c.bf16 %v3209_v51, %v3204_v28 }
  0x41   :  { %5766 = vst [vmem:[#allocation21_spill] sm:$0xff] %v3214_v52  ;;  %5769 = vst [vmem:[#allocation24_spill] sm:$0xff] %v3229_v41  ;;  %v2243_v0 = vpack.c.bf16 %v3219_v62, %v3214_v52  ;;  %v2371_v53 = vpack.c.bf16 %v3229_v41, %v3224_v29  ;;  %v3252_v62 = vld [vmem:[%s5560_s0 + $0x410] sm:$0xff]  ;;  %v3272_v41 = vld [vmem:[%s5560_s0 + $0x488] sm:$0xff]  ;;  %v2245_v29 = vpack.c.bf16 %v3247_v39, %v3242_v38 }
  0x42   :  { %5772 = vst [vmem:[#allocation27_spill] sm:$0xff] %v3252_v62  ;;  %5776 = vst [vmem:[#allocation31_spill] sm:$0xff] %v3272_v41  ;;  %v3295_v39 = vld [vmem:[%s5560_s0 + $0x498] sm:$0xff]  ;;  %v3338_v38 = vld [vmem:[%s5560_s0 + $0x4d0] sm:$0xff] }
  0x43   :  { %5779 = vst [vmem:[#allocation34_spill] sm:$0xff] %v3295_v39  ;;  %5786 = vst [vmem:[#allocation41_spill] sm:$0xff] %v3338_v38 }
  0x46   :  { %2242 = vmatpush1.bf16.xpose.msra.mxu1 %v2241_v63  ;;  %v3257_v63 = vld [vmem:[%s5560_s0 + $0x448] sm:$0xff] }
  0x47   :  { %2370 = vmatpush1.bf16.xpose.msra.mxu0 %v2369_v2  ;;  %2244 = vmatprep.subr.bf16.mxu1 %v2243_v0  ;;  %5773 = vst [vmem:[#allocation28_spill] sm:$0xff] %v3257_v63  ;;  %v3262_v0 = vld [vmem:[%s5560_s0 + $0x468] sm:$0xff]  ;;  %v3267_v2 = vld [vmem:[%s5560_s0 + $0x4a0] sm:$0xff]  ;;  %v2373_v52 = vpack.c.bf16 %v3257_v63, %v3252_v62 }
  0x48   :  { %2372 = vmatprep.subr.bf16.mxu0 %v2371_v53  ;;  %5774 = vst [vmem:[#allocation29_spill] sm:$0xff] %v3262_v0  ;;  %5775 = vst [vmem:[#allocation30_spill] sm:$0xff] %v3267_v2  ;;  %v3277_v53 = vld [vmem:[%s5560_s0 + $0x4c0] sm:$0xff]  ;;  %v2247_v51 = vpack.c.bf16 %v3267_v2, %v3262_v0 }
  0x49   :  { %5777 = vst [vmem:[#allocation32_spill] sm:$0xff] %v3277_v53  ;;  %v2375_v28 = vpack.c.bf16 %v3277_v53, %v3272_v41  ;;  %v3300_v2 = vld [vmem:[%s5560_s0 + $0x480] sm:$0xff]  ;;  %v3320_v53 = vld [vmem:[%s5560_s0 + $0x4f8] sm:$0xff]  ;;  %v2249_v41 = vpack.c.bf16 %v3295_v39, %v3290_v27  ;;  %v3343_v39 = vld [vmem:[%s5560_s0 + $0x508] sm:$0xff] }
  0x4a   :  { %5780 = vst [vmem:[#allocation35_spill] sm:$0xff] %v3300_v2  ;;  %5784 = vst [vmem:[#allocation39_spill] sm:$0xff] %v3320_v53  ;;  %v3386_v27 = vld [vmem:[%s5560_s0 + $0x540] sm:$0xff] }
  0x4b   :  { %5787 = vst [vmem:[#allocation42_spill] sm:$0xff] %v3343_v39  ;;  %5794 = vst [vmem:[#allocation49_spill] sm:$0xff] %v3386_v27 }
  0x4e   :  { %2246 = vmatpush1.bf16.xpose.msra.mxu1 %v2245_v29  ;;  %v3305_v29 = vld [vmem:[%s5560_s0 + $0x4b8] sm:$0xff] }
  0x4f   :  { %2374 = vmatpush1.bf16.xpose.msra.mxu0 %v2373_v52  ;;  %2248 = vmatprep.subr.bf16.mxu1 %v2247_v51  ;;  %5781 = vst [vmem:[#allocation36_spill] sm:$0xff] %v3305_v29  ;;  %v3310_v51 = vld [vmem:[%s5560_s0 + $0x4d8] sm:$0xff]  ;;  %v3315_v52 = vld [vmem:[%s5560_s0 + $0x510] sm:$0xff]  ;;  %v2377_v0 = vpack.c.bf16 %v3305_v29, %v3300_v2 }
  0x50   :  { %2376 = vmatprep.subr.bf16.mxu0 %v2375_v28  ;;  %5782 = vst [vmem:[#allocation37_spill] sm:$0xff] %v3310_v51  ;;  %5783 = vst [vmem:[#allocation38_spill] sm:$0xff] %v3315_v52  ;;  %v3325_v28 = vld [vmem:[%s5560_s0 + $0x530] sm:$0xff]  ;;  %v2251_v63 = vpack.c.bf16 %v3315_v52, %v3310_v51 }
  0x51   :  { %5785 = vst [vmem:[#allocation40_spill] sm:$0xff] %v3325_v28  ;;  %v2379_v62 = vpack.c.bf16 %v3325_v28, %v3320_v53  ;;  %v3348_v52 = vld [vmem:[%s5560_s0 + $0x4f0] sm:$0xff]  ;;  %v3368_v28 = vld [vmem:[%s5560_s0 + $0x568] sm:$0xff]  ;;  %v2253_v53 = vpack.c.bf16 %v3343_v39, %v3338_v38  ;;  %v3391_v39 = vld [vmem:[%s5560_s0 + $0x578] sm:$0xff] }
  0x52   :  { %5788 = vst [vmem:[#allocation43_spill] sm:$0xff] %v3348_v52  ;;  %5792 = vst [vmem:[#allocation47_spill] sm:$0xff] %v3368_v28  ;;  %v3434_v38 = vld [vmem:[%s5560_s0 + $0x5b0] sm:$0xff] }
  0x53   :  { %5795 = vst [vmem:[#allocation50_spill] sm:$0xff] %v3391_v39  ;;  %5802 = vst [vmem:[#allocation57_spill] sm:$0xff] %v3434_v38 }
  0x56   :  { %2250 = vmatpush1.bf16.xpose.msra.mxu1 %v2249_v41  ;;  %v3353_v41 = vld [vmem:[%s5560_s0 + $0x528] sm:$0xff] }
  0x57   :  { %2378 = vmatpush1.bf16.xpose.msra.mxu0 %v2377_v0  ;;  %2252 = vmatprep.subr.bf16.mxu1 %v2251_v63  ;;  %5789 = vst [vmem:[#allocation44_spill] sm:$0xff] %v3353_v41  ;;  %v3358_v63 = vld [vmem:[%s5560_s0 + $0x548] sm:$0xff]  ;;  %v3363_v0 = vld [vmem:[%s5560_s0 + $0x580] sm:$0xff]  ;;  %v2381_v51 = vpack.c.bf16 %v3353_v41, %v3348_v52 }
  0x58   :  { %2380 = vmatprep.subr.bf16.mxu0 %v2379_v62  ;;  %5790 = vst [vmem:[#allocation45_spill] sm:$0xff] %v3358_v63  ;;  %5791 = vst [vmem:[#allocation46_spill] sm:$0xff] %v3363_v0  ;;  %v3373_v62 = vld [vmem:[%s5560_s0 + $0x5a0] sm:$0xff]  ;;  %v2255_v29 = vpack.c.bf16 %v3363_v0, %v3358_v63 }
  0x59   :  { %5793 = vst [vmem:[#allocation48_spill] sm:$0xff] %v3373_v62  ;;  %v2383_v2 = vpack.c.bf16 %v3373_v62, %v3368_v28  ;;  %v3396_v0 = vld [vmem:[%s5560_s0 + $0x560] sm:$0xff]  ;;  %v3416_v62 = vld [vmem:[%s5560_s0 + $0x5d8] sm:$0xff]  ;;  %v2257_v28 = vpack.c.bf16 %v3391_v39, %v3386_v27  ;;  %v3439_v39 = vld [vmem:[%s5560_s0 + $0x5e8] sm:$0xff] }
  0x5a   :  { %5796 = vst [vmem:[#allocation51_spill] sm:$0xff] %v3396_v0  ;;  %5800 = vst [vmem:[#allocation55_spill] sm:$0xff] %v3416_v62  ;;  %v3482_v27 = vld [vmem:[%s5560_s0 + $0x620] sm:$0xff] }
  0x5b   :  { %5803 = vst [vmem:[#allocation58_spill] sm:$0xff] %v3439_v39  ;;  %5810 = vst [vmem:[#allocation65_spill] sm:$0xff] %v3482_v27 }
  0x5e   :  { %2254 = vmatpush1.bf16.xpose.msra.mxu1 %v2253_v53  ;;  %v3401_v53 = vld [vmem:[%s5560_s0 + $0x598] sm:$0xff] }
  0x5f   :  { %2382 = vmatpush1.bf16.xpose.msra.mxu0 %v2381_v51  ;;  %2256 = vmatprep.subr.bf16.mxu1 %v2255_v29  ;;  %5797 = vst [vmem:[#allocation52_spill] sm:$0xff] %v3401_v53  ;;  %v3406_v29 = vld [vmem:[%s5560_s0 + $0x5b8] sm:$0xff]  ;;  %v3411_v51 = vld [vmem:[%s5560_s0 + $0x5f0] sm:$0xff]  ;;  %v2385_v63 = vpack.c.bf16 %v3401_v53, %v3396_v0 }
  0x60   :  { %2384 = vmatprep.subr.bf16.mxu0 %v2383_v2  ;;  %5798 = vst [vmem:[#allocation53_spill] sm:$0xff] %v3406_v29  ;;  %5799 = vst [vmem:[#allocation54_spill] sm:$0xff] %v3411_v51  ;;  %v3421_v2 = vld [vmem:[%s5560_s0 + $0x610] sm:$0xff]  ;;  %v2259_v41 = vpack.c.bf16 %v3411_v51, %v3406_v29 }
  0x61   :  { %5801 = vst [vmem:[#allocation56_spill] sm:$0xff] %v3421_v2  ;;  %v2387_v52 = vpack.c.bf16 %v3421_v2, %v3416_v62  ;;  %v3444_v51 = vld [vmem:[%s5560_s0 + $0x5d0] sm:$0xff]  ;;  %v3464_v2 = vld [vmem:[%s5560_s0 + $0x648] sm:$0xff]  ;;  %v2261_v62 = vpack.c.bf16 %v3439_v39, %v3434_v38  ;;  %v3487_v39 = vld [vmem:[%s5560_s0 + $0x658] sm:$0xff] }
  0x62   :  { %5804 = vst [vmem:[#allocation59_spill] sm:$0xff] %v3444_v51  ;;  %5808 = vst [vmem:[#allocation63_spill] sm:$0xff] %v3464_v2  ;;  %v3530_v38 = vld [vmem:[%s5560_s0 + $0x690] sm:$0xff] }
  0x63   :  { %5811 = vst [vmem:[#allocation66_spill] sm:$0xff] %v3487_v39  ;;  %5818 = vst [vmem:[#allocation73_spill] sm:$0xff] %v3530_v38 }
  0x66   :  { %2258 = vmatpush1.bf16.xpose.msra.mxu1 %v2257_v28  ;;  %v3449_v28 = vld [vmem:[%s5560_s0 + $0x608] sm:$0xff] }
  0x67   :  { %2386 = vmatpush1.bf16.xpose.msra.mxu0 %v2385_v63  ;;  %2260 = vmatprep.subr.bf16.mxu1 %v2259_v41  ;;  %5805 = vst [vmem:[#allocation60_spill] sm:$0xff] %v3449_v28  ;;  %v3454_v41 = vld [vmem:[%s5560_s0 + $0x628] sm:$0xff]  ;;  %v3459_v63 = vld [vmem:[%s5560_s0 + $0x660] sm:$0xff]  ;;  %v2389_v29 = vpack.c.bf16 %v3449_v28, %v3444_v51 }
  0x68   :  { %2388 = vmatprep.subr.bf16.mxu0 %v2387_v52  ;;  %5806 = vst [vmem:[#allocation61_spill] sm:$0xff] %v3454_v41  ;;  %5807 = vst [vmem:[#allocation62_spill] sm:$0xff] %v3459_v63  ;;  %v3469_v52 = vld [vmem:[%s5560_s0 + $0x680] sm:$0xff]  ;;  %v2263_v53 = vpack.c.bf16 %v3459_v63, %v3454_v41 }
  0x69   :  { %5809 = vst [vmem:[#allocation64_spill] sm:$0xff] %v3469_v52  ;;  %v2391_v0 = vpack.c.bf16 %v3469_v52, %v3464_v2  ;;  %v3492_v63 = vld [vmem:[%s5560_s0 + $0x640] sm:$0xff]  ;;  %v3512_v52 = vld [vmem:[%s5560_s0 + $0x6b8] sm:$0xff]  ;;  %v2265_v2 = vpack.c.bf16 %v3487_v39, %v3482_v27  ;;  %v3535_v39 = vld [vmem:[%s5560_s0 + $0x6c8] sm:$0xff] }
  0x6a   :  { %5812 = vst [vmem:[#allocation67_spill] sm:$0xff] %v3492_v63  ;;  %5816 = vst [vmem:[#allocation71_spill] sm:$0xff] %v3512_v52 }
  0x6b   :  { %5819 = vst [vmem:[#allocation74_spill] sm:$0xff] %v3535_v39 }
  0x6e   :  { %2262 = vmatpush1.bf16.xpose.msra.mxu1 %v2261_v62  ;;  %v3497_v62 = vld [vmem:[%s5560_s0 + $0x678] sm:$0xff] }
  0x6f   :  { %2390 = vmatpush1.bf16.xpose.msra.mxu0 %v2389_v29  ;;  %2264 = vmatprep.subr.bf16.mxu1 %v2263_v53  ;;  %5813 = vst [vmem:[#allocation68_spill] sm:$0xff] %v3497_v62  ;;  %v3502_v53 = vld [vmem:[%s5560_s0 + $0x698] sm:$0xff]  ;;  %v3507_v29 = vld [vmem:[%s5560_s0 + $0x6d0] sm:$0xff]  ;;  %v2393_v41 = vpack.c.bf16 %v3497_v62, %v3492_v63 }
  0x70   :  { %2392 = vmatprep.subr.bf16.mxu0 %v2391_v0  ;;  %5814 = vst [vmem:[#allocation69_spill] sm:$0xff] %v3502_v53  ;;  %5815 = vst [vmem:[#allocation70_spill] sm:$0xff] %v3507_v29  ;;  %v3517_v0 = vld [vmem:[%s5560_s0 + $0x6f0] sm:$0xff]  ;;  %v2267_v28 = vpack.c.bf16 %v3507_v29, %v3502_v53 }
  0x71   :  { %5817 = vst [vmem:[#allocation72_spill] sm:$0xff] %v3517_v0  ;;  %v2395_v51 = vpack.c.bf16 %v3517_v0, %v3512_v52  ;;  %v3540_v29 = vld [vmem:[%s5560_s0 + $0x6b0] sm:$0xff]  ;;  %v2269_v52 = vpack.c.bf16 %v3535_v39, %v3530_v38  ;;  %v3584_v39 = vld [vmem:[%s5560_s0 + $0x48] sm:$0xff] }
  0x72   :  { %5820 = vst [vmem:[#allocation75_spill] sm:$0xff] %v3540_v29  ;;  %v3560_v0 = vld [vmem:[%s5560_s0 + $0x3b0] sm:$0xff] }
  0x73   :  { %5824 = vst [vmem:[#allocation79_spill] sm:$0xff] %v3560_v0 }
  0x76   :  { %2266 = vmatpush1.bf16.xpose.msra.mxu1 %v2265_v2  ;;  %v3545_v2 = vld [vmem:[%s5560_s0 + $0x6e8] sm:$0xff] }
  0x77   :  { %2394 = vmatpush1.bf16.xpose.msra.mxu0 %v2393_v41  ;;  %2268 = vmatprep.subr.bf16.mxu1 %v2267_v28  ;;  %5821 = vst [vmem:[#allocation76_spill] sm:$0xff] %v3545_v2  ;;  %v3550_v28 = vld [vmem:[%s5560_s0 + $0x18] sm:$0xff]  ;;  %v3555_v41 = vld [vmem:[%s5560_s0 + $0x50] sm:$0xff]  ;;  %v2397_v53 = vpack.c.bf16 %v3545_v2, %v3540_v29 }
  0x78   :  { %2396 = vmatprep.subr.bf16.mxu0 %v2395_v51  ;;  %5822 = vst [vmem:[#allocation77_spill] sm:$0xff] %v3550_v28  ;;  %5823 = vst [vmem:[#allocation78_spill] sm:$0xff] %v3555_v41  ;;  %v3565_v51 = vld [vmem:[%s5560_s0 + $0x3e8] sm:$0xff]  ;;  %v2271_v62 = vpack.c.bf16 %v3555_v41, %v3550_v28  ;;  %v3589_v41 = vld [vmem:[%s5560_s0 + $0x10] sm:$0xff] }
  0x79   :  { %5825 = vst [vmem:[#allocation80_spill] sm:$0xff] %v3565_v51  ;;  %v2399_v63 = vpack.c.bf16 %v3565_v51, %v3560_v0  ;;  %5828 = vst [vmem:[#allocation81_spill] sm:$0xff] %v3589_v41  ;;  %v3596_v0 = vld [vmem:[%s5560_s0 + $0x30] sm:$0xff]  ;;  %v245_v51 = vld [vmem:[%s5560_s0 + $0x420] sm:$0xff] }
  0x7a   :  { %v252_v28 = vld [vmem:[%s5560_s0 + $0x458] sm:$0xff] }
  0x7b   :  { %v2405_v38 = vpack.c.bf16 %v252_v28, %v245_v51  ;;  %v3694_v28 = vld [vmem:[%s5560_s0 + $0x128] sm:$0xff]  ;;  %v3728_v51 = vld [vmem:[%s5560_s0 + $0x500] sm:$0xff] }
  0x7c   :  { %5831 = vst [vmem:[#allocation84_spill] sm:$0xff] %v3728_v51 }
  0x7e   :  { %2270 = vmatpush1.bf16.xpose.msra.mxu1 %v2269_v52  ;;  %v3601_v52 = vld [vmem:[%s5560_s0 + $0x68] sm:$0xff] }
  0x7f   :  { %2398 = vmatpush1.bf16.xpose.msra.mxu0 %v2397_v53  ;;  %2272 = vmatprep.subr.bf16.mxu1 %v2271_v62  ;;  %5829 = vst [vmem:[#allocation82_spill] sm:$0xff] %v3601_v52  ;;  %v3606_v62 = vld [vmem:[%s5560_s0 + $0x88] sm:$0xff]  ;;  %v3611_v53 = vld [vmem:[%s5560_s0 + $0xc0] sm:$0xff]  ;;  %v2402_v2 = vpack.c.bf16 %v3601_v52, %v3596_v0  ;;  %v3638_v52 = vld [vmem:[%s5560_s0 + $0xb8] sm:$0xff] }
  0x80   :  { %2401 = vmatprep.subr.msk.bf16.mxu0 %vm3577_vm1, %v2399_v63  ;;  %v2273_v63 = vpack.c.bf16 %v3584_v39, %v3589_v41  ;;  %v2275_v29 = vpack.c.bf16 %v3611_v53, %v3606_v62  ;;  %v3633_v41 = vld [vmem:[%s5560_s0 + $0x80] sm:$0xff] }
  0x85   :  { %563 = vmatmul.mubr.f32.vlgmr.msra.gmra.mrb[0].mxu1 %v2809_v5  ;;  %v3644_v5 = vld [vmem:[%s5560_s0 + $0xf8] sm:$0xff] }
  0x86   :  { %1077 = vmatmul.mubr.f32.vlgmr.msra.gmra.mrb[0].mxu0 %v2822_v9  ;;  %2274 = vmatpush1.bf16.xpose.msra.mxu1 %v2273_v63  ;;  %v3662_v9 = vld [vmem:[%s5560_s0 + $0xd8] sm:$0xff] }
  0x87   :  { %2404 = vmatpush3.bf16.xpose.msk.msra.mxu0 %vm3577_vm1, %v2402_v2  ;;  %568 = vmatprep.mubr.f32.mxu1 %v2795_v1  ;;  %v3650_v1 = vld [vmem:[%s5560_s0 + $0x130] sm:$0xff]  ;;  %v3733_v63 = vld [vmem:[%s5560_s0 + $0x538] sm:$0xff] }
  0x88   :  { %1082 = vmatprep.mubr.f32.mxu0 %v2804_v4  ;;  %2276 = vmatprep.subr.bf16.mxu1 %v2275_v29  ;;  %v3657_v4 = vld [vmem:[%s5560_s0 + $0xa0] sm:$0xff]  ;;  %v3674_v29 = vld [vmem:[%s5560_s0 + $0x4c8] sm:$0xff]  ;;  %v2279_v2 = vpack.c.bf16 %v3650_v1, %v3644_v5  ;;  %5832 = vst [vmem:[#allocation85_spill] sm:$0xff] %v3733_v63 }
  0x89   :  { %569 = vmatmul.mubr.f32.gmra.mrb[2].mxu1 %v2814_v6  ;;  %2407 = vmatprep.subr.msk.bf16.mxu0 %vm3577_vm1, %v2405_v38  ;;  %v2277_v6 = vpack.c.bf16 %v3638_v52, %v3633_v41  ;;  %v259_v38 = vld [vmem:[%s5560_s0 + $0x490] sm:$0xff]  ;;  %5830 = vst [vmem:[#allocation83_spill] sm:$0xff] %v3674_v29 }
  0x8a   :  { %1083 = vmatmul.mubr.f32.gmra.mrb[2].mxu0 %v2827_v10  ;;  %574 = vmatprep.mubr.f32.mxu1 %v2834_v12  ;;  %v2408_v10 = vpack.c.bf16 %v3662_v9, %v3657_v4  ;;  %v2411_v12 = vpack.c.bf16 %v3674_v29, %v259_v38  ;;  %v3754_v38 = vld [vmem:[%s5560_s0 + $0x198] sm:$0xff]  ;;  %v5860_v29 = vld [vmem:[#allocation6_spill] sm:$0xff] }
  0x8b   :  { %1088 = vmatprep.mubr.f32.mxu0 %v2844_v14  ;;  %v3689_v14 = vld [vmem:[%s5560_s0 + $0xf0] sm:$0xff] }
  0x8d   :  { %575 = vmatmul.mubr.f32.gmra.mrb[4].mxu1 %v2858_v18  ;;  %v3714_v18 = vld [vmem:[%s5560_s0 + $0x110] sm:$0xff] }
  0x8e   :  { %1089 = vmatmul.mubr.f32.gmra.mrb[4].mxu0 %v2868_v20  ;;  %2278 = vmatpush1.bf16.xpose.msra.mxu1 %v2277_v6  ;;  %v3719_v20 = vld [vmem:[%s5560_s0 + $0x148] sm:$0xff]  ;;  %v2417_v6 = vpack.c.bf16 %v3733_v63, %v3728_v51  ;;  %v5858_v51 = vld [vmem:[#allocation9_spill] sm:$0xff] }
  0x8f   :  { %580 = vmatprep.mubr.f32.mxu1 %v2839_v13  ;;  %1094 = vmatprep.mubr.f32.mxu0 %v2851_v16  ;;  %v3701_v13 = vld [vmem:[%s5560_s0 + $0x168] sm:$0xff]  ;;  %v3707_v16 = vld [vmem:[%s5560_s0 + $0x1a0] sm:$0xff] }
  0x90   :  { %2280 = vmatprep.subr.bf16.mxu1 %v2279_v2  ;;  %2410 = vmatpush3.bf16.xpose.msk.msra.mxu0 %vm3577_vm1, %v2408_v10  ;;  %v3788_v2 = vld [vmem:[%s5560_s0 + $0x570] sm:$0xff]  ;;  %v3793_v10 = vld [vmem:[%s5560_s0 + $0x5a8] sm:$0xff] }
  0x91   :  { %581 = vmatmul.mubr.f32.gmra.mrb[6].mxu1 %v2863_v19  ;;  %2413 = vmatprep.subr.msk.bf16.mxu0 %vm3577_vm1, %v2411_v12  ;;  %v2281_v19 = vpack.c.bf16 %v3694_v28, %v3689_v14  ;;  %5833 = vst [vmem:[#allocation86_spill] sm:$0xff] %v3788_v2  ;;  %5834 = vst [vmem:[#allocation87_spill] sm:$0xff] %v3793_v10  ;;  %v2423_v12 = vpack.c.bf16 %v3793_v10, %v3788_v2  ;;  %v5857_v2 = vld [vmem:[#allocation7_spill] sm:$0xff] }
  0x92   :  { %1095 = vmatmul.mubr.f32.gmra.mrb[6].mxu0 %v2873_v21  ;;  %586 = vmatprep.mubr.f32.mxu1 %v2878_v22  ;;  %v2283_v21 = vpack.c.bf16 %v3707_v16, %v3701_v13  ;;  %v2414_v22 = vpack.c.bf16 %v3719_v20, %v3714_v18  ;;  %v5859_v63 = vld [vmem:[#allocation11_spill] sm:$0xff] }
  0x93   :  { %1100 = vmatprep.mubr.f32.mxu0 %v2888_v24  ;;  %v3749_v24 = vld [vmem:[%s5560_s0 + $0x160] sm:$0xff] }
  0x95   :  { %587 = vmatmul.mubr.f32.gmra.mrb[8].mxu1 %v2906_v30  ;;  %v3759_v30 = vld [vmem:[%s5560_s0 + $0x1d8] sm:$0xff] }
  0x96   :  { %1101 = vmatmul.mubr.f32.gmra.mrb[8].mxu0 %v2916_v32  ;;  %2282 = vmatpush1.bf16.xpose.msra.mxu1 %v2281_v19  ;;  %v3779_v32 = vld [vmem:[%s5560_s0 + $0x1b8] sm:$0xff]  ;;  %v3814_v19 = vld [vmem:[%s5560_s0 + $0x208] sm:$0xff] }
  0x97   :  { %592 = vmatprep.mubr.f32.mxu1 %v2883_v23  ;;  %1106 = vmatprep.mubr.f32.mxu0 %v2893_v25  ;;  %v3767_v23 = vld [vmem:[%s5560_s0 + $0x210] sm:$0xff]  ;;  %v3774_v25 = vld [vmem:[%s5560_s0 + $0x180] sm:$0xff] }
  0x98   :  { %2284 = vmatprep.subr.bf16.mxu1 %v2283_v21  ;;  %2416 = vmatpush3.bf16.xpose.msk.msra.mxu0 %vm3577_vm1, %v2414_v22  ;;  %v3848_v21 = vld [vmem:[%s5560_s0 + $0x5e0] sm:$0xff]  ;;  %v3853_v22 = vld [vmem:[%s5560_s0 + $0x618] sm:$0xff] }
  0x99   :  { %593 = vmatmul.mubr.f32.gmra.mrb[10].mxu1 %v2911_v31  ;;  %2419 = vmatprep.subr.msk.bf16.mxu0 %vm3577_vm1, %v2417_v6  ;;  %v2285_v31 = vpack.c.bf16 %v3754_v38, %v3749_v24  ;;  %5836 = vst [vmem:[#allocation89_spill] sm:$0xff] %v3848_v21  ;;  %5837 = vst [vmem:[#allocation90_spill] sm:$0xff] %v3853_v22  ;;  %v2429_v6 = vpack.c.bf16 %v3853_v22, %v3848_v21  ;;  %v3994_v21 = vld [vmem:[%s5560_s0 + $0x358] sm:$0xff] }
  0x9a   :  { %1107 = vmatmul.mubr.f32.gmra.mrb[10].mxu0 %v2921_v33  ;;  %598 = vmatprep.mubr.f32.mxu1 %v2926_v34  ;;  %v2287_v33 = vpack.c.bf16 %v3767_v23, %v3759_v30  ;;  %v2420_v34 = vpack.c.bf16 %v3779_v32, %v3774_v25 }
  0x9b   :  { %1112 = vmatprep.mubr.f32.mxu0 %v2936_v36  ;;  %v3809_v36 = vld [vmem:[%s5560_s0 + $0x1d0] sm:$0xff] }
  0x9d   :  { %599 = vmatmul.mubr.f32.gmra.mrb[12].mxu1 %v2954_v42  ;;  %v3819_v42 = vld [vmem:[%s5560_s0 + $0x248] sm:$0xff] }
  0x9e   :  { %1113 = vmatmul.mubr.f32.gmra.mrb[12].mxu0 %v2964_v44  ;;  %2286 = vmatpush1.bf16.xpose.msra.mxu1 %v2285_v31  ;;  %v3839_v44 = vld [vmem:[%s5560_s0 + $0x228] sm:$0xff]  ;;  %v3874_v31 = vld [vmem:[%s5560_s0 + $0x278] sm:$0xff] }
  0x9f   :  { %604 = vmatprep.mubr.f32.mxu1 %v2931_v35  ;;  %1118 = vmatprep.mubr.f32.mxu0 %v2941_v37  ;;  %v3827_v35 = vld [vmem:[%s5560_s0 + $0x280] sm:$0xff]  ;;  %v3834_v37 = vld [vmem:[%s5560_s0 + $0x1f0] sm:$0xff] }
  0xa0   :  { %2288 = vmatprep.subr.bf16.mxu1 %v2287_v33  ;;  %2422 = vmatpush3.bf16.xpose.msk.msra.mxu0 %vm3577_vm1, %v2420_v34  ;;  %5835 = vst [vmem:[#allocation88_spill] sm:$0xff] %v3834_v37  ;;  %v3908_v33 = vld [vmem:[%s5560_s0 + $0x650] sm:$0xff]  ;;  %v3913_v34 = vld [vmem:[%s5560_s0 + $0x688] sm:$0xff] }
  0xa1   :  { %605 = vmatmul.mubr.f32.gmra.mrb[14].mxu1 %v2959_v43  ;;  %2425 = vmatprep.subr.msk.bf16.mxu0 %vm3577_vm1, %v2423_v12  ;;  %v2289_v43 = vpack.c.bf16 %v3814_v19, %v3809_v36  ;;  %5840 = vst [vmem:[#allocation93_spill] sm:$0xff] %v3908_v33  ;;  %5841 = vst [vmem:[#allocation94_spill] sm:$0xff] %v3913_v34 }
  0xa2   :  { %1119 = vmatmul.mubr.f32.gmra.mrb[14].mxu0 %v2969_v45  ;;  %610 = vmatprep.mubr.f32.mxu1 %v2974_v46  ;;  %v2291_v45 = vpack.c.bf16 %v3827_v35, %v3819_v42  ;;  %v2426_v46 = vpack.c.bf16 %v3839_v44, %v3834_v37 }
  0xa3   :  { %1124 = vmatprep.mubr.f32.mxu0 %v2984_v48  ;;  %v3869_v48 = vld [vmem:[%s5560_s0 + $0x240] sm:$0xff] }
  0xa5   :  { %611 = vmatmul.mubr.f32.gmra.mrb[16].mxu1 %v3002_v54  ;;  %v3879_v54 = vld [vmem:[%s5560_s0 + $0x2b8] sm:$0xff] }
  0xa6   :  { %1125 = vmatmul.mubr.f32.gmra.mrb[16].mxu0 %v3012_v56  ;;  %2290 = vmatpush1.bf16.xpose.msra.mxu1 %v2289_v43  ;;  %v3899_v56 = vld [vmem:[%s5560_s0 + $0x298] sm:$0xff]  ;;  %v2435_v43 = vpack.c.bf16 %v3913_v34, %v3908_v33  ;;  %v5848_v34 = vld [vmem:[#allocation2_spill] sm:$0xff] }
  0xa7   :  { %616 = vmatprep.mubr.f32.mxu1 %v2979_v47  ;;  %1130 = vmatprep.mubr.f32.mxu0 %v2989_v49  ;;  %v3887_v47 = vld [vmem:[%s5560_s0 + $0x2f0] sm:$0xff]  ;;  %v3894_v49 = vld [vmem:[%s5560_s0 + $0x260] sm:$0xff]  ;;  %5839 = vst [vmem:[#allocation92_spill] sm:$0xff] %v3899_v56 }
  0xa8   :  { %2292 = vmatprep.subr.bf16.mxu1 %v2291_v45  ;;  %2428 = vmatpush3.bf16.xpose.msk.msra.mxu0 %vm3577_vm1, %v2426_v46  ;;  %5838 = vst [vmem:[#allocation91_spill] sm:$0xff] %v3894_v49  ;;  %v2432_v12 = vpack.c.bf16 %v3899_v56, %v3894_v49  ;;  %v3934_v45 = vld [vmem:[%s5560_s0 + $0x2e8] sm:$0xff]  ;;  %v3954_v46 = vld [vmem:[%s5560_s0 + $0x2d0] sm:$0xff]  ;;  %v5884_v49 = vld [vmem:[#allocation22_spill] sm:$0xff] }
  0xa9   :  { %617 = vmatmul.mubr.f32.gmra.mrb[18].mxu1 %v3007_v55  ;;  %2431 = vmatprep.subr.msk.bf16.mxu0 %vm3577_vm1, %v2429_v6  ;;  %v2293_v55 = vpack.c.bf16 %v3874_v31, %v3869_v48  ;;  %5844 = vst [vmem:[#allocation97_spill] sm:$0xff] %v3954_v46  ;;  %v3959_v6 = vld [vmem:[%s5560_s0 + $0x308] sm:$0xff] }
  0xaa   :  { %1131 = vmatmul.mubr.f32.gmra.mrb[18].mxu0 %v3017_v57  ;;  %622 = vmatprep.mubr.f32.mxu1 %v3022_v58  ;;  %v2295_v57 = vpack.c.bf16 %v3887_v47, %v3879_v54  ;;  %5845 = vst [vmem:[#allocation98_spill] sm:$0xff] %v3959_v6 }
  0xab   :  { %1136 = vmatprep.mubr.f32.mxu0 %v3032_v60  ;;  %v3929_v60 = vld [vmem:[%s5560_s0 + $0x2b0] sm:$0xff] }
  0xad   :  { %623 = vmatmul.mubr.f32.gmra.mrb[20].mxu1 %v3050_v3 }
  0xae   :  { %1137 = vmatmul.mubr.f32.gmra.mrb[20].mxu0 %v3060_v8  ;;  %2294 = vmatpush1.bf16.xpose.msra.mxu1 %v2293_v55  ;;  %v3939_v8 = vld [vmem:[%s5560_s0 + $0x328] sm:$0xff]  ;;  %v2297_v55 = vpack.c.bf16 %v3934_v45, %v3929_v60 }
  0xaf   :  { %628 = vmatprep.mubr.f32.mxu1 %v3027_v59  ;;  %1142 = vmatprep.mubr.f32.mxu0 %v3037_v61  ;;  %5842 = vst [vmem:[#allocation95_spill] sm:$0xff] %v3939_v8  ;;  %v3947_v61 = vld [vmem:[%s5560_s0 + $0x360] sm:$0xff] }
  0xb0   :  { %2296 = vmatprep.subr.bf16.mxu1 %v2295_v57  ;;  %2434 = vmatpush3.bf16.xpose.msk.msra.mxu0 %vm3577_vm1, %v2432_v12  ;;  %5843 = vst [vmem:[#allocation96_spill] sm:$0xff] %v3947_v61  ;;  %v3968_v57 = vld [vmem:[%s5560_s0 + $0x6c0] sm:$0xff]  ;;  %v3973_v12 = vld [vmem:[%s5560_s0 + $0x6f8] sm:$0xff] }
  0xb1   :  { %629 = vmatmul.mubr.f32.gmra.mrb[22].mxu1 %v3055_v7  ;;  %2437 = vmatprep.subr.msk.bf16.mxu0 %vm3577_vm1, %v2435_v43  ;;  %5846 = vst [vmem:[#allocation99_spill] sm:$0xff] %v3968_v57  ;;  %5847 = vst [vmem:[#allocation100_spill] sm:$0xff] %v3973_v12  ;;  %v2438_v43 = vpack.c.bf16 %v3959_v6, %v3954_v46  ;;  %v2441_v33 = vpack.c.bf16 %v3973_v12, %v3968_v57  ;;  %v4019_v57 = vld [vmem:[%s5560_s0 + $0x378] sm:$0xff]  ;;  %v4037_v46 = vld [vmem:[%s5560_s0 + $0x390] sm:$0xff] }
  0xb2   :  { %1143 = vmatmul.mubr.f32.gmra.mrb[22].mxu0 %v3065_v11  ;;  %634 = vmatprep.mubr.f32.mxu1 %v3070_v15  ;;  %v2299_v11 = vpack.c.bf16 %v3947_v61, %v3939_v8  ;;  %5854 = vst [vmem:[#allocation103_spill] sm:$0xff] %v4019_v57  ;;  %v5856_v12 = vld [vmem:[#allocation5_spill] sm:$0xff]  ;;  %v5883_v6 = vld [vmem:[#allocation27_spill] sm:$0xff] }
  0xb3   :  { %1148 = vmatprep.mubr.f32.mxu0 %v3080_v26  ;;  %v3989_v26 = vld [vmem:[%s5560_s0 + $0x320] sm:$0xff]  ;;  %v5958_v61 = vld [vmem:[#allocation77_spill] sm:$0xff] }
  0xb4   :  { %5849 = vst [vmem:[#allocation2_spill] sm:$0xff] %v3989_v26  ;;  %v2301_v22 = vpack.c.bf16 %v3994_v21, %v3989_v26  ;;  %v5957_v26 = vld [vmem:[#allocation76_spill] sm:$0xff] }
  0xb5   :  { %635 = vmatmul.mubr.f32.gmra.mrb[24].mxu1 %v3098_v40 }
  0xb6   :  { %1149 = vmatmul.mubr.f32.gmra.mrb[24].mxu0 %v3108_v50  ;;  %2298 = vmatpush1.bf16.xpose.msra.mxu1 %v2297_v55  ;;  %v3999_v50 = vld [vmem:[%s5560_s0 + $0x398] sm:$0xff]  ;;  %v4007_v55 = vld [vmem:[%s5560_s0 + $0x3d0] sm:$0xff] }
  0xb7   :  { %640 = vmatprep.mubr.f32.mxu1 %v3075_v17  ;;  %1154 = vmatprep.mubr.f32.mxu0 %v5848_v34  ;;  %5850 = vst [vmem:[#allocation101_spill] sm:$0xff] %v3999_v50  ;;  %v5851_v34 = vld [vmem:[#allocation3_spill] sm:$0xff] }
  0xb8   :  { %2300 = vmatprep.subr.bf16.mxu1 %v2299_v11  ;;  %2440 = vmatpush3.bf16.xpose.msk.msra.mxu0 %vm3577_vm1, %v2438_v43  ;;  %5852 = vst [vmem:[#allocation3_spill] sm:$0xff] %v4007_v55  ;;  %v4014_v11 = vld [vmem:[%s5560_s0 + $0x340] sm:$0xff]  ;;  %v5855_v43 = vld [vmem:[#allocation4_spill] sm:$0xff] }
  0xb9   :  { %641 = vmatmul.mubr.f32.gmra.mrb[26].mxu1 %v5851_v34  ;;  %2443 = vmatprep.subr.msk.bf16.mxu0 %vm3577_vm1, %v2441_v33  ;;  %5853 = vst [vmem:[#allocation102_spill] sm:$0xff] %v4014_v11  ;;  %v2303_v33 = vpack.c.bf16 %v4007_v55, %v3999_v50  ;;  %v2444_v10 = vpack.c.bf16 %v4019_v57, %v4014_v11  ;;  %5862 = vst [vmem:[#allocation4_spill] sm:$0xff] %v4037_v46  ;;  %v5868_v11 = vld [vmem:[#allocation13_spill] sm:$0xff]  ;;  %v5871_v57 = vld [vmem:[#allocation19_spill] sm:$0xff] }
  0xba   :  { %1155 = vmatmul.mubr.f32.gmra.mrb[26].mxu0 %v5855_v43  ;;  %646 = vmatprep.mubr.f32.mxu1 %v5856_v12  ;;  %v5861_v43 = vld [vmem:[#allocation8_spill] sm:$0xff]  ;;  %v5872_v50 = vld [vmem:[#allocation14_spill] sm:$0xff] }
  0xbb   :  { %1160 = vmatprep.mubr.f32.mxu0 %v5857_v2  ;;  %v4042_v2 = vld [vmem:[%s5560_s0 + $0x3c8] sm:$0xff]  ;;  %v5873_v55 = vld [vmem:[#allocation16_spill] sm:$0xff] }
  0xbc   :  { %5863 = vst [vmem:[#allocation5_spill] sm:$0xff] %v4042_v2  ;;  %v2305_v27 = vpack.c.bf16 %v4042_v2, %v4037_v46  ;;  %v5885_v46 = vld [vmem:[#allocation24_spill] sm:$0xff] }
  0xbd   :  { %647 = vmatmul.mubr.f32.gmra.mrb[28].mxu1 %v5858_v51 }
  0xbe   :  { %1161 = vmatmul.mubr.f32.gmra.mrb[28].mxu0 %v5859_v63  ;;  %2302 = vmatpush1.bf16.xpose.msra.mxu1 %v2301_v22  ;;  %v5864_v63 = vld [vmem:[#allocation10_spill] sm:$0xff] }
  0xbf   :  { %652 = vmatprep.mubr.f32.mxu1 %v5860_v29  ;;  %1166 = vmatprep.mubr.f32.mxu0 %v5861_v43  ;;  %v4050_v29 = vld [vmem:[%s5560_s0 + $0x408] sm:$0xff]  ;;  %v4055_v22 = vld [vmem:[%s5560_s0 + $0x440] sm:$0xff]  ;;  %v5867_v43 = vld [vmem:[#allocation12_spill] sm:$0xff] }
  0xc0   :  { %2304 = vmatprep.subr.bf16.mxu1 %v2303_v33  ;;  %2446 = vmatpush3.bf16.xpose.msk.msra.mxu0 %vm3577_vm1, %v2444_v10  ;;  %5865 = vst [vmem:[#allocation7_spill] sm:$0xff] %v4050_v29  ;;  %5866 = vst [vmem:[#allocation9_spill] sm:$0xff] %v4055_v22  ;;  %v5869_v10 = vld [vmem:[#allocation15_spill] sm:$0xff]  ;;  %v2307_v33 = vpack.c.bf16 %v4055_v22, %v4050_v29  ;;  %v5882_v22 = vld [vmem:[#allocation25_spill] sm:$0xff] }
  0xc1   :  { %653 = vmatmul.mubr.f32.gmra.mrb[30].mxu1 %v5864_v63  ;;  %v5870_v63 = vld [vmem:[#allocation17_spill] sm:$0xff] }
  0xc2   :  { %1167 = vmatmul.mubr.f32.gmra.mrb[30].mxu0 %v5867_v43  ;;  %658 = vmatprep.mubr.f32.mxu1 %v5868_v11  ;;  %v4071_v11 = vld [vmem:[%s5560_s0 + $0x400] sm:$0xff]  ;;  %v4076_v43 = vld [vmem:[%s5560_s0 + $0x438] sm:$0xff] }
  0xc3   :  { %1172 = vmatprep.mubr.f32.mxu0 %v5869_v10  ;;  %5874 = vst [vmem:[#allocation11_spill] sm:$0xff] %v4071_v11  ;;  %5875 = vst [vmem:[#allocation6_spill] sm:$0xff] %v4076_v43  ;;  %v5876_v10 = vld [vmem:[#allocation18_spill] sm:$0xff]  ;;  %v2309_v29 = vpack.c.bf16 %v4076_v43, %v4071_v11  ;;  %v5897_v43 = vld [vmem:[#allocation32_spill] sm:$0xff] }
  0xc4   :  { %v5896_v11 = vld [vmem:[#allocation30_spill] sm:$0xff] }
  0xc5   :  { %659 = vmatmul.mubr.f32.gmra.mrb[32].mxu1 %v5870_v63 }
  0xc6   :  { %1173 = vmatmul.mubr.f32.gmra.mrb[32].mxu0 %v5871_v57  ;;  %2306 = vmatpush1.bf16.xpose.msra.mxu1 %v2305_v27  ;;  %v4082_v57 = vld [vmem:[%s5560_s0 + $0x478] sm:$0xff] }
  0xc7   :  { %664 = vmatprep.mubr.f32.mxu1 %v5872_v50  ;;  %1178 = vmatprep.mubr.f32.mxu0 %v5873_v55  ;;  %5877 = vst [vmem:[#allocation8_spill] sm:$0xff] %v4082_v57  ;;  %v4087_v50 = vld [vmem:[%s5560_s0 + $0x4b0] sm:$0xff]  ;;  %v5880_v27 = vld [vmem:[#allocation21_spill] sm:$0xff] }
  0xc8   :  { %2308 = vmatprep.subr.bf16.mxu1 %v2307_v33  ;;  %5878 = vst [vmem:[#allocation10_spill] sm:$0xff] %v4087_v50  ;;  %v5879_v55 = vld [vmem:[#allocation20_spill] sm:$0xff]  ;;  %v5881_v33 = vld [vmem:[#allocation23_spill] sm:$0xff] }
  0xc9   :  { %665 = vmatmul.mubr.f32.gmra.mrb[34].mxu1 %v5876_v10  ;;  %v2311_v10 = vpack.c.bf16 %v4087_v50, %v4082_v57  ;;  %v5894_v57 = vld [vmem:[#allocation33_spill] sm:$0xff]  ;;  %v5895_v50 = vld [vmem:[#allocation35_spill] sm:$0xff] }
  0xca   :  { %1179 = vmatmul.mubr.f32.gmra.mrb[34].mxu0 %v5879_v55  ;;  %670 = vmatprep.mubr.f32.mxu1 %v5880_v27  ;;  %v4103_v55 = vld [vmem:[%s5560_s0 + $0x470] sm:$0xff]  ;;  %v4108_v27 = vld [vmem:[%s5560_s0 + $0x4a8] sm:$0xff] }
  0xcb   :  { %1184 = vmatprep.mubr.f32.mxu0 %v5881_v33  ;;  %5886 = vst [vmem:[#allocation12_spill] sm:$0xff] %v4103_v55  ;;  %5887 = vst [vmem:[#allocation13_spill] sm:$0xff] %v4108_v27  ;;  %v5888_v33 = vld [vmem:[#allocation26_spill] sm:$0xff] }
  0xcd   :  { %671 = vmatmul.mubr.f32.gmra.mrb[36].mxu1 %v5882_v22  ;;  %v2313_v22 = vpack.c.bf16 %v4108_v27, %v4103_v55  ;;  %v5908_v55 = vld [vmem:[#allocation38_spill] sm:$0xff]  ;;  %v5909_v27 = vld [vmem:[#allocation40_spill] sm:$0xff] }
  0xce   :  { %1185 = vmatmul.mubr.f32.gmra.mrb[36].mxu0 %v5883_v6  ;;  %2310 = vmatpush1.bf16.xpose.msra.mxu1 %v2309_v29  ;;  %v4114_v6 = vld [vmem:[%s5560_s0 + $0x4e8] sm:$0xff]  ;;  %v5892_v29 = vld [vmem:[#allocation29_spill] sm:$0xff] }
  0xcf   :  { %676 = vmatprep.mubr.f32.mxu1 %v5884_v49  ;;  %1190 = vmatprep.mubr.f32.mxu0 %v5885_v46  ;;  %5889 = vst [vmem:[#allocation15_spill] sm:$0xff] %v4114_v6  ;;  %v4119_v49 = vld [vmem:[%s5560_s0 + $0x520] sm:$0xff]  ;;  %v5891_v46 = vld [vmem:[#allocation28_spill] sm:$0xff] }
  0xd0   :  { %2312 = vmatprep.subr.bf16.mxu1 %v2311_v10  ;;  %5890 = vst [vmem:[#allocation17_spill] sm:$0xff] %v4119_v49  ;;  %v5893_v10 = vld [vmem:[#allocation31_spill] sm:$0xff] }
  0xd1   :  { %677 = vmatmul.mubr.f32.gmra.mrb[38].mxu1 %v5888_v33  ;;  %v2315_v33 = vpack.c.bf16 %v4119_v49, %v4114_v6  ;;  %v5906_v6 = vld [vmem:[#allocation41_spill] sm:$0xff]  ;;  %v5907_v49 = vld [vmem:[#allocation43_spill] sm:$0xff] }
  0xd2   :  { %1191 = vmatmul.mubr.f32.gmra.mrb[38].mxu0 %v5891_v46  ;;  %682 = vmatprep.mubr.f32.mxu1 %v5892_v29  ;;  %v4135_v46 = vld [vmem:[%s5560_s0 + $0x4e0] sm:$0xff]  ;;  %v4140_v29 = vld [vmem:[%s5560_s0 + $0x518] sm:$0xff] }
  0xd3   :  { %1196 = vmatprep.mubr.f32.mxu0 %v5893_v10  ;;  %5898 = vst [vmem:[#allocation19_spill] sm:$0xff] %v4135_v46  ;;  %5899 = vst [vmem:[#allocation14_spill] sm:$0xff] %v4140_v29  ;;  %v5900_v10 = vld [vmem:[#allocation34_spill] sm:$0xff] }
  0xd5   :  { %683 = vmatmul.mubr.f32.gmra.mrb[40].mxu1 %v5894_v57  ;;  %v4146_v57 = vld [vmem:[%s5560_s0 + $0x558] sm:$0xff] }
  0xd6   :  { %1197 = vmatmul.mubr.f32.gmra.mrb[40].mxu0 %v5895_v50  ;;  %2314 = vmatpush1.bf16.xpose.msra.mxu1 %v2313_v22  ;;  %5901 = vst [vmem:[#allocation16_spill] sm:$0xff] %v4146_v57  ;;  %v5904_v50 = vld [vmem:[#allocation37_spill] sm:$0xff]  ;;  %v2317_v22 = vpack.c.bf16 %v4140_v29, %v4135_v46  ;;  %v5920_v46 = vld [vmem:[#allocation46_spill] sm:$0xff]  ;;  %v5921_v29 = vld [vmem:[#allocation48_spill] sm:$0xff] }
  0xd7   :  { %688 = vmatprep.mubr.f32.mxu1 %v5896_v11  ;;  %1202 = vmatprep.mubr.f32.mxu0 %v5897_v43  ;;  %v4151_v11 = vld [vmem:[%s5560_s0 + $0x590] sm:$0xff] }
  0xd8   :  { %2316 = vmatprep.subr.bf16.mxu1 %v2315_v33  ;;  %5902 = vst [vmem:[#allocation18_spill] sm:$0xff] %v4151_v11  ;;  %v5903_v43 = vld [vmem:[#allocation36_spill] sm:$0xff]  ;;  %v5905_v33 = vld [vmem:[#allocation39_spill] sm:$0xff] }
  0xd9   :  { %689 = vmatmul.mubr.f32.gmra.mrb[42].mxu1 %v5900_v10  ;;  %v2319_v10 = vpack.c.bf16 %v4151_v11, %v4146_v57  ;;  %v5918_v57 = vld [vmem:[#allocation49_spill] sm:$0xff]  ;;  %v5919_v11 = vld [vmem:[#allocation51_spill] sm:$0xff] }
  0xda   :  { %1203 = vmatmul.mubr.f32.gmra.mrb[42].mxu0 %v5903_v43  ;;  %694 = vmatprep.mubr.f32.mxu1 %v5904_v50  ;;  %v4167_v43 = vld [vmem:[%s5560_s0 + $0x550] sm:$0xff]  ;;  %v4172_v50 = vld [vmem:[%s5560_s0 + $0x588] sm:$0xff] }
  0xdb   :  { %1208 = vmatprep.mubr.f32.mxu0 %v5905_v33  ;;  %5910 = vst [vmem:[#allocation20_spill] sm:$0xff] %v4167_v43  ;;  %5911 = vst [vmem:[#allocation21_spill] sm:$0xff] %v4172_v50  ;;  %v5912_v33 = vld [vmem:[#allocation42_spill] sm:$0xff] }
  0xdd   :  { %695 = vmatmul.mubr.f32.gmra.mrb[44].mxu1 %v5906_v6  ;;  %v4178_v6 = vld [vmem:[%s5560_s0 + $0x5c8] sm:$0xff] }
  0xde   :  { %1209 = vmatmul.mubr.f32.gmra.mrb[44].mxu0 %v5907_v49  ;;  %2318 = vmatpush1.bf16.xpose.msra.mxu1 %v2317_v22  ;;  %5913 = vst [vmem:[#allocation23_spill] sm:$0xff] %v4178_v6  ;;  %v5916_v49 = vld [vmem:[#allocation45_spill] sm:$0xff]  ;;  %v2321_v22 = vpack.c.bf16 %v4172_v50, %v4167_v43  ;;  %v5932_v43 = vld [vmem:[#allocation54_spill] sm:$0xff]  ;;  %v5933_v50 = vld [vmem:[#allocation56_spill] sm:$0xff] }
  0xdf   :  { %700 = vmatprep.mubr.f32.mxu1 %v5908_v55  ;;  %1214 = vmatprep.mubr.f32.mxu0 %v5909_v27  ;;  %v4183_v55 = vld [vmem:[%s5560_s0 + $0x600] sm:$0xff]  ;;  %v5915_v27 = vld [vmem:[#allocation44_spill] sm:$0xff] }
  0xe0   :  { %2320 = vmatprep.subr.bf16.mxu1 %v2319_v10  ;;  %5914 = vst [vmem:[#allocation25_spill] sm:$0xff] %v4183_v55  ;;  %v5917_v10 = vld [vmem:[#allocation47_spill] sm:$0xff] }
  0xe1   :  { %701 = vmatmul.mubr.f32.gmra.mrb[46].mxu1 %v5912_v33  ;;  %v2323_v33 = vpack.c.bf16 %v4183_v55, %v4178_v6  ;;  %v5930_v6 = vld [vmem:[#allocation57_spill] sm:$0xff]  ;;  %v5931_v55 = vld [vmem:[#allocation59_spill] sm:$0xff] }
  0xe2   :  { %1215 = vmatmul.mubr.f32.gmra.mrb[46].mxu0 %v5915_v27  ;;  %706 = vmatprep.mubr.f32.mxu1 %v5916_v49  ;;  %v4199_v27 = vld [vmem:[%s5560_s0 + $0x5c0] sm:$0xff]  ;;  %v4204_v49 = vld [vmem:[%s5560_s0 + $0x5f8] sm:$0xff] }
  0xe3   :  { %1220 = vmatprep.mubr.f32.mxu0 %v5917_v10  ;;  %5922 = vst [vmem:[#allocation27_spill] sm:$0xff] %v4199_v27  ;;  %5923 = vst [vmem:[#allocation22_spill] sm:$0xff] %v4204_v49  ;;  %v5924_v10 = vld [vmem:[#allocation50_spill] sm:$0xff] }
  0xe5   :  { %707 = vmatmul.mubr.f32.gmra.mrb[48].mxu1 %v5918_v57  ;;  %v4210_v57 = vld [vmem:[%s5560_s0 + $0x638] sm:$0xff] }
  0xe6   :  { %1221 = vmatmul.mubr.f32.gmra.mrb[48].mxu0 %v5919_v11  ;;  %2322 = vmatpush1.bf16.xpose.msra.mxu1 %v2321_v22  ;;  %5925 = vst [vmem:[#allocation24_spill] sm:$0xff] %v4210_v57  ;;  %v5928_v11 = vld [vmem:[#allocation53_spill] sm:$0xff]  ;;  %v2325_v22 = vpack.c.bf16 %v4204_v49, %v4199_v27  ;;  %v5944_v27 = vld [vmem:[#allocation62_spill] sm:$0xff]  ;;  %v5945_v49 = vld [vmem:[#allocation64_spill] sm:$0xff] }
  0xe7   :  { %712 = vmatprep.mubr.f32.mxu1 %v5920_v46  ;;  %1226 = vmatprep.mubr.f32.mxu0 %v5921_v29  ;;  %v4215_v46 = vld [vmem:[%s5560_s0 + $0x670] sm:$0xff] }
  0xe8   :  { %2324 = vmatprep.subr.bf16.mxu1 %v2323_v33  ;;  %5926 = vst [vmem:[#allocation26_spill] sm:$0xff] %v4215_v46  ;;  %v5927_v29 = vld [vmem:[#allocation52_spill] sm:$0xff]  ;;  %v5929_v33 = vld [vmem:[#allocation55_spill] sm:$0xff] }
  0xe9   :  { %713 = vmatmul.mubr.f32.gmra.mrb[50].mxu1 %v5924_v10  ;;  %v2327_v10 = vpack.c.bf16 %v4215_v46, %v4210_v57  ;;  %v5942_v57 = vld [vmem:[#allocation65_spill] sm:$0xff]  ;;  %v5943_v46 = vld [vmem:[#allocation67_spill] sm:$0xff] }
  0xea   :  { %1227 = vmatmul.mubr.f32.gmra.mrb[50].mxu0 %v5927_v29  ;;  %718 = vmatprep.mubr.f32.mxu1 %v5928_v11  ;;  %v4231_v29 = vld [vmem:[%s5560_s0 + $0x630] sm:$0xff]  ;;  %v4236_v11 = vld [vmem:[%s5560_s0 + $0x668] sm:$0xff] }
  0xeb   :  { %1232 = vmatprep.mubr.f32.mxu0 %v5929_v33  ;;  %5934 = vst [vmem:[#allocation28_spill] sm:$0xff] %v4231_v29  ;;  %5935 = vst [vmem:[#allocation29_spill] sm:$0xff] %v4236_v11  ;;  %v5936_v33 = vld [vmem:[#allocation58_spill] sm:$0xff] }
  0xed   :  { %719 = vmatmul.mubr.f32.gmra.mrb[52].mxu1 %v5930_v6  ;;  %v4242_v6 = vld [vmem:[%s5560_s0 + $0x6a8] sm:$0xff] }
  0xee   :  { %1233 = vmatmul.mubr.f32.gmra.mrb[52].mxu0 %v5931_v55  ;;  %2326 = vmatpush1.bf16.xpose.msra.mxu1 %v2325_v22  ;;  %5937 = vst [vmem:[#allocation31_spill] sm:$0xff] %v4242_v6  ;;  %v5940_v55 = vld [vmem:[#allocation61_spill] sm:$0xff]  ;;  %v2329_v22 = vpack.c.bf16 %v4236_v11, %v4231_v29  ;;  %v5954_v29 = vld [vmem:[#allocation70_spill] sm:$0xff]  ;;  %v5955_v11 = vld [vmem:[#allocation72_spill] sm:$0xff] }
  0xef   :  { %724 = vmatprep.mubr.f32.mxu1 %v5932_v43  ;;  %1238 = vmatprep.mubr.f32.mxu0 %v5933_v50  ;;  %v4247_v43 = vld [vmem:[%s5560_s0 + $0x6e0] sm:$0xff]  ;;  %v5939_v50 = vld [vmem:[#allocation60_spill] sm:$0xff] }
  0xf0   :  { %2328 = vmatprep.subr.bf16.mxu1 %v2327_v10  ;;  %5938 = vst [vmem:[#allocation33_spill] sm:$0xff] %v4247_v43  ;;  %v5941_v10 = vld [vmem:[#allocation63_spill] sm:$0xff] }
  0xf1   :  { %725 = vmatmul.mubr.f32.gmra.mrb[54].mxu1 %v5936_v33  ;;  %v2331_v33 = vpack.c.bf16 %v4247_v43, %v4242_v6  ;;  %v5951_v43 = vld [vmem:[#allocation71_spill] sm:$0xff] }
  0xf2   :  { %1239 = vmatmul.mubr.f32.gmra.mrb[54].mxu0 %v5939_v50  ;;  %730 = vmatprep.mubr.f32.mxu1 %v5940_v55  ;;  %v4263_v50 = vld [vmem:[%s5560_s0 + $0x6a0] sm:$0xff]  ;;  %v4268_v55 = vld [vmem:[%s5560_s0 + $0x6d8] sm:$0xff] }
  0xf3   :  { %1244 = vmatprep.mubr.f32.mxu0 %v5941_v10  ;;  %5946 = vst [vmem:[#allocation35_spill] sm:$0xff] %v4263_v50  ;;  %5947 = vst [vmem:[#allocation30_spill] sm:$0xff] %v4268_v55  ;;  %v5948_v10 = vld [vmem:[#allocation66_spill] sm:$0xff] }
  0xf5   :  { %731 = vmatmul.mubr.f32.gmra.mrb[56].mxu1 %v5942_v57  ;;  %v5949_v57 = vld [vmem:[#allocation68_spill] sm:$0xff] }
  0xf6   :  { %1245 = vmatmul.mubr.f32.gmra.mrb[56].mxu0 %v5943_v46  ;;  %2330 = vmatpush1.bf16.xpose.msra.mxu1 %v2329_v22  ;;  %v5950_v46 = vld [vmem:[#allocation69_spill] sm:$0xff] }
  0xf7   :  { %736 = vmatprep.mubr.f32.mxu1 %v5944_v27  ;;  %1250 = vmatprep.mubr.f32.mxu0 %v5945_v49  ;;  %v2333_v27 = vpack.c.bf16 %v4268_v55, %v4263_v50  ;;  %v2640_v49 = vld [vmem:[%s5560_s0 + $0x40] sm:$0xff]  ;;  %v2641_v22 = vld [vmem:[%s5560_s0 + $0x38] sm:$0xff]  ;;  %v2646_v55 = vld [vmem:[%s5560_s0 + $0xb0] sm:$0xff] }
  0xf8   :  { %2332 = vmatprep.subr.bf16.mxu1 %v2331_v33  ;;  %v1695_v6 = vadd.f32 %v2641_v22, %v2640_v49  ;;  %v5952_v33 = vld [vmem:[#allocation73_spill] sm:$0xff]  ;;  %v2645_v49 = vld [vmem:[%s5560_s0 + $0x70] sm:$0xff]  ;;  %v5953_v22 = vld [vmem:[#allocation75_spill] sm:$0xff] }
  0xf9   :  { %737 = vmatmul.mubr.f32.gmra.mrb[58].mxu1 %v5948_v10  ;;  %v2642_v10 = vld [vmem:[%s5560_s0 + $0x8] sm:$0xff]  ;;  %v2644_v50 = vld [vmem:[%s5560_s0 + $0x78] sm:$0xff] }
  0xfa   :  { %1251 = vmatmul.mubr.f32.gmra.mrb[58].mxu0 %v5949_v57  ;;  %742 = vmatprep.mubr.f32.mxu1 %v5950_v46  ;;  %v2643_v57 = vld [vmem:[%s5560_s0] sm:$0xff] }
  0xfb   :  { %1256 = vmatprep.mubr.f32.mxu0 %v5951_v43  ;;  %v1686_v46 = vadd.f32 %v2643_v57, %v2642_v10  ;;  %v1704_v43 = vadd.f32 %v2645_v49, %v2644_v50  ;;  %v2647_v10 = vld [vmem:[%s5560_s0 + $0xa8] sm:$0xff]  ;;  %v2650_v49 = vld [vmem:[%s5560_s0 + $0x120] sm:$0xff] }
  0xfc   :  { %v1713_v57 = vadd.f32 %v2647_v10, %v2646_v55  ;;  %v2648_v50 = vld [vmem:[%s5560_s0 + $0xe8] sm:$0xff]  ;;  %v2651_v55 = vld [vmem:[%s5560_s0 + $0x118] sm:$0xff] }
  0xfd   :  { %743 = vmatmul.mubr.f32.gmra.mrb[60].mxu1 %v5952_v33  ;;  %v1696_v33 = vadd.f32 %v1695_v6, %v3584_v39  ;;  %v2649_v6 = vld [vmem:[%s5560_s0 + $0xe0] sm:$0xff] }
  0xfe   :  { %1257 = vmatmul.mubr.f32.gmra.mrb[60].mxu0 %v5953_v22  ;;  %2334 = vmatpush1.bf16.xpose.msra.mxu1 %v2333_v27  ;;  %v1722_v27 = vadd.f32 %v2649_v6, %v2648_v50  ;;  %v2653_v22 = vld [vmem:[%s5560_s0 + $0x150] sm:$0xff]  ;;  %v2655_v6 = vld [vmem:[%s5560_s0 + $0x188] sm:$0xff] }
  0xff   :  { %748 = vmatprep.mubr.f32.mxu1 %v5954_v29  ;;  %1262 = vmatprep.mubr.f32.mxu0 %v5955_v11  ;;  %v1731_v29 = vadd.f32 %v2651_v55, %v2650_v49  ;;  %v2652_v11 = vld [vmem:[%s5560_s0 + $0x158] sm:$0xff]  ;;  %v2654_v50 = vld [vmem:[%s5560_s0 + $0x190] sm:$0xff]  ;;  %v2656_v49 = vld [vmem:[%s5560_s0 + $0x1c8] sm:$0xff] }
 0x100   :  { %v1740_v10 = vadd.f32 %v2653_v22, %v2652_v11  ;;  %v1749_v8 = vadd.f32 %v2655_v6, %v2654_v50  ;;  %v2657_v55 = vld [vmem:[%s5560_s0 + $0x1c0] sm:$0xff]  ;;  %v2659_v22 = vld [vmem:[%s5560_s0 + $0x1f8] sm:$0xff]  ;;  %v4347_v50 = vadd.f32 %v3022_v58, %v3050_v3  ;;  %v4351_v6 = vadd.f32 %v3027_v59, %v3055_v7 }
 0x101   :  { %v4335_v56 = vadd.f32 %v2657_v55, %v2656_v49  ;;  %v2658_v11 = vld [vmem:[%s5560_s0 + $0x200] sm:$0xff]  ;;  %v4356_v55 = vadd.f32 %v3070_v15, %v3098_v40  ;;  %v4364_v58 = vadd.f32 %v3075_v17, %v5851_v34  ;;  %v4368_v59 = vadd.f32 %v5856_v12, %v5858_v51  ;;  %v2660_v34 = vld [vmem:[%s5560_s0 + $0x58] sm:$0xff] }
 0x102   :  { %v4343_v2 = vadd.f32 %v2659_v22, %v2658_v11  ;;  %v5956_v49 = vld [vmem:[#allocation74_spill] sm:$0xff]  ;;  %1263 = vmatmul.mubr.f32.gmra.mrb[62].mxu0 %v5957_v26  ;;  %v1705_v11 = vadd.f32 %v1704_v43, %v3633_v41  ;;  %v5959_v22 = vld [vmem:[#allocation81_spill] sm:$0xff]  ;;  %v1714_v3 = vadd.f32 %v1713_v57, %v3638_v52  ;;  %v1709_v26 = vsel %vm401_vm0, %v3657_v4, 0.0 }
 0x103   :  { %749 = vmatmul.mubr.f32.gmra.mrb[62].mxu1 %v5956_v49  ;;  %v1687_v37 = vadd.f32 %v1686_v46, %v5959_v22  ;;  %2143 = vmatprep.mubr.msk.f32.mxu0 %vm401_vm0, %v3596_v0  ;;  %v5960_v7 = vld [vmem:[#allocation78_spill] sm:$0xff]  ;;  %v1732_v17 = vadd.f32 %v1731_v29, %v3694_v28  ;;  %v1691_v51 = vsel %vm401_vm0, %v3596_v0, 0.0 }
 0x104   :  { %819 = vmatprep.mubr.f32.mxu1 %v5958_v61  ;;  %v1697_v15 = vadd.f32 %v1696_v33, %v5960_v7  ;;  %v1706_v40 = vadd.f32 %v1705_v11, %v3606_v62  ;;  %v1715_v12 = vadd.f32 %v1714_v3, %v3611_v53  ;;  %v1723_v33 = vadd.f32 %v1722_v27, %v3689_v14  ;;  %v2662_v57 = vld [vmem:[%s5560_s0 + $0x20] sm:$0xff] }
 0x105   :  { %v1688_v46 = vadd.f32 %v1687_v37, %v5958_v61  ;;  %v2661_v37 = vld [vmem:[%s5560_s0 + $0x90] sm:$0xff]  ;;  %v5961_v49 = vld [vmem:[#allocation82_spill] sm:$0xff]  ;;  %v1733_v27 = vadd.f32 %v1732_v17, %v3650_v1 }
 0x106   :  { %v1698_v43 = vadd.f32 %v2660_v34, %v1697_v15  ;;  %2144 = vmatmul.mubr.msk.f32.vlgmr.msra.gmra.mrb[0].mxu0 %vm401_vm0, %v3596_v0  ;;  %v1707_v61 = vadd.f32 %v2661_v37, %v1706_v40  ;;  %v1700_v11 = vsel %vm401_vm0, %v5961_v49, 0.0  ;;  %v2663_v0 = vld [vmem:[%s5560_s0 + $0xc8] sm:$0xff]  ;;  %v2664_v3 = vld [vmem:[%s5560_s0 + $0x60] sm:$0xff]  ;;  %v1724_v15 = vadd.f32 %v1723_v33, %v3644_v5 }
 0x107   :  { %820 = vmatmul.mubr.f32.vlgmr.msra.gmra.mrb[0].mxu1 %v5959_v22  ;;  %v1689_v29 = vadd.f32 %v2662_v57, %v1688_v46  ;;  %2145 = vmatprep.mubr.msk.f32.mxu0 %vm401_vm0, %v5961_v49  ;;  %v1716_v22 = vadd.f32 %v2663_v0, %v1715_v12  ;;  %v1750_v40 = vadd.f32 %v1749_v8, %v3754_v38  ;;  %v2665_v46 = vld [vmem:[%s5560_s0 + $0x98] sm:$0xff]  ;;  %v2666_v34 = vld [vmem:[%s5560_s0 + $0x28] sm:$0xff]  ;;  %v2668_v8 = vld [vmem:[%s5560_s0 + $0xd0] sm:$0xff] }
 0x108   :  { %825 = vmatprep.mubr.f32.mxu1 %v5960_v7  ;;  %v1699_v7 = vadd.f32 %v2664_v3, %v1698_v43  ;;  %v1708_v17 = vadd.f32 %v2665_v46, %v1707_v61  ;;  %v2667_v12 = vld [vmem:[%s5560_s0 + $0x138] sm:$0xff]  ;;  %v1741_v43 = vadd.f32 %v1740_v10, %v3749_v24  ;;  %v1718_v61 = vsel %vm401_vm0, %v3662_v9, 0.0 }
 0x109   :  { %v1690_v37 = vadd.f32 %v2666_v34, %v1689_v29  ;;  %v1734_v57 = vadd.f32 %v2667_v12, %v1733_v27  ;;  %v1717_v33 = vadd.f32 %v2668_v8, %v1716_v22  ;;  %v2669_v29 = vld [vmem:[%s5560_s0 + $0x100] sm:$0xff]  ;;  %v1751_v3 = vadd.f32 %v1750_v40, %v3707_v16  ;;  %v2674_v12 = vld [vmem:[%s5560_s0 + $0x348] sm:$0xff] }
 0x10a   :  { %v1725_v0 = vadd.f32 %v2669_v29, %v1724_v15  ;;  %2146 = vmatmul.mubr.msk.f32.gmra.mrb[2].mxu0 %vm401_vm0, %v5961_v49  ;;  %v2670_v27 = vld [vmem:[%s5560_s0 + $0x140] sm:$0xff]  ;;  %v1736_v46 = vsel %vm401_vm0, %v3719_v20, 0.0  ;;  %v1701_v15 = vadd.f32 %v1700_v11, %v1699_v7  ;;  %v2671_v49 = vld [vmem:[%s5560_s0 + $0x108] sm:$0xff]  ;;  %v1727_v34 = vsel %vm401_vm0, %v3714_v18, 0.0 }
 0x10b   :  { %826 = vmatmul.mubr.f32.gmra.mrb[2].mxu1 %v3584_v39  ;;  %v1710_v39 = vadd.f32 %v1709_v26, %v1708_v17  ;;  %v1692_v10 = vadd.f32 %v1691_v51, %v1690_v37  ;;  %v1735_v22 = vadd.f32 %v2670_v27, %v1734_v57  ;;  %2147 = vmatprep.mubr.msk.f32.mxu0 %vm401_vm0, %v3657_v4  ;;  %v2673_v37 = vld [vmem:[%s5560_s0 + $0x350] sm:$0xff] }
 0x10c   :  { %831 = vmatprep.mubr.f32.mxu1 %v3606_v62  ;;  %v1726_v40 = vadd.f32 %v2671_v49, %v1725_v0  ;;  %v2672_v62 = vld [vmem:[%s5560_s0 + $0x1a8] sm:$0xff]  ;;  %v1742_v51 = vadd.f32 %v1741_v43, %v3701_v13  ;;  %v1719_v17 = vadd.f32 %v1718_v61, %v1717_v33  ;;  %v1768_v11 = vadd.f32 %v4343_v2, %v3814_v19  ;;  %v2677_v0 = vld [vmem:[%s5560_s0 + $0x1b0] sm:$0xff] }
 0x10d   :  { %v1752_v26 = vadd.f32 %v2672_v62, %v1751_v3  ;;  %1711 = vadd.xlane.f32.xlu1 %v1710_v39  ;;  %1693 = vadd.xlane.f32.xlu0 %v1692_v10  ;;  %v1759_v7 = vadd.f32 %v4335_v56, %v3809_v36  ;;  %v1821_v57 = vadd.f32 %v2674_v12, %v2673_v37  ;;  %v2675_v43 = vld [vmem:[%s5560_s0 + $0x388] sm:$0xff]  ;;  %v2676_v56 = vld [vmem:[%s5560_s0 + $0x170] sm:$0xff]  ;;  %v2679_v10 = vld [vmem:[%s5560_s0 + $0x218] sm:$0xff] }
 0x10e   :  { %v4462_v8 = vadd.f32 %v2675_v43, %v5870_v63  ;;  %v1737_v2 = vadd.f32 %v1736_v46, %v1735_v22  ;;  %v1743_v33 = vadd.f32 %v2676_v56, %v1742_v51  ;;  %2148 = vmatmul.mubr.msk.f32.gmra.mrb[4].mxu0 %vm401_vm0, %v3657_v4  ;;  %v1769_v61 = vadd.f32 %v1768_v11, %v3767_v23  ;;  %v2680_v22 = vld [vmem:[%s5560_s0 + $0x1e0] sm:$0xff]  ;;  %v2682_v51 = vld [vmem:[%s5560_s0 + $0x3b8] sm:$0xff] }
 0x10f   :  { %832 = vmatmul.mubr.f32.gmra.mrb[4].mxu1 %v3633_v41  ;;  %v1760_v29 = vadd.f32 %v1759_v7, %v3759_v30  ;;  %v1786_v63 = vadd.f32 %v4351_v6, %v3874_v31  ;;  %2149 = vmatprep.mubr.msk.f32.mxu0 %vm401_vm0, %v3662_v9  ;;  %v1728_v41 = vadd.f32 %v1727_v34, %v1726_v40  ;;  %v1754_v6 = vsel %vm401_vm0, %v3779_v32, 0.0  ;;  %v2684_v34 = vld [vmem:[%s5560_s0 + $0x1e8] sm:$0xff] }
 0x110   :  { %837 = vmatprep.mubr.f32.mxu1 %v3611_v53  ;;  %v1753_v3 = vadd.f32 %v2677_v0, %v1752_v26  ;;  %v2678_v53 = vld [vmem:[%s5560_s0 + $0x178] sm:$0xff]  ;;  %v1777_v39 = vadd.f32 %v4347_v50, %v3869_v48  ;;  %v1770_v27 = vadd.f32 %v2679_v10, %v1769_v61  ;;  %v1745_v50 = vsel %vm401_vm0, %v3774_v25, 0.0  ;;  %v2681_v26 = vld [vmem:[%s5560_s0 + $0x3c0] sm:$0xff] }
 0x111   :  { %v1744_v4 = vadd.f32 %v2678_v53, %v1743_v33  ;;  %1720 = vadd.xlane.f32.xlu1 %v1719_v17  ;;  %1702 = vadd.xlane.f32.xlu0 %v1701_v15  ;;  %v1761_v46 = vadd.f32 %v2680_v22, %v1760_v29  ;;  %v1787_v49 = vadd.f32 %v1786_v63, %v3827_v35  ;;  %v5962_v33 = vld [vmem:[#allocation88_spill] sm:$0xff]  ;;  %v2687_v0 = vld [vmem:[%s5560_s0 + $0x3f8] sm:$0xff] }
 0x112   :  { %v1778_v15 = vadd.f32 %v1777_v39, %v3819_v42  ;;  %v1804_v40 = vadd.f32 %v4364_v58, %v3934_v45  ;;  %v1795_v62 = vadd.f32 %v4356_v55, %v3929_v60  ;;  %2150 = vmatmul.mubr.msk.f32.gmra.mrb[6].mxu0 %vm401_vm0, %v3662_v9  ;;  %v2683_v58 = vld [vmem:[%s5560_s0 + $0x220] sm:$0xff]  ;;  %v1772_v55 = vsel %vm401_vm0, %v3839_v44, 0.0  ;;  %v2686_v29 = vld [vmem:[%s5560_s0 + $0x250] sm:$0xff] }
 0x113   :  { %838 = vmatmul.mubr.f32.gmra.mrb[6].mxu1 %v3638_v52  ;;  %v1839_v52 = vadd.f32 %v2682_v51, %v2681_v26  ;;  %v1771_v17 = vadd.f32 %v2683_v58, %v1770_v27  ;;  %v1762_v11 = vadd.f32 %v2684_v34, %v1761_v46  ;;  %2151 = vmatprep.mubr.msk.f32.mxu0 %vm401_vm0, %v3714_v18  ;;  %v1763_v61 = vsel %vm401_vm0, %v5962_v33, 0.0  ;;  %v5963_v27 = vld [vmem:[#allocation96_spill] sm:$0xff]  ;;  %v5964_v46 = vld [vmem:[#allocation2_spill] sm:$0xff]  ;;  %v5967_v58 = vld [vmem:[#allocation95_spill] sm:$0xff] }
 0x114   :  { %843 = vmatprep.mubr.f32.mxu1 %v3644_v5  ;;  %v2685_v5 = vld [vmem:[%s5560_s0 + $0x288] sm:$0xff]  ;;  %v1805_v7 = vadd.f32 %v1804_v40, %v3887_v47  ;;  %v1796_v37 = vadd.f32 %v1795_v62, %v3879_v54  ;;  %v1822_v12 = vadd.f32 %v1821_v57, %v3994_v21  ;;  %v1755_v43 = vadd.f32 %v1754_v6, %v1753_v3  ;;  %v2688_v57 = vld [vmem:[%s5560_s0 + $0x3f0] sm:$0xff]  ;;  %v2692_v6 = vld [vmem:[%s5560_s0 + $0x2c0] sm:$0xff] }
 0x115   :  { %v1788_v9 = vadd.f32 %v2685_v5, %v1787_v49  ;;  %1738 = vadd.xlane.f32.xlu1 %v1737_v2  ;;  %1729 = vadd.xlane.f32.xlu0 %v1728_v41  ;;  %v1746_v56 = vadd.f32 %v1745_v50, %v1744_v4  ;;  %v1779_v63 = vadd.f32 %v2686_v29, %v1778_v15  ;;  %v2689_v41 = vld [vmem:[%s5560_s0 + $0x430] sm:$0xff]  ;;  %v2690_v3 = vld [vmem:[%s5560_s0 + $0x428] sm:$0xff]  ;;  %v2691_v4 = vld [vmem:[%s5560_s0 + $0x2f8] sm:$0xff] }
 0x116   :  { %v1848_v2 = vadd.f32 %v2688_v57, %v2687_v0  ;;  %v1857_v53 = vadd.f32 %v2690_v3, %v2689_v41  ;;  %v1806_v39 = vadd.f32 %v2691_v4, %v1805_v7  ;;  %2152 = vmatmul.mubr.msk.f32.gmra.mrb[8].mxu0 %vm401_vm0, %v3714_v18  ;;  %v1797_v10 = vadd.f32 %v2692_v6, %v1796_v37  ;;  %v2693_v18 = vld [vmem:[%s5560_s0 + $0x290] sm:$0xff]  ;;  %v5965_v15 = vld [vmem:[#allocation5_spill] sm:$0xff]  ;;  %v2701_v41 = vld [vmem:[%s5560_s0 + $0x368] sm:$0xff] }
 0x117   :  { %844 = vmatmul.mubr.f32.gmra.mrb[8].mxu1 %v3689_v14  ;;  %v1823_v22 = vadd.f32 %v1822_v12, %v5963_v27  ;;  %v1813_v14 = vadd.f32 %v4368_v59, %v5964_v46  ;;  %2153 = vmatprep.mubr.msk.f32.mxu0 %vm401_vm0, %v3719_v20  ;;  %v1773_v49 = vadd.f32 %v1772_v55, %v1771_v17  ;;  %v5966_v62 = vld [vmem:[#allocation92_spill] sm:$0xff]  ;;  %v2694_v59 = vld [vmem:[%s5560_s0 + $0x258] sm:$0xff] }
 0x118   :  { %849 = vmatprep.mubr.f32.mxu1 %v3650_v1  ;;  %v1764_v50 = vadd.f32 %v1763_v61, %v1762_v11  ;;  %v1789_v1 = vadd.f32 %v2693_v18, %v1788_v9  ;;  %v1840_v40 = vadd.f32 %v1839_v52, %v5965_v15  ;;  %v1790_v26 = vsel %vm401_vm0, %v5966_v62, 0.0  ;;  %v5968_v55 = vld [vmem:[#allocation4_spill] sm:$0xff]  ;;  %v2695_v11 = vld [vmem:[%s5560_s0 + $0x468] sm:$0xff]  ;;  %v2696_v52 = vld [vmem:[%s5560_s0 + $0x460] sm:$0xff] }
 0x119   :  { %1756 = vadd.xlane.f32.xlu1 %v1755_v43  ;;  %1747 = vadd.xlane.f32.xlu0 %v1746_v56  ;;  %v1780_v51 = vadd.f32 %v2694_v59, %v1779_v63  ;;  %v1814_v17 = vadd.f32 %v1813_v14, %v5967_v58  ;;  %v1831_v34 = vadd.f32 %v4462_v8, %v5968_v55  ;;  %v2697_v9 = vld [vmem:[%s5560_s0 + $0x4a0] sm:$0xff]  ;;  %v2698_v7 = vld [vmem:[%s5560_s0 + $0x498] sm:$0xff]  ;;  %v5969_v8 = vld [vmem:[#allocation91_spill] sm:$0xff] }
 0x11a   :  { %v1866_v5 = vadd.f32 %v2696_v52, %v2695_v11  ;;  %v1875_v37 = vadd.f32 %v2698_v7, %v2697_v9  ;;  %v1781_v12 = vsel %vm401_vm0, %v5969_v8, 0.0  ;;  %v5970_v43 = vld [vmem:[#allocation98_spill] sm:$0xff]  ;;  %2154 = vmatmul.mubr.msk.f32.gmra.mrb[10].mxu0 %vm401_vm0, %v3719_v20  ;;  %v5971_v0 = vld [vmem:[#allocation97_spill] sm:$0xff]  ;;  %v1824_v20 = vadd.f32 %v2701_v41, %v1823_v22  ;;  %v2702_v3 = vld [vmem:[%s5560_s0 + $0x330] sm:$0xff] }
 0x11b   :  { %850 = vmatmul.mubr.f32.gmra.mrb[10].mxu1 %v3694_v28  ;;  %v1808_v56 = vsel %vm401_vm0, %v5970_v43, 0.0  ;;  %v2699_v61 = vld [vmem:[%s5560_s0 + $0x300] sm:$0xff]  ;;  %v2700_v28 = vld [vmem:[%s5560_s0 + $0x2c8] sm:$0xff]  ;;  %v1799_v57 = vsel %vm401_vm0, %v5971_v0, 0.0  ;;  %2155 = vmatprep.mubr.msk.f32.mxu0 %vm401_vm0, %v3774_v25  ;;  %v1815_v4 = vadd.f32 %v2702_v3, %v1814_v17  ;;  %v1782_v18 = vadd.f32 %v1781_v12, %v1780_v51  ;;  %v2707_v51 = vld [vmem:[%s5560_s0 + $0x370] sm:$0xff] }
 0x11c   :  { %855 = vmatprep.mubr.f32.mxu1 %v3701_v13  ;;  %v1807_v29 = vadd.f32 %v2699_v61, %v1806_v39  ;;  %v1798_v63 = vadd.f32 %v2700_v28, %v1797_v10  ;;  %v1791_v13 = vadd.f32 %v1790_v26, %v1789_v1  ;;  %v5972_v39 = vld [vmem:[#allocation3_spill] sm:$0xff]  ;;  %v5973_v10 = vld [vmem:[#allocation101_spill] sm:$0xff]  ;;  %v5974_v59 = vld [vmem:[#allocation6_spill] sm:$0xff] }
 0x11d   :  { %v1841_v6 = vadd.f32 %v1840_v40, %v5972_v39  ;;  %v1832_v14 = vadd.f32 %v1831_v34, %v5973_v10  ;;  %1774 = vadd.xlane.f32.xlu1 %v1773_v49  ;;  %1765 = vadd.xlane.f32.xlu0 %v1764_v50  ;;  %v1858_v11 = vadd.f32 %v1857_v53, %v5974_v59  ;;  %v5975_v52 = vld [vmem:[#allocation11_spill] sm:$0xff]  ;;  %v2703_v1 = vld [vmem:[%s5560_s0 + $0x4d8] sm:$0xff]  ;;  %v2704_v26 = vld [vmem:[%s5560_s0 + $0x4d0] sm:$0xff] }
 0x11e   :  { %v1849_v22 = vadd.f32 %v1848_v2, %v5975_v52  ;;  %v1884_v17 = vadd.f32 %v2704_v26, %v2703_v1  ;;  %v2705_v40 = vld [vmem:[%s5560_s0 + $0x510] sm:$0xff]  ;;  %v2706_v49 = vld [vmem:[%s5560_s0 + $0x508] sm:$0xff]  ;;  %2156 = vmatmul.mubr.msk.f32.gmra.mrb[12].mxu0 %vm401_vm0, %v3774_v25  ;;  %v1809_v2 = vadd.f32 %v1808_v56, %v1807_v29  ;;  %v1800_v50 = vadd.f32 %v1799_v57, %v1798_v63  ;;  %v2710_v56 = vld [vmem:[%s5560_s0 + $0x3a0] sm:$0xff] }
 0x11f   :  { %v1893_v53 = vadd.f32 %v2706_v49, %v2705_v40  ;;  %856 = vmatmul.mubr.f32.gmra.mrb[12].mxu1 %v3749_v24  ;;  %v1825_v34 = vadd.f32 %v2707_v51, %v1824_v20  ;;  %v5976_v9 = vld [vmem:[#allocation103_spill] sm:$0xff]  ;;  %2157 = vmatprep.mubr.msk.f32.mxu0 %vm401_vm0, %v3779_v32  ;;  %v2708_v24 = vld [vmem:[%s5560_s0 + $0x338] sm:$0xff]  ;;  %v1833_v61 = vadd.f32 %v2710_v56, %v1832_v14  ;;  %v5978_v63 = vld [vmem:[#allocation102_spill] sm:$0xff] }
 0x120   :  { %861 = vmatprep.mubr.f32.mxu1 %v3707_v16  ;;  %v1826_v7 = vsel %vm401_vm0, %v5976_v9, 0.0  ;;  %v1816_v25 = vadd.f32 %v2708_v24, %v1815_v4  ;;  %v2709_v16 = vld [vmem:[%s5560_s0 + $0x3d8] sm:$0xff]  ;;  %v1817_v57 = vsel %vm401_vm0, %v5978_v63, 0.0  ;;  %v5980_v3 = vld [vmem:[#allocation7_spill] sm:$0xff]  ;;  %v5981_v1 = vld [vmem:[#allocation12_spill] sm:$0xff] }
 0x121   :  { %v1842_v12 = vadd.f32 %v2709_v16, %v1841_v6  ;;  %v5977_v29 = vld [vmem:[#allocation13_spill] sm:$0xff]  ;;  %1792 = vadd.xlane.f32.xlu1 %v1791_v13  ;;  %1783 = vadd.xlane.f32.xlu0 %v1782_v18  ;;  %v1850_v4 = vadd.f32 %v1849_v22, %v5980_v3  ;;  %v1867_v26 = vadd.f32 %v1866_v5, %v5981_v1  ;;  %v2711_v6 = vld [vmem:[%s5560_s0 + $0x548] sm:$0xff]  ;;  %v2712_v14 = vld [vmem:[%s5560_s0 + $0x540] sm:$0xff] }
 0x122   :  { %v1876_v28 = vadd.f32 %v1875_v37, %v5977_v29  ;;  %v5979_v41 = vld [vmem:[#allocation9_spill] sm:$0xff]  ;;  %v1902_v37 = vadd.f32 %v2712_v14, %v2711_v6  ;;  %v2713_v13 = vld [vmem:[%s5560_s0 + $0x580] sm:$0xff]  ;;  %2158 = vmatmul.mubr.msk.f32.gmra.mrb[14].mxu0 %vm401_vm0, %v3779_v32  ;;  %v1827_v5 = vadd.f32 %v1826_v7, %v1825_v34  ;;  %v5982_v22 = vld [vmem:[#allocation80_spill] sm:$0xff]  ;;  %v1818_v56 = vadd.f32 %v1817_v57, %v1816_v25 }
 0x123   :  { %v1859_v20 = vadd.f32 %v1858_v11, %v5979_v41  ;;  %v2714_v18 = vld [vmem:[%s5560_s0 + $0x578] sm:$0xff]  ;;  %862 = vmatmul.mubr.f32.gmra.mrb[14].mxu1 %v3754_v38  ;;  %v1844_v40 = vsel %vm401_vm0, %v5982_v22, 0.0  ;;  %v5983_v49 = vld [vmem:[#allocation14_spill] sm:$0xff]  ;;  %v5984_v24 = vld [vmem:[#allocation19_spill] sm:$0xff]  ;;  %2159 = vmatprep.mubr.msk.f32.mxu0 %vm401_vm0, %v5962_v33 }
 0x124   :  { %v1911_v11 = vadd.f32 %v2714_v18, %v2713_v13  ;;  %867 = vmatprep.mubr.f32.mxu1 %v3759_v30  ;;  %v1894_v51 = vadd.f32 %v1893_v53, %v5983_v49  ;;  %v1885_v16 = vadd.f32 %v1884_v17, %v5984_v24  ;;  %v2715_v38 = vld [vmem:[%s5560_s0 + $0x3e0] sm:$0xff]  ;;  %v2716_v30 = vld [vmem:[%s5560_s0 + $0x3a8] sm:$0xff]  ;;  %v5987_v13 = vld [vmem:[#allocation8_spill] sm:$0xff] }
 0x125   :  { %v1843_v6 = vadd.f32 %v2715_v38, %v1842_v12  ;;  %v1834_v32 = vadd.f32 %v2716_v30, %v1833_v61  ;;  %v5985_v34 = vld [vmem:[#allocation10_spill] sm:$0xff]  ;;  %1810 = vadd.xlane.f32.xlu1 %v1809_v2  ;;  %1801 = vadd.xlane.f32.xlu0 %v1800_v50  ;;  %v5986_v53 = vld [vmem:[#allocation79_spill] sm:$0xff]  ;;  %v2718_v12 = vld [vmem:[%s5560_s0 + $0x410] sm:$0xff]  ;;  %v1868_v18 = vadd.f32 %v1867_v26, %v5987_v13 }
 0x126   :  { %v1877_v7 = vadd.f32 %v1876_v28, %v5985_v34  ;;  %v1835_v17 = vsel %vm401_vm0, %v5986_v53, 0.0  ;;  %v2717_v25 = vld [vmem:[%s5560_s0 + $0x448] sm:$0xff]  ;;  %v1851_v14 = vadd.f32 %v2718_v12, %v1850_v4  ;;  %v2719_v2 = vld [vmem:[%s5560_s0 + $0x5b8] sm:$0xff]  ;;  %v2720_v50 = vld [vmem:[%s5560_s0 + $0x5b0] sm:$0xff]  ;;  %2160 = vmatmul.mubr.msk.f32.gmra.mrb[16].mxu0 %vm401_vm0, %v5962_v33 }
 0x127   :  { %v1860_v57 = vadd.f32 %v2717_v25, %v1859_v20  ;;  %v1920_v61 = vadd.f32 %v2720_v50, %v2719_v2  ;;  %v2721_v28 = vld [vmem:[%s5560_s0 + $0x5f0] sm:$0xff]  ;;  %v2722_v20 = vld [vmem:[%s5560_s0 + $0x5e8] sm:$0xff]  ;;  %868 = vmatmul.mubr.f32.gmra.mrb[16].mxu1 %v3809_v36  ;;  %v5988_v26 = vld [vmem:[#allocation17_spill] sm:$0xff]  ;;  %2161 = vmatprep.mubr.msk.f32.mxu0 %vm401_vm0, %v3839_v44  ;;  %v1845_v12 = vadd.f32 %v1844_v40, %v1843_v6 }
 0x128   :  { %v1929_v4 = vadd.f32 %v2722_v20, %v2721_v28  ;;  %873 = vmatprep.mubr.f32.mxu1 %v3767_v23  ;;  %v1895_v22 = vadd.f32 %v1894_v51, %v5988_v26  ;;  %v5989_v38 = vld [vmem:[#allocation15_spill] sm:$0xff]  ;;  %v5990_v53 = vld [vmem:[#allocation21_spill] sm:$0xff]  ;;  %v1836_v2 = vadd.f32 %v1835_v17, %v1834_v32  ;;  %v5991_v28 = vld [vmem:[#allocation20_spill] sm:$0xff] }
 0x129   :  { %v1886_v30 = vadd.f32 %v1885_v16, %v5989_v38  ;;  %v1912_v25 = vadd.f32 %v1911_v11, %v5990_v53  ;;  %v2723_v36 = vld [vmem:[%s5560_s0 + $0x4b8] sm:$0xff]  ;;  %v1903_v33 = vadd.f32 %v1902_v37, %v5991_v28  ;;  %1828 = vadd.xlane.f32.xlu1 %v1827_v5  ;;  %1819 = vadd.xlane.f32.xlu0 %v1818_v56  ;;  %v2724_v23 = vld [vmem:[%s5560_s0 + $0x450] sm:$0xff]  ;;  %v2726_v16 = vld [vmem:[%s5560_s0 + $0x480] sm:$0xff] }
 0x12a   :  { %v1878_v50 = vadd.f32 %v2723_v36, %v1877_v7  ;;  %v1861_v51 = vadd.f32 %v2724_v23, %v1860_v57  ;;  %v2725_v11 = vld [vmem:[%s5560_s0 + $0x418] sm:$0xff]  ;;  %v1869_v6 = vadd.f32 %v2726_v16, %v1868_v18  ;;  %v2727_v37 = vld [vmem:[%s5560_s0 + $0x628] sm:$0xff]  ;;  %v2728_v5 = vld [vmem:[%s5560_s0 + $0x620] sm:$0xff]  ;;  %2162 = vmatmul.mubr.msk.f32.gmra.mrb[18].mxu0 %vm401_vm0, %v3839_v44 }
 0x12b   :  { %v1852_v40 = vadd.f32 %v2725_v11, %v1851_v14  ;;  %v1938_v56 = vadd.f32 %v2728_v5, %v2727_v37  ;;  %v2729_v32 = vld [vmem:[%s5560_s0 + $0x660] sm:$0xff]  ;;  %v2730_v7 = vld [vmem:[%s5560_s0 + $0x658] sm:$0xff]  ;;  %874 = vmatmul.mubr.f32.gmra.mrb[18].mxu1 %v3814_v19  ;;  %v2733_v19 = vld [vmem:[%s5560_s0 + $0x528] sm:$0xff]  ;;  %2163 = vmatprep.mubr.msk.f32.mxu0 %vm401_vm0, %v5969_v8 }
 0x12c   :  { %v1947_v17 = vadd.f32 %v2730_v7, %v2729_v32  ;;  %v4737_v57 = vld [vmem:[%s5560_s0 + $0x458] sm:$0xff]  ;;  %v4744_v18 = vld [vmem:[%s5560_s0 + $0x420] sm:$0xff]  ;;  %879 = vmatprep.mubr.f32.mxu1 %v3819_v42  ;;  %v1896_v36 = vadd.f32 %v2733_v19, %v1895_v22  ;;  %v2734_v23 = vld [vmem:[%s5560_s0 + $0x4f0] sm:$0xff] }
 0x12d   :  { %v1862_v14 = vsel %vm401_vm0, %v4737_v57, 0.0  ;;  %v1853_v20 = vsel %vm401_vm0, %v4744_v18, 0.0  ;;  %v1887_v11 = vadd.f32 %v2734_v23, %v1886_v30  ;;  %v5992_v16 = vld [vmem:[#allocation18_spill] sm:$0xff]  ;;  %v5993_v5 = vld [vmem:[#allocation16_spill] sm:$0xff]  ;;  %v5995_v22 = vld [vmem:[#allocation27_spill] sm:$0xff]  ;;  %1846 = vadd.xlane.f32.xlu1 %v1845_v12  ;;  %1837 = vadd.xlane.f32.xlu0 %v1836_v2 }
 0x12e   :  { %v1913_v37 = vadd.f32 %v1912_v25, %v5992_v16  ;;  %v2735_v44 = vld [vmem:[%s5560_s0 + $0x4c0] sm:$0xff]  ;;  %v1904_v32 = vadd.f32 %v1903_v33, %v5993_v5  ;;  %v1921_v19 = vadd.f32 %v1920_v61, %v5995_v22  ;;  %v1863_v28 = vadd.f32 %v1862_v14, %v1861_v51  ;;  %v5996_v23 = vld [vmem:[#allocation83_spill] sm:$0xff]  ;;  %v2738_v61 = vld [vmem:[%s5560_s0 + $0x690] sm:$0xff]  ;;  %2164 = vmatmul.mubr.msk.f32.gmra.mrb[20].mxu0 %vm401_vm0, %v5969_v8 }
 0x12f   :  { %v1879_v42 = vadd.f32 %v2735_v44, %v1878_v50  ;;  %v5994_v7 = vld [vmem:[#allocation22_spill] sm:$0xff]  ;;  %v1854_v30 = vadd.f32 %v1853_v20, %v1852_v40  ;;  %v1880_v25 = vsel %vm401_vm0, %v5996_v23, 0.0  ;;  %v2736_v16 = vld [vmem:[%s5560_s0 + $0x488] sm:$0xff]  ;;  %v2737_v50 = vld [vmem:[%s5560_s0 + $0x698] sm:$0xff]  ;;  %880 = vmatmul.mubr.f32.gmra.mrb[20].mxu1 %v3869_v48  ;;  %2165 = vmatprep.mubr.msk.f32.mxu0 %vm401_vm0, %v5966_v62 }
 0x130   :  { %v1930_v53 = vadd.f32 %v1929_v4, %v5994_v7  ;;  %v1870_v49 = vadd.f32 %v2736_v16, %v1869_v6  ;;  %v1956_v4 = vadd.f32 %v2738_v61, %v2737_v50  ;;  %v2739_v12 = vld [vmem:[%s5560_s0 + $0x6d0] sm:$0xff]  ;;  %v2740_v2 = vld [vmem:[%s5560_s0 + $0x6c8] sm:$0xff]  ;;  %v5997_v6 = vld [vmem:[#allocation85_spill] sm:$0xff]  ;;  %885 = vmatprep.mubr.f32.mxu1 %v3827_v35 }
 0x131   :  { %v1965_v33 = vadd.f32 %v2740_v2, %v2739_v12  ;;  %v4787_v51 = vld [vmem:[%s5560_s0 + $0x490] sm:$0xff]  ;;  %v1898_v14 = vsel %vm401_vm0, %v5997_v6, 0.0  ;;  %v2743_v16 = vld [vmem:[%s5560_s0 + $0x4f8] sm:$0xff]  ;;  %v1881_v35 = vadd.f32 %v1880_v25, %v1879_v42  ;;  %1864 = vadd.xlane.f32.xlu1 %v1863_v28  ;;  %1855 = vadd.xlane.f32.xlu0 %v1854_v30  ;;  %v6004_v25 = vld [vmem:[#allocation30_spill] sm:$0xff] }
 0x132   :  { %v1871_v40 = vsel %vm401_vm0, %v4787_v51, 0.0  ;;  %v2742_v48 = vld [vmem:[%s5560_s0 + $0x530] sm:$0xff]  ;;  %v1888_v44 = vadd.f32 %v2743_v16, %v1887_v11  ;;  %v2744_v61 = vld [vmem:[%s5560_s0 + $0x598] sm:$0xff]  ;;  %v6000_v11 = vld [vmem:[#allocation23_spill] sm:$0xff]  ;;  %2166 = vmatmul.mubr.msk.f32.gmra.mrb[22].mxu0 %vm401_vm0, %v5966_v62 }
 0x133   :  { %v1897_v20 = vadd.f32 %v2742_v48, %v1896_v36  ;;  %v5998_v23 = vld [vmem:[#allocation84_spill] sm:$0xff]  ;;  %v1914_v8 = vadd.f32 %v2744_v61, %v1913_v37  ;;  %v2745_v36 = vld [vmem:[%s5560_s0 + $0x560] sm:$0xff]  ;;  %v5999_v2 = vld [vmem:[#allocation25_spill] sm:$0xff]  ;;  %v1922_v48 = vadd.f32 %v1921_v19, %v6000_v11  ;;  %v1872_v16 = vadd.f32 %v1871_v40, %v1870_v49  ;;  %886 = vmatmul.mubr.f32.gmra.mrb[22].mxu1 %v3874_v31 }
 0x134   :  { %v1889_v50 = vsel %vm401_vm0, %v5998_v23, 0.0  ;;  %v1905_v12 = vadd.f32 %v2745_v36, %v1904_v32  ;;  %v1931_v6 = vadd.f32 %v1930_v53, %v5999_v2  ;;  %v6001_v23 = vld [vmem:[#allocation29_spill] sm:$0xff]  ;;  %v6002_v22 = vld [vmem:[#allocation28_spill] sm:$0xff]  ;;  %891 = vmatprep.mubr.f32.mxu1 %v3879_v54  ;;  %v2746_v53 = vld [vmem:[%s5560_s0 + $0x5a0] sm:$0xff]  ;;  %2167 = vmatprep.mubr.msk.f32.mxu0 %vm401_vm0, %v5971_v0  ;;  %v1966_v40 = vadd.f32 %v1965_v33, %v6004_v25 }
 0x135   :  { %v1948_v7 = vadd.f32 %v1947_v17, %v6001_v23  ;;  %v1939_v37 = vadd.f32 %v1938_v56, %v6002_v22  ;;  %v1899_v42 = vadd.f32 %v1898_v14, %v1897_v20  ;;  %v1890_v32 = vadd.f32 %v1889_v50, %v1888_v44  ;;  %v6003_v19 = vld [vmem:[#allocation87_spill] sm:$0xff]  ;;  %v2749_v17 = vld [vmem:[%s5560_s0 + $0x5d0] sm:$0xff]  ;;  %1882 = vadd.xlane.f32.xlu1 %v1881_v35  ;;  %v6005_v14 = vld [vmem:[#allocation86_spill] sm:$0xff] }
 0x136   :  { %v1915_v28 = vadd.f32 %v2746_v53, %v1914_v8  ;;  %v1916_v49 = vsel %vm401_vm0, %v6003_v19, 0.0  ;;  %v2747_v31 = vld [vmem:[%s5560_s0 + $0x568] sm:$0xff]  ;;  %v1923_v30 = vadd.f32 %v2749_v17, %v1922_v48  ;;  %1873 = vadd.xlane.f32.xlu0 %v1872_v16  ;;  %v1907_v20 = vsel %vm401_vm0, %v6005_v14, 0.0  ;;  %v6006_v44 = vld [vmem:[#allocation26_spill] sm:$0xff]  ;;  %v6007_v61 = vld [vmem:[#allocation24_spill] sm:$0xff]  ;;  %2168 = vmatmul.mubr.msk.f32.gmra.mrb[24].mxu0 %vm401_vm0, %v5971_v0 }
 0x137   :  { %v1906_v62 = vadd.f32 %v2747_v31, %v1905_v12  ;;  %v2748_v54 = vld [vmem:[%s5560_s0 + $0x608] sm:$0xff]  ;;  %v1949_v50 = vadd.f32 %v1948_v7, %v6006_v44  ;;  %v1940_v8 = vadd.f32 %v1939_v37, %v6007_v61  ;;  %892 = vmatmul.mubr.f32.gmra.mrb[24].mxu1 %v3929_v60  ;;  %v6009_v33 = vld [vmem:[#allocation90_spill] sm:$0xff]  ;;  %2169 = vmatprep.mubr.msk.f32.mxu0 %vm401_vm0, %v5970_v43  ;;  %v2750_v7 = vld [vmem:[%s5560_s0 + $0x610] sm:$0xff] }
 0x138   :  { %v1932_v56 = vadd.f32 %v2748_v54, %v1931_v6  ;;  %v6008_v36 = vld [vmem:[#allocation35_spill] sm:$0xff]  ;;  %897 = vmatprep.mubr.f32.mxu1 %v3887_v47  ;;  %v1917_v6 = vadd.f32 %v1916_v49, %v1915_v28  ;;  %v1934_v35 = vsel %vm401_vm0, %v6009_v33, 0.0  ;;  %v2751_v60 = vld [vmem:[%s5560_s0 + $0x5d8] sm:$0xff]  ;;  %v2753_v49 = vld [vmem:[%s5560_s0 + $0x640] sm:$0xff] }
 0x139   :  { %v1957_v12 = vadd.f32 %v1956_v4, %v6008_v36  ;;  %v1908_v48 = vadd.f32 %v1907_v20, %v1906_v62  ;;  %v1924_v0 = vadd.f32 %v2751_v60, %v1923_v30  ;;  %v6010_v16 = vld [vmem:[#allocation33_spill] sm:$0xff]  ;;  %1900 = vadd.xlane.f32.xlu1 %v1899_v42  ;;  %v1941_v31 = vadd.f32 %v2753_v49, %v1940_v8  ;;  %v6012_v62 = vld [vmem:[#allocation31_spill] sm:$0xff]  ;;  %v6013_v20 = vld [vmem:[#allocation94_spill] sm:$0xff] }
 0x13a   :  { %v1933_v4 = vadd.f32 %v2750_v7, %v1932_v56  ;;  %v1967_v47 = vadd.f32 %v1966_v40, %v6010_v16  ;;  %1891 = vadd.xlane.f32.xlu0 %v1890_v32  ;;  %v6011_v37 = vld [vmem:[#allocation89_spill] sm:$0xff]  ;;  %2170 = vmatmul.mubr.msk.f32.gmra.mrb[26].mxu0 %vm401_vm0, %v5970_v43  ;;  %v2754_v56 = vld [vmem:[%s5560_s0 + $0x6e8] sm:$0xff]  ;;  %v2757_v40 = vld [vmem:[%s5560_s0 + $0x6b0] sm:$0xff] }
 0x13b   :  { %v1925_v53 = vsel %vm401_vm0, %v6011_v37, 0.0  ;;  %v2752_v28 = vld [vmem:[%s5560_s0 + $0x678] sm:$0xff]  ;;  %v1958_v54 = vadd.f32 %v1957_v12, %v6012_v62  ;;  %898 = vmatmul.mubr.f32.gmra.mrb[26].mxu1 %v3934_v45  ;;  %2171 = vmatprep.mubr.msk.f32.mxu0 %vm401_vm0, %v5978_v63  ;;  %v2755_v45 = vld [vmem:[%s5560_s0 + $0x680] sm:$0xff] }
 0x13c   :  { %v1950_v19 = vadd.f32 %v2752_v28, %v1949_v50  ;;  %903 = vmatprep.mubr.f32.mxu1 %v5967_v58  ;;  %v1935_v42 = vadd.f32 %v1934_v35, %v1933_v4  ;;  %v1926_v32 = vadd.f32 %v1925_v53, %v1924_v0  ;;  %v1968_v17 = vadd.f32 %v2754_v56, %v1967_v47  ;;  %v2756_v58 = vld [vmem:[%s5560_s0 + $0x648] sm:$0xff]  ;;  %v6014_v8 = vld [vmem:[#allocation93_spill] sm:$0xff]  ;;  %v2760_v0 = vld [vmem:[%s5560_s0 + $0x3b0] sm:$0xff] }
 0x13d   :  { %1918 = vadd.xlane.f32.xlu1 %v1917_v6  ;;  %v1942_v43 = vadd.f32 %v2756_v58, %v1941_v31  ;;  %v1959_v14 = vadd.f32 %v2757_v40, %v1958_v54  ;;  %v1952_v50 = vsel %vm401_vm0, %v6013_v20, 0.0  ;;  %v1943_v12 = vsel %vm401_vm0, %v6014_v8, 0.0  ;;  %v2758_v6 = vld [vmem:[%s5560_s0 + $0x6f0] sm:$0xff]  ;;  %v6016_v4 = vld [vmem:[#allocation99_spill] sm:$0xff] }
 0x13e   :  { %1909 = vadd.xlane.f32.xlu0 %v1908_v48  ;;  %v1951_v30 = vadd.f32 %v2755_v45, %v1950_v19  ;;  %2172 = vmatmul.mubr.msk.f32.gmra.mrb[28].mxu0 %vm401_vm0, %v5978_v63  ;;  %v1969_v33 = vadd.f32 %v2758_v6, %v1968_v17  ;;  %v2759_v48 = vld [vmem:[%s5560_s0 + $0x6b8] sm:$0xff]  ;;  %v1961_v60 = vsel %vm401_vm0, %v6016_v4, 0.0 }
 0x13f   :  { %904 = vmatmul.mubr.f32.gmra.mrb[28].mxu1 %v5964_v46  ;;  %2173 = vmatprep.mubr.msk.f32.mxu0 %vm401_vm0, %v5976_v9  ;;  %v1944_v35 = vadd.f32 %v1943_v12, %v1942_v43  ;;  %v1960_v7 = vadd.f32 %v2759_v48, %v1959_v14 }
 0x140   :  { %909 = vmatprep.mubr.f32.mxu1 %v5963_v27  ;;  %v1953_v46 = vadd.f32 %v1952_v50, %v1951_v30  ;;  %v6015_v27 = vld [vmem:[#allocation100_spill] sm:$0xff] }
 0x141   :  { %1936 = vadd.xlane.f32.xlu1 %v1935_v42  ;;  %v1970_v63 = vsel %vm401_vm0, %v6015_v27, 0.0  ;;  %v1962_v47 = vadd.f32 %v1961_v60, %v1960_v7 }
 0x142   :  { %1927 = vadd.xlane.f32.xlu0 %v1926_v32  ;;  %2174 = vmatmul.mubr.msk.f32.gmra.mrb[30].mxu0 %vm401_vm0, %v5976_v9  ;;  %v6018_v9 = vld [vmem:[#allocation20_spill] sm:$0xff] }
 0x143   :  { %910 = vmatmul.mubr.f32.gmra.mrb[30].mxu1 %v3994_v21  ;;  %2175 = vmatprep.mubr.msk.f32.mxu0 %vm401_vm0, %v2760_v0  ;;  %v1971_v21 = vadd.f32 %v1970_v63, %v1969_v33 }
 0x144   :  { %915 = vmatprep.mubr.f32.mxu1 %v5973_v10  ;;  %v2761_v10 = vld [vmem:[%s5560_s0 + $0x3e8] sm:$0xff] }
 0x145   :  { %1954 = vadd.xlane.f32.xlu1 %v1953_v46 }
 0x146   :  { %1945 = vadd.xlane.f32.xlu0 %v1944_v35  ;;  %2176 = vmatmul.mubr.msk.f32.gmra.mrb[32].mxu0 %vm401_vm0, %v2760_v0 }
 0x147   :  { %916 = vmatmul.mubr.f32.gmra.mrb[32].mxu1 %v5968_v55  ;;  %2177 = vmatprep.mubr.msk.f32.mxu0 %vm401_vm0, %v2761_v10  ;;  %v2763_v55 = vld [vmem:[%s5560_s0 + $0x500] sm:$0xff] }
 0x148   :  { %921 = vmatprep.mubr.f32.mxu1 %v5972_v39  ;;  %v2764_v39 = vld [vmem:[%s5560_s0 + $0x538] sm:$0xff] }
 0x149   :  { %1972 = vadd.xlane.f32.xlu1 %v1971_v21 }
 0x14a   :  { %1963 = vadd.xlane.f32.xlu0 %v1962_v47  ;;  %2178 = vmatmul.mubr.msk.f32.gmra.mrb[34].mxu0 %vm401_vm0, %v2761_v10 }
 0x14b   :  { %922 = vmatmul.mubr.f32.gmra.mrb[34].mxu1 %v5965_v15  ;;  %2179 = vmatprep.mubr.msk.f32.mxu0 %vm401_vm0, %v4744_v18  ;;  %v2762_v15 = vld [vmem:[%s5560_s0 + $0x4c8] sm:$0xff] }
 0x14c   :  { %927 = vmatprep.mubr.f32.mxu1 %v5980_v3  ;;  %v6020_v3 = vld [vmem:[#allocation21_spill] sm:$0xff] }
 0x14e   :  { %2180 = vmatmul.mubr.msk.f32.gmra.mrb[36].mxu0 %vm401_vm0, %v4744_v18  ;;  %v2772_v18 = vld [vmem:[%s5560_s0 + $0x6f8] sm:$0xff] }
 0x14f   :  { %928 = vmatmul.mubr.f32.gmra.mrb[36].mxu1 %v5975_v52  ;;  %2181 = vmatprep.mubr.msk.f32.mxu0 %vm401_vm0, %v4737_v57  ;;  %v2765_v52 = vld [vmem:[%s5560_s0 + $0x570] sm:$0xff] }
 0x150   :  { %933 = vmatprep.mubr.f32.mxu1 %v5979_v41  ;;  %v2766_v41 = vld [vmem:[%s5560_s0 + $0x5a8] sm:$0xff] }
 0x152   :  { %2182 = vmatmul.mubr.msk.f32.gmra.mrb[38].mxu0 %vm401_vm0, %v4737_v57  ;;  %v2771_v57 = vld [vmem:[%s5560_s0 + $0x6c0] sm:$0xff] }
 0x153   :  { %934 = vmatmul.mubr.f32.gmra.mrb[38].mxu1 %v5974_v59  ;;  %2183 = vmatprep.mubr.msk.f32.mxu0 %vm401_vm0, %v4787_v51  ;;  %v6017_v59 = vld [vmem:[#allocation14_spill] sm:$0xff] }
 0x154   :  { %939 = vmatprep.mubr.f32.mxu1 %v5987_v13  ;;  %v6022_v13 = vld [vmem:[#allocation22_spill] sm:$0xff] }
 0x156   :  { %2184 = vmatmul.mubr.msk.f32.gmra.mrb[40].mxu0 %vm401_vm0, %v4787_v51 }
 0x157   :  { %940 = vmatmul.mubr.f32.gmra.mrb[40].mxu1 %v5981_v1  ;;  %2185 = vmatprep.mubr.msk.f32.mxu0 %vm401_vm0, %v2762_v15  ;;  %v2767_v1 = vld [vmem:[%s5560_s0 + $0x5e0] sm:$0xff] }
 0x158   :  { %945 = vmatprep.mubr.f32.mxu1 %v5985_v34  ;;  %v2768_v34 = vld [vmem:[%s5560_s0 + $0x618] sm:$0xff] }
 0x15a   :  { %2186 = vmatmul.mubr.msk.f32.gmra.mrb[42].mxu0 %vm401_vm0, %v2762_v15 }
 0x15b   :  { %946 = vmatmul.mubr.f32.gmra.mrb[42].mxu1 %v5977_v29  ;;  %2187 = vmatprep.mubr.msk.f32.mxu0 %vm401_vm0, %v2763_v55  ;;  %v6019_v29 = vld [vmem:[#allocation18_spill] sm:$0xff] }
 0x15c   :  { %951 = vmatprep.mubr.f32.mxu1 %v5989_v38  ;;  %v2770_v38 = vld [vmem:[%s5560_s0 + $0x688] sm:$0xff] }
 0x15e   :  { %2188 = vmatmul.mubr.msk.f32.gmra.mrb[44].mxu0 %vm401_vm0, %v2763_v55 }
 0x15f   :  { %952 = vmatmul.mubr.f32.gmra.mrb[44].mxu1 %v5984_v24  ;;  %2189 = vmatprep.mubr.msk.f32.mxu0 %vm401_vm0, %v2764_v39  ;;  %v6021_v24 = vld [vmem:[#allocation27_spill] sm:$0xff] }
 0x160   :  { %957 = vmatprep.mubr.f32.mxu1 %v5988_v26  ;;  %v2769_v26 = vld [vmem:[%s5560_s0 + $0x650] sm:$0xff] }
 0x162   :  { %2190 = vmatmul.mubr.msk.f32.gmra.mrb[46].mxu0 %vm401_vm0, %v2764_v39 }
 0x163   :  { %958 = vmatmul.mubr.f32.gmra.mrb[46].mxu1 %v6017_v59  ;;  %2191 = vmatprep.mubr.msk.f32.mxu0 %vm401_vm0, %v2765_v52 }
 0x164   :  { %963 = vmatprep.mubr.f32.mxu1 %v5993_v5  ;;  %v2773_v5 = vmov 0.0  }
 0x165   :  { %83 = vst.msk [vmem:[%s5561_s2 + $0x10] sm:$0xff] %vm80_vm2, %v2773_v5  ;;  %81 = vst.msk [vmem:[%s5561_s2] sm:$0xff] %vm80_vm2, %v2773_v5 }
 0x166   :  { %2192 = vmatmul.mubr.msk.f32.gmra.mrb[48].mxu0 %vm401_vm0, %v2765_v52  ;;  %82 = vst.msk [vmem:[%s5561_s2 + $0x8] sm:$0xff] %vm80_vm2, %v2773_v5  ;;  %84 = vst.msk [vmem:[%s5561_s2 + $0x18] sm:$0xff] %vm80_vm2, %v2773_v5 }
 0x167   :  { %964 = vmatmul.mubr.f32.gmra.mrb[48].mxu1 %v6018_v9  ;;  %2193 = vmatprep.mubr.msk.f32.mxu0 %vm401_vm0, %v2766_v41  ;;  %85 = vst.msk [vmem:[%s5561_s2 + $0x20] sm:$0xff] %vm80_vm2, %v2773_v5  ;;  %86 = vst.msk [vmem:[%s5561_s2 + $0x28] sm:$0xff] %vm80_vm2, %v2773_v5 }
 0x168   :  { %969 = vmatprep.mubr.f32.mxu1 %v6019_v29  ;;  %87 = vst.msk [vmem:[%s5561_s2 + $0x30] sm:$0xff] %vm80_vm2, %v2773_v5  ;;  %88 = vst.msk [vmem:[%s5561_s2 + $0x38] sm:$0xff] %vm80_vm2, %v2773_v5 }
 0x169   :  { %89 = vst.msk [vmem:[%s5561_s2 + $0x40] sm:$0xff] %vm80_vm2, %v2773_v5  ;;  %90 = vst.msk [vmem:[%s5561_s2 + $0x48] sm:$0xff] %vm80_vm2, %v2773_v5 }
 0x16a   :  { %2194 = vmatmul.mubr.msk.f32.gmra.mrb[50].mxu0 %vm401_vm0, %v2766_v41  ;;  %91 = vst.msk [vmem:[%s5561_s2 + $0x50] sm:$0xff] %vm80_vm2, %v2773_v5  ;;  %92 = vst.msk [vmem:[%s5561_s2 + $0x58] sm:$0xff] %vm80_vm2, %v2773_v5 }
 0x16b   :  { %970 = vmatmul.mubr.f32.gmra.mrb[50].mxu1 %v6020_v3  ;;  %2195 = vmatprep.mubr.msk.f32.mxu0 %vm401_vm0, %v2767_v1  ;;  %93 = vst.msk [vmem:[%s5561_s2 + $0x60] sm:$0xff] %vm80_vm2, %v2773_v5  ;;  %94 = vst.msk [vmem:[%s5561_s2 + $0x68] sm:$0xff] %vm80_vm2, %v2773_v5 }
 0x16c   :  { %975 = vmatprep.mubr.f32.mxu1 %v6000_v11  ;;  %95 = vst.msk [vmem:[%s5561_s2 + $0x70] sm:$0xff] %vm80_vm2, %v2773_v5  ;;  %96 = vst.msk [vmem:[%s5561_s2 + $0x78] sm:$0xff] %vm80_vm2, %v2773_v5 }
 0x16d   :  { %97 = vst.msk [vmem:[%s5561_s2 + $0x80] sm:$0xff] %vm80_vm2, %v2773_v5  ;;  %98 = vst.msk [vmem:[%s5561_s2 + $0x88] sm:$0xff] %vm80_vm2, %v2773_v5 }
 0x16e   :  { %2196 = vmatmul.mubr.msk.f32.gmra.mrb[52].mxu0 %vm401_vm0, %v2767_v1  ;;  %99 = vst.msk [vmem:[%s5561_s2 + $0x90] sm:$0xff] %vm80_vm2, %v2773_v5  ;;  %100 = vst.msk [vmem:[%s5561_s2 + $0x98] sm:$0xff] %vm80_vm2, %v2773_v5  ;;  %v1659_v28 = vld [vmem:[%s5561_s2 + $0x28] sm:$0xff]  ;;  %v1658_v49 = vld [vmem:[%s5561_s2 + $0x20] sm:$0xff] }
 0x16f   :  { %976 = vmatmul.mubr.f32.gmra.mrb[52].mxu1 %v6021_v24  ;;  %2197 = vmatprep.mubr.msk.f32.mxu0 %vm401_vm0, %v2768_v34  ;;  %101 = vst.msk [vmem:[%s5561_s2 + $0xa0] sm:$0xff] %vm80_vm2, %v2773_v5  ;;  %102 = vst.msk [vmem:[%s5561_s2 + $0xa8] sm:$0xff] %vm80_vm2, %v2773_v5  ;;  %v1661_v42 = vld [vmem:[%s5561_s2 + $0x38] sm:$0xff]  ;;  %v1660_v56 = vld [vmem:[%s5561_s2 + $0x30] sm:$0xff] }
 0x170   :  { %981 = vmatprep.mubr.f32.mxu1 %v5999_v2  ;;  %103 = vst.msk [vmem:[%s5561_s2 + $0xb0] sm:$0xff] %vm80_vm2, %v2773_v5  ;;  %104 = vst.msk [vmem:[%s5561_s2 + $0xb8] sm:$0xff] %vm80_vm2, %v2773_v5  ;;  %v1654_v2 = vld [vmem:[%s5561_s2] sm:$0xff]  ;;  %v1663_v58 = vld [vmem:[%s5561_s2 + $0x48] sm:$0xff] }
 0x171   :  { %105 = vst.msk [vmem:[%s5561_s2 + $0xc0] sm:$0xff] %vm80_vm2, %v2773_v5  ;;  %106 = vst.msk [vmem:[%s5561_s2 + $0xc8] sm:$0xff] %vm80_vm2, %v2773_v5  ;;  %v1662_v40 = vld [vmem:[%s5561_s2 + $0x40] sm:$0xff]  ;;  %v1665_v8 = vld [vmem:[%s5561_s2 + $0x58] sm:$0xff] }
 0x172   :  { %2198 = vmatmul.mubr.msk.f32.gmra.mrb[54].mxu0 %vm401_vm0, %v2768_v34  ;;  %107 = vst.msk [vmem:[%s5561_s2 + $0xd0] sm:$0xff] %vm80_vm2, %v2773_v5  ;;  %108 = vst.msk [vmem:[%s5561_s2 + $0xd8] sm:$0xff] %vm80_vm2, %v2773_v5  ;;  %v1664_v6 = vld [vmem:[%s5561_s2 + $0x50] sm:$0xff]  ;;  %v1667_v48 = vld [vmem:[%s5561_s2 + $0x68] sm:$0xff] }
 0x173   :  { %982 = vmatmul.mubr.f32.gmra.mrb[54].mxu1 %v6022_v13  ;;  %2199 = vmatprep.mubr.msk.f32.mxu0 %vm401_vm0, %v2769_v26  ;;  %109 = vst.msk [vmem:[%s5561_s2 + $0xe0] sm:$0xff] %vm80_vm2, %v2773_v5  ;;  %110 = vst.msk [vmem:[%s5561_s2 + $0xe8] sm:$0xff] %vm80_vm2, %v2773_v5  ;;  %v1666_v27 = vld [vmem:[%s5561_s2 + $0x60] sm:$0xff]  ;;  %v1669_v0 = vld [vmem:[%s5561_s2 + $0x78] sm:$0xff] }
 0x174   :  { %987 = vmatprep.mubr.f32.mxu1 %v6007_v61  ;;  %111 = vst.msk [vmem:[%s5561_s2 + $0xf0] sm:$0xff] %vm80_vm2, %v2773_v5  ;;  %112 = vst.msk [vmem:[%s5561_s2 + $0xf8] sm:$0xff] %vm80_vm2, %v2773_v5  ;;  %v1668_v47 = vld [vmem:[%s5561_s2 + $0x70] sm:$0xff]  ;;  %v1671_v39 = vld [vmem:[%s5561_s2 + $0x88] sm:$0xff] }
 0x175   :  { %v1670_v52 = vld [vmem:[%s5561_s2 + $0x80] sm:$0xff]  ;;  %v1673_v3 = vld [vmem:[%s5561_s2 + $0x98] sm:$0xff]  ;;  %v1672_v24 = vld [vmem:[%s5561_s2 + $0x90] sm:$0xff] }
 0x176   :  { %2200 = vmatmul.mubr.msk.f32.gmra.mrb[56].mxu0 %vm401_vm0, %v2769_v26 }
 0x177   :  { %988 = vmatmul.mubr.f32.gmra.mrb[56].mxu1 %v6002_v22  ;;  %2201 = vmatprep.mubr.msk.f32.mxu0 %vm401_vm0, %v2770_v38  ;;  %v1656_v22 = vld [vmem:[%s5561_s2 + $0x10] sm:$0xff] }
 0x178   :  { %993 = vmatprep.mubr.f32.mxu1 %v6006_v44  ;;  %v1657_v44 = vld [vmem:[%s5561_s2 + $0x18] sm:$0xff] }
 0x17a   :  { %2202 = vmatmul.mubr.msk.f32.gmra.mrb[58].mxu0 %vm401_vm0, %v2770_v38  ;;  %v1675_v38 = vld [vmem:[%s5561_s2 + $0xa8] sm:$0xff] }
 0x17b   :  { %994 = vmatmul.mubr.f32.gmra.mrb[58].mxu1 %v6001_v23  ;;  %2203 = vmatprep.mubr.msk.f32.mxu0 %vm401_vm0, %v2771_v57 }
 0x17c   :  { %999 = vmatprep.mubr.f32.mxu1 %v6012_v62 }
 0x17e   :  { %2204 = vmatmul.mubr.msk.f32.gmra.mrb[60].mxu0 %vm401_vm0, %v2771_v57 }
 0x17f   :  { %1000 = vmatmul.mubr.f32.gmra.mrb[60].mxu1 %v6008_v36  ;;  %2205 = vmatprep.mubr.msk.f32.mxu0 %vm401_vm0, %v2772_v18  ;;  %v1655_v36 = vld [vmem:[%s5561_s2 + $0x8] sm:$0xff] }
 0x180   :  { %1005 = vmatprep.mubr.f32.mxu1 %v6010_v16 }
 0x182   :  { %2206 = vmatmul.mubr.msk.f32.gmra.mrb[62].mxu0 %vm401_vm0, %v2772_v18  ;;  %v1674_v18 = vld [vmem:[%s5561_s2 + $0xa0] sm:$0xff] }
 0x183   :  { %1006 = vmatmul.mubr.f32.gmra.mrb[62].mxu1 %v6004_v25 }
 0x19a   :  { %v1712_v51 = vpop.xlane.xlu1 %1711  ;;  %v1694_v11 = vpop.xlane.xlu0 %1693 }
 0x19b   :  { %v1976_v23 = vadd.f32 %v1712_v51, %v1656_v22  ;;  %v1974_v25 = vadd.f32 %v1694_v11, %v1654_v2  ;;  %v1677_v2 = vld [vmem:[%s5561_s2 + $0xb8] sm:$0xff] }
 0x19d   :  { %2009 = vst.msk [vmem:[%s5561_s2 + $0x10] sm:$0xff] %vm80_vm2, %v1976_v23  ;;  %2007 = vst.msk [vmem:[%s5561_s2] sm:$0xff] %vm80_vm2, %v1974_v25  ;;  %v1676_v23 = vld [vmem:[%s5561_s2 + $0xb0] sm:$0xff] }
 0x19e   :  { %v1721_v61 = vpop.xlane.xlu1 %1720  ;;  %v1703_v16 = vpop.xlane.xlu0 %1702 }
 0x19f   :  { %v1977_v37 = vadd.f32 %v1721_v61, %v1657_v44  ;;  %v1975_v53 = vadd.f32 %v1703_v16, %v1655_v36  ;;  %v1679_v36 = vld [vmem:[%s5561_s2 + $0xc8] sm:$0xff] }
 0x1a1   :  { %2010 = vst.msk [vmem:[%s5561_s2 + $0x18] sm:$0xff] %vm80_vm2, %v1977_v37  ;;  %2008 = vst.msk [vmem:[%s5561_s2 + $0x8] sm:$0xff] %vm80_vm2, %v1975_v53  ;;  %v1678_v37 = vld [vmem:[%s5561_s2 + $0xc0] sm:$0xff] }
 0x1a2   :  { %v1739_v19 = vpop.xlane.xlu1 %1738  ;;  %v1730_v31 = vpop.xlane.xlu0 %1729 }
 0x1a3   :  { %v1979_v62 = vadd.f32 %v1739_v19, %v1659_v28  ;;  %v1978_v54 = vadd.f32 %v1730_v31, %v1658_v49  ;;  %v1681_v49 = vld [vmem:[%s5561_s2 + $0xd8] sm:$0xff] }
 0x1a5   :  { %2012 = vst.msk [vmem:[%s5561_s2 + $0x28] sm:$0xff] %vm80_vm2, %v1979_v62  ;;  %2011 = vst.msk [vmem:[%s5561_s2 + $0x20] sm:$0xff] %vm80_vm2, %v1978_v54  ;;  %v1680_v62 = vld [vmem:[%s5561_s2 + $0xd0] sm:$0xff] }
 0x1a6   :  { %v1757_v32 = vpop.xlane.xlu1 %1756  ;;  %v1748_v17 = vpop.xlane.xlu0 %1747 }
 0x1a7   :  { %v1981_v45 = vadd.f32 %v1757_v32, %v1661_v42  ;;  %v1980_v30 = vadd.f32 %v1748_v17, %v1660_v56  ;;  %v1683_v56 = vld [vmem:[%s5561_s2 + $0xe8] sm:$0xff] }
 0x1a9   :  { %2014 = vst.msk [vmem:[%s5561_s2 + $0x38] sm:$0xff] %vm80_vm2, %v1981_v45  ;;  %2013 = vst.msk [vmem:[%s5561_s2 + $0x30] sm:$0xff] %vm80_vm2, %v1980_v30  ;;  %v1682_v45 = vld [vmem:[%s5561_s2 + $0xe0] sm:$0xff] }
 0x1aa   :  { %v1775_v43 = vpop.xlane.xlu1 %1774  ;;  %v1766_v14 = vpop.xlane.xlu0 %1765 }
 0x1ab   :  { %v1983_v20 = vadd.f32 %v1775_v43, %v1663_v58  ;;  %v1982_v50 = vadd.f32 %v1766_v14, %v1662_v40  ;;  %v1685_v14 = vld [vmem:[%s5561_s2 + $0xf8] sm:$0xff] }
 0x1ad   :  { %2016 = vst.msk [vmem:[%s5561_s2 + $0x48] sm:$0xff] %vm80_vm2, %v1983_v20  ;;  %2015 = vst.msk [vmem:[%s5561_s2 + $0x40] sm:$0xff] %vm80_vm2, %v1982_v50  ;;  %v1684_v50 = vld [vmem:[%s5561_s2 + $0xf0] sm:$0xff] }
 0x1ae   :  { %v1793_v12 = vpop.xlane.xlu1 %1792  ;;  %v1784_v33 = vpop.xlane.xlu0 %1783 }
 0x1af   :  { %v1985_v46 = vadd.f32 %v1793_v12, %v1665_v8  ;;  %v1984_v35 = vadd.f32 %v1784_v33, %v1664_v6 }
 0x1b1   :  { %2018 = vst.msk [vmem:[%s5561_s2 + $0x58] sm:$0xff] %vm80_vm2, %v1985_v46  ;;  %2017 = vst.msk [vmem:[%s5561_s2 + $0x50] sm:$0xff] %vm80_vm2, %v1984_v35 }
 0x1b2   :  { %v1811_v7 = vpop.xlane.xlu1 %1810  ;;  %v1802_v63 = vpop.xlane.xlu0 %1801 }
 0x1b3   :  { %v1987_v4 = vadd.f32 %v1811_v7, %v1667_v48  ;;  %v1986_v60 = vadd.f32 %v1802_v63, %v1666_v27 }
 0x1b5   :  { %2020 = vst.msk [vmem:[%s5561_s2 + $0x68] sm:$0xff] %vm80_vm2, %v1987_v4  ;;  %2019 = vst.msk [vmem:[%s5561_s2 + $0x60] sm:$0xff] %vm80_vm2, %v1986_v60 }
 0x1b6   :  { %v1829_v21 = vpop.xlane.xlu1 %1828  ;;  %v1820_v10 = vpop.xlane.xlu0 %1819 }
 0x1b7   :  { %v1989_v15 = vadd.f32 %v1829_v21, %v1669_v0  ;;  %v1988_v55 = vadd.f32 %v1820_v10, %v1668_v47 }
 0x1b9   :  { %2022 = vst.msk [vmem:[%s5561_s2 + $0x78] sm:$0xff] %vm80_vm2, %v1989_v15  ;;  %2021 = vst.msk [vmem:[%s5561_s2 + $0x70] sm:$0xff] %vm80_vm2, %v1988_v55 }
 0x1ba   :  { %v1847_v59 = vpop.xlane.xlu1 %1846  ;;  %v1838_v9 = vpop.xlane.xlu0 %1837 }
 0x1bb   :  { %v1991_v29 = vadd.f32 %v1847_v59, %v1671_v39  ;;  %v1990_v41 = vadd.f32 %v1838_v9, %v1670_v52 }
 0x1bd   :  { %2024 = vst.msk [vmem:[%s5561_s2 + $0x88] sm:$0xff] %vm80_vm2, %v1991_v29  ;;  %2023 = vst.msk [vmem:[%s5561_s2 + $0x80] sm:$0xff] %vm80_vm2, %v1990_v41 }
 0x1be   :  { %v1865_v1 = vpop.xlane.xlu1 %1864  ;;  %v1856_v34 = vpop.xlane.xlu0 %1855 }
 0x1bf   :  { %v1993_v13 = vadd.f32 %v1865_v1, %v1673_v3  ;;  %v1992_v26 = vadd.f32 %v1856_v34, %v1672_v24 }
 0x1c1   :  { %2026 = vst.msk [vmem:[%s5561_s2 + $0x98] sm:$0xff] %vm80_vm2, %v1993_v13  ;;  %2025 = vst.msk [vmem:[%s5561_s2 + $0x90] sm:$0xff] %vm80_vm2, %v1992_v26 }
 0x1c2   :  { %v1883_v57 = vpop.xlane.xlu1 %1882 }
 0x1c3   :  { %v1874_v5 = vpop.xlane.xlu0 %1873  ;;  %v1995_v22 = vadd.f32 %v1883_v57, %v1675_v38 }
 0x1c4   :  { %v1994_v51 = vadd.f32 %v1874_v5, %v1674_v18 }
 0x1c5   :  { %2028 = vst.msk [vmem:[%s5561_s2 + $0xa8] sm:$0xff] %vm80_vm2, %v1995_v22 }
 0x1c6   :  { %2027 = vst.msk [vmem:[%s5561_s2 + $0xa0] sm:$0xff] %vm80_vm2, %v1994_v51  ;;  %v1901_v11 = vpop.xlane.xlu1 %1900 }
 0x1c7   :  { %v1892_v25 = vpop.xlane.xlu0 %1891  ;;  %v1997_v44 = vadd.f32 %v1901_v11, %v1677_v2 }
 0x1c8   :  { %v1996_v61 = vadd.f32 %v1892_v25, %v1676_v23 }
 0x1c9   :  { %2030 = vst.msk [vmem:[%s5561_s2 + $0xb8] sm:$0xff] %vm80_vm2, %v1997_v44 }
 0x1ca   :  { %2029 = vst.msk [vmem:[%s5561_s2 + $0xb0] sm:$0xff] %vm80_vm2, %v1996_v61  ;;  %v1919_v16 = vpop.xlane.xlu1 %1918 }
 0x1cb   :  { %v1910_v53 = vpop.xlane.xlu0 %1909  ;;  %v1999_v28 = vadd.f32 %v1919_v16, %v1679_v36 }
 0x1cc   :  { %v1998_v19 = vadd.f32 %v1910_v53, %v1678_v37 }
 0x1cd   :  { %2032 = vst.msk [vmem:[%s5561_s2 + $0xc8] sm:$0xff] %vm80_vm2, %v1999_v28 }
 0x1ce   :  { %2031 = vst.msk [vmem:[%s5561_s2 + $0xc0] sm:$0xff] %vm80_vm2, %v1998_v19  ;;  %v1937_v31 = vpop.xlane.xlu1 %1936 }
 0x1cf   :  { %v1928_v54 = vpop.xlane.xlu0 %1927  ;;  %v2001_v42 = vadd.f32 %v1937_v31, %v1681_v49 }
 0x1d0   :  { %v2000_v32 = vadd.f32 %v1928_v54, %v1680_v62 }
 0x1d1   :  { %2034 = vst.msk [vmem:[%s5561_s2 + $0xd8] sm:$0xff] %vm80_vm2, %v2001_v42 }
 0x1d2   :  { %2033 = vst.msk [vmem:[%s5561_s2 + $0xd0] sm:$0xff] %vm80_vm2, %v2000_v32  ;;  %v1955_v17 = vpop.xlane.xlu1 %1954 }
 0x1d3   :  { %v1946_v30 = vpop.xlane.xlu0 %1945  ;;  %v2003_v58 = vadd.f32 %v1955_v17, %v1683_v56 }
 0x1d4   :  { %v2002_v43 = vadd.f32 %v1946_v30, %v1682_v45 }
 0x1d5   :  { %2036 = vst.msk [vmem:[%s5561_s2 + $0xe8] sm:$0xff] %vm80_vm2, %v2003_v58 }
 0x1d6   :  { %2035 = vst.msk [vmem:[%s5561_s2 + $0xe0] sm:$0xff] %vm80_vm2, %v2002_v43  ;;  %v1973_v20 = vpop.xlane.xlu1 %1972 }
 0x1d7   :  { %v2005_v6 = vadd.f32 %v1973_v20, %v1685_v14  ;;  %v1964_v35 = vpop.xlane.xlu0 %1963 }
 0x1d8   :  { %v2004_v7 = vadd.f32 %v1964_v35, %v1684_v50 }
 0x1d9   :  { %v1335_v8 = vpop.f32.mrb[0].mxu0  ;;  %2038 = vst.msk [vmem:[%s5561_s2 + $0xf8] sm:$0xff] %vm80_vm2, %v2005_v6 }
 0x1da   :  { %v821_v40 = vpop.f32.mrb[0].mxu1  ;;  %v1337_v46 = vpop.f32.mrb[1].mxu0  ;;  %2037 = vst.msk [vmem:[%s5561_s2 + $0xf0] sm:$0xff] %vm80_vm2, %v2004_v7 }
 0x1db   :  { %v823_v12 = vpop.f32.mrb[1].mxu1  ;;  %v2447_v33 = vadd.f32 %v1335_v8, %v821_v40 }
 0x1dc   :  { %v2448_v48 = vadd.f32 %v1337_v46, %v823_v12 }
 0x1dd   :  { %v1341_v63 = vpop.f32.mrb[2].mxu0  ;;  %1590 = vst [vmem:[%s5562_s1] sm:$0xff] %v2447_v33 }
 0x1de   :  { %v827_v27 = vpop.f32.mrb[2].mxu1  ;;  %v1343_v0 = vpop.f32.mrb[3].mxu0  ;;  %1591 = vst [vmem:[%s5562_s1 + $0x8] sm:$0xff] %v2448_v48 }
 0x1df   :  { %v829_v4 = vpop.f32.mrb[3].mxu1  ;;  %v2449_v60 = vadd.f32 %v1341_v63, %v827_v27 }
 0x1e0   :  { %v2450_v21 = vadd.f32 %v1343_v0, %v829_v4 }
 0x1e1   :  { %v1347_v10 = vpop.f32.mrb[4].mxu0  ;;  %1592 = vst [vmem:[%s5562_s1 + $0x10] sm:$0xff] %v2449_v60 }
 0x1e2   :  { %v833_v47 = vpop.f32.mrb[4].mxu1  ;;  %v1349_v39 = vpop.f32.mrb[5].mxu0  ;;  %1593 = vst [vmem:[%s5562_s1 + $0x18] sm:$0xff] %v2450_v21 }
 0x1e3   :  { %v835_v15 = vpop.f32.mrb[5].mxu1  ;;  %v2451_v55 = vadd.f32 %v1347_v10, %v833_v47 }
 0x1e4   :  { %v2452_v59 = vadd.f32 %v1349_v39, %v835_v15 }
 0x1e5   :  { %v1353_v9 = vpop.f32.mrb[6].mxu0  ;;  %1594 = vst [vmem:[%s5562_s1 + $0x20] sm:$0xff] %v2451_v55 }
 0x1e6   :  { %v839_v52 = vpop.f32.mrb[6].mxu1  ;;  %v1355_v3 = vpop.f32.mrb[7].mxu0  ;;  %1595 = vst [vmem:[%s5562_s1 + $0x28] sm:$0xff] %v2452_v59 }
 0x1e7   :  { %v841_v29 = vpop.f32.mrb[7].mxu1  ;;  %v2453_v41 = vadd.f32 %v1353_v9, %v839_v52 }
 0x1e8   :  { %v2454_v1 = vadd.f32 %v1355_v3, %v841_v29 }
 0x1e9   :  { %v1359_v34 = vpop.f32.mrb[8].mxu0  ;;  %1596 = vst [vmem:[%s5562_s1 + $0x30] sm:$0xff] %v2453_v41 }
 0x1ea   :  { %v845_v24 = vpop.f32.mrb[8].mxu1  ;;  %v1361_v38 = vpop.f32.mrb[9].mxu0  ;;  %1597 = vst [vmem:[%s5562_s1 + $0x38] sm:$0xff] %v2454_v1 }
 0x1eb   :  { %v847_v13 = vpop.f32.mrb[9].mxu1  ;;  %v2455_v26 = vadd.f32 %v1359_v34, %v845_v24 }
 0x1ec   :  { %v2456_v57 = vadd.f32 %v1361_v38, %v847_v13 }
 0x1ed   :  { %v1365_v5 = vpop.f32.mrb[10].mxu0  ;;  %1598 = vst [vmem:[%s5562_s1 + $0x40] sm:$0xff] %v2455_v26 }
 0x1ee   :  { %v851_v18 = vpop.f32.mrb[10].mxu1  ;;  %v1367_v2 = vpop.f32.mrb[11].mxu0  ;;  %1599 = vst [vmem:[%s5562_s1 + $0x48] sm:$0xff] %v2456_v57 }
 0x1ef   :  { %v853_v22 = vpop.f32.mrb[11].mxu1  ;;  %v2457_v51 = vadd.f32 %v1365_v5, %v851_v18 }
 0x1f0   :  { %v2458_v11 = vadd.f32 %v1367_v2, %v853_v22 }
 0x1f1   :  { %v1371_v25 = vpop.f32.mrb[12].mxu0  ;;  %1600 = vst [vmem:[%s5562_s1 + $0x50] sm:$0xff] %v2457_v51 }
 0x1f2   :  { %v857_v23 = vpop.f32.mrb[12].mxu1  ;;  %v1373_v36 = vpop.f32.mrb[13].mxu0  ;;  %1601 = vst [vmem:[%s5562_s1 + $0x58] sm:$0xff] %v2458_v11 }
 0x1f3   :  { %v859_v44 = vpop.f32.mrb[13].mxu1  ;;  %v2459_v61 = vadd.f32 %v1371_v25, %v857_v23 }
 0x1f4   :  { %v2460_v16 = vadd.f32 %v1373_v36, %v859_v44 }
 0x1f5   :  { %v1377_v53 = vpop.f32.mrb[14].mxu0  ;;  %1602 = vst [vmem:[%s5562_s1 + $0x60] sm:$0xff] %v2459_v61 }
 0x1f6   :  { %v863_v37 = vpop.f32.mrb[14].mxu1  ;;  %v1379_v49 = vpop.f32.mrb[15].mxu0  ;;  %1603 = vst [vmem:[%s5562_s1 + $0x68] sm:$0xff] %v2460_v16 }
 0x1f7   :  { %v865_v28 = vpop.f32.mrb[15].mxu1  ;;  %v2461_v19 = vadd.f32 %v1377_v53, %v863_v37 }
 0x1f8   :  { %v2462_v31 = vadd.f32 %v1379_v49, %v865_v28 }
 0x1f9   :  { %v1383_v54 = vpop.f32.mrb[16].mxu0  ;;  %1604 = vst [vmem:[%s5562_s1 + $0x70] sm:$0xff] %v2461_v19 }
 0x1fa   :  { %v869_v62 = vpop.f32.mrb[16].mxu1  ;;  %v1385_v56 = vpop.f32.mrb[17].mxu0  ;;  %1605 = vst [vmem:[%s5562_s1 + $0x78] sm:$0xff] %v2462_v31 }
 0x1fb   :  { %v871_v42 = vpop.f32.mrb[17].mxu1  ;;  %v2463_v32 = vadd.f32 %v1383_v54, %v869_v62 }
 0x1fc   :  { %v2464_v17 = vadd.f32 %v1385_v56, %v871_v42 }
 0x1fd   :  { %v1389_v30 = vpop.f32.mrb[18].mxu0  ;;  %1606 = vst [vmem:[%s5562_s1 + $0x80] sm:$0xff] %v2463_v32 }
 0x1fe   :  { %v875_v45 = vpop.f32.mrb[18].mxu1  ;;  %v1391_v40 = vpop.f32.mrb[19].mxu0  ;;  %1607 = vst [vmem:[%s5562_s1 + $0x88] sm:$0xff] %v2464_v17 }
 0x1ff   :  { %v877_v58 = vpop.f32.mrb[19].mxu1  ;;  %v2465_v43 = vadd.f32 %v1389_v30, %v875_v45 }
 0x200   :  { %v2466_v14 = vadd.f32 %v1391_v40, %v877_v58 }
 0x201   :  { %v1395_v50 = vpop.f32.mrb[20].mxu0  ;;  %1608 = vst [vmem:[%s5562_s1 + $0x90] sm:$0xff] %v2465_v43 }
 0x202   :  { %v881_v20 = vpop.f32.mrb[20].mxu1  ;;  %v1397_v6 = vpop.f32.mrb[21].mxu0  ;;  %1609 = vst [vmem:[%s5562_s1 + $0x98] sm:$0xff] %v2466_v14 }
 0x203   :  { %v883_v8 = vpop.f32.mrb[21].mxu1  ;;  %v2467_v12 = vadd.f32 %v1395_v50, %v881_v20 }
 0x204   :  { %v2468_v33 = vadd.f32 %v1397_v6, %v883_v8 }
 0x205   :  { %v1401_v35 = vpop.f32.mrb[22].mxu0  ;;  %1610 = vst [vmem:[%s5562_s1 + $0xa0] sm:$0xff] %v2467_v12 }
 0x206   :  { %v887_v46 = vpop.f32.mrb[22].mxu1  ;;  %v1403_v27 = vpop.f32.mrb[23].mxu0  ;;  %1611 = vst [vmem:[%s5562_s1 + $0xa8] sm:$0xff] %v2468_v33 }
 0x207   :  { %v889_v48 = vpop.f32.mrb[23].mxu1  ;;  %v2469_v7 = vadd.f32 %v1401_v35, %v887_v46 }
 0x208   :  { %v2470_v63 = vadd.f32 %v1403_v27, %v889_v48 }
 0x209   :  { %v1407_v60 = vpop.f32.mrb[24].mxu0  ;;  %1612 = vst [vmem:[%s5562_s1 + $0xb0] sm:$0xff] %v2469_v7 }
 0x20a   :  { %v893_v4 = vpop.f32.mrb[24].mxu1  ;;  %v1409_v47 = vpop.f32.mrb[25].mxu0  ;;  %1613 = vst [vmem:[%s5562_s1 + $0xb8] sm:$0xff] %v2470_v63 }
 0x20b   :  { %v895_v0 = vpop.f32.mrb[25].mxu1  ;;  %v2471_v21 = vadd.f32 %v1407_v60, %v893_v4 }
 0x20c   :  { %v2472_v10 = vadd.f32 %v1409_v47, %v895_v0 }
 0x20d   :  { %v1413_v55 = vpop.f32.mrb[26].mxu0  ;;  %1614 = vst [vmem:[%s5562_s1 + $0xc0] sm:$0xff] %v2471_v21 }
 0x20e   :  { %v899_v15 = vpop.f32.mrb[26].mxu1  ;;  %v1415_v52 = vpop.f32.mrb[27].mxu0  ;;  %1615 = vst [vmem:[%s5562_s1 + $0xc8] sm:$0xff] %v2472_v10 }
 0x20f   :  { %v901_v39 = vpop.f32.mrb[27].mxu1  ;;  %v2473_v59 = vadd.f32 %v1413_v55, %v899_v15 }
 0x210   :  { %v2474_v9 = vadd.f32 %v1415_v52, %v901_v39 }
 0x211   :  { %v1419_v41 = vpop.f32.mrb[28].mxu0  ;;  %1616 = vst [vmem:[%s5562_s1 + $0xd0] sm:$0xff] %v2473_v59 }
 0x212   :  { %v905_v29 = vpop.f32.mrb[28].mxu1  ;;  %v1421_v24 = vpop.f32.mrb[29].mxu0  ;;  %1617 = vst [vmem:[%s5562_s1 + $0xd8] sm:$0xff] %v2474_v9 }
 0x213   :  { %v907_v3 = vpop.f32.mrb[29].mxu1  ;;  %v2475_v1 = vadd.f32 %v1419_v41, %v905_v29 }
 0x214   :  { %v2476_v34 = vadd.f32 %v1421_v24, %v907_v3 }
 0x215   :  { %v1425_v26 = vpop.f32.mrb[30].mxu0  ;;  %1618 = vst [vmem:[%s5562_s1 + $0xe0] sm:$0xff] %v2475_v1 }
 0x216   :  { %v911_v13 = vpop.f32.mrb[30].mxu1  ;;  %v1427_v18 = vpop.f32.mrb[31].mxu0  ;;  %1619 = vst [vmem:[%s5562_s1 + $0xe8] sm:$0xff] %v2476_v34 }
 0x217   :  { %v913_v38 = vpop.f32.mrb[31].mxu1  ;;  %v2477_v57 = vadd.f32 %v1425_v26, %v911_v13 }
 0x218   :  { %v2478_v5 = vadd.f32 %v1427_v18, %v913_v38 }
 0x219   :  { %v1431_v51 = vpop.f32.mrb[32].mxu0  ;;  %1620 = vst [vmem:[%s5562_s1 + $0xf0] sm:$0xff] %v2477_v57 }
 0x21a   :  { %v917_v22 = vpop.f32.mrb[32].mxu1  ;;  %v1433_v23 = vpop.f32.mrb[33].mxu0  ;;  %1621 = vst [vmem:[%s5562_s1 + $0xf8] sm:$0xff] %v2478_v5 }
 0x21b   :  { %v919_v2 = vpop.f32.mrb[33].mxu1  ;;  %v2479_v11 = vadd.f32 %v1431_v51, %v917_v22 }
 0x21c   :  { %v2480_v25 = vadd.f32 %v1433_v23, %v919_v2 }
 0x21d   :  { %v1437_v61 = vpop.f32.mrb[34].mxu0  ;;  %1622 = vst [vmem:[%s5562_s1 + $0x100] sm:$0xff] %v2479_v11 }
 0x21e   :  { %v923_v44 = vpop.f32.mrb[34].mxu1  ;;  %v1439_v37 = vpop.f32.mrb[35].mxu0  ;;  %1623 = vst [vmem:[%s5562_s1 + $0x108] sm:$0xff] %v2480_v25 }
 0x21f   :  { %v925_v36 = vpop.f32.mrb[35].mxu1  ;;  %v2481_v16 = vadd.f32 %v1437_v61, %v923_v44 }
 0x220   :  { %v2482_v53 = vadd.f32 %v1439_v37, %v925_v36 }
 0x221   :  { %v1443_v19 = vpop.f32.mrb[36].mxu0  ;;  %1624 = vst [vmem:[%s5562_s1 + $0x110] sm:$0xff] %v2481_v16 }
 0x222   :  { %v929_v28 = vpop.f32.mrb[36].mxu1  ;;  %v1445_v62 = vpop.f32.mrb[37].mxu0  ;;  %1625 = vst [vmem:[%s5562_s1 + $0x118] sm:$0xff] %v2482_v53 }
 0x223   :  { %v931_v49 = vpop.f32.mrb[37].mxu1  ;;  %v2483_v31 = vadd.f32 %v1443_v19, %v929_v28 }
 0x224   :  { %v2484_v54 = vadd.f32 %v1445_v62, %v931_v49 }
 0x225   :  { %v1449_v32 = vpop.f32.mrb[38].mxu0  ;;  %1626 = vst [vmem:[%s5562_s1 + $0x120] sm:$0xff] %v2483_v31 }
 0x226   :  { %v935_v42 = vpop.f32.mrb[38].mxu1  ;;  %v1451_v45 = vpop.f32.mrb[39].mxu0  ;;  %1627 = vst [vmem:[%s5562_s1 + $0x128] sm:$0xff] %v2484_v54 }
 0x227   :  { %v937_v56 = vpop.f32.mrb[39].mxu1  ;;  %v2485_v17 = vadd.f32 %v1449_v32, %v935_v42 }
 0x228   :  { %v2486_v30 = vadd.f32 %v1451_v45, %v937_v56 }
 0x229   :  { %v1455_v43 = vpop.f32.mrb[40].mxu0  ;;  %1628 = vst [vmem:[%s5562_s1 + $0x130] sm:$0xff] %v2485_v17 }
 0x22a   :  { %v941_v58 = vpop.f32.mrb[40].mxu1  ;;  %v1457_v20 = vpop.f32.mrb[41].mxu0  ;;  %1629 = vst [vmem:[%s5562_s1 + $0x138] sm:$0xff] %v2486_v30 }
 0x22b   :  { %v943_v40 = vpop.f32.mrb[41].mxu1  ;;  %v2487_v14 = vadd.f32 %v1455_v43, %v941_v58 }
 0x22c   :  { %v2488_v50 = vadd.f32 %v1457_v20, %v943_v40 }
 0x22d   :  { %v1461_v12 = vpop.f32.mrb[42].mxu0  ;;  %1630 = vst [vmem:[%s5562_s1 + $0x140] sm:$0xff] %v2487_v14 }
 0x22e   :  { %v947_v8 = vpop.f32.mrb[42].mxu1  ;;  %v1463_v46 = vpop.f32.mrb[43].mxu0  ;;  %1631 = vst [vmem:[%s5562_s1 + $0x148] sm:$0xff] %v2488_v50 }
 0x22f   :  { %v949_v6 = vpop.f32.mrb[43].mxu1  ;;  %v2489_v33 = vadd.f32 %v1461_v12, %v947_v8 }
 0x230   :  { %v2490_v35 = vadd.f32 %v1463_v46, %v949_v6 }
 0x231   :  { %v1467_v7 = vpop.f32.mrb[44].mxu0  ;;  %1632 = vst [vmem:[%s5562_s1 + $0x150] sm:$0xff] %v2489_v33 }
 0x232   :  { %v953_v48 = vpop.f32.mrb[44].mxu1  ;;  %v1469_v4 = vpop.f32.mrb[45].mxu0  ;;  %1633 = vst [vmem:[%s5562_s1 + $0x158] sm:$0xff] %v2490_v35 }
 0x233   :  { %v955_v27 = vpop.f32.mrb[45].mxu1  ;;  %v2491_v63 = vadd.f32 %v1467_v7, %v953_v48 }
 0x234   :  { %v2492_v60 = vadd.f32 %v1469_v4, %v955_v27 }
 0x235   :  { %v1473_v21 = vpop.f32.mrb[46].mxu0  ;;  %1634 = vst [vmem:[%s5562_s1 + $0x160] sm:$0xff] %v2491_v63 }
 0x236   :  { %v959_v0 = vpop.f32.mrb[46].mxu1  ;;  %v1475_v15 = vpop.f32.mrb[47].mxu0  ;;  %1635 = vst [vmem:[%s5562_s1 + $0x168] sm:$0xff] %v2492_v60 }
 0x237   :  { %v961_v47 = vpop.f32.mrb[47].mxu1  ;;  %v2493_v10 = vadd.f32 %v1473_v21, %v959_v0 }
 0x238   :  { %v2494_v55 = vadd.f32 %v1475_v15, %v961_v47 }
 0x239   :  { %v1479_v59 = vpop.f32.mrb[48].mxu0  ;;  %1636 = vst [vmem:[%s5562_s1 + $0x170] sm:$0xff] %v2493_v10 }
 0x23a   :  { %v965_v39 = vpop.f32.mrb[48].mxu1  ;;  %v1481_v29 = vpop.f32.mrb[49].mxu0  ;;  %1637 = vst [vmem:[%s5562_s1 + $0x178] sm:$0xff] %v2494_v55 }
 0x23b   :  { %v967_v52 = vpop.f32.mrb[49].mxu1  ;;  %v2495_v9 = vadd.f32 %v1479_v59, %v965_v39 }
 0x23c   :  { %v2496_v41 = vadd.f32 %v1481_v29, %v967_v52 }
 0x23d   :  { %v1485_v1 = vpop.f32.mrb[50].mxu0  ;;  %1638 = vst [vmem:[%s5562_s1 + $0x180] sm:$0xff] %v2495_v9 }
 0x23e   :  { %v971_v3 = vpop.f32.mrb[50].mxu1  ;;  %v1487_v13 = vpop.f32.mrb[51].mxu0  ;;  %1639 = vst [vmem:[%s5562_s1 + $0x188] sm:$0xff] %v2496_v41 }
 0x23f   :  { %v973_v24 = vpop.f32.mrb[51].mxu1  ;;  %v2497_v34 = vadd.f32 %v1485_v1, %v971_v3 }
 0x240   :  { %v2498_v26 = vadd.f32 %v1487_v13, %v973_v24 }
 0x241   :  { %v1491_v57 = vpop.f32.mrb[52].mxu0  ;;  %1640 = vst [vmem:[%s5562_s1 + $0x190] sm:$0xff] %v2497_v34 }
 0x242   :  { %v977_v38 = vpop.f32.mrb[52].mxu1  ;;  %v1493_v22 = vpop.f32.mrb[53].mxu0  ;;  %1641 = vst [vmem:[%s5562_s1 + $0x198] sm:$0xff] %v2498_v26 }
 0x243   :  { %v979_v18 = vpop.f32.mrb[53].mxu1  ;;  %v2499_v5 = vadd.f32 %v1491_v57, %v977_v38 }
 0x244   :  { %v2500_v51 = vadd.f32 %v1493_v22, %v979_v18 }
 0x245   :  { %v1497_v11 = vpop.f32.mrb[54].mxu0  ;;  %1642 = vst [vmem:[%s5562_s1 + $0x1a0] sm:$0xff] %v2499_v5 }
 0x246   :  { %v983_v2 = vpop.f32.mrb[54].mxu1  ;;  %v1499_v44 = vpop.f32.mrb[55].mxu0  ;;  %1643 = vst [vmem:[%s5562_s1 + $0x1a8] sm:$0xff] %v2500_v51 }
 0x247   :  { %v985_v23 = vpop.f32.mrb[55].mxu1  ;;  %v2501_v25 = vadd.f32 %v1497_v11, %v983_v2 }
 0x248   :  { %v2502_v61 = vadd.f32 %v1499_v44, %v985_v23 }
 0x249   :  { %v1503_v16 = vpop.f32.mrb[56].mxu0  ;;  %1644 = vst [vmem:[%s5562_s1 + $0x1b0] sm:$0xff] %v2501_v25 }
 0x24a   :  { %v989_v36 = vpop.f32.mrb[56].mxu1  ;;  %v1505_v28 = vpop.f32.mrb[57].mxu0  ;;  %1645 = vst [vmem:[%s5562_s1 + $0x1b8] sm:$0xff] %v2502_v61 }
 0x24b   :  { %v991_v37 = vpop.f32.mrb[57].mxu1  ;;  %v2503_v53 = vadd.f32 %v1503_v16, %v989_v36 }
 0x24c   :  { %v2504_v19 = vadd.f32 %v1505_v28, %v991_v37 }
 0x24d   :  { %v1509_v31 = vpop.f32.mrb[58].mxu0  ;;  %1646 = vst [vmem:[%s5562_s1 + $0x1c0] sm:$0xff] %v2503_v53 }
 0x24e   :  { %v995_v49 = vpop.f32.mrb[58].mxu1  ;;  %v1511_v42 = vpop.f32.mrb[59].mxu0  ;;  %1647 = vst [vmem:[%s5562_s1 + $0x1c8] sm:$0xff] %v2504_v19 }
 0x24f   :  { %v997_v62 = vpop.f32.mrb[59].mxu1  ;;  %v2505_v54 = vadd.f32 %v1509_v31, %v995_v49 }
 0x250   :  { %v2506_v32 = vadd.f32 %v1511_v42, %v997_v62 }
 0x251   :  { %v1515_v17 = vpop.f32.mrb[60].mxu0  ;;  %1648 = vst [vmem:[%s5562_s1 + $0x1d0] sm:$0xff] %v2505_v54 }
 0x252   :  { %v1001_v56 = vpop.f32.mrb[60].mxu1  ;;  %v1517_v58 = vpop.f32.mrb[61].mxu0  ;;  %1649 = vst [vmem:[%s5562_s1 + $0x1d8] sm:$0xff] %v2506_v32 }
 0x253   :  { %v1003_v45 = vpop.f32.mrb[61].mxu1  ;;  %v2507_v30 = vadd.f32 %v1515_v17, %v1001_v56 }
 0x254   :  { %v2508_v43 = vadd.f32 %v1517_v58, %v1003_v45 }
 0x255   :  { %v1521_v14 = vpop.f32.mrb[62].mxu0  ;;  %1650 = vst [vmem:[%s5562_s1 + $0x1e0] sm:$0xff] %v2507_v30 }
 0x256   :  { %v1007_v40 = vpop.f32.mrb[62].mxu1  ;;  %v1523_v8 = vpop.f32.mrb[63].mxu0  ;;  %1651 = vst [vmem:[%s5562_s1 + $0x1e8] sm:$0xff] %v2508_v43 }
 0x257   :  { %v1009_v20 = vpop.f32.mrb[63].mxu1  ;;  %v2509_v50 = vadd.f32 %v1521_v14, %v1007_v40 }
 0x258   :  { %v2510_v12 = vadd.f32 %v1523_v8, %v1009_v20 }
 0x259   :  { %1652 = vst [vmem:[%s5562_s1 + $0x1f0] sm:$0xff] %v2509_v50 }
 0x25a   :  { %1653 = vst [vmem:[%s5562_s1 + $0x1f8] sm:$0xff] %v2510_v12 }

// kernel: conv_bn_add.3
= control target key start
LH: loop header
LB: loop body
LE: loop exit
PB: predicated region body
PF: predicated region fallthrough
CT: control target
= control target key end

     0   :  { %s3715_s18 = smov 0   ;;  %s3717_s19 = smov 0   ;;  %s6036_s0 = inlined_call_operand.vmem [shape: f32[1,256,784], index: 0, kind: input, shape index: {}]   ;;  %s6037_s1 = inlined_call_operand.vmem [shape: f32[1024,256], index: 1, kind: input, shape index: {}]   ;;  %s6038_s2 = inlined_call_operand.vmem [shape: f32[1024,1], index: 2, kind: input, shape index: {}]   ;;  %s6039_s3 = inlined_call_operand.vmem [shape: f32[1024,1], index: 3, kind: input, shape index: {}]   ;;  %s6040_s4 = inlined_call_operand.vmem [shape: f32[1,1024,784], index: 4, kind: input, shape index: {}]   ;;  %s6041_s5 = inlined_call_operand.vmem [shape: f32[1,1024,784], index: 5, kind: output, shape index: {}]  }
   0x1   :  { %s3719_s20 = smov 0  }
   0x2 LB: > { %s27_s21 = sadd.s32 1, %s3677_s19  ;;  %p3374_p0 = scmp.ge.s32.totalorder %s3681_s20, 1  ;;  %s3681_s20 = sphi %s3719_s20, %s15_s20   ;;  %s3677_s19 = sphi %s3717_s19, %s6164_s19   ;;  %s3673_s18 = sphi %s3715_s18, %s6163_s18  }
   0x3   : > { %p28_p1 = scmp.ge.s32.totalorder %s27_s21, 4  ;;  %p276_p2 = scmp.lt.s32.totalorder %s3681_s20, 5 }
   0x5   : > { %s6166_s21 = smov (%p28_p1, %s27_s21), 0  ;;  %p277_p3 = pnand %p3374_p0, %p276_p2 }
   0x7   : > { %280 = sbr.rel (%p277_p3) target bundleno = 553 (0x229), region = 40 }
   0xe   : > { %v473_v0 = vld [vmem:[%s6036_s0 + $0x8] sm:$0xff]  ;;  %v480_v1 = vld [vmem:[%s6036_s0 + $0x40] sm:$0xff]  ;;  %v475_v2 = vld [vmem:[%s6036_s0 + $0x18] sm:$0xff]  ;;  %v3683_v7 = vmov 0   ;;  %s3375_s22 = sshll.u32 %s3673_s18, 5  ;;  %vm2978_vm0 = vcmask 130048  }
   0xf   : > { %v3389_v3 = vpack.c.bf16 %v480_v1, %v473_v0  ;;  %v482_v4 = vld [vmem:[%s6036_s0 + $0x50] sm:$0xff]  ;;  %v472_v5 = vld [vmem:[%s6036_s0] sm:$0xff]  ;;  %v479_v6 = vld [vmem:[%s6036_s0 + $0x38] sm:$0xff]  ;;  %3656 = vset.pattern.permute.xlu0 %v3683_v7  ;;  %3657 = vset.pattern.permute.xlu1 %v3683_v7  ;;  %p3940_p4 = scmp.lt.s32.totalorder %s3375_s22, 127 }
  0x10   : > { %v3453_v8 = vpack.c.bf16 %v482_v4, %v475_v2  ;;  %v3391_v9 = vpack.c.bf16 %v479_v6, %v472_v5  ;;  %v474_v10 = vld [vmem:[%s6036_s0 + $0x10] sm:$0xff]  ;;  %v481_v11 = vld [vmem:[%s6036_s0 + $0x48] sm:$0xff]  ;;  %v487_v12 = vld [vmem:[%s6036_s0 + $0x78] sm:$0xff] }
  0x11   : > { %3390 = vmatprep.subr.bf16.mxu0 %v3389_v3  ;;  %v3455_v13 = vpack.c.bf16 %v481_v11, %v474_v10  ;;  %v494_v14 = vld [vmem:[%s6036_s0 + $0xb0] sm:$0xff]  ;;  %v489_v15 = vld [vmem:[%s6036_s0 + $0x88] sm:$0xff]  ;;  %v496_v16 = vld [vmem:[%s6036_s0 + $0xc0] sm:$0xff]  ;;  %s6168_s22 = smov (!%p3940_p4, %s3375_s22), 127 }
  0x12   : > { %3454 = vmatprep.subr.bf16.mxu1 %v3453_v8  ;;  %3392 = vmatpush1.bf16.msra.mxu0 %v3391_v9  ;;  %v3393_v17 = vpack.c.bf16 %v494_v14, %v487_v12  ;;  %v3457_v18 = vpack.c.bf16 %v496_v16, %v489_v15  ;;  %v486_v19 = vld [vmem:[%s6036_s0 + $0x70] sm:$0xff]  ;;  %v493_v20 = vld [vmem:[%s6036_s0 + $0xa8] sm:$0xff]  ;;  %v488_v21 = vld [vmem:[%s6036_s0 + $0x80] sm:$0xff]  ;;  %s3388_s24 = sshll.u32 %s6168_s22, 4  ;;  %s3379_s6 = sshll.u32 %s6168_s22, 3 }
  0x13   : > { %3456 = vmatpush1.bf16.msra.mxu1 %v3455_v13  ;;  %v3395_v22 = vpack.c.bf16 %v493_v20, %v486_v19  ;;  %v495_v23 = vld [vmem:[%s6036_s0 + $0xb8] sm:$0xff]  ;;  %v501_v24 = vld [vmem:[%s6036_s0 + $0xe8] sm:$0xff]  ;;  %v508_v25 = vld [vmem:[%s6036_s0 + $0x120] sm:$0xff]  ;;  %s4024_s17 = scalar_lea.vmem %s6037_s1, %s3388_s24  ;;  %s4090_s25 = scalar_lea.vmem %s6038_s2, %s3379_s6 }
  0x14   : > { %3394 = vmatprep.subr.bf16.mxu0 %v3393_v17  ;;  %3458 = vmatprep.subr.bf16.mxu1 %v3457_v18  ;;  %v3459_v26 = vpack.c.bf16 %v495_v23, %v488_v21  ;;  %v3397_v27 = vpack.c.bf16 %v508_v25, %v501_v24  ;;  %v503_v28 = vld [vmem:[%s6036_s0 + $0xf8] sm:$0xff]  ;;  %v510_v29 = vld [vmem:[%s6036_s0 + $0x130] sm:$0xff]  ;;  %v500_v30 = vld [vmem:[%s6036_s0 + $0xe0] sm:$0xff]  ;;  %s4572_s14 = scalar_lea.vmem %s6039_s3, %s3379_s6 }
  0x15   : > { %v3461_v31 = vpack.c.bf16 %v510_v29, %v503_v28  ;;  %v507_v32 = vld [vmem:[%s6036_s0 + $0x118] sm:$0xff]  ;;  %v502_v33 = vld [vmem:[%s6036_s0 + $0xf0] sm:$0xff]  ;;  %v509_v34 = vld [vmem:[%s6036_s0 + $0x128] sm:$0xff] }
  0x16   : > { %3396 = vmatpush1.bf16.msra.mxu0 %v3395_v22  ;;  %v3399_v35 = vpack.c.bf16 %v507_v32, %v500_v30  ;;  %v515_v36 = vld [vmem:[%s6036_s0 + $0x158] sm:$0xff]  ;;  %v522_v37 = vld [vmem:[%s6036_s0 + $0x190] sm:$0xff]  ;;  %v517_v38 = vld [vmem:[%s6036_s0 + $0x168] sm:$0xff]  ;;  %v3463_v39 = vpack.c.bf16 %v509_v34, %v502_v33 }
  0x17   : > { %3460 = vmatpush1.bf16.msra.mxu1 %v3459_v26  ;;  %3398 = vmatprep.subr.bf16.mxu0 %v3397_v27  ;;  %v3401_v40 = vpack.c.bf16 %v522_v37, %v515_v36  ;;  %v524_v41 = vld [vmem:[%s6036_s0 + $0x1a0] sm:$0xff]  ;;  %v514_v42 = vld [vmem:[%s6036_s0 + $0x150] sm:$0xff]  ;;  %v521_v43 = vld [vmem:[%s6036_s0 + $0x188] sm:$0xff] }
  0x18   : > { %3462 = vmatprep.subr.bf16.mxu1 %v3461_v31  ;;  %v3465_v44 = vpack.c.bf16 %v524_v41, %v517_v38  ;;  %v516_v45 = vld [vmem:[%s6036_s0 + $0x160] sm:$0xff]  ;;  %v523_v46 = vld [vmem:[%s6036_s0 + $0x198] sm:$0xff]  ;;  %v529_v47 = vld [vmem:[%s6036_s0 + $0x1c8] sm:$0xff]  ;;  %v3403_v51 = vpack.c.bf16 %v521_v43, %v514_v42 }
  0x19   : > { %v536_v48 = vld [vmem:[%s6036_s0 + $0x200] sm:$0xff]  ;;  %v531_v49 = vld [vmem:[%s6036_s0 + $0x1d8] sm:$0xff]  ;;  %v538_v50 = vld [vmem:[%s6036_s0 + $0x210] sm:$0xff]  ;;  %v3467_v52 = vpack.c.bf16 %v523_v46, %v516_v45 }
  0x1a   : > { %3400 = vmatpush1.bf16.msra.mxu0 %v3399_v35  ;;  %v3405_v53 = vpack.c.bf16 %v536_v48, %v529_v47  ;;  %v528_v54 = vld [vmem:[%s6036_s0 + $0x1c0] sm:$0xff]  ;;  %v535_v55 = vld [vmem:[%s6036_s0 + $0x1f8] sm:$0xff]  ;;  %v530_v56 = vld [vmem:[%s6036_s0 + $0x1d0] sm:$0xff]  ;;  %v3469_v57 = vpack.c.bf16 %v538_v50, %v531_v49 }
  0x1b   : > { %3464 = vmatpush1.bf16.msra.mxu1 %v3463_v39  ;;  %3402 = vmatprep.subr.bf16.mxu0 %v3401_v40  ;;  %v537_v58 = vld [vmem:[%s6036_s0 + $0x208] sm:$0xff]  ;;  %v543_v59 = vld [vmem:[%s6036_s0 + $0x238] sm:$0xff]  ;;  %v550_v60 = vld [vmem:[%s6036_s0 + $0x270] sm:$0xff]  ;;  %v3407_v63 = vpack.c.bf16 %v535_v55, %v528_v54 }
  0x1c   : > { %3466 = vmatprep.subr.bf16.mxu1 %v3465_v44  ;;  %v545_v61 = vld [vmem:[%s6036_s0 + $0x248] sm:$0xff]  ;;  %v552_v62 = vld [vmem:[%s6036_s0 + $0x280] sm:$0xff]  ;;  %v3471_v0 = vpack.c.bf16 %v537_v58, %v530_v56  ;;  %v3409_v1 = vpack.c.bf16 %v550_v60, %v543_v59  ;;  %v542_v2 = vld [vmem:[%s6036_s0 + $0x230] sm:$0xff] }
  0x1d   : > { %v549_v3 = vld [vmem:[%s6036_s0 + $0x268] sm:$0xff]  ;;  %v544_v4 = vld [vmem:[%s6036_s0 + $0x240] sm:$0xff]  ;;  %v3473_v5 = vpack.c.bf16 %v552_v62, %v545_v61  ;;  %v551_v6 = vld [vmem:[%s6036_s0 + $0x278] sm:$0xff] }
  0x1e   : > { %3404 = vmatpush1.bf16.msra.mxu0 %v3403_v51  ;;  %v557_v7 = vld [vmem:[%s6036_s0 + $0x2a8] sm:$0xff]  ;;  %v564_v8 = vld [vmem:[%s6036_s0 + $0x2e0] sm:$0xff]  ;;  %v559_v9 = vld [vmem:[%s6036_s0 + $0x2b8] sm:$0xff]  ;;  %v3411_v11 = vpack.c.bf16 %v549_v3, %v542_v2  ;;  %v3475_v12 = vpack.c.bf16 %v551_v6, %v544_v4 }
  0x1f   : > { %3468 = vmatpush1.bf16.msra.mxu1 %v3467_v52  ;;  %3406 = vmatprep.subr.bf16.mxu0 %v3405_v53  ;;  %v566_v10 = vld [vmem:[%s6036_s0 + $0x2f0] sm:$0xff]  ;;  %v3413_v13 = vpack.c.bf16 %v564_v8, %v557_v7  ;;  %v556_v14 = vld [vmem:[%s6036_s0 + $0x2a0] sm:$0xff]  ;;  %v563_v15 = vld [vmem:[%s6036_s0 + $0x2d8] sm:$0xff] }
  0x20   : > { %3470 = vmatprep.subr.bf16.mxu1 %v3469_v57  ;;  %v558_v16 = vld [vmem:[%s6036_s0 + $0x2b0] sm:$0xff]  ;;  %v3477_v17 = vpack.c.bf16 %v566_v10, %v559_v9  ;;  %v565_v18 = vld [vmem:[%s6036_s0 + $0x2e8] sm:$0xff]  ;;  %v571_v19 = vld [vmem:[%s6036_s0 + $0x318] sm:$0xff]  ;;  %v3415_v23 = vpack.c.bf16 %v563_v15, %v556_v14 }
  0x21   : > { %v578_v20 = vld [vmem:[%s6036_s0 + $0x350] sm:$0xff]  ;;  %v573_v21 = vld [vmem:[%s6036_s0 + $0x328] sm:$0xff]  ;;  %v580_v22 = vld [vmem:[%s6036_s0 + $0x360] sm:$0xff]  ;;  %v3479_v24 = vpack.c.bf16 %v565_v18, %v558_v16 }
  0x22   : > { %3408 = vmatpush1.bf16.msra.mxu0 %v3407_v63  ;;  %v3417_v25 = vpack.c.bf16 %v578_v20, %v571_v19  ;;  %v570_v26 = vld [vmem:[%s6036_s0 + $0x310] sm:$0xff]  ;;  %v577_v27 = vld [vmem:[%s6036_s0 + $0x348] sm:$0xff]  ;;  %v572_v28 = vld [vmem:[%s6036_s0 + $0x320] sm:$0xff]  ;;  %v3481_v29 = vpack.c.bf16 %v580_v22, %v573_v21 }
  0x23   : > { %3472 = vmatpush1.bf16.msra.mxu1 %v3471_v0  ;;  %3410 = vmatprep.subr.bf16.mxu0 %v3409_v1  ;;  %v579_v30 = vld [vmem:[%s6036_s0 + $0x358] sm:$0xff]  ;;  %v585_v31 = vld [vmem:[%s6036_s0 + $0x388] sm:$0xff]  ;;  %v592_v32 = vld [vmem:[%s6036_s0 + $0x3c0] sm:$0xff]  ;;  %v3419_v35 = vpack.c.bf16 %v577_v27, %v570_v26 }
  0x24   : > { %3474 = vmatprep.subr.bf16.mxu1 %v3473_v5  ;;  %v587_v33 = vld [vmem:[%s6036_s0 + $0x398] sm:$0xff]  ;;  %v594_v34 = vld [vmem:[%s6036_s0 + $0x3d0] sm:$0xff]  ;;  %v3483_v36 = vpack.c.bf16 %v579_v30, %v572_v28  ;;  %v3421_v37 = vpack.c.bf16 %v592_v32, %v585_v31  ;;  %v584_v38 = vld [vmem:[%s6036_s0 + $0x380] sm:$0xff] }
  0x25   : > { %v591_v39 = vld [vmem:[%s6036_s0 + $0x3b8] sm:$0xff]  ;;  %v586_v40 = vld [vmem:[%s6036_s0 + $0x390] sm:$0xff]  ;;  %v3485_v41 = vpack.c.bf16 %v594_v34, %v587_v33  ;;  %v593_v42 = vld [vmem:[%s6036_s0 + $0x3c8] sm:$0xff] }
  0x26   : > { %3412 = vmatpush1.bf16.msra.mxu0 %v3411_v11  ;;  %v599_v43 = vld [vmem:[%s6036_s0 + $0x3f8] sm:$0xff]  ;;  %v606_v44 = vld [vmem:[%s6036_s0 + $0x430] sm:$0xff]  ;;  %v601_v45 = vld [vmem:[%s6036_s0 + $0x408] sm:$0xff]  ;;  %v3423_v47 = vpack.c.bf16 %v591_v39, %v584_v38  ;;  %v3487_v48 = vpack.c.bf16 %v593_v42, %v586_v40 }
  0x27   : > { %3476 = vmatpush1.bf16.msra.mxu1 %v3475_v12  ;;  %3414 = vmatprep.subr.bf16.mxu0 %v3413_v13  ;;  %v608_v46 = vld [vmem:[%s6036_s0 + $0x440] sm:$0xff]  ;;  %v3425_v49 = vpack.c.bf16 %v606_v44, %v599_v43  ;;  %v598_v50 = vld [vmem:[%s6036_s0 + $0x3f0] sm:$0xff]  ;;  %v605_v51 = vld [vmem:[%s6036_s0 + $0x428] sm:$0xff] }
  0x28   : > { %3478 = vmatprep.subr.bf16.mxu1 %v3477_v17  ;;  %v600_v52 = vld [vmem:[%s6036_s0 + $0x400] sm:$0xff]  ;;  %v3489_v53 = vpack.c.bf16 %v608_v46, %v601_v45  ;;  %v607_v54 = vld [vmem:[%s6036_s0 + $0x438] sm:$0xff]  ;;  %v613_v55 = vld [vmem:[%s6036_s0 + $0x468] sm:$0xff]  ;;  %v3427_v59 = vpack.c.bf16 %v605_v51, %v598_v50 }
  0x29   : > { %v620_v56 = vld [vmem:[%s6036_s0 + $0x4a0] sm:$0xff]  ;;  %v615_v57 = vld [vmem:[%s6036_s0 + $0x478] sm:$0xff]  ;;  %v622_v58 = vld [vmem:[%s6036_s0 + $0x4b0] sm:$0xff]  ;;  %v3491_v60 = vpack.c.bf16 %v607_v54, %v600_v52 }
  0x2a   : > { %3416 = vmatpush1.bf16.msra.mxu0 %v3415_v23  ;;  %v3429_v61 = vpack.c.bf16 %v620_v56, %v613_v55  ;;  %v612_v62 = vld [vmem:[%s6036_s0 + $0x460] sm:$0xff]  ;;  %v619_v63 = vld [vmem:[%s6036_s0 + $0x498] sm:$0xff]  ;;  %v614_v0 = vld [vmem:[%s6036_s0 + $0x470] sm:$0xff]  ;;  %v3493_v1 = vpack.c.bf16 %v622_v58, %v615_v57 }
  0x2b   : > { %3480 = vmatpush1.bf16.msra.mxu1 %v3479_v24  ;;  %3418 = vmatprep.subr.bf16.mxu0 %v3417_v25  ;;  %v621_v2 = vld [vmem:[%s6036_s0 + $0x4a8] sm:$0xff]  ;;  %v627_v3 = vld [vmem:[%s6036_s0 + $0x4d8] sm:$0xff]  ;;  %v634_v4 = vld [vmem:[%s6036_s0 + $0x510] sm:$0xff]  ;;  %v3431_v7 = vpack.c.bf16 %v619_v63, %v612_v62 }
  0x2c   : > { %3482 = vmatprep.subr.bf16.mxu1 %v3481_v29  ;;  %v629_v5 = vld [vmem:[%s6036_s0 + $0x4e8] sm:$0xff]  ;;  %v636_v6 = vld [vmem:[%s6036_s0 + $0x520] sm:$0xff]  ;;  %v626_v8 = vld [vmem:[%s6036_s0 + $0x4d0] sm:$0xff]  ;;  %v3495_v9 = vpack.c.bf16 %v621_v2, %v614_v0  ;;  %v3433_v10 = vpack.c.bf16 %v634_v4, %v627_v3 }
  0x2d   : > { %v633_v11 = vld [vmem:[%s6036_s0 + $0x508] sm:$0xff]  ;;  %v628_v12 = vld [vmem:[%s6036_s0 + $0x4e0] sm:$0xff]  ;;  %v635_v13 = vld [vmem:[%s6036_s0 + $0x518] sm:$0xff]  ;;  %v3497_v14 = vpack.c.bf16 %v636_v6, %v629_v5 }
  0x2e   : > { %3420 = vmatpush1.bf16.msra.mxu0 %v3419_v35  ;;  %v641_v15 = vld [vmem:[%s6036_s0 + $0x548] sm:$0xff]  ;;  %v648_v16 = vld [vmem:[%s6036_s0 + $0x580] sm:$0xff]  ;;  %v643_v18 = vld [vmem:[%s6036_s0 + $0x558] sm:$0xff]  ;;  %v3435_v20 = vpack.c.bf16 %v633_v11, %v626_v8  ;;  %v3499_v21 = vpack.c.bf16 %v635_v13, %v628_v12 }
  0x2f   : > { %3484 = vmatpush1.bf16.msra.mxu1 %v3483_v36  ;;  %3422 = vmatprep.subr.bf16.mxu0 %v3421_v37  ;;  %v409_v17 = vld [vmem:[%s4024_s17 + $0x8] sm:$0xff]  ;;  %v650_v19 = vld [vmem:[%s6036_s0 + $0x590] sm:$0xff]  ;;  %v3437_v22 = vpack.c.bf16 %v648_v16, %v641_v15  ;;  %v640_v23 = vld [vmem:[%s6036_s0 + $0x540] sm:$0xff] }
  0x30   : > { %3486 = vmatprep.subr.bf16.mxu1 %v3485_v41  ;;  %760 = vmatprep.mubr.f32.mxu0 %v409_v17  ;;  %v647_v24 = vld [vmem:[%s6036_s0 + $0x578] sm:$0xff]  ;;  %v642_v25 = vld [vmem:[%s6036_s0 + $0x550] sm:$0xff]  ;;  %v3501_v26 = vpack.c.bf16 %v650_v19, %v643_v18  ;;  %v649_v27 = vld [vmem:[%s6036_s0 + $0x588] sm:$0xff] }
  0x31   : > { %1017 = vmatprep.mubr.f32.mxu1 %v409_v17  ;;  %v655_v28 = vld [vmem:[%s6036_s0 + $0x5b8] sm:$0xff]  ;;  %v662_v29 = vld [vmem:[%s6036_s0 + $0x5f0] sm:$0xff]  ;;  %v657_v30 = vld [vmem:[%s6036_s0 + $0x5c8] sm:$0xff]  ;;  %v3439_v32 = vpack.c.bf16 %v647_v24, %v640_v23  ;;  %v3503_v33 = vpack.c.bf16 %v649_v27, %v642_v25 }
  0x32   : > { %3424 = vmatpush1.bf16.msra.mxu0 %v3423_v47  ;;  %v664_v31 = vld [vmem:[%s6036_s0 + $0x600] sm:$0xff]  ;;  %v3441_v34 = vpack.c.bf16 %v662_v29, %v655_v28  ;;  %v654_v35 = vld [vmem:[%s6036_s0 + $0x5b0] sm:$0xff]  ;;  %v661_v36 = vld [vmem:[%s6036_s0 + $0x5e8] sm:$0xff] }
  0x33   : > { %3488 = vmatpush1.bf16.msra.mxu1 %v3487_v48  ;;  %3426 = vmatprep.subr.bf16.mxu0 %v3425_v49  ;;  %v656_v37 = vld [vmem:[%s6036_s0 + $0x5c0] sm:$0xff]  ;;  %v3505_v38 = vpack.c.bf16 %v664_v31, %v657_v30  ;;  %v663_v39 = vld [vmem:[%s6036_s0 + $0x5f8] sm:$0xff]  ;;  %v669_v40 = vld [vmem:[%s6036_s0 + $0x628] sm:$0xff]  ;;  %v3443_v44 = vpack.c.bf16 %v661_v36, %v654_v35 }
  0x34   : > { %3490 = vmatprep.subr.bf16.mxu1 %v3489_v53  ;;  %v676_v41 = vld [vmem:[%s6036_s0 + $0x660] sm:$0xff]  ;;  %v671_v42 = vld [vmem:[%s6036_s0 + $0x638] sm:$0xff]  ;;  %v678_v43 = vld [vmem:[%s6036_s0 + $0x670] sm:$0xff]  ;;  %v3507_v46 = vpack.c.bf16 %v663_v39, %v656_v37 }
  0x35   : > { %v1692_v45 = vld [vmem:[%s4090_s25] sm:$0xff]  ;;  %v3445_v47 = vpack.c.bf16 %v676_v41, %v669_v40  ;;  %v675_v49 = vld [vmem:[%s6036_s0 + $0x658] sm:$0xff]  ;;  %v670_v50 = vld [vmem:[%s6036_s0 + $0x630] sm:$0xff]  ;;  %v3509_v51 = vpack.c.bf16 %v678_v43, %v671_v42 }
  0x36   : > { %3428 = vmatpush1.bf16.msra.mxu0 %v3427_v59  ;;  %v668_v48 = vld [vmem:[%s6036_s0 + $0x620] sm:$0xff]  ;;  %v677_v52 = vld [vmem:[%s6036_s0 + $0x668] sm:$0xff]  ;;  %v683_v53 = vld [vmem:[%s6036_s0 + $0x698] sm:$0xff]  ;;  %1726 = vperm.xlu0 %3656, %v1692_v45  }
  0x37   : > { %3492 = vmatpush1.bf16.msra.mxu1 %v3491_v60  ;;  %3430 = vmatprep.subr.bf16.mxu0 %v3429_v61  ;;  %v690_v54 = vld [vmem:[%s6036_s0 + $0x6d0] sm:$0xff]  ;;  %v685_v55 = vld [vmem:[%s6036_s0 + $0x6a8] sm:$0xff]  ;;  %v692_v56 = vld [vmem:[%s6036_s0 + $0x6e0] sm:$0xff]  ;;  %v3447_v58 = vpack.c.bf16 %v675_v49, %v668_v48  ;;  %v3511_v61 = vpack.c.bf16 %v677_v52, %v670_v50 }
  0x38   : > { %3494 = vmatprep.subr.bf16.mxu1 %v3493_v1  ;;  %v1694_v57 = vld [vmem:[%s4090_s25 + $0x10] sm:$0xff]  ;;  %v1693_v60 = vld [vmem:[%s4090_s25 + $0x8] sm:$0xff]  ;;  %v3449_v62 = vpack.c.bf16 %v690_v54, %v683_v53  ;;  %v684_v0 = vld [vmem:[%s6036_s0 + $0x6a0] sm:$0xff]  ;;  %v3513_v2 = vpack.c.bf16 %v692_v56, %v685_v55 }
  0x39   : > { %v682_v59 = vld [vmem:[%s6036_s0 + $0x690] sm:$0xff]  ;;  %1736 = vperm.xlu1 %3657, %v1694_v57   ;;  %v689_v63 = vld [vmem:[%s6036_s0 + $0x6c8] sm:$0xff]  ;;  %v1695_v1 = vld [vmem:[%s4090_s25 + $0x18] sm:$0xff] }
  0x3a   : > { %3432 = vmatpush1.bf16.msra.mxu0 %v3431_v7  ;;  %v691_v3 = vld [vmem:[%s6036_s0 + $0x6d8] sm:$0xff]  ;;  %v477_v4 = vld [vmem:[%s6036_s0 + $0x28] sm:$0xff]  ;;  %v484_v5 = vld [vmem:[%s6036_s0 + $0x60] sm:$0xff]  ;;  %1731 = vperm.xlu0 %3656, %v1693_v60   ;;  %v3451_v7 = vpack.c.bf16 %v689_v63, %v682_v59 }
  0x3b   : > { %3496 = vmatpush1.bf16.msra.mxu1 %v3495_v9  ;;  %3434 = vmatprep.subr.bf16.mxu0 %v3433_v10  ;;  %v1696_v6 = vld [vmem:[%s4090_s25 + $0x20] sm:$0xff]  ;;  %v3515_v8 = vpack.c.bf16 %v691_v3, %v684_v0  ;;  %v3517_v9 = vpack.c.bf16 %v484_v5, %v477_v4  ;;  %v483_v11 = vld [vmem:[%s6036_s0 + $0x58] sm:$0xff]  ;;  %v1697_v12 = vld [vmem:[%s4090_s25 + $0x28] sm:$0xff] }
  0x3c   : > { %3498 = vmatprep.subr.bf16.mxu1 %v3497_v14  ;;  %v476_v10 = vld [vmem:[%s6036_s0 + $0x20] sm:$0xff]  ;;  %v478_v13 = vld [vmem:[%s6036_s0 + $0x30] sm:$0xff]  ;;  %v485_v14 = vld [vmem:[%s6036_s0 + $0x68] sm:$0xff] }
  0x3d   : > { %1741 = vperm.xlu1 %3657, %v1695_v1   ;;  %v491_v15 = vld [vmem:[%s6036_s0 + $0x98] sm:$0xff]  ;;  %v498_v16 = vld [vmem:[%s6036_s0 + $0xd0] sm:$0xff]  ;;  %v4175_v18 = vld [vmem:[%s4024_s17] sm:$0xff]  ;;  %v3519_v19 = vpack.c.bf16 %v483_v11, %v476_v10 }
  0x3e   : > { %3436 = vmatpush1.bf16.msra.mxu0 %v3435_v20  ;;  %1746 = vperm.xlu0 %3656, %v1696_v6   ;;  %v1698_v17 = vld [vmem:[%s4090_s25 + $0x30] sm:$0xff]  ;;  %v3582_v20 = vpack.c.bf16 %v485_v14, %v478_v13  ;;  %v3521_v23 = vpack.c.bf16 %v498_v16, %v491_v15  ;;  %v497_v25 = vld [vmem:[%s6036_s0 + $0xc8] sm:$0xff]  ;;  %v499_v27 = vld [vmem:[%s6036_s0 + $0xd8] sm:$0xff] }
  0x3f   : > { %3500 = vmatpush1.bf16.msra.mxu1 %v3499_v21  ;;  %3438 = vmatprep.subr.bf16.mxu0 %v3437_v22  ;;  %v4178_v21 = vld [vmem:[%s4024_s17 + $0x18] sm:$0xff]  ;;  %v3684_v22 = vmov 0.0|0.0   ;;  %v490_v24 = vld [vmem:[%s6036_s0 + $0x90] sm:$0xff]  ;;  %v505_v28 = vld [vmem:[%s6036_s0 + $0x108] sm:$0xff] }
  0x40   : > { %3502 = vmatprep.subr.bf16.mxu1 %v3501_v26  ;;  %v492_v26 = vld [vmem:[%s6036_s0 + $0xa0] sm:$0xff]  ;;  %v4202_v30 = vld [vmem:[%s4024_s17 + $0x10] sm:$0xff]  ;;  %v4206_v31 = vld [vmem:[%s4024_s17 + $0x28] sm:$0xff] }
  0x41   : > { %1751 = vperm.xlu1 %3657, %v1697_v12   ;;  %v512_v29 = vld [vmem:[%s6036_s0 + $0x140] sm:$0xff]  ;;  %v511_v36 = vld [vmem:[%s6036_s0 + $0x138] sm:$0xff]  ;;  %v506_v37 = vld [vmem:[%s6036_s0 + $0x110] sm:$0xff] }
  0x42   : > { %3440 = vmatpush1.bf16.msra.mxu0 %v3439_v32  ;;  %1756 = vperm.xlu0 %3656, %v1698_v17   ;;  %v3523_v32 = vpack.c.bf16 %v497_v25, %v490_v24  ;;  %v504_v35 = vld [vmem:[%s6036_s0 + $0x100] sm:$0xff]  ;;  %v519_v39 = vld [vmem:[%s6036_s0 + $0x178] sm:$0xff]  ;;  %v526_v40 = vld [vmem:[%s6036_s0 + $0x1b0] sm:$0xff] }
  0x43   : > { %3504 = vmatpush1.bf16.msra.mxu1 %v3503_v33  ;;  %3442 = vmatprep.subr.bf16.mxu0 %v3441_v34  ;;  %v3585_v33 = vpack.c.bf16 %v499_v27, %v492_v26  ;;  %v3525_v34 = vpack.c.bf16 %v512_v29, %v505_v28  ;;  %v4232_v41 = vld [vmem:[%s4024_s17 + $0x20] sm:$0xff]  ;;  %v4236_v42 = vld [vmem:[%s4024_s17 + $0x38] sm:$0xff]  ;;  %v3527_v43 = vpack.c.bf16 %v511_v36, %v504_v35  ;;  %v533_v50 = vld [vmem:[%s6036_s0 + $0x1e8] sm:$0xff] }
  0x44   : > { %3506 = vmatprep.subr.bf16.mxu1 %v3505_v38  ;;  %v513_v38 = vld [vmem:[%s6036_s0 + $0x148] sm:$0xff]  ;;  %v3529_v45 = vpack.c.bf16 %v526_v40, %v519_v39  ;;  %v520_v48 = vld [vmem:[%s6036_s0 + $0x180] sm:$0xff]  ;;  %v527_v49 = vld [vmem:[%s6036_s0 + $0x1b8] sm:$0xff] }
  0x45   : > { %v4261_v52 = vld [vmem:[%s4024_s17 + $0x30] sm:$0xff]  ;;  %v4265_v53 = vld [vmem:[%s4024_s17 + $0x48] sm:$0xff]  ;;  %v3591_v55 = vpack.c.bf16 %v527_v49, %v520_v48  ;;  %v532_v57 = vld [vmem:[%s6036_s0 + $0x1e0] sm:$0xff] }
  0x46   : > { %3444 = vmatpush1.bf16.msra.mxu0 %v3443_v44  ;;  %v3588_v44 = vpack.c.bf16 %v513_v38, %v506_v37  ;;  %v534_v59 = vld [vmem:[%s6036_s0 + $0x1f0] sm:$0xff]  ;;  %v541_v60 = vld [vmem:[%s6036_s0 + $0x228] sm:$0xff]  ;;  %v1699_v4 = vld [vmem:[%s4090_s25 + $0x38] sm:$0xff] }
  0x47   : > { %3508 = vmatpush1.bf16.msra.mxu1 %v3507_v46  ;;  %3446 = vmatprep.subr.bf16.mxu0 %v3445_v47  ;;  %v518_v46 = vld [vmem:[%s6036_s0 + $0x170] sm:$0xff]  ;;  %v525_v47 = vld [vmem:[%s6036_s0 + $0x1a8] sm:$0xff]  ;;  %v3594_v1 = vpack.c.bf16 %v541_v60, %v534_v59  ;;  %v568_v15 = vld [vmem:[%s6036_s0 + $0x300] sm:$0xff] }
  0x48   : > { %3510 = vmatprep.subr.bf16.mxu1 %v3509_v51  ;;  %v540_v51 = vld [vmem:[%s6036_s0 + $0x220] sm:$0xff]  ;;  %v3531_v54 = vpack.c.bf16 %v525_v47, %v518_v46  ;;  %v4291_v0 = vld [vmem:[%s4024_s17 + $0x50] sm:$0xff]  ;;  %v553_v6 = vld [vmem:[%s6036_s0 + $0x288] sm:$0xff]  ;;  %1761 = vperm.xlu1 %3657, %v1699_v4  }
  0x49   : > { %v3533_v56 = vpack.c.bf16 %v540_v51, %v533_v50  ;;  %v554_v3 = vld [vmem:[%s6036_s0 + $0x290] sm:$0xff]  ;;  %v4319_v10 = vld [vmem:[%s4024_s17 + $0x68] sm:$0xff]  ;;  %v4331_v16 = vld [vmem:[%s4024_s17 + $0x60] sm:$0xff] }
  0x4a   : > { %3448 = vmatpush1.bf16.msra.mxu0 %v3447_v58  ;;  %v539_v58 = vld [vmem:[%s6036_s0 + $0x218] sm:$0xff]  ;;  %v546_v5 = vld [vmem:[%s6036_s0 + $0x250] sm:$0xff]  ;;  %v561_v14 = vld [vmem:[%s6036_s0 + $0x2c8] sm:$0xff] }
  0x4b   : > { %3512 = vmatpush1.bf16.msra.mxu1 %v3511_v61  ;;  %3450 = vmatprep.subr.bf16.mxu0 %v3449_v62  ;;  %v4284_v61 = vld [vmem:[%s4024_s17 + $0x40] sm:$0xff]  ;;  %v4288_v62 = vld [vmem:[%s4024_s17 + $0x58] sm:$0xff]  ;;  %v3535_v63 = vpack.c.bf16 %v539_v58, %v532_v57  ;;  %v3539_v12 = vpack.c.bf16 %v553_v6, %v546_v5  ;;  %v4350_v26 = vld [vmem:[%s4024_s17 + $0x70] sm:$0xff] }
  0x4c   : > { %3514 = vmatprep.subr.bf16.mxu1 %v3513_v2  ;;  %v547_v2 = vld [vmem:[%s6036_s0 + $0x258] sm:$0xff]  ;;  %v560_v24 = vld [vmem:[%s6036_s0 + $0x2c0] sm:$0xff]  ;;  %v562_v27 = vld [vmem:[%s6036_s0 + $0x2d0] sm:$0xff] }
  0x4d   : > { %v3537_v11 = vpack.c.bf16 %v554_v3, %v547_v2  ;;  %v4335_v17 = vld [vmem:[%s4024_s17 + $0x78] sm:$0xff]  ;;  %v569_v28 = vld [vmem:[%s6036_s0 + $0x308] sm:$0xff]  ;;  %v582_v37 = vld [vmem:[%s6036_s0 + $0x370] sm:$0xff] }
  0x4e   : > { %3452 = vmatpush1.bf16.msra.mxu0 %v3451_v7  ;;  %v1700_v7 = vld [vmem:[%s4090_s25 + $0x40] sm:$0xff]  ;;  %v567_v25 = vld [vmem:[%s6036_s0 + $0x2f8] sm:$0xff]  ;;  %v4360_v29 = vld [vmem:[%s4024_s17 + $0x88] sm:$0xff]  ;;  %v3600_v35 = vpack.c.bf16 %v569_v28, %v562_v27 }
  0x4f   : > { %3516 = vmatpush1.bf16.msra.mxu1 %v3515_v8  ;;  %3518 = vmatprep.subr.bf16.mxu0 %v3517_v9  ;;  %v548_v8 = vld [vmem:[%s6036_s0 + $0x260] sm:$0xff]  ;;  %v555_v9 = vld [vmem:[%s6036_s0 + $0x298] sm:$0xff]  ;;  %v1705_v40 = vld [vmem:[%s4090_s25 + $0x68] sm:$0xff] }
  0x50   : > { %3581 = vmatprep.subr.bf16.mxu1 %v3684_v22  ;;  %1766 = vperm.xlu0 %3656, %v1700_v7   ;;  %v3597_v13 = vpack.c.bf16 %v555_v9, %v548_v8  ;;  %v575_v36 = vld [vmem:[%s6036_s0 + $0x338] sm:$0xff]  ;;  %v4375_v38 = vld [vmem:[%s4024_s17 + $0x80] sm:$0xff]  ;;  %v581_v46 = vld [vmem:[%s6036_s0 + $0x368] sm:$0xff] }
  0x51   : > { %761 = vmatmul.mubr.f32.vlgmr.msra.gmra.mrb[0].mxu0 %v4175_v18  ;;  %v4379_v39 = vld [vmem:[%s4024_s17 + $0x98] sm:$0xff]  ;;  %v4393_v47 = vld [vmem:[%s4024_s17 + $0x90] sm:$0xff]  ;;  %v576_v48 = vld [vmem:[%s6036_s0 + $0x340] sm:$0xff] }
  0x52   : > { %1018 = vmatmul.mubr.f32.vlgmr.msra.gmra.mrb[0].mxu1 %v4175_v18  ;;  %3520 = vmatpush1.bf16.msra.mxu0 %v3519_v19  ;;  %v1701_v19 = vld [vmem:[%s4090_s25 + $0x48] sm:$0xff]  ;;  %v583_v49 = vld [vmem:[%s6036_s0 + $0x378] sm:$0xff]  ;;  %v596_v58 = vld [vmem:[%s6036_s0 + $0x3e0] sm:$0xff] }
  0x53   : > { %3583 = vmatpush1.bf16.msra.mxu1 %v3582_v20  ;;  %766 = vmatprep.mubr.f32.mxu0 %v4178_v21  ;;  %v3541_v20 = vpack.c.bf16 %v568_v15, %v561_v14  ;;  %v4403_v50 = vld [vmem:[%s4024_s17 + $0xa8] sm:$0xff]  ;;  %v1707_v51 = vld [vmem:[%s4090_s25 + $0x78] sm:$0xff]  ;;  %v4418_v59 = vld [vmem:[%s4024_s17 + $0xa0] sm:$0xff] }
  0x54   : > { %1023 = vmatprep.mubr.f32.mxu1 %v4178_v21  ;;  %3522 = vmatprep.subr.bf16.mxu0 %v3521_v23  ;;  %v1702_v23 = vld [vmem:[%s4090_s25 + $0x50] sm:$0xff]  ;;  %v589_v57 = vld [vmem:[%s6036_s0 + $0x3a8] sm:$0xff]  ;;  %v4422_v60 = vld [vmem:[%s4024_s17 + $0xb8] sm:$0xff] }
  0x55   : > { %767 = vmatmul.mubr.f32.gmra.mrb[2].mxu0 %v4202_v30  ;;  %3584 = vmatprep.subr.bf16.mxu1 %v3684_v22  ;;  %v1710_v2 = vld [vmem:[%s4090_s25 + $0x90] sm:$0xff]  ;;  %v588_v3 = vld [vmem:[%s6036_s0 + $0x3a0] sm:$0xff]  ;;  %v595_v4 = vld [vmem:[%s6036_s0 + $0x3d8] sm:$0xff] }
  0x56   : > { %1024 = vmatmul.mubr.f32.gmra.mrb[2].mxu1 %v4202_v30  ;;  %772 = vmatprep.mubr.f32.mxu0 %v4206_v31  ;;  %v4436_v5 = vld [vmem:[%s4024_s17 + $0xb0] sm:$0xff]  ;;  %v597_v7 = vld [vmem:[%s6036_s0 + $0x3e8] sm:$0xff]  ;;  %v1711_v9 = vld [vmem:[%s4090_s25 + $0x98] sm:$0xff] }
  0x57   : > { %1029 = vmatprep.mubr.f32.mxu1 %v4206_v31  ;;  %3524 = vmatpush1.bf16.msra.mxu0 %v3523_v32  ;;  %v1703_v32 = vld [vmem:[%s4090_s25 + $0x58] sm:$0xff]  ;;  %v590_v6 = vld [vmem:[%s6036_s0 + $0x3b0] sm:$0xff]  ;;  %v4446_v8 = vld [vmem:[%s4024_s17 + $0xc8] sm:$0xff] }
  0x58   : > { %3586 = vmatpush1.bf16.msra.mxu1 %v3585_v33  ;;  %3526 = vmatprep.subr.bf16.mxu0 %v3525_v34  ;;  %v3543_v33 = vpack.c.bf16 %v567_v25, %v560_v24  ;;  %v1704_v34 = vld [vmem:[%s4090_s25 + $0x60] sm:$0xff]  ;;  %v603_v14 = vld [vmem:[%s6036_s0 + $0x418] sm:$0xff]  ;;  %v610_v15 = vld [vmem:[%s6036_s0 + $0x450] sm:$0xff] }
  0x59   : > { %773 = vmatmul.mubr.f32.gmra.mrb[4].mxu0 %v4232_v41  ;;  %3587 = vmatprep.subr.bf16.mxu1 %v3684_v22  ;;  %v3553_v24 = vpack.c.bf16 %v610_v15, %v603_v14  ;;  %v1714_v25 = vld [vmem:[%s4090_s25 + $0xb0] sm:$0xff]  ;;  %v609_v28 = vld [vmem:[%s6036_s0 + $0x448] sm:$0xff] }
  0x5a   : > { %1030 = vmatmul.mubr.f32.gmra.mrb[4].mxu1 %v4232_v41  ;;  %778 = vmatprep.mubr.f32.mxu0 %v4236_v42  ;;  %v602_v27 = vld [vmem:[%s6036_s0 + $0x410] sm:$0xff] }
  0x5b   : > { %1035 = vmatprep.mubr.f32.mxu1 %v4236_v42  ;;  %3528 = vmatpush1.bf16.msra.mxu0 %v3527_v43  ;;  %v3545_v43 = vpack.c.bf16 %v582_v37, %v575_v36  ;;  %v1715_v36 = vld [vmem:[%s4090_s25 + $0xb8] sm:$0xff]  ;;  %v3555_v37 = vpack.c.bf16 %v609_v28, %v602_v27  ;;  %v1722_v15 = vld [vmem:[%s4090_s25 + $0xf0] sm:$0xff]  ;;  %v632_v27 = vld [vmem:[%s6036_s0 + $0x500] sm:$0xff] }
  0x5c   : > { %3589 = vmatpush1.bf16.msra.mxu1 %v3588_v44  ;;  %3530 = vmatprep.subr.bf16.mxu0 %v3529_v45  ;;  %v1706_v44 = vld [vmem:[%s4090_s25 + $0x70] sm:$0xff]  ;;  %v639_v28 = vld [vmem:[%s6036_s0 + $0x538] sm:$0xff] }
  0x5d   : > { %779 = vmatmul.mubr.f32.gmra.mrb[6].mxu0 %v4261_v52  ;;  %3590 = vmatprep.subr.bf16.mxu1 %v3684_v22  ;;  %v574_v45 = vld [vmem:[%s6036_s0 + $0x330] sm:$0xff] }
  0x5e   : > { %1036 = vmatmul.mubr.f32.gmra.mrb[6].mxu1 %v4261_v52  ;;  %784 = vmatprep.mubr.f32.mxu0 %v4265_v53 }
  0x5f   : > { %1041 = vmatprep.mubr.f32.mxu1 %v4265_v53  ;;  %3532 = vmatpush1.bf16.msra.mxu0 %v3531_v54  ;;  %v3547_v54 = vpack.c.bf16 %v581_v46, %v574_v45  ;;  %v624_v45 = vld [vmem:[%s6036_s0 + $0x4c0] sm:$0xff] }
  0x60   : > { %3592 = vmatpush1.bf16.msra.mxu1 %v3591_v55  ;;  %3534 = vmatprep.subr.bf16.mxu0 %v3533_v56  ;;  %v1708_v55 = vld [vmem:[%s4090_s25 + $0x80] sm:$0xff]  ;;  %v3603_v56 = vpack.c.bf16 %v583_v49, %v576_v48  ;;  %v4508_v48 = vld [vmem:[%s4024_s17 + $0xf8] sm:$0xff]  ;;  %v1717_v49 = vld [vmem:[%s4090_s25 + $0xc8] sm:$0xff] }
  0x61   : > { %785 = vmatmul.mubr.f32.gmra.mrb[8].mxu0 %v4284_v61  ;;  %3593 = vmatprep.subr.bf16.mxu1 %v3684_v22  ;;  %v4504_v46 = vld [vmem:[%s4024_s17 + $0xe0] sm:$0xff] }
  0x62   : > { %1042 = vmatmul.mubr.f32.gmra.mrb[8].mxu1 %v4284_v61  ;;  %790 = vmatprep.mubr.f32.mxu0 %v4288_v62 }
  0x63   : > { %1047 = vmatprep.mubr.f32.mxu1 %v4288_v62  ;;  %3536 = vmatpush1.bf16.msra.mxu0 %v3535_v63  ;;  %v1709_v63 = vld [vmem:[%s4090_s25 + $0x88] sm:$0xff] }
  0x64   : > { %3595 = vmatpush1.bf16.msra.mxu1 %v3594_v1  ;;  %3538 = vmatprep.subr.bf16.mxu0 %v3537_v11  ;;  %v3549_v1 = vpack.c.bf16 %v596_v58, %v589_v57  ;;  %v3551_v11 = vpack.c.bf16 %v595_v4, %v588_v3  ;;  %v4522_v57 = vld [vmem:[%s4024_s17 + $0xf0] sm:$0xff]  ;;  %v1720_v4 = vld [vmem:[%s4090_s25 + $0xe0] sm:$0xff] }
  0x65   : > { %791 = vmatmul.mubr.f32.gmra.mrb[10].mxu0 %v4291_v0  ;;  %3596 = vmatprep.subr.bf16.mxu1 %v3684_v22  ;;  %v618_v58 = vld [vmem:[%s6036_s0 + $0x490] sm:$0xff] }
  0x66   : > { %1048 = vmatmul.mubr.f32.gmra.mrb[10].mxu1 %v4291_v0  ;;  %796 = vmatprep.mubr.f32.mxu0 %v4319_v10 }
  0x67   : > { %1053 = vmatprep.mubr.f32.mxu1 %v4319_v10  ;;  %3540 = vmatpush1.bf16.msra.mxu0 %v3539_v12  ;;  %v1712_v12 = vld [vmem:[%s4090_s25 + $0xa0] sm:$0xff] }
  0x68   : > { %3598 = vmatpush1.bf16.msra.mxu1 %v3597_v13  ;;  %1771 = vperm.xlu1 %3657, %v1701_v19   ;;  %v3606_v13 = vpack.c.bf16 %v597_v7, %v590_v6  ;;  %v4461_v19 = vld [vmem:[%s4024_s17 + $0xc0] sm:$0xff]  ;;  %v631_v7 = vld [vmem:[%s6036_s0 + $0x4f8] sm:$0xff] }
  0x69   : > { %797 = vmatmul.mubr.f32.gmra.mrb[12].mxu0 %v4331_v16  ;;  %1776 = vperm.xlu0 %3656, %v1702_v23   ;;  %v1713_v23 = vld [vmem:[%s4090_s25 + $0xa8] sm:$0xff] }
  0x6a   : > { %1054 = vmatmul.mubr.f32.gmra.mrb[12].mxu1 %v4331_v16  ;;  %802 = vmatprep.mubr.f32.mxu0 %v4335_v17 }
  0x6b   : > { %1059 = vmatprep.mubr.f32.mxu1 %v4335_v17  ;;  %3542 = vmatprep.subr.bf16.mxu0 %v3541_v20  ;;  %v4465_v20 = vld [vmem:[%s4024_s17 + $0xd8] sm:$0xff] }
  0x6c   : > { %3599 = vmatprep.subr.bf16.mxu1 %v3684_v22  ;;  %1781 = vperm.xlu1 %3657, %v1703_v32   ;;  %v4479_v32 = vld [vmem:[%s4024_s17 + $0xd0] sm:$0xff] }
  0x6d   : > { %803 = vmatmul.mubr.f32.gmra.mrb[14].mxu0 %v4350_v26  ;;  %1786 = vperm.xlu0 %3656, %v1704_v34   ;;  %v611_v34 = vld [vmem:[%s6036_s0 + $0x458] sm:$0xff] }
  0x6e   : > { %1060 = vmatmul.mubr.f32.gmra.mrb[14].mxu1 %v4350_v26  ;;  %808 = vmatprep.mubr.f32.mxu0 %v4360_v29 }
  0x6f   : > { %1065 = vmatprep.mubr.f32.mxu1 %v4360_v29  ;;  %3544 = vmatpush1.bf16.msra.mxu0 %v3543_v33  ;;  %v604_v33 = vld [vmem:[%s6036_s0 + $0x420] sm:$0xff] }
  0x70   : > { %3601 = vmatpush1.bf16.msra.mxu1 %v3600_v35  ;;  %1791 = vperm.xlu1 %3657, %v1705_v40   ;;  %v4489_v35 = vld [vmem:[%s4024_s17 + $0xe8] sm:$0xff]  ;;  %v1716_v40 = vld [vmem:[%s4090_s25 + $0xc0] sm:$0xff] }
  0x71   : > { %809 = vmatmul.mubr.f32.gmra.mrb[16].mxu0 %v4375_v38  ;;  %1796 = vperm.xlu0 %3656, %v1706_v44   ;;  %v617_v44 = vld [vmem:[%s6036_s0 + $0x488] sm:$0xff] }
  0x72   : > { %1066 = vmatmul.mubr.f32.gmra.mrb[16].mxu1 %v4375_v38  ;;  %814 = vmatprep.mubr.f32.mxu0 %v4379_v39 }
  0x73   : > { %1071 = vmatprep.mubr.f32.mxu1 %v4379_v39  ;;  %3546 = vmatprep.subr.bf16.mxu0 %v3545_v43  ;;  %v3609_v43 = vpack.c.bf16 %v611_v34, %v604_v33  ;;  %v4582_v33 = vld [vmem:[%s4024_s17 + $0x128] sm:$0xff]  ;;  %v1723_v34 = vld [vmem:[%s4090_s25 + $0xf8] sm:$0xff] }
  0x74   : > { %3602 = vmatprep.subr.bf16.mxu1 %v3684_v22  ;;  %1801 = vperm.xlu1 %3657, %v1707_v51   ;;  %v3557_v51 = vpack.c.bf16 %v624_v45, %v617_v44  ;;  %v652_v44 = vld [vmem:[%s6036_s0 + $0x5a0] sm:$0xff] }
  0x75   : > { %815 = vmatmul.mubr.f32.gmra.mrb[18].mxu0 %v4393_v47  ;;  %1806 = vperm.xlu0 %3656, %v1708_v55   ;;  %v616_v55 = vld [vmem:[%s6036_s0 + $0x480] sm:$0xff] }
  0x76   : > { %1072 = vmatmul.mubr.f32.gmra.mrb[18].mxu1 %v4393_v47  ;;  %820 = vmatprep.mubr.f32.mxu0 %v4403_v50  ;;  %v4597_v45 = vld [vmem:[%s4024_s17 + $0x120] sm:$0xff] }
  0x77   : > { %1077 = vmatprep.mubr.f32.mxu1 %v4403_v50  ;;  %3548 = vmatpush1.bf16.msra.mxu0 %v3547_v54  ;;  %v1718_v54 = vld [vmem:[%s4090_s25 + $0xd0] sm:$0xff] }
  0x78   : > { %3604 = vmatpush1.bf16.msra.mxu1 %v3603_v56  ;;  %1811 = vperm.xlu1 %3657, %v1709_v63   ;;  %v623_v56 = vld [vmem:[%s6036_s0 + $0x4b8] sm:$0xff]  ;;  %v625_v63 = vld [vmem:[%s6036_s0 + $0x4c8] sm:$0xff] }
  0x79   : > { %821 = vmatmul.mubr.f32.gmra.mrb[20].mxu0 %v4418_v59  ;;  %1816 = vperm.xlu0 %3656, %v1710_v2   ;;  %v1719_v2 = vld [vmem:[%s4090_s25 + $0xd8] sm:$0xff]  ;;  %v3559_v3 = vpack.c.bf16 %v623_v56, %v616_v55  ;;  %v3612_v6 = vpack.c.bf16 %v625_v63, %v618_v58  ;;  %v644_v55 = vld [vmem:[%s6036_s0 + $0x560] sm:$0xff]  ;;  %v2110_v58 = vld [vmem:[%s4572_s14 + $0x10] sm:$0xff] }
  0x7a   : > { %1078 = vmatmul.mubr.f32.gmra.mrb[20].mxu1 %v4418_v59  ;;  %826 = vmatprep.mubr.f32.mxu0 %v4422_v60  ;;  %v651_v56 = vld [vmem:[%s6036_s0 + $0x598] sm:$0xff]  ;;  %v646_v63 = vld [vmem:[%s6036_s0 + $0x570] sm:$0xff] }
  0x7b   : > { %1083 = vmatprep.mubr.f32.mxu1 %v4422_v60  ;;  %3550 = vmatprep.subr.bf16.mxu0 %v3549_v1  ;;  %v4532_v1 = vld [vmem:[%s4024_s17 + $0x108] sm:$0xff] }
  0x7c   : > { %3605 = vmatprep.subr.bf16.mxu1 %v3684_v22  ;;  %1821 = vperm.xlu1 %3657, %v1711_v9   ;;  %v638_v9 = vld [vmem:[%s6036_s0 + $0x530] sm:$0xff] }
  0x7d   : > { %827 = vmatmul.mubr.f32.gmra.mrb[22].mxu0 %v4436_v5  ;;  %1826 = vperm.xlu0 %3656, %v1712_v12   ;;  %v4551_v12 = vld [vmem:[%s4024_s17 + $0x118] sm:$0xff]  ;;  %v3561_v14 = vpack.c.bf16 %v638_v9, %v631_v7  ;;  %v4628_v7 = vld [vmem:[%s4024_s17 + $0x140] sm:$0xff] }
  0x7e   : > { %1084 = vmatmul.mubr.f32.gmra.mrb[22].mxu1 %v4436_v5  ;;  %832 = vmatprep.mubr.f32.mxu0 %v4446_v8 }
  0x7f   : > { %1089 = vmatprep.mubr.f32.mxu1 %v4446_v8  ;;  %3552 = vmatpush1.bf16.msra.mxu0 %v3551_v11  ;;  %v4547_v11 = vld [vmem:[%s4024_s17 + $0x100] sm:$0xff] }
  0x80   : > { %3607 = vmatpush1.bf16.msra.mxu1 %v3606_v13  ;;  %1831 = vperm.xlu1 %3657, %v1713_v23   ;;  %v1721_v13 = vld [vmem:[%s4090_s25 + $0xe8] sm:$0xff]  ;;  %v630_v23 = vld [vmem:[%s6036_s0 + $0x4f0] sm:$0xff] }
  0x81   : > { %833 = vmatmul.mubr.f32.gmra.mrb[24].mxu0 %v4461_v19  ;;  %1836 = vperm.xlu0 %3656, %v1714_v25   ;;  %v4565_v25 = vld [vmem:[%s4024_s17 + $0x110] sm:$0xff] }
  0x82   : > { %1090 = vmatmul.mubr.f32.gmra.mrb[24].mxu1 %v4461_v19  ;;  %838 = vmatprep.mubr.f32.mxu0 %v4465_v20 }
  0x83   : > { %1095 = vmatprep.mubr.f32.mxu1 %v4465_v20  ;;  %3554 = vmatprep.subr.bf16.mxu0 %v3553_v24  ;;  %v637_v24 = vld [vmem:[%s6036_s0 + $0x528] sm:$0xff] }
  0x84   : > { %3608 = vmatprep.subr.bf16.mxu1 %v3684_v22  ;;  %1841 = vperm.xlu1 %3657, %v1715_v36   ;;  %v3563_v36 = vpack.c.bf16 %v637_v24, %v630_v23  ;;  %v658_v23 = vld [vmem:[%s6036_s0 + $0x5d0] sm:$0xff]  ;;  %v665_v24 = vld [vmem:[%s6036_s0 + $0x608] sm:$0xff] }
  0x85   : > { %839 = vmatmul.mubr.f32.gmra.mrb[26].mxu0 %v4479_v32  ;;  %1846 = vperm.xlu0 %3656, %v1716_v40   ;;  %v3615_v40 = vpack.c.bf16 %v639_v28, %v632_v27  ;;  %v2112_v27 = vld [vmem:[%s4572_s14 + $0x20] sm:$0xff] }
  0x86   : > { %1096 = vmatmul.mubr.f32.gmra.mrb[26].mxu1 %v4479_v32  ;;  %844 = vmatprep.mubr.f32.mxu0 %v4489_v35  ;;  %v660_v28 = vld [vmem:[%s6036_s0 + $0x5e0] sm:$0xff] }
  0x87   : > { %1101 = vmatprep.mubr.f32.mxu1 %v4489_v35  ;;  %3556 = vmatpush1.bf16.msra.mxu0 %v3555_v37  ;;  %v2108_v37 = vld [vmem:[%s4572_s14] sm:$0xff] }
  0x88   : > { %3610 = vmatpush1.bf16.msra.mxu1 %v3609_v43  ;;  %1851 = vperm.xlu1 %3657, %v1717_v49   ;;  %v645_v43 = vld [vmem:[%s6036_s0 + $0x568] sm:$0xff]  ;;  %v4601_v49 = vld [vmem:[%s4024_s17 + $0x138] sm:$0xff] }
  0x89   : > { %845 = vmatmul.mubr.f32.gmra.mrb[28].mxu0 %v4504_v46  ;;  %1856 = vperm.xlu0 %3656, %v1718_v54   ;;  %v3565_v54 = vpack.c.bf16 %v652_v44, %v645_v43  ;;  %v673_v44 = vld [vmem:[%s6036_s0 + $0x648] sm:$0xff] }
  0x8a   : > { %1102 = vmatmul.mubr.f32.gmra.mrb[28].mxu1 %v4504_v46  ;;  %850 = vmatprep.mubr.f32.mxu0 %v4508_v48 }
  0x8b   : > { %1107 = vmatprep.mubr.f32.mxu1 %v4508_v48  ;;  %3558 = vmatprep.subr.bf16.mxu0 %v3557_v51  ;;  %v2109_v51 = vld [vmem:[%s4572_s14 + $0x8] sm:$0xff] }
  0x8c   : > { %3611 = vmatprep.subr.bf16.mxu1 %v3684_v22  ;;  %1861 = vperm.xlu1 %3657, %v1719_v2   ;;  %v653_v2 = vld [vmem:[%s6036_s0 + $0x5a8] sm:$0xff] }
  0x8d   : > { %851 = vmatmul.mubr.f32.gmra.mrb[30].mxu0 %v4522_v57  ;;  %1866 = vperm.xlu0 %3656, %v1720_v4   ;;  %v4625_v4 = vld [vmem:[%s4024_s17 + $0x148] sm:$0xff]  ;;  %v3618_v9 = vpack.c.bf16 %v653_v2, %v646_v63  ;;  %v672_v63 = vld [vmem:[%s6036_s0 + $0x640] sm:$0xff]  ;;  %v679_v2 = vld [vmem:[%s6036_s0 + $0x678] sm:$0xff] }
  0x8e   : > { %1108 = vmatmul.mubr.f32.gmra.mrb[30].mxu1 %v4522_v57  ;;  %856 = vmatprep.mubr.f32.mxu0 %v4532_v1 }
  0x8f   : > { %1113 = vmatprep.mubr.f32.mxu1 %v4532_v1  ;;  %3560 = vmatpush1.bf16.msra.mxu0 %v3559_v3  ;;  %v4621_v3 = vld [vmem:[%s4024_s17 + $0x130] sm:$0xff] }
  0x90   : > { %3613 = vmatpush1.bf16.msra.mxu1 %v3612_v6  ;;  %1871 = vperm.xlu1 %3657, %v1721_v13   ;;  %v3567_v6 = vpack.c.bf16 %v651_v56, %v644_v55  ;;  %v659_v13 = vld [vmem:[%s6036_s0 + $0x5d8] sm:$0xff]  ;;  %v4672_v55 = vld [vmem:[%s4024_s17 + $0x168] sm:$0xff] }
  0x91   : > { %857 = vmatmul.mubr.f32.gmra.mrb[32].mxu0 %v4547_v11  ;;  %1876 = vperm.xlu0 %3656, %v1722_v15   ;;  %v2111_v15 = vld [vmem:[%s4572_s14 + $0x18] sm:$0xff]  ;;  %v2113_v56 = vld [vmem:[%s4572_s14 + $0x28] sm:$0xff] }
  0x92   : > { %1114 = vmatmul.mubr.f32.gmra.mrb[32].mxu1 %v4547_v11  ;;  %862 = vmatprep.mubr.f32.mxu0 %v4551_v12 }
  0x93   : > { %1119 = vmatprep.mubr.f32.mxu1 %v4551_v12  ;;  %3562 = vmatprep.subr.bf16.mxu0 %v3561_v14  ;;  %v666_v14 = vld [vmem:[%s6036_s0 + $0x610] sm:$0xff] }
  0x94   : > { %3614 = vmatprep.subr.bf16.mxu1 %v3684_v22  ;;  %1881 = vperm.xlu1 %3657, %v1723_v34   ;;  %v667_v34 = vld [vmem:[%s6036_s0 + $0x618] sm:$0xff] }
  0x95   : > { %863 = vmatmul.mubr.f32.gmra.mrb[34].mxu0 %v4565_v25  ;;  %2142 = vperm.xlu0 %3656, %v2108_v37   ;;  %v3569_v37 = vpack.c.bf16 %v666_v14, %v659_v13  ;;  %v3621_v43 = vpack.c.bf16 %v667_v34, %v660_v28  ;;  %v681_v13 = vld [vmem:[%s6036_s0 + $0x688] sm:$0xff]  ;;  %v4693_v14 = vld [vmem:[%s4024_s17 + $0x160] sm:$0xff]  ;;  %v687_v28 = vld [vmem:[%s6036_s0 + $0x6b8] sm:$0xff] }
  0x96   : > { %1120 = vmatmul.mubr.f32.gmra.mrb[34].mxu1 %v4565_v25  ;;  %868 = vmatprep.mubr.f32.mxu0 %v4582_v33  ;;  %v694_v34 = vld [vmem:[%s6036_s0 + $0x6f0] sm:$0xff] }
  0x97   : > { %1125 = vmatprep.mubr.f32.mxu1 %v4582_v33  ;;  %3564 = vmatpush1.bf16.msra.mxu0 %v3563_v36  ;;  %v4656_v36 = vld [vmem:[%s4024_s17 + $0x158] sm:$0xff] }
  0x98   : > { %3616 = vmatpush1.bf16.msra.mxu1 %v3615_v40  ;;  %2147 = vperm.xlu1 %3657, %v2109_v51   ;;  %v3571_v40 = vpack.c.bf16 %v665_v24, %v658_v23  ;;  %v680_v51 = vld [vmem:[%s6036_s0 + $0x680] sm:$0xff]  ;;  %v3575_v23 = vpack.c.bf16 %v679_v2, %v672_v63  ;;  %v4700_v24 = vld [vmem:[%s4024_s17 + $0x170] sm:$0xff]  ;;  %v3577_v63 = vpack.c.bf16 %v694_v34, %v687_v28  ;;  %v4751_v34 = vld [vmem:[%s4024_s17 + $0x1a8] sm:$0xff] }
  0x99   : > { %869 = vmatmul.mubr.f32.gmra.mrb[36].mxu0 %v4597_v45  ;;  %2152 = vperm.xlu0 %3656, %v2110_v58   ;;  %v3573_v58 = vpack.c.bf16 %v680_v51, %v673_v44  ;;  %v2116_v44 = vld [vmem:[%s4572_s14 + $0x40] sm:$0xff]  ;;  %v4747_v28 = vld [vmem:[%s4024_s17 + $0x190] sm:$0xff] }
  0x9a   : > { %1126 = vmatmul.mubr.f32.gmra.mrb[36].mxu1 %v4597_v45  ;;  %874 = vmatprep.mubr.f32.mxu0 %v4601_v49  ;;  %v688_v51 = vld [vmem:[%s6036_s0 + $0x6c0] sm:$0xff] }
  0x9b   : > { %1131 = vmatprep.mubr.f32.mxu1 %v4601_v49  ;;  %3566 = vmatprep.subr.bf16.mxu0 %v3565_v54  ;;  %v4668_v54 = vld [vmem:[%s4024_s17 + $0x150] sm:$0xff] }
  0x9c   : > { %3617 = vmatprep.subr.bf16.mxu1 %v3684_v22  ;;  %3568 = vmatpush1.bf16.msra.mxu0 %v3567_v6  ;;  %v2114_v6 = vld [vmem:[%s4572_s14 + $0x30] sm:$0xff] }
  0x9d   : > { %875 = vmatmul.mubr.f32.gmra.mrb[38].mxu0 %v4621_v3  ;;  %3619 = vmatpush1.bf16.msra.mxu1 %v3618_v9  ;;  %v674_v9 = vld [vmem:[%s6036_s0 + $0x650] sm:$0xff] }
  0x9e   : > { %1132 = vmatmul.mubr.f32.gmra.mrb[38].mxu1 %v4621_v3  ;;  %880 = vmatprep.mubr.f32.mxu0 %v4625_v4 }
  0x9f   : > { %1137 = vmatprep.mubr.f32.mxu1 %v4625_v4  ;;  %2157 = vperm.xlu1 %3657, %v2111_v15   ;;  %v4697_v15 = vld [vmem:[%s4024_s17 + $0x178] sm:$0xff] }
  0xa0   : > { %2162 = vperm.xlu0 %3656, %v2112_v27   ;;  %3570 = vmatprep.subr.bf16.mxu0 %v3569_v37  ;;  %v3624_v27 = vpack.c.bf16 %v681_v13, %v674_v9  ;;  %v2115_v37 = vld [vmem:[%s4572_s14 + $0x38] sm:$0xff]  ;;  %v4734_v9 = vld [vmem:[%s4024_s17 + $0x180] sm:$0xff] }
  0xa1   : > { %881 = vmatmul.mubr.f32.gmra.mrb[40].mxu0 %v4628_v7  ;;  %3620 = vmatprep.subr.bf16.mxu1 %v3684_v22  ;;  %v4738_v13 = vld [vmem:[%s4024_s17 + $0x198] sm:$0xff] }
  0xa2   : > { %1138 = vmatmul.mubr.f32.gmra.mrb[40].mxu1 %v4628_v7  ;;  %886 = vmatprep.mubr.f32.mxu0 %v4656_v36 }
  0xa3   : > { %1143 = vmatprep.mubr.f32.mxu1 %v4656_v36  ;;  %3572 = vmatpush1.bf16.msra.mxu0 %v3571_v40  ;;  %v686_v40 = vld [vmem:[%s6036_s0 + $0x6b0] sm:$0xff] }
  0xa4   : > { %3622 = vmatpush1.bf16.msra.mxu1 %v3621_v43  ;;  %2167 = vperm.xlu1 %3657, %v2113_v56   ;;  %v693_v43 = vld [vmem:[%s6036_s0 + $0x6e8] sm:$0xff]  ;;  %v695_v56 = vld [vmem:[%s6036_s0 + $0x6f8] sm:$0xff] }
  0xa5   : > { %887 = vmatmul.mubr.f32.gmra.mrb[42].mxu0 %v4668_v54  ;;  %2172 = vperm.xlu0 %3656, %v2114_v6   ;;  %v3579_v2 = vpack.c.bf16 %v693_v43, %v686_v40  ;;  %v3627_v6 = vpack.c.bf16 %v695_v56, %v688_v51  ;;  %v4759_v40 = vld [vmem:[%s4024_s17 + $0x1a0] sm:$0xff]  ;;  %v4763_v43 = vld [vmem:[%s4024_s17 + $0x1b8] sm:$0xff]  ;;  %v2122_v51 = vld [vmem:[%s4572_s14 + $0x70] sm:$0xff] }
  0xa6   : > { %1144 = vmatmul.mubr.f32.gmra.mrb[42].mxu1 %v4668_v54  ;;  %892 = vmatprep.mubr.f32.mxu0 %v4672_v55  ;;  %v4771_v56 = vld [vmem:[%s4024_s17 + $0x1b0] sm:$0xff] }
  0xa7   : > { %1149 = vmatprep.mubr.f32.mxu1 %v4672_v55  ;;  %3574 = vmatprep.subr.bf16.mxu0 %v3573_v58  ;;  %v4728_v58 = vld [vmem:[%s4024_s17 + $0x188] sm:$0xff] }
  0xa8   : > { %3623 = vmatprep.subr.bf16.mxu1 %v3684_v22  ;;  %3576 = vmatpush1.bf16.msra.mxu0 %v3575_v23  ;;  %v2117_v23 = vld [vmem:[%s4572_s14 + $0x48] sm:$0xff] }
  0xa9   : > { %893 = vmatmul.mubr.f32.gmra.mrb[44].mxu0 %v4693_v14  ;;  %3625 = vmatpush1.bf16.msra.mxu1 %v3624_v27  ;;  %v2118_v27 = vld [vmem:[%s4572_s14 + $0x50] sm:$0xff] }
  0xaa   : > { %1150 = vmatmul.mubr.f32.gmra.mrb[44].mxu1 %v4693_v14  ;;  %898 = vmatprep.mubr.f32.mxu0 %v4697_v15 }
  0xab   : > { %1155 = vmatprep.mubr.f32.mxu1 %v4697_v15  ;;  %2177 = vperm.xlu1 %3657, %v2115_v37   ;;  %v2120_v37 = vld [vmem:[%s4572_s14 + $0x60] sm:$0xff] }
  0xac   : > { %2182 = vperm.xlu0 %3656, %v2116_v44   ;;  %3578 = vmatprep.subr.bf16.mxu0 %v3577_v63  ;;  %v2121_v44 = vld [vmem:[%s4572_s14 + $0x68] sm:$0xff] }
  0xad   : > { %899 = vmatmul.mubr.f32.gmra.mrb[46].mxu0 %v4700_v24  ;;  %3626 = vmatprep.subr.bf16.mxu1 %v3684_v22  ;;  %v2119_v22 = vld [vmem:[%s4572_s14 + $0x58] sm:$0xff]  ;;  %v4775_v63 = vld [vmem:[%s4024_s17 + $0x1c8] sm:$0xff] }
  0xae   : > { %1156 = vmatmul.mubr.f32.gmra.mrb[46].mxu1 %v4700_v24  ;;  %904 = vmatprep.mubr.f32.mxu0 %v4728_v58  ;;  %6103 = vst [vmem:[#allocation2_spill] sm:$0xff] %v4775_v63 }
  0xaf   : > { %1161 = vmatprep.mubr.f32.mxu1 %v4728_v58  ;;  %3580 = vmatpush1.bf16.msra.mxu0 %v3579_v2  ;;  %v2123_v2 = vld [vmem:[%s4572_s14 + $0x78] sm:$0xff] }
  0xb0   : > { %3628 = vmatpush1.bf16.msra.mxu1 %v3627_v6  ;;  %2187 = vperm.xlu1 %3657, %v2117_v23   ;;  %v2124_v6 = vld [vmem:[%s4572_s14 + $0x80] sm:$0xff] }
  0xb1   : > { %905 = vmatmul.mubr.f32.gmra.mrb[48].mxu0 %v4734_v9  ;;  %2192 = vperm.xlu0 %3656, %v2118_v27   ;;  %v4783_v23 = vld [vmem:[%s4024_s17 + $0x1c0] sm:$0xff]  ;;  %v4787_v27 = vld [vmem:[%s4024_s17 + $0x1d8] sm:$0xff] }
  0xb2   : > { %1162 = vmatmul.mubr.f32.gmra.mrb[48].mxu1 %v4734_v9  ;;  %910 = vmatprep.mubr.f32.mxu0 %v4738_v13  ;;  %6104 = vst [vmem:[#allocation3_spill] sm:$0xff] %v4783_v23  ;;  %6105 = vst [vmem:[#allocation4_spill] sm:$0xff] %v4787_v27 }
  0xb3   : > { %1167 = vmatprep.mubr.f32.mxu1 %v4738_v13 }
  0xb4   : > { %2197 = vperm.xlu1 %3657, %v2119_v22   ;;  %v2125_v22 = vld [vmem:[%s4572_s14 + $0x88] sm:$0xff] }
  0xb5   : > { %911 = vmatmul.mubr.f32.gmra.mrb[50].mxu0 %v4747_v28  ;;  %2202 = vperm.xlu0 %3656, %v2120_v37   ;;  %v2126_v37 = vld [vmem:[%s4572_s14 + $0x90] sm:$0xff] }
  0xb6   : > { %1168 = vmatmul.mubr.f32.gmra.mrb[50].mxu1 %v4747_v28  ;;  %916 = vmatprep.mubr.f32.mxu0 %v4751_v34 }
  0xb7   : > { %1173 = vmatprep.mubr.f32.mxu1 %v4751_v34 }
  0xb8   : > { %2207 = vperm.xlu1 %3657, %v2121_v44   ;;  %v4795_v44 = vld [vmem:[%s4024_s17 + $0x1d0] sm:$0xff] }
  0xb9   : > { %917 = vmatmul.mubr.f32.gmra.mrb[52].mxu0 %v4759_v40  ;;  %2212 = vperm.xlu0 %3656, %v2122_v51   ;;  %6106 = vst [vmem:[#allocation5_spill] sm:$0xff] %v4795_v44  ;;  %v4799_v51 = vld [vmem:[%s4024_s17 + $0x1e8] sm:$0xff] }
  0xba   : > { %1174 = vmatmul.mubr.f32.gmra.mrb[52].mxu1 %v4759_v40  ;;  %922 = vmatprep.mubr.f32.mxu0 %v4763_v43  ;;  %6107 = vst [vmem:[#allocation6_spill] sm:$0xff] %v4799_v51 }
  0xbb   : > { %1179 = vmatprep.mubr.f32.mxu1 %v4763_v43 }
  0xbc   : > { %2217 = vperm.xlu1 %3657, %v2123_v2   ;;  %v2127_v2 = vld [vmem:[%s4572_s14 + $0x98] sm:$0xff] }
  0xbd   : > { %923 = vmatmul.mubr.f32.gmra.mrb[54].mxu0 %v4771_v56  ;;  %2222 = vperm.xlu0 %3656, %v2124_v6   ;;  %v2128_v6 = vld [vmem:[%s4572_s14 + $0xa0] sm:$0xff] }
  0xbe   : > { %1180 = vmatmul.mubr.f32.gmra.mrb[54].mxu1 %v4771_v56  ;;  %928 = vmatprep.mubr.f32.mxu0 %v4775_v63 }
  0xbf   : > { %1185 = vmatprep.mubr.f32.mxu1 %v4775_v63  ;;  %v2133_v63 = vld [vmem:[%s4572_s14 + $0xc8] sm:$0xff] }
  0xc0   : > { %2227 = vperm.xlu1 %3657, %v2125_v22   ;;  %v2129_v22 = vld [vmem:[%s4572_s14 + $0xa8] sm:$0xff] }
  0xc1   : > { %929 = vmatmul.mubr.f32.gmra.mrb[56].mxu0 %v4783_v23  ;;  %2232 = vperm.xlu0 %3656, %v2126_v37   ;;  %v2130_v37 = vld [vmem:[%s4572_s14 + $0xb0] sm:$0xff] }
  0xc2   : > { %1186 = vmatmul.mubr.f32.gmra.mrb[56].mxu1 %v4783_v23  ;;  %934 = vmatprep.mubr.f32.mxu0 %v4787_v27  ;;  %v4807_v23 = vld [vmem:[%s4024_s17 + $0x1e0] sm:$0xff] }
  0xc3   : > { %1191 = vmatprep.mubr.f32.mxu1 %v4787_v27  ;;  %6108 = vst [vmem:[#allocation7_spill] sm:$0xff] %v4807_v23  ;;  %v4811_v27 = vld [vmem:[%s4024_s17 + $0x1f8] sm:$0xff] }
  0xc4   : > { %2237 = vperm.xlu1 %3657, %v2127_v2   ;;  %v4824_v2 = vpop.permute.xlu0 %1726 }
  0xc5   : > { %935 = vmatmul.mubr.f32.gmra.mrb[58].mxu0 %v4795_v44  ;;  %2242 = vperm.xlu0 %3656, %v2128_v6   ;;  %6110 = vst [vmem:[#allocation9_spill] sm:$0xff] %v4824_v2  ;;  %v2132_v6 = vld [vmem:[%s4572_s14 + $0xc0] sm:$0xff] }
  0xc6   : > { %1192 = vmatmul.mubr.f32.gmra.mrb[58].mxu1 %v4795_v44  ;;  %940 = vmatprep.mubr.f32.mxu0 %v4799_v51  ;;  %v4819_v44 = vld [vmem:[%s4024_s17 + $0x1f0] sm:$0xff] }
  0xc7   : > { %1197 = vmatprep.mubr.f32.mxu1 %v4799_v51  ;;  %6109 = vst [vmem:[#allocation8_spill] sm:$0xff] %v4819_v44  ;;  %v2131_v51 = vld [vmem:[%s4572_s14 + $0xb8] sm:$0xff] }
  0xc8   : > { %2247 = vperm.xlu1 %3657, %v2129_v22   ;;  %v2134_v22 = vld [vmem:[%s4572_s14 + $0xd0] sm:$0xff] }
  0xc9   : > { %941 = vmatmul.mubr.f32.gmra.mrb[60].mxu0 %v4807_v23  ;;  %2252 = vperm.xlu0 %3656, %v2130_v37   ;;  %v4834_v37 = vpop.permute.xlu1 %1736 }
  0xca   : > { %1198 = vmatmul.mubr.f32.gmra.mrb[60].mxu1 %v4807_v23  ;;  %946 = vmatprep.mubr.f32.mxu0 %v4811_v27  ;;  %v3658_v23 = vld [vmem:[%s4024_s17 + $0x8] sm:$0xff]  ;;  %s3629_s17 = smul.u32 56, %s6168_s22 }
  0xcb   : > { %1203 = vmatprep.mubr.f32.mxu1 %v4811_v27 }
  0xcc   : > { %2257 = vperm.xlu1 %3657, %v2131_v51   ;;  %v2136_v51 = vld [vmem:[%s4572_s14 + $0xe0] sm:$0xff]  ;;  %s4986_s10 = scalar_lea.vmem %s6040_s4, %s3629_s17  ;;  %s5005_s12 = scalar_lea.vmem %s6041_s5, %s3629_s17 }
  0xcd   : > { %947 = vmatmul.mubr.f32.gmra.mrb[62].mxu0 %v4819_v44  ;;  %2262 = vperm.xlu0 %3656, %v2132_v6   ;;  %v2138_v6 = vld [vmem:[%s4572_s14 + $0xf0] sm:$0xff] }
  0xce   : > { %1204 = vmatmul.mubr.f32.gmra.mrb[62].mxu1 %v4819_v44  ;;  %1274 = vmatprep.mubr.f32.mxu0 %v3658_v23  ;;  %v4837_v44 = vpop.permute.xlu0 %1731 }
  0xcf   : > { %1531 = vmatprep.mubr.f32.mxu1 %v3658_v23  ;;  %v2135_v23 = vld [vmem:[%s4572_s14 + $0xd8] sm:$0xff] }
  0xd0   : > { %2267 = vperm.xlu1 %3657, %v2133_v63  }
  0xd1   : > { %1275 = vmatmul.mubr.f32.vlgmr.msra.gmra.mrb[64].mxu0 %v4175_v18  ;;  %2272 = vperm.xlu0 %3656, %v2134_v22  }
  0xd2   : > { %1532 = vmatmul.mubr.f32.vlgmr.msra.gmra.mrb[64].mxu1 %v4175_v18  ;;  %1280 = vmatprep.mubr.f32.mxu0 %v4178_v21  ;;  %v4845_v18 = vpop.permute.xlu1 %1741  ;;  %v4849_v63 = vpop.permute.xlu0 %1746 }
  0xd3   : > { %1536 = vmatprep.mubr.f32.mxu1 %v4178_v21  ;;  %v2137_v21 = vld [vmem:[%s4572_s14 + $0xe8] sm:$0xff] }
  0xd4   : > { %2277 = vperm.xlu1 %3657, %v2135_v23   ;;  %v2527_v23 = vld [vmem:[%s4986_s10 + $0x18] sm:$0xff] }
  0xd5   : > { %1281 = vmatmul.mubr.f32.gmra.mrb[66].mxu0 %v4202_v30  ;;  %2282 = vperm.xlu0 %3656, %v2136_v51  }
  0xd6   : > { %1537 = vmatmul.mubr.f32.gmra.mrb[66].mxu1 %v4202_v30  ;;  %1286 = vmatprep.mubr.f32.mxu0 %v4206_v31  ;;  %v2139_v30 = vld [vmem:[%s4572_s14 + $0xf8] sm:$0xff]  ;;  %v4862_v22 = vpop.permute.xlu0 %1756 }
  0xd7   : > { %1541 = vmatprep.mubr.f32.mxu1 %v4206_v31  ;;  %v4859_v31 = vpop.permute.xlu1 %1751 }
  0xd8   : > { %2287 = vperm.xlu1 %3657, %v2137_v21  }
  0xd9   : > { %1287 = vmatmul.mubr.f32.gmra.mrb[68].mxu0 %v4232_v41  ;;  %2292 = vperm.xlu0 %3656, %v2138_v6  }
  0xda   : > { %1542 = vmatmul.mubr.f32.gmra.mrb[68].mxu1 %v4232_v41  ;;  %1292 = vmatprep.mubr.f32.mxu0 %v4236_v42 }
  0xdb   : > { %1546 = vmatprep.mubr.f32.mxu1 %v4236_v42  ;;  %v4868_v41 = vpop.permute.xlu1 %1761  ;;  %v4871_v42 = vpop.permute.xlu0 %1766 }
  0xdc   : > { %2297 = vperm.xlu1 %3657, %v2139_v30  }
  0xdd   : > { %1293 = vmatmul.mubr.f32.gmra.mrb[70].mxu0 %v4261_v52 }
  0xde   : > { %1547 = vmatmul.mubr.f32.gmra.mrb[70].mxu1 %v4261_v52  ;;  %1298 = vmatprep.mubr.f32.mxu0 %v4265_v53 }
  0xdf   : > { %1551 = vmatprep.mubr.f32.mxu1 %v4265_v53 }
  0xe1   : > { %1299 = vmatmul.mubr.f32.gmra.mrb[72].mxu0 %v4284_v61 }
  0xe2   : > { %1552 = vmatmul.mubr.f32.gmra.mrb[72].mxu1 %v4284_v61  ;;  %1304 = vmatprep.mubr.f32.mxu0 %v4288_v62 }
  0xe3   : > { %1556 = vmatprep.mubr.f32.mxu1 %v4288_v62 }
  0xe5   : > { %1305 = vmatmul.mubr.f32.gmra.mrb[74].mxu0 %v4291_v0 }
  0xe6   : > { %1557 = vmatmul.mubr.f32.gmra.mrb[74].mxu1 %v4291_v0  ;;  %1310 = vmatprep.mubr.f32.mxu0 %v4319_v10 }
  0xe7   : > { %1561 = vmatprep.mubr.f32.mxu1 %v4319_v10  ;;  %v4879_v52 = vpop.permute.xlu1 %1771 }
  0xe8   : > { %v4882_v53 = vpop.permute.xlu0 %1776 }
  0xe9   : > { %1311 = vmatmul.mubr.f32.gmra.mrb[76].mxu0 %v4331_v16 }
  0xea   : > { %1562 = vmatmul.mubr.f32.gmra.mrb[76].mxu1 %v4331_v16  ;;  %1316 = vmatprep.mubr.f32.mxu0 %v4335_v17 }
  0xeb   : > { %1566 = vmatprep.mubr.f32.mxu1 %v4335_v17  ;;  %v4887_v61 = vpop.permute.xlu1 %1781 }
  0xec   : > { %v4890_v62 = vpop.permute.xlu0 %1786 }
  0xed   : > { %1317 = vmatmul.mubr.f32.gmra.mrb[78].mxu0 %v4350_v26 }
  0xee   : > { %1567 = vmatmul.mubr.f32.gmra.mrb[78].mxu1 %v4350_v26  ;;  %1322 = vmatprep.mubr.f32.mxu0 %v4360_v29 }
  0xef   : > { %1571 = vmatprep.mubr.f32.mxu1 %v4360_v29  ;;  %v4895_v0 = vpop.permute.xlu1 %1791 }
  0xf0   : > { %v4898_v10 = vpop.permute.xlu0 %1796 }
  0xf1   : > { %1323 = vmatmul.mubr.f32.gmra.mrb[80].mxu0 %v4375_v38 }
  0xf2   : > { %1572 = vmatmul.mubr.f32.gmra.mrb[80].mxu1 %v4375_v38  ;;  %1328 = vmatprep.mubr.f32.mxu0 %v4379_v39 }
  0xf3   : > { %1576 = vmatprep.mubr.f32.mxu1 %v4379_v39  ;;  %v4903_v16 = vpop.permute.xlu1 %1801 }
  0xf4   : > { %v4906_v17 = vpop.permute.xlu0 %1806 }
  0xf5   : > { %1329 = vmatmul.mubr.f32.gmra.mrb[82].mxu0 %v4393_v47 }
  0xf6   : > { %1577 = vmatmul.mubr.f32.gmra.mrb[82].mxu1 %v4393_v47  ;;  %1334 = vmatprep.mubr.f32.mxu0 %v4403_v50 }
  0xf7   : > { %1581 = vmatprep.mubr.f32.mxu1 %v4403_v50  ;;  %v4911_v26 = vpop.permute.xlu1 %1811 }
  0xf8   : > { %v4914_v29 = vpop.permute.xlu0 %1816 }
  0xf9   : > { %1335 = vmatmul.mubr.f32.gmra.mrb[84].mxu0 %v4418_v59 }
  0xfa   : > { %1582 = vmatmul.mubr.f32.gmra.mrb[84].mxu1 %v4418_v59  ;;  %1340 = vmatprep.mubr.f32.mxu0 %v4422_v60 }
  0xfb   : > { %1586 = vmatprep.mubr.f32.mxu1 %v4422_v60  ;;  %v4919_v38 = vpop.permute.xlu1 %1821 }
  0xfc   : > { %v4922_v39 = vpop.permute.xlu0 %1826 }
  0xfd   : > { %1341 = vmatmul.mubr.f32.gmra.mrb[86].mxu0 %v4436_v5 }
  0xfe   : > { %1587 = vmatmul.mubr.f32.gmra.mrb[86].mxu1 %v4436_v5  ;;  %1346 = vmatprep.mubr.f32.mxu0 %v4446_v8 }
  0xff   : > { %1591 = vmatprep.mubr.f32.mxu1 %v4446_v8  ;;  %v4928_v47 = vpop.permute.xlu1 %1831 }
 0x100   : > { %v4933_v50 = vpop.permute.xlu0 %1836 }
 0x101   : > { %1347 = vmatmul.mubr.f32.gmra.mrb[88].mxu0 %v4461_v19 }
 0x102   : > { %1592 = vmatmul.mubr.f32.gmra.mrb[88].mxu1 %v4461_v19  ;;  %1352 = vmatprep.mubr.f32.mxu0 %v4465_v20 }
 0x103   : > { %1596 = vmatprep.mubr.f32.mxu1 %v4465_v20  ;;  %v4939_v59 = vpop.permute.xlu1 %1841 }
 0x104   : > { %v4942_v60 = vpop.permute.xlu0 %1846 }
 0x105   : > { %1353 = vmatmul.mubr.f32.gmra.mrb[90].mxu0 %v4479_v32 }
 0x106   : > { %1597 = vmatmul.mubr.f32.gmra.mrb[90].mxu1 %v4479_v32  ;;  %1358 = vmatprep.mubr.f32.mxu0 %v4489_v35 }
 0x107   : > { %1601 = vmatprep.mubr.f32.mxu1 %v4489_v35  ;;  %v4948_v5 = vpop.permute.xlu1 %1851 }
 0x108   : > { %v4953_v8 = vpop.permute.xlu0 %1856 }
 0x109   : > { %1359 = vmatmul.mubr.f32.gmra.mrb[92].mxu0 %v4504_v46 }
 0x10a   : > { %1602 = vmatmul.mubr.f32.gmra.mrb[92].mxu1 %v4504_v46  ;;  %1364 = vmatprep.mubr.f32.mxu0 %v4508_v48 }
 0x10b   : > { %1606 = vmatprep.mubr.f32.mxu1 %v4508_v48  ;;  %v4959_v19 = vpop.permute.xlu1 %1861 }
 0x10c   : > { %v4962_v20 = vpop.permute.xlu0 %1866 }
 0x10d   : > { %1365 = vmatmul.mubr.f32.gmra.mrb[94].mxu0 %v4522_v57 }
 0x10e   : > { %1607 = vmatmul.mubr.f32.gmra.mrb[94].mxu1 %v4522_v57  ;;  %1370 = vmatprep.mubr.f32.mxu0 %v4532_v1 }
 0x10f   : > { %1611 = vmatprep.mubr.f32.mxu1 %v4532_v1  ;;  %v4968_v32 = vpop.permute.xlu1 %1871 }
 0x110   : > { %v4973_v35 = vpop.permute.xlu0 %1876 }
 0x111   : > { %1371 = vmatmul.mubr.f32.gmra.mrb[96].mxu0 %v4547_v11 }
 0x112   : > { %1612 = vmatmul.mubr.f32.gmra.mrb[96].mxu1 %v4547_v11  ;;  %1376 = vmatprep.mubr.f32.mxu0 %v4551_v12 }
 0x113   : > { %1616 = vmatprep.mubr.f32.mxu1 %v4551_v12  ;;  %v4980_v46 = vpop.permute.xlu1 %1881 }
 0x114   : > { %6111 = vst [vmem:[#allocation10_spill] sm:$0xff] %v4980_v46  ;;  %v4988_v57 = vpop.permute.xlu0 %2142 }
 0x115   : > { %1377 = vmatmul.mubr.f32.gmra.mrb[98].mxu0 %v4565_v25  ;;  %6112 = vst [vmem:[#allocation11_spill] sm:$0xff] %v4988_v57 }
 0x116   : > { %1617 = vmatmul.mubr.f32.gmra.mrb[98].mxu1 %v4565_v25  ;;  %1382 = vmatprep.mubr.f32.mxu0 %v4582_v33 }
 0x117   : > { %1621 = vmatprep.mubr.f32.mxu1 %v4582_v33  ;;  %v5010_v6 = vpop.permute.xlu1 %2147 }
 0x119   : > { %1383 = vmatmul.mubr.f32.gmra.mrb[100].mxu0 %v4597_v45 }
 0x11a   : > { %1622 = vmatmul.mubr.f32.gmra.mrb[100].mxu1 %v4597_v45  ;;  %1388 = vmatprep.mubr.f32.mxu0 %v4601_v49 }
 0x11b   : > { %1626 = vmatprep.mubr.f32.mxu1 %v4601_v49  ;;  %v2524_v49 = vld [vmem:[%s4986_s10] sm:$0xff] }
 0x11d   : > { %1389 = vmatmul.mubr.f32.gmra.mrb[102].mxu0 %v4621_v3 }
 0x11e   : > { %1627 = vmatmul.mubr.f32.gmra.mrb[102].mxu1 %v4621_v3  ;;  %1394 = vmatprep.mubr.f32.mxu0 %v4625_v4 }
 0x11f   : > { %1631 = vmatprep.mubr.f32.mxu1 %v4625_v4  ;;  %v2525_v4 = vld [vmem:[%s4986_s10 + $0x8] sm:$0xff] }
 0x121   : > { %1395 = vmatmul.mubr.f32.gmra.mrb[104].mxu0 %v4628_v7 }
 0x122   : > { %1632 = vmatmul.mubr.f32.gmra.mrb[104].mxu1 %v4628_v7  ;;  %1400 = vmatprep.mubr.f32.mxu0 %v4656_v36  ;;  %v2526_v7 = vld [vmem:[%s4986_s10 + $0x10] sm:$0xff] }
 0x123   : > { %1636 = vmatprep.mubr.f32.mxu1 %v4656_v36 }
 0x124   : > { %v762_v48 = vpop.f32.mrb[0].mxu0 }
 0x125   : > { %v1884_v1 = vmul.f32 %v4824_v2, %v762_v48  ;;  %v764_v11 = vpop.f32.mrb[1].mxu0  ;;  %v1019_v12 = vpop.f32.mrb[0].mxu1  ;;  %1401 = vmatmul.mubr.f32.gmra.mrb[106].mxu0 %v4668_v54 }
 0x126   : > { %v1885_v25 = vmul.f32 %v4824_v2, %v764_v11  ;;  %v1886_v33 = vmul.f32 %v4824_v2, %v1019_v12  ;;  %1637 = vmatmul.mubr.f32.gmra.mrb[106].mxu1 %v4668_v54  ;;  %v1021_v45 = vpop.f32.mrb[1].mxu1  ;;  %1406 = vmatprep.mubr.f32.mxu0 %v4672_v55 }
 0x127   : > { %v1887_v3 = vmul.f32 %v4824_v2, %v1021_v45  ;;  %v2300_v36 = vadd.f32 %v4988_v57, %v1884_v1  ;;  %1641 = vmatprep.mubr.f32.mxu1 %v4672_v55  ;;  %v2533_v2 = vld [vmem:[%s4986_s10 + $0x48] sm:$0xff] }
 0x128   : > { %v2301_v54 = vadd.f32 %v4988_v57, %v1885_v25  ;;  %v2302_v51 = vadd.f32 %v4988_v57, %v1886_v33  ;;  %v768_v21 = vpop.f32.mrb[2].mxu0 }
 0x129   : > { %v2303_v30 = vadd.f32 %v4988_v57, %v1887_v3  ;;  %v2748_v48 = vadd.f32 %v2524_v49, %v2300_v36  ;;  %v1891_v55 = vmul.f32 %v4837_v44, %v768_v21  ;;  %v770_v1 = vpop.f32.mrb[3].mxu0  ;;  %v1025_v11 = vpop.f32.mrb[2].mxu1  ;;  %1407 = vmatmul.mubr.f32.gmra.mrb[108].mxu0 %v4693_v14  ;;  %v2531_v49 = vld [vmem:[%s4986_s10 + $0x38] sm:$0xff]  ;;  %v2532_v57 = vld [vmem:[%s4986_s10 + $0x40] sm:$0xff] }
 0x12a   : > { %v2749_v12 = vadd.f32 %v2525_v4, %v2301_v54  ;;  %v2750_v25 = vadd.f32 %v2526_v7, %v2302_v51  ;;  %v1892_v33 = vmul.f32 %v4837_v44, %v770_v1  ;;  %v1893_v45 = vmul.f32 %v4837_v44, %v1025_v11  ;;  %1642 = vmatmul.mubr.f32.gmra.mrb[108].mxu1 %v4693_v14  ;;  %v1027_v3 = vpop.f32.mrb[3].mxu1  ;;  %v2534_v7 = vld [vmem:[%s4986_s10 + $0x50] sm:$0xff]  ;;  %v5031_v51 = vpop.permute.xlu0 %2152 }
 0x12b   : > { %v2751_v36 = vadd.f32 %v2527_v23, %v2303_v30  ;;  %2972 = vst [vmem:[%s5005_s12] sm:$0xff] %v2748_v48  ;;  %v1894_v21 = vmul.f32 %v4837_v44, %v1027_v3  ;;  %v2307_v4 = vadd.f32 %v5010_v6, %v1891_v55  ;;  %1412 = vmatprep.mubr.f32.mxu0 %v4697_v15  ;;  %v2538_v3 = vld [vmem:[%s4986_s10 + $0x70] sm:$0xff] }
 0x12c   : > { %1646 = vmatprep.mubr.f32.mxu1 %v4697_v15  ;;  %2973 = vst [vmem:[%s5005_s12 + $0x8] sm:$0xff] %v2749_v12  ;;  %2974 = vst [vmem:[%s5005_s12 + $0x10] sm:$0xff] %v2750_v25  ;;  %v2308_v14 = vadd.f32 %v5010_v6, %v1892_v33  ;;  %v2309_v54 = vadd.f32 %v5010_v6, %v1893_v45  ;;  %v774_v23 = vpop.f32.mrb[4].mxu0 }
 0x12d   : > { %2975 = vst [vmem:[%s5005_s12 + $0x18] sm:$0xff] %v2751_v36  ;;  %v2310_v30 = vadd.f32 %v5010_v6, %v1894_v21  ;;  %v2755_v48 = vadd.f32 %v2531_v49, %v2307_v4  ;;  %v1898_v15 = vmul.f32 %v4834_v37, %v774_v23  ;;  %v776_v55 = vpop.f32.mrb[5].mxu0  ;;  %v1031_v1 = vpop.f32.mrb[4].mxu1  ;;  %1413 = vmatmul.mubr.f32.gmra.mrb[110].mxu0 %v4700_v24  ;;  %v2539_v21 = vld [vmem:[%s4986_s10 + $0x78] sm:$0xff]  ;;  %v2540_v4 = vld [vmem:[%s4986_s10 + $0x80] sm:$0xff] }
 0x12e   : > { %v2756_v11 = vadd.f32 %v2532_v57, %v2308_v14  ;;  %v2757_v12 = vadd.f32 %v2533_v2, %v2309_v54  ;;  %v1899_v25 = vmul.f32 %v4834_v37, %v776_v55  ;;  %v1900_v33 = vmul.f32 %v4834_v37, %v1031_v1  ;;  %1647 = vmatmul.mubr.f32.gmra.mrb[110].mxu1 %v4700_v24  ;;  %v1033_v45 = vpop.f32.mrb[5].mxu1  ;;  %v2541_v2 = vld [vmem:[%s4986_s10 + $0x88] sm:$0xff]  ;;  %v5053_v54 = vpop.permute.xlu1 %2157 }
 0x12f   : > { %v2758_v49 = vadd.f32 %v2534_v7, %v2310_v30  ;;  %2980 = vst [vmem:[%s5005_s12 + $0x38] sm:$0xff] %v2755_v48  ;;  %v1901_v36 = vmul.f32 %v4834_v37, %v1033_v45  ;;  %v2314_v57 = vadd.f32 %v5031_v51, %v1898_v15  ;;  %1418 = vmatprep.mubr.f32.mxu0 %v4728_v58 }
 0x130   : > { %1651 = vmatprep.mubr.f32.mxu1 %v4728_v58  ;;  %2981 = vst [vmem:[%s5005_s12 + $0x40] sm:$0xff] %v2756_v11  ;;  %2982 = vst [vmem:[%s5005_s12 + $0x48] sm:$0xff] %v2757_v12  ;;  %v2315_v24 = vadd.f32 %v5031_v51, %v1899_v25  ;;  %v2316_v14 = vadd.f32 %v5031_v51, %v1900_v33  ;;  %v780_v7 = vpop.f32.mrb[6].mxu0  ;;  %v2545_v33 = vld [vmem:[%s4986_s10 + $0xa8] sm:$0xff] }
 0x131   : > { %2983 = vst [vmem:[%s5005_s12 + $0x50] sm:$0xff] %v2758_v49  ;;  %v2317_v23 = vadd.f32 %v5031_v51, %v1901_v36  ;;  %v2762_v30 = vadd.f32 %v2538_v3, %v2314_v57  ;;  %v1905_v58 = vmul.f32 %v4845_v18, %v780_v7  ;;  %v782_v48 = vpop.f32.mrb[7].mxu0  ;;  %v1037_v15 = vpop.f32.mrb[6].mxu1  ;;  %1419 = vmatmul.mubr.f32.gmra.mrb[112].mxu0 %v4734_v9  ;;  %v2546_v49 = vld [vmem:[%s4986_s10 + $0xb0] sm:$0xff]  ;;  %v2547_v36 = vld [vmem:[%s4986_s10 + $0xb8] sm:$0xff] }
 0x132   : > { %v2763_v55 = vadd.f32 %v2539_v21, %v2315_v24  ;;  %v2764_v1 = vadd.f32 %v2540_v4, %v2316_v14  ;;  %v1906_v11 = vmul.f32 %v4845_v18, %v782_v48  ;;  %v1907_v12 = vmul.f32 %v4845_v18, %v1037_v15  ;;  %1652 = vmatmul.mubr.f32.gmra.mrb[112].mxu1 %v4734_v9  ;;  %v1039_v25 = vpop.f32.mrb[7].mxu1  ;;  %v2548_v4 = vld [vmem:[%s4986_s10 + $0xc0] sm:$0xff]  ;;  %v5075_v24 = vpop.permute.xlu0 %2162 }
 0x133   : > { %v2765_v45 = vadd.f32 %v2541_v2, %v2317_v23  ;;  %2987 = vst [vmem:[%s5005_s12 + $0x70] sm:$0xff] %v2762_v30  ;;  %v1908_v3 = vmul.f32 %v4845_v18, %v1039_v25  ;;  %v2321_v21 = vadd.f32 %v5053_v54, %v1905_v58  ;;  %1424 = vmatprep.mubr.f32.mxu0 %v4738_v13 }
 0x134   : > { %1656 = vmatprep.mubr.f32.mxu1 %v4738_v13  ;;  %2988 = vst [vmem:[%s5005_s12 + $0x78] sm:$0xff] %v2763_v55  ;;  %2989 = vst [vmem:[%s5005_s12 + $0x80] sm:$0xff] %v2764_v1  ;;  %v2322_v9 = vadd.f32 %v5053_v54, %v1906_v11  ;;  %v2323_v57 = vadd.f32 %v5053_v54, %v1907_v12  ;;  %v786_v2 = vpop.f32.mrb[8].mxu0  ;;  %v2552_v11 = vld [vmem:[%s4986_s10 + $0xe0] sm:$0xff] }
 0x135   : > { %2990 = vst [vmem:[%s5005_s12 + $0x88] sm:$0xff] %v2765_v45  ;;  %v2324_v14 = vadd.f32 %v5053_v54, %v1908_v3  ;;  %v2769_v7 = vadd.f32 %v2545_v33, %v2321_v21  ;;  %v1912_v13 = vmul.f32 %v4849_v63, %v786_v2  ;;  %v788_v23 = vpop.f32.mrb[9].mxu0  ;;  %v1043_v30 = vpop.f32.mrb[8].mxu1  ;;  %1425 = vmatmul.mubr.f32.gmra.mrb[114].mxu0 %v4747_v28  ;;  %v2553_v33 = vld [vmem:[%s4986_s10 + $0xe8] sm:$0xff]  ;;  %v2554_v45 = vld [vmem:[%s4986_s10 + $0xf0] sm:$0xff] }
 0x136   : > { %v2770_v58 = vadd.f32 %v2546_v49, %v2322_v9  ;;  %v2771_v48 = vadd.f32 %v2547_v36, %v2323_v57  ;;  %v1913_v15 = vmul.f32 %v4849_v63, %v788_v23  ;;  %v1914_v55 = vmul.f32 %v4849_v63, %v1043_v30  ;;  %1657 = vmatmul.mubr.f32.gmra.mrb[114].mxu1 %v4747_v28  ;;  %v1045_v1 = vpop.f32.mrb[9].mxu1  ;;  %v2555_v49 = vld [vmem:[%s4986_s10 + $0xf8] sm:$0xff] }
 0x137   : > { %v2772_v12 = vadd.f32 %v2548_v4, %v2324_v14  ;;  %2994 = vst [vmem:[%s5005_s12 + $0xa8] sm:$0xff] %v2769_v7  ;;  %v1915_v25 = vmul.f32 %v4849_v63, %v1045_v1  ;;  %v2328_v3 = vadd.f32 %v5075_v24, %v1912_v13  ;;  %1430 = vmatprep.mubr.f32.mxu0 %v4751_v34  ;;  %v5097_v4 = vpop.permute.xlu1 %2167  ;;  %v2560_v1 = vld [vmem:[%s4986_s10 + $0x120] sm:$0xff] }
 0x138   : > { %1661 = vmatprep.mubr.f32.mxu1 %v4751_v34  ;;  %2995 = vst [vmem:[%s5005_s12 + $0xb0] sm:$0xff] %v2770_v58  ;;  %2996 = vst [vmem:[%s5005_s12 + $0xb8] sm:$0xff] %v2771_v48  ;;  %v2329_v28 = vadd.f32 %v5075_v24, %v1913_v15  ;;  %v2330_v36 = vadd.f32 %v5075_v24, %v1914_v55  ;;  %v792_v21 = vpop.f32.mrb[10].mxu0  ;;  %v2559_v48 = vld [vmem:[%s4986_s10 + $0x118] sm:$0xff] }
 0x139   : > { %2997 = vst [vmem:[%s5005_s12 + $0xc0] sm:$0xff] %v2772_v12  ;;  %v2331_v9 = vadd.f32 %v5075_v24, %v1915_v25  ;;  %v2776_v57 = vadd.f32 %v2552_v11, %v2328_v3  ;;  %v1919_v34 = vmul.f32 %v4859_v31, %v792_v21  ;;  %v794_v2 = vpop.f32.mrb[11].mxu0  ;;  %v1049_v14 = vpop.f32.mrb[10].mxu1  ;;  %1431 = vmatmul.mubr.f32.gmra.mrb[116].mxu0 %v4759_v40  ;;  %v2561_v11 = vld [vmem:[%s4986_s10 + $0x128] sm:$0xff]  ;;  %v2562_v25 = vld [vmem:[%s4986_s10 + $0x130] sm:$0xff] }
 0x13a   : > { %v2777_v7 = vadd.f32 %v2553_v33, %v2329_v28  ;;  %v2778_v13 = vadd.f32 %v2554_v45, %v2330_v36  ;;  %v1920_v23 = vmul.f32 %v4859_v31, %v794_v2  ;;  %v1921_v30 = vmul.f32 %v4859_v31, %v1049_v14  ;;  %1662 = vmatmul.mubr.f32.gmra.mrb[116].mxu1 %v4759_v40  ;;  %v1051_v58 = vpop.f32.mrb[11].mxu1  ;;  %v5119_v3 = vpop.permute.xlu0 %2172 }
 0x13b   : > { %v2779_v15 = vadd.f32 %v2555_v49, %v2331_v9  ;;  %3001 = vst [vmem:[%s5005_s12 + $0xe0] sm:$0xff] %v2776_v57  ;;  %v1922_v55 = vmul.f32 %v4859_v31, %v1051_v58  ;;  %v2335_v12 = vadd.f32 %v5097_v4, %v1919_v34  ;;  %1436 = vmatprep.mubr.f32.mxu0 %v4763_v43  ;;  %v2568_v58 = vld [vmem:[%s4986_s10 + $0x160] sm:$0xff] }
 0x13c   : > { %1666 = vmatprep.mubr.f32.mxu1 %v4763_v43  ;;  %3002 = vst [vmem:[%s5005_s12 + $0xe8] sm:$0xff] %v2777_v7  ;;  %3003 = vst [vmem:[%s5005_s12 + $0xf0] sm:$0xff] %v2778_v13  ;;  %v2336_v40 = vadd.f32 %v5097_v4, %v1920_v23  ;;  %v2337_v33 = vadd.f32 %v5097_v4, %v1921_v30  ;;  %v798_v45 = vpop.f32.mrb[12].mxu0  ;;  %v2566_v7 = vld [vmem:[%s4986_s10 + $0x150] sm:$0xff]  ;;  %v2567_v30 = vld [vmem:[%s4986_s10 + $0x158] sm:$0xff] }
 0x13d   : > { %3004 = vst [vmem:[%s5005_s12 + $0xf8] sm:$0xff] %v2779_v15  ;;  %v2338_v49 = vadd.f32 %v5097_v4, %v1922_v55  ;;  %v2783_v28 = vadd.f32 %v2559_v48, %v2335_v12  ;;  %v1926_v43 = vmul.f32 %v4862_v22, %v798_v45  ;;  %v800_v36 = vpop.f32.mrb[13].mxu0  ;;  %v1055_v21 = vpop.f32.mrb[12].mxu1  ;;  %1437 = vmatmul.mubr.f32.gmra.mrb[118].mxu0 %v4771_v56  ;;  %v6113_v15 = vld [vmem:[#allocation2_spill] sm:$0xff]  ;;  %v2569_v55 = vld [vmem:[%s4986_s10 + $0x168] sm:$0xff] }
 0x13e   : > { %v2784_v9 = vadd.f32 %v2560_v1, %v2336_v40  ;;  %v2785_v57 = vadd.f32 %v2561_v11, %v2337_v33  ;;  %v1927_v34 = vmul.f32 %v4862_v22, %v800_v36  ;;  %v1928_v2 = vmul.f32 %v4862_v22, %v1055_v21  ;;  %1667 = vmatmul.mubr.f32.gmra.mrb[118].mxu1 %v4771_v56  ;;  %v1057_v14 = vpop.f32.mrb[13].mxu1  ;;  %v5141_v12 = vpop.permute.xlu1 %2177 }
 0x13f   : > { %v2786_v13 = vadd.f32 %v2562_v25, %v2338_v49  ;;  %3008 = vst [vmem:[%s5005_s12 + $0x118] sm:$0xff] %v2783_v28  ;;  %v1929_v23 = vmul.f32 %v4862_v22, %v1057_v14  ;;  %v2342_v48 = vadd.f32 %v5119_v3, %v1926_v43  ;;  %1442 = vmatprep.mubr.f32.mxu0 %v6113_v15  ;;  %v6114_v28 = vld [vmem:[#allocation3_spill] sm:$0xff] }
 0x140   : > { %1671 = vmatprep.mubr.f32.mxu1 %v6113_v15  ;;  %3009 = vst [vmem:[%s5005_s12 + $0x120] sm:$0xff] %v2784_v9  ;;  %3010 = vst [vmem:[%s5005_s12 + $0x128] sm:$0xff] %v2785_v57  ;;  %v2343_v56 = vadd.f32 %v5119_v3, %v1927_v34  ;;  %v2344_v1 = vadd.f32 %v5119_v3, %v1928_v2  ;;  %v804_v11 = vpop.f32.mrb[14].mxu0  ;;  %v2573_v34 = vld [vmem:[%s4986_s10 + $0x188] sm:$0xff] }
 0x141   : > { %3011 = vst [vmem:[%s5005_s12 + $0x130] sm:$0xff] %v2786_v13  ;;  %v2345_v25 = vadd.f32 %v5119_v3, %v1929_v23  ;;  %v2790_v40 = vadd.f32 %v2566_v7, %v2342_v48  ;;  %v1933_v33 = vmul.f32 %v4868_v41, %v804_v11  ;;  %v806_v45 = vpop.f32.mrb[15].mxu0  ;;  %v1061_v49 = vpop.f32.mrb[14].mxu1  ;;  %1443 = vmatmul.mubr.f32.gmra.mrb[120].mxu0 %v6114_v28  ;;  %v2574_v7 = vld [vmem:[%s4986_s10 + $0x190] sm:$0xff]  ;;  %v2575_v13 = vld [vmem:[%s4986_s10 + $0x198] sm:$0xff] }
 0x142   : > { %v2791_v43 = vadd.f32 %v2567_v30, %v2343_v56  ;;  %v2792_v36 = vadd.f32 %v2568_v58, %v2344_v1  ;;  %v1934_v21 = vmul.f32 %v4868_v41, %v806_v45  ;;  %v1935_v9 = vmul.f32 %v4868_v41, %v1061_v49  ;;  %1672 = vmatmul.mubr.f32.gmra.mrb[120].mxu1 %v6114_v28  ;;  %v1063_v57 = vpop.f32.mrb[15].mxu1  ;;  %v6115_v30 = vld [vmem:[#allocation4_spill] sm:$0xff]  ;;  %v2576_v58 = vld [vmem:[%s4986_s10 + $0x1a0] sm:$0xff]  ;;  %v5163_v56 = vpop.permute.xlu0 %2182  ;;  %v6116_v45 = vld [vmem:[#allocation5_spill] sm:$0xff] }
 0x143   : > { %v2793_v2 = vadd.f32 %v2569_v55, %v2345_v25  ;;  %3015 = vst [vmem:[%s5005_s12 + $0x150] sm:$0xff] %v2790_v40  ;;  %v1936_v14 = vmul.f32 %v4868_v41, %v1063_v57  ;;  %v2349_v23 = vadd.f32 %v5141_v12, %v1933_v33  ;;  %1448 = vmatprep.mubr.f32.mxu0 %v6115_v30 }
 0x144   : > { %1676 = vmatprep.mubr.f32.mxu1 %v6115_v30  ;;  %3016 = vst [vmem:[%s5005_s12 + $0x158] sm:$0xff] %v2791_v43  ;;  %3017 = vst [vmem:[%s5005_s12 + $0x160] sm:$0xff] %v2792_v36  ;;  %v2350_v48 = vadd.f32 %v5141_v12, %v1934_v21  ;;  %v2351_v15 = vadd.f32 %v5141_v12, %v1935_v9  ;;  %v810_v55 = vpop.f32.mrb[16].mxu0  ;;  %v2580_v9 = vld [vmem:[%s4986_s10 + $0x1c0] sm:$0xff] }
 0x145   : > { %3018 = vst [vmem:[%s5005_s12 + $0x168] sm:$0xff] %v2793_v2  ;;  %v2352_v1 = vadd.f32 %v5141_v12, %v1936_v14  ;;  %v2797_v11 = vadd.f32 %v2573_v34, %v2349_v23  ;;  %v1940_v25 = vmul.f32 %v4871_v42, %v810_v55  ;;  %v812_v40 = vpop.f32.mrb[17].mxu0  ;;  %v1067_v33 = vpop.f32.mrb[16].mxu1  ;;  %1449 = vmatmul.mubr.f32.gmra.mrb[122].mxu0 %v6116_v45  ;;  %v2581_v2 = vld [vmem:[%s4986_s10 + $0x1c8] sm:$0xff]  ;;  %v2582_v14 = vld [vmem:[%s4986_s10 + $0x1d0] sm:$0xff]  ;;  %v6117_v23 = vld [vmem:[#allocation6_spill] sm:$0xff] }
 0x146   : > { %v2798_v49 = vadd.f32 %v2574_v7, %v2350_v48  ;;  %v2799_v28 = vadd.f32 %v2575_v13, %v2351_v15  ;;  %v1941_v43 = vmul.f32 %v4871_v42, %v812_v40  ;;  %v1942_v36 = vmul.f32 %v4871_v42, %v1067_v33  ;;  %1677 = vmatmul.mubr.f32.gmra.mrb[122].mxu1 %v6116_v45  ;;  %v1069_v21 = vpop.f32.mrb[17].mxu1  ;;  %v2583_v13 = vld [vmem:[%s4986_s10 + $0x1d8] sm:$0xff]  ;;  %v5185_v15 = vpop.permute.xlu1 %2187  ;;  %v6118_v33 = vld [vmem:[#allocation7_spill] sm:$0xff] }
 0x147   : > { %v2800_v57 = vadd.f32 %v2576_v58, %v2352_v1  ;;  %3022 = vst [vmem:[%s5005_s12 + $0x188] sm:$0xff] %v2797_v11  ;;  %v1943_v34 = vmul.f32 %v4871_v42, %v1069_v21  ;;  %v2356_v7 = vadd.f32 %v5163_v56, %v1940_v25  ;;  %1454 = vmatprep.mubr.f32.mxu0 %v6117_v23  ;;  %v2587_v21 = vld [vmem:[%s4986_s10 + $0x1f8] sm:$0xff] }
 0x148   : > { %1681 = vmatprep.mubr.f32.mxu1 %v6117_v23  ;;  %3023 = vst [vmem:[%s5005_s12 + $0x190] sm:$0xff] %v2798_v49  ;;  %3024 = vst [vmem:[%s5005_s12 + $0x198] sm:$0xff] %v2799_v28  ;;  %v2357_v30 = vadd.f32 %v5163_v56, %v1941_v43  ;;  %v2358_v48 = vadd.f32 %v5163_v56, %v1942_v36  ;;  %v816_v58 = vpop.f32.mrb[18].mxu0 }
 0x149   : > { %3025 = vst [vmem:[%s5005_s12 + $0x1a0] sm:$0xff] %v2800_v57  ;;  %v2359_v55 = vadd.f32 %v5163_v56, %v1943_v34  ;;  %v2804_v1 = vadd.f32 %v2580_v9, %v2356_v7  ;;  %v1947_v11 = vmul.f32 %v4879_v52, %v816_v58  ;;  %v818_v25 = vpop.f32.mrb[19].mxu0  ;;  %v1073_v40 = vpop.f32.mrb[18].mxu1  ;;  %1455 = vmatmul.mubr.f32.gmra.mrb[124].mxu0 %v6118_v33  ;;  %v2588_v34 = vld [vmem:[%s4986_s10 + $0x200] sm:$0xff]  ;;  %v2589_v7 = vld [vmem:[%s4986_s10 + $0x208] sm:$0xff] }
 0x14a   : > { %v2805_v45 = vadd.f32 %v2581_v2, %v2357_v30  ;;  %v2806_v49 = vadd.f32 %v2582_v14, %v2358_v48  ;;  %v1948_v28 = vmul.f32 %v4879_v52, %v818_v25  ;;  %v1949_v43 = vmul.f32 %v4879_v52, %v1073_v40  ;;  %1682 = vmatmul.mubr.f32.gmra.mrb[124].mxu1 %v6118_v33  ;;  %v1075_v36 = vpop.f32.mrb[19].mxu1  ;;  %v2590_v14 = vld [vmem:[%s4986_s10 + $0x210] sm:$0xff]  ;;  %v5207_v48 = vpop.permute.xlu0 %2192 }
 0x14b   : > { %v2807_v9 = vadd.f32 %v2583_v13, %v2359_v55  ;;  %3029 = vst [vmem:[%s5005_s12 + $0x1c0] sm:$0xff] %v2804_v1  ;;  %v1950_v57 = vmul.f32 %v4879_v52, %v1075_v36  ;;  %v2363_v2 = vadd.f32 %v5185_v15, %v1947_v11  ;;  %1460 = vmatprep.mubr.f32.mxu0 %v4811_v27  ;;  %v6119_v25 = vld [vmem:[#allocation8_spill] sm:$0xff] }
 0x14c   : > { %1686 = vmatprep.mubr.f32.mxu1 %v4811_v27  ;;  %3030 = vst [vmem:[%s5005_s12 + $0x1c8] sm:$0xff] %v2805_v45  ;;  %3031 = vst [vmem:[%s5005_s12 + $0x1d0] sm:$0xff] %v2806_v49  ;;  %v2364_v23 = vadd.f32 %v5185_v15, %v1948_v28  ;;  %v2365_v30 = vadd.f32 %v5185_v15, %v1949_v43  ;;  %v822_v13 = vpop.f32.mrb[20].mxu0  ;;  %v2594_v43 = vld [vmem:[%s4986_s10 + $0x230] sm:$0xff] }
 0x14d   : > { %3032 = vst [vmem:[%s5005_s12 + $0x1d8] sm:$0xff] %v2807_v9  ;;  %v2366_v58 = vadd.f32 %v5185_v15, %v1950_v57  ;;  %v2811_v55 = vadd.f32 %v2587_v21, %v2363_v2  ;;  %v1954_v27 = vmul.f32 %v4882_v53, %v822_v13  ;;  %v824_v1 = vpop.f32.mrb[21].mxu0  ;;  %v1079_v11 = vpop.f32.mrb[20].mxu1  ;;  %1461 = vmatmul.mubr.f32.gmra.mrb[126].mxu0 %v6119_v25  ;;  %v2595_v9 = vld [vmem:[%s4986_s10 + $0x238] sm:$0xff]  ;;  %v2596_v57 = vld [vmem:[%s4986_s10 + $0x240] sm:$0xff] }
 0x14e   : > { %v2812_v40 = vadd.f32 %v2588_v34, %v2364_v23  ;;  %v2813_v33 = vadd.f32 %v2589_v7, %v2365_v30  ;;  %v1955_v45 = vmul.f32 %v4882_v53, %v824_v1  ;;  %v1956_v49 = vmul.f32 %v4882_v53, %v1079_v11  ;;  %1687 = vmatmul.mubr.f32.gmra.mrb[126].mxu1 %v6119_v25  ;;  %v1081_v28 = vpop.f32.mrb[21].mxu1  ;;  %v2597_v34 = vld [vmem:[%s4986_s10 + $0x248] sm:$0xff]  ;;  %v5227_v13 = vpop.permute.xlu1 %2197 }
 0x14f   : > { %v2814_v36 = vadd.f32 %v2590_v14, %v2366_v58  ;;  %3036 = vst [vmem:[%s5005_s12 + $0x1f8] sm:$0xff] %v2811_v55  ;;  %v1957_v21 = vmul.f32 %v4882_v53, %v1081_v28  ;;  %v2370_v2 = vadd.f32 %v5207_v48, %v1954_v27  ;;  %6120 = vst [vmem:[#allocation2_spill] sm:$0xff] %v5227_v13 }
 0x150   : > { %3037 = vst [vmem:[%s5005_s12 + $0x200] sm:$0xff] %v2812_v40  ;;  %3038 = vst [vmem:[%s5005_s12 + $0x208] sm:$0xff] %v2813_v33  ;;  %v2371_v7 = vadd.f32 %v5207_v48, %v1955_v45  ;;  %v2372_v23 = vadd.f32 %v5207_v48, %v1956_v49  ;;  %v828_v30 = vpop.f32.mrb[22].mxu0  ;;  %v2601_v49 = vld [vmem:[%s4986_s10 + $0x268] sm:$0xff] }
 0x151   : > { %3039 = vst [vmem:[%s5005_s12 + $0x210] sm:$0xff] %v2814_v36  ;;  %v2373_v14 = vadd.f32 %v5207_v48, %v1957_v21  ;;  %v2818_v58 = vadd.f32 %v2594_v43, %v2370_v2  ;;  %v1961_v55 = vmul.f32 %v4887_v61, %v828_v30  ;;  %v830_v27 = vpop.f32.mrb[23].mxu0  ;;  %v1085_v1 = vpop.f32.mrb[22].mxu1  ;;  %v2602_v36 = vld [vmem:[%s4986_s10 + $0x270] sm:$0xff]  ;;  %v2603_v21 = vld [vmem:[%s4986_s10 + $0x278] sm:$0xff]  ;;  %v2604_v30 = vld [vmem:[%s4986_s10 + $0x280] sm:$0xff] }
 0x152   : > { %v2819_v11 = vadd.f32 %v2595_v9, %v2371_v7  ;;  %v2820_v25 = vadd.f32 %v2596_v57, %v2372_v23  ;;  %v1962_v40 = vmul.f32 %v4887_v61, %v830_v27  ;;  %v1963_v33 = vmul.f32 %v4887_v61, %v1085_v1  ;;  %v1087_v45 = vpop.f32.mrb[23].mxu1  ;;  %v5245_v23 = vpop.permute.xlu0 %2202 }
 0x153   : > { %v2821_v28 = vadd.f32 %v2597_v34, %v2373_v14  ;;  %3043 = vst [vmem:[%s5005_s12 + $0x230] sm:$0xff] %v2818_v58  ;;  %v1964_v43 = vmul.f32 %v4887_v61, %v1087_v45  ;;  %v2377_v2 = vadd.f32 %v5227_v13, %v1961_v55  ;;  %6121 = vst [vmem:[#allocation3_spill] sm:$0xff] %v5245_v23  ;;  %v2608_v45 = vld [vmem:[%s4986_s10 + $0x2a0] sm:$0xff] }
 0x154   : > { %3044 = vst [vmem:[%s5005_s12 + $0x238] sm:$0xff] %v2819_v11  ;;  %3045 = vst [vmem:[%s5005_s12 + $0x240] sm:$0xff] %v2820_v25  ;;  %v2378_v9 = vadd.f32 %v5227_v13, %v1962_v40  ;;  %v2379_v57 = vadd.f32 %v5227_v13, %v1963_v33  ;;  %v834_v7 = vpop.f32.mrb[24].mxu0 }
 0x155   : > { %3046 = vst [vmem:[%s5005_s12 + $0x248] sm:$0xff] %v2821_v28  ;;  %v2380_v34 = vadd.f32 %v5227_v13, %v1964_v43  ;;  %v2825_v14 = vadd.f32 %v2601_v49, %v2377_v2  ;;  %v1968_v58 = vmul.f32 %v4890_v62, %v834_v7  ;;  %v836_v55 = vpop.f32.mrb[25].mxu0  ;;  %v1091_v27 = vpop.f32.mrb[24].mxu1  ;;  %v2609_v43 = vld [vmem:[%s4986_s10 + $0x2a8] sm:$0xff]  ;;  %v2610_v2 = vld [vmem:[%s4986_s10 + $0x2b0] sm:$0xff]  ;;  %v2611_v13 = vld [vmem:[%s4986_s10 + $0x2b8] sm:$0xff] }
 0x156   : > { %v2826_v1 = vadd.f32 %v2602_v36, %v2378_v9  ;;  %v2827_v11 = vadd.f32 %v2603_v21, %v2379_v57  ;;  %v1969_v25 = vmul.f32 %v4890_v62, %v836_v55  ;;  %v1970_v40 = vmul.f32 %v4890_v62, %v1091_v27  ;;  %v1093_v33 = vpop.f32.mrb[25].mxu1  ;;  %v5263_v57 = vpop.permute.xlu1 %2207 }
 0x157   : > { %v2828_v28 = vadd.f32 %v2604_v30, %v2380_v34  ;;  %3050 = vst [vmem:[%s5005_s12 + $0x268] sm:$0xff] %v2825_v14  ;;  %v1971_v49 = vmul.f32 %v4890_v62, %v1093_v33  ;;  %v2384_v7 = vadd.f32 %v5245_v23, %v1968_v58  ;;  %6122 = vst [vmem:[#allocation4_spill] sm:$0xff] %v5263_v57  ;;  %v2615_v33 = vld [vmem:[%s4986_s10 + $0x2d8] sm:$0xff] }
 0x158   : > { %3051 = vst [vmem:[%s5005_s12 + $0x270] sm:$0xff] %v2826_v1  ;;  %3052 = vst [vmem:[%s5005_s12 + $0x278] sm:$0xff] %v2827_v11  ;;  %v2385_v36 = vadd.f32 %v5245_v23, %v1969_v25  ;;  %v2386_v21 = vadd.f32 %v5245_v23, %v1970_v40  ;;  %v840_v9 = vpop.f32.mrb[26].mxu0 }
 0x159   : > { %3053 = vst [vmem:[%s5005_s12 + $0x280] sm:$0xff] %v2828_v28  ;;  %v2387_v30 = vadd.f32 %v5245_v23, %v1971_v49  ;;  %v2832_v34 = vadd.f32 %v2608_v45, %v2384_v7  ;;  %v1975_v14 = vmul.f32 %v4895_v0, %v840_v9  ;;  %v842_v58 = vpop.f32.mrb[27].mxu0  ;;  %v1097_v55 = vpop.f32.mrb[26].mxu1  ;;  %v2616_v49 = vld [vmem:[%s4986_s10 + $0x2e0] sm:$0xff]  ;;  %v2617_v7 = vld [vmem:[%s4986_s10 + $0x2e8] sm:$0xff]  ;;  %v2618_v23 = vld [vmem:[%s4986_s10 + $0x2f0] sm:$0xff] }
 0x15a   : > { %v2833_v27 = vadd.f32 %v2609_v43, %v2385_v36  ;;  %v2834_v1 = vadd.f32 %v2610_v2, %v2386_v21  ;;  %v1976_v11 = vmul.f32 %v4895_v0, %v842_v58  ;;  %v1977_v25 = vmul.f32 %v4895_v0, %v1097_v55  ;;  %v1099_v40 = vpop.f32.mrb[27].mxu1  ;;  %v5281_v21 = vpop.permute.xlu0 %2212 }
 0x15b   : > { %v2835_v28 = vadd.f32 %v2611_v13, %v2387_v30  ;;  %3057 = vst [vmem:[%s5005_s12 + $0x2a0] sm:$0xff] %v2832_v34  ;;  %v1978_v45 = vmul.f32 %v4895_v0, %v1099_v40  ;;  %v2391_v9 = vadd.f32 %v5263_v57, %v1975_v14  ;;  %6123 = vst [vmem:[#allocation5_spill] sm:$0xff] %v5281_v21  ;;  %v2622_v40 = vld [vmem:[%s4986_s10 + $0x310] sm:$0xff] }
 0x15c   : > { %3058 = vst [vmem:[%s5005_s12 + $0x2a8] sm:$0xff] %v2833_v27  ;;  %3059 = vst [vmem:[%s5005_s12 + $0x2b0] sm:$0xff] %v2834_v1  ;;  %v2392_v43 = vadd.f32 %v5263_v57, %v1976_v11  ;;  %v2393_v2 = vadd.f32 %v5263_v57, %v1977_v25  ;;  %v846_v36 = vpop.f32.mrb[28].mxu0 }
 0x15d   : > { %3060 = vst [vmem:[%s5005_s12 + $0x2b8] sm:$0xff] %v2835_v28  ;;  %v2394_v13 = vadd.f32 %v5263_v57, %v1978_v45  ;;  %v2839_v30 = vadd.f32 %v2615_v33, %v2391_v9  ;;  %v1982_v34 = vmul.f32 %v4898_v10, %v846_v36  ;;  %v848_v14 = vpop.f32.mrb[29].mxu0  ;;  %v1103_v58 = vpop.f32.mrb[28].mxu1  ;;  %v2623_v45 = vld [vmem:[%s4986_s10 + $0x318] sm:$0xff]  ;;  %v2624_v9 = vld [vmem:[%s4986_s10 + $0x320] sm:$0xff]  ;;  %v2625_v57 = vld [vmem:[%s4986_s10 + $0x328] sm:$0xff] }
 0x15e   : > { %v2840_v55 = vadd.f32 %v2616_v49, %v2392_v43  ;;  %v2841_v27 = vadd.f32 %v2617_v7, %v2393_v2  ;;  %v1983_v1 = vmul.f32 %v4898_v10, %v848_v14  ;;  %v1984_v11 = vmul.f32 %v4898_v10, %v1103_v58  ;;  %v1105_v25 = vpop.f32.mrb[29].mxu1  ;;  %v5299_v2 = vpop.permute.xlu1 %2217 }
 0x15f   : > { %v2842_v28 = vadd.f32 %v2618_v23, %v2394_v13  ;;  %3064 = vst [vmem:[%s5005_s12 + $0x2d8] sm:$0xff] %v2839_v30  ;;  %v1985_v33 = vmul.f32 %v4898_v10, %v1105_v25  ;;  %v2398_v36 = vadd.f32 %v5281_v21, %v1982_v34  ;;  %6124 = vst [vmem:[#allocation6_spill] sm:$0xff] %v5299_v2  ;;  %v2629_v25 = vld [vmem:[%s4986_s10 + $0x348] sm:$0xff] }
 0x160   : > { %3065 = vst [vmem:[%s5005_s12 + $0x2e0] sm:$0xff] %v2840_v55  ;;  %3066 = vst [vmem:[%s5005_s12 + $0x2e8] sm:$0xff] %v2841_v27  ;;  %v2399_v49 = vadd.f32 %v5281_v21, %v1983_v1  ;;  %v2400_v7 = vadd.f32 %v5281_v21, %v1984_v11  ;;  %v852_v43 = vpop.f32.mrb[30].mxu0 }
 0x161   : > { %3067 = vst [vmem:[%s5005_s12 + $0x2f0] sm:$0xff] %v2842_v28  ;;  %v2401_v23 = vadd.f32 %v5281_v21, %v1985_v33  ;;  %v2846_v13 = vadd.f32 %v2622_v40, %v2398_v36  ;;  %v1989_v30 = vmul.f32 %v4903_v16, %v852_v43  ;;  %v854_v34 = vpop.f32.mrb[31].mxu0  ;;  %v1109_v14 = vpop.f32.mrb[30].mxu1  ;;  %v2630_v33 = vld [vmem:[%s4986_s10 + $0x350] sm:$0xff]  ;;  %v2631_v36 = vld [vmem:[%s4986_s10 + $0x358] sm:$0xff]  ;;  %v2632_v21 = vld [vmem:[%s4986_s10 + $0x360] sm:$0xff] }
 0x162   : > { %v2847_v58 = vadd.f32 %v2623_v45, %v2399_v49  ;;  %v2848_v55 = vadd.f32 %v2624_v9, %v2400_v7  ;;  %v1990_v27 = vmul.f32 %v4903_v16, %v854_v34  ;;  %v1991_v1 = vmul.f32 %v4903_v16, %v1109_v14  ;;  %v1111_v11 = vpop.f32.mrb[31].mxu1  ;;  %v5317_v7 = vpop.permute.xlu0 %2222 }
 0x163   : > { %v2849_v28 = vadd.f32 %v2625_v57, %v2401_v23  ;;  %3071 = vst [vmem:[%s5005_s12 + $0x310] sm:$0xff] %v2846_v13  ;;  %v1992_v40 = vmul.f32 %v4903_v16, %v1111_v11  ;;  %v2405_v43 = vadd.f32 %v5299_v2, %v1989_v30  ;;  %6125 = vst [vmem:[#allocation7_spill] sm:$0xff] %v5317_v7  ;;  %v2636_v11 = vld [vmem:[%s4986_s10 + $0x380] sm:$0xff] }
 0x164   : > { %3072 = vst [vmem:[%s5005_s12 + $0x318] sm:$0xff] %v2847_v58  ;;  %3073 = vst [vmem:[%s5005_s12 + $0x320] sm:$0xff] %v2848_v55  ;;  %v2406_v45 = vadd.f32 %v5299_v2, %v1990_v27  ;;  %v2407_v9 = vadd.f32 %v5299_v2, %v1991_v1  ;;  %v858_v49 = vpop.f32.mrb[32].mxu0 }
 0x165   : > { %3074 = vst [vmem:[%s5005_s12 + $0x328] sm:$0xff] %v2849_v28  ;;  %v2408_v57 = vadd.f32 %v5299_v2, %v1992_v40  ;;  %v2853_v23 = vadd.f32 %v2629_v25, %v2405_v43  ;;  %v1996_v13 = vmul.f32 %v4906_v17, %v858_v49  ;;  %v860_v30 = vpop.f32.mrb[33].mxu0  ;;  %v1115_v34 = vpop.f32.mrb[32].mxu1  ;;  %v2637_v40 = vld [vmem:[%s4986_s10 + $0x388] sm:$0xff]  ;;  %v2638_v43 = vld [vmem:[%s4986_s10 + $0x390] sm:$0xff]  ;;  %v2639_v2 = vld [vmem:[%s4986_s10 + $0x398] sm:$0xff] }
 0x166   : > { %v2854_v14 = vadd.f32 %v2630_v33, %v2406_v45  ;;  %v2855_v58 = vadd.f32 %v2631_v36, %v2407_v9  ;;  %v1997_v55 = vmul.f32 %v4906_v17, %v860_v30  ;;  %v1998_v27 = vmul.f32 %v4906_v17, %v1115_v34  ;;  %v1117_v1 = vpop.f32.mrb[33].mxu1  ;;  %v5335_v9 = vpop.permute.xlu1 %2227 }
 0x167   : > { %v2856_v28 = vadd.f32 %v2632_v21, %v2408_v57  ;;  %3078 = vst [vmem:[%s5005_s12 + $0x348] sm:$0xff] %v2853_v23  ;;  %v1999_v25 = vmul.f32 %v4906_v17, %v1117_v1  ;;  %v2412_v49 = vadd.f32 %v5317_v7, %v1996_v13  ;;  %6126 = vst [vmem:[#allocation8_spill] sm:$0xff] %v5335_v9  ;;  %v2643_v1 = vld [vmem:[%s4986_s10 + $0x3b8] sm:$0xff] }
 0x168   : > { %3079 = vst [vmem:[%s5005_s12 + $0x350] sm:$0xff] %v2854_v14  ;;  %3080 = vst [vmem:[%s5005_s12 + $0x358] sm:$0xff] %v2855_v58  ;;  %v2413_v33 = vadd.f32 %v5317_v7, %v1997_v55  ;;  %v2414_v36 = vadd.f32 %v5317_v7, %v1998_v27  ;;  %v864_v45 = vpop.f32.mrb[34].mxu0 }
 0x169   : > { %3081 = vst [vmem:[%s5005_s12 + $0x360] sm:$0xff] %v2856_v28  ;;  %v2415_v21 = vadd.f32 %v5317_v7, %v1999_v25  ;;  %v2860_v57 = vadd.f32 %v2636_v11, %v2412_v49  ;;  %v2003_v23 = vmul.f32 %v4911_v26, %v864_v45  ;;  %v866_v13 = vpop.f32.mrb[35].mxu0  ;;  %v1121_v30 = vpop.f32.mrb[34].mxu1  ;;  %v2644_v25 = vld [vmem:[%s4986_s10 + $0x3c0] sm:$0xff]  ;;  %v2645_v49 = vld [vmem:[%s4986_s10 + $0x3c8] sm:$0xff]  ;;  %v2646_v7 = vld [vmem:[%s4986_s10 + $0x3d0] sm:$0xff] }
 0x16a   : > { %v2861_v34 = vadd.f32 %v2637_v40, %v2413_v33  ;;  %v2862_v14 = vadd.f32 %v2638_v43, %v2414_v36  ;;  %v2004_v58 = vmul.f32 %v4911_v26, %v866_v13  ;;  %v2005_v55 = vmul.f32 %v4911_v26, %v1121_v30  ;;  %v1123_v27 = vpop.f32.mrb[35].mxu1  ;;  %v5353_v36 = vpop.permute.xlu0 %2232 }
 0x16b   : > { %v2863_v28 = vadd.f32 %v2639_v2, %v2415_v21  ;;  %3085 = vst [vmem:[%s5005_s12 + $0x380] sm:$0xff] %v2860_v57  ;;  %v2006_v11 = vmul.f32 %v4911_v26, %v1123_v27  ;;  %v2419_v45 = vadd.f32 %v5335_v9, %v2003_v23  ;;  %6127 = vst [vmem:[#allocation12_spill] sm:$0xff] %v5353_v36  ;;  %v2650_v27 = vld [vmem:[%s4986_s10 + $0x3f0] sm:$0xff] }
 0x16c   : > { %3086 = vst [vmem:[%s5005_s12 + $0x388] sm:$0xff] %v2861_v34  ;;  %3087 = vst [vmem:[%s5005_s12 + $0x390] sm:$0xff] %v2862_v14  ;;  %v2420_v40 = vadd.f32 %v5335_v9, %v2004_v58  ;;  %v2421_v43 = vadd.f32 %v5335_v9, %v2005_v55  ;;  %v870_v33 = vpop.f32.mrb[36].mxu0 }
 0x16d   : > { %3088 = vst [vmem:[%s5005_s12 + $0x398] sm:$0xff] %v2863_v28  ;;  %v2422_v2 = vadd.f32 %v5335_v9, %v2006_v11  ;;  %v2867_v21 = vadd.f32 %v2643_v1, %v2419_v45  ;;  %v2010_v57 = vmul.f32 %v4914_v29, %v870_v33  ;;  %v872_v23 = vpop.f32.mrb[37].mxu0  ;;  %v1127_v13 = vpop.f32.mrb[36].mxu1  ;;  %v2651_v11 = vld [vmem:[%s4986_s10 + $0x3f8] sm:$0xff]  ;;  %v2652_v45 = vld [vmem:[%s4986_s10 + $0x400] sm:$0xff]  ;;  %v2653_v9 = vld [vmem:[%s4986_s10 + $0x408] sm:$0xff] }
 0x16e   : > { %v2868_v30 = vadd.f32 %v2644_v25, %v2420_v40  ;;  %v2869_v34 = vadd.f32 %v2645_v49, %v2421_v43  ;;  %v2011_v14 = vmul.f32 %v4914_v29, %v872_v23  ;;  %v2012_v58 = vmul.f32 %v4914_v29, %v1127_v13  ;;  %v1129_v55 = vpop.f32.mrb[37].mxu1  ;;  %v5371_v43 = vpop.permute.xlu1 %2237 }
 0x16f   : > { %v2870_v28 = vadd.f32 %v2646_v7, %v2422_v2  ;;  %3092 = vst [vmem:[%s5005_s12 + $0x3b8] sm:$0xff] %v2867_v21  ;;  %v2013_v1 = vmul.f32 %v4914_v29, %v1129_v55  ;;  %v2426_v33 = vadd.f32 %v5353_v36, %v2010_v57  ;;  %6128 = vst [vmem:[#allocation13_spill] sm:$0xff] %v5371_v43  ;;  %v2657_v55 = vld [vmem:[%s4986_s10 + $0x428] sm:$0xff] }
 0x170   : > { %3093 = vst [vmem:[%s5005_s12 + $0x3c0] sm:$0xff] %v2868_v30  ;;  %3094 = vst [vmem:[%s5005_s12 + $0x3c8] sm:$0xff] %v2869_v34  ;;  %v2427_v25 = vadd.f32 %v5353_v36, %v2011_v14  ;;  %v2428_v49 = vadd.f32 %v5353_v36, %v2012_v58  ;;  %v876_v40 = vpop.f32.mrb[38].mxu0 }
 0x171   : > { %3095 = vst [vmem:[%s5005_s12 + $0x3d0] sm:$0xff] %v2870_v28  ;;  %v2429_v7 = vadd.f32 %v5353_v36, %v2013_v1  ;;  %v2874_v2 = vadd.f32 %v2650_v27, %v2426_v33  ;;  %v2017_v21 = vmul.f32 %v4919_v38, %v876_v40  ;;  %v878_v57 = vpop.f32.mrb[39].mxu0  ;;  %v1133_v23 = vpop.f32.mrb[38].mxu1  ;;  %v2658_v1 = vld [vmem:[%s4986_s10 + $0x430] sm:$0xff]  ;;  %v2659_v33 = vld [vmem:[%s4986_s10 + $0x438] sm:$0xff]  ;;  %v2660_v36 = vld [vmem:[%s4986_s10 + $0x440] sm:$0xff] }
 0x172   : > { %v2875_v13 = vadd.f32 %v2651_v11, %v2427_v25  ;;  %v2876_v30 = vadd.f32 %v2652_v45, %v2428_v49  ;;  %v2018_v34 = vmul.f32 %v4919_v38, %v878_v57  ;;  %v2019_v14 = vmul.f32 %v4919_v38, %v1133_v23  ;;  %v1135_v58 = vpop.f32.mrb[39].mxu1  ;;  %v5389_v49 = vpop.permute.xlu0 %2242 }
 0x173   : > { %v2877_v28 = vadd.f32 %v2653_v9, %v2429_v7  ;;  %3099 = vst [vmem:[%s5005_s12 + $0x3f0] sm:$0xff] %v2874_v2  ;;  %v2020_v27 = vmul.f32 %v4919_v38, %v1135_v58  ;;  %v2433_v40 = vadd.f32 %v5371_v43, %v2017_v21  ;;  %6129 = vst [vmem:[#allocation14_spill] sm:$0xff] %v5389_v49  ;;  %v2664_v58 = vld [vmem:[%s4986_s10 + $0x460] sm:$0xff] }
 0x174   : > { %3100 = vst [vmem:[%s5005_s12 + $0x3f8] sm:$0xff] %v2875_v13  ;;  %3101 = vst [vmem:[%s5005_s12 + $0x400] sm:$0xff] %v2876_v30  ;;  %v2434_v11 = vadd.f32 %v5371_v43, %v2018_v34  ;;  %v2435_v45 = vadd.f32 %v5371_v43, %v2019_v14  ;;  %v882_v25 = vpop.f32.mrb[40].mxu0 }
 0x175   : > { %3102 = vst [vmem:[%s5005_s12 + $0x408] sm:$0xff] %v2877_v28  ;;  %v2436_v9 = vadd.f32 %v5371_v43, %v2020_v27  ;;  %v2881_v7 = vadd.f32 %v2657_v55, %v2433_v40  ;;  %v2024_v2 = vmul.f32 %v4922_v39, %v882_v25  ;;  %v884_v21 = vpop.f32.mrb[41].mxu0  ;;  %v1139_v57 = vpop.f32.mrb[40].mxu1  ;;  %v2665_v27 = vld [vmem:[%s4986_s10 + $0x468] sm:$0xff]  ;;  %v2666_v40 = vld [vmem:[%s4986_s10 + $0x470] sm:$0xff]  ;;  %v2667_v43 = vld [vmem:[%s4986_s10 + $0x478] sm:$0xff] }
 0x176   : > { %v2882_v23 = vadd.f32 %v2658_v1, %v2434_v11  ;;  %v2883_v13 = vadd.f32 %v2659_v33, %v2435_v45  ;;  %v2025_v30 = vmul.f32 %v4922_v39, %v884_v21  ;;  %v2026_v34 = vmul.f32 %v4922_v39, %v1139_v57  ;;  %v1141_v14 = vpop.f32.mrb[41].mxu1  ;;  %v5407_v45 = vpop.permute.xlu1 %2247 }
 0x177   : > { %v2884_v28 = vadd.f32 %v2660_v36, %v2436_v9  ;;  %3106 = vst [vmem:[%s5005_s12 + $0x428] sm:$0xff] %v2881_v7  ;;  %v2027_v55 = vmul.f32 %v4922_v39, %v1141_v14  ;;  %v2440_v25 = vadd.f32 %v5389_v49, %v2024_v2  ;;  %6130 = vst [vmem:[#allocation15_spill] sm:$0xff] %v5407_v45  ;;  %v2671_v14 = vld [vmem:[%s4986_s10 + $0x498] sm:$0xff] }
 0x178   : > { %3107 = vst [vmem:[%s5005_s12 + $0x430] sm:$0xff] %v2882_v23  ;;  %3108 = vst [vmem:[%s5005_s12 + $0x438] sm:$0xff] %v2883_v13  ;;  %v2441_v1 = vadd.f32 %v5389_v49, %v2025_v30  ;;  %v2442_v33 = vadd.f32 %v5389_v49, %v2026_v34  ;;  %v888_v11 = vpop.f32.mrb[42].mxu0 }
 0x179   : > { %3109 = vst [vmem:[%s5005_s12 + $0x440] sm:$0xff] %v2884_v28  ;;  %v2443_v36 = vadd.f32 %v5389_v49, %v2027_v55  ;;  %v2888_v9 = vadd.f32 %v2664_v58, %v2440_v25  ;;  %v2031_v7 = vmul.f32 %v4928_v47, %v888_v11  ;;  %v890_v2 = vpop.f32.mrb[43].mxu0  ;;  %v1145_v21 = vpop.f32.mrb[42].mxu1  ;;  %v2672_v55 = vld [vmem:[%s4986_s10 + $0x4a0] sm:$0xff]  ;;  %v2673_v25 = vld [vmem:[%s4986_s10 + $0x4a8] sm:$0xff]  ;;  %v2674_v49 = vld [vmem:[%s4986_s10 + $0x4b0] sm:$0xff] }
 0x17a   : > { %v2889_v57 = vadd.f32 %v2665_v27, %v2441_v1  ;;  %v2890_v23 = vadd.f32 %v2666_v40, %v2442_v33  ;;  %v2032_v13 = vmul.f32 %v4928_v47, %v890_v2  ;;  %v2033_v30 = vmul.f32 %v4928_v47, %v1145_v21  ;;  %v1147_v34 = vpop.f32.mrb[43].mxu1  ;;  %v5425_v33 = vpop.permute.xlu0 %2252 }
 0x17b   : > { %v2891_v28 = vadd.f32 %v2667_v43, %v2443_v36  ;;  %3113 = vst [vmem:[%s5005_s12 + $0x460] sm:$0xff] %v2888_v9  ;;  %v2034_v58 = vmul.f32 %v4928_v47, %v1147_v34  ;;  %v2447_v11 = vadd.f32 %v5407_v45, %v2031_v7  ;;  %6131 = vst [vmem:[#allocation16_spill] sm:$0xff] %v5425_v33  ;;  %v2678_v34 = vld [vmem:[%s4986_s10 + $0x4d0] sm:$0xff] }
 0x17c   : > { %3114 = vst [vmem:[%s5005_s12 + $0x468] sm:$0xff] %v2889_v57  ;;  %3115 = vst [vmem:[%s5005_s12 + $0x470] sm:$0xff] %v2890_v23  ;;  %v2448_v27 = vadd.f32 %v5407_v45, %v2032_v13  ;;  %v2449_v40 = vadd.f32 %v5407_v45, %v2033_v30  ;;  %v894_v1 = vpop.f32.mrb[44].mxu0 }
 0x17d   : > { %3116 = vst [vmem:[%s5005_s12 + $0x478] sm:$0xff] %v2891_v28  ;;  %v2450_v43 = vadd.f32 %v5407_v45, %v2034_v58  ;;  %v2895_v36 = vadd.f32 %v2671_v14, %v2447_v11  ;;  %v2038_v9 = vmul.f32 %v4933_v50, %v894_v1  ;;  %v896_v7 = vpop.f32.mrb[45].mxu0  ;;  %v1151_v2 = vpop.f32.mrb[44].mxu1  ;;  %v2679_v58 = vld [vmem:[%s4986_s10 + $0x4d8] sm:$0xff]  ;;  %v2680_v11 = vld [vmem:[%s4986_s10 + $0x4e0] sm:$0xff]  ;;  %v2681_v45 = vld [vmem:[%s4986_s10 + $0x4e8] sm:$0xff] }
 0x17e   : > { %v2896_v21 = vadd.f32 %v2672_v55, %v2448_v27  ;;  %v2897_v57 = vadd.f32 %v2673_v25, %v2449_v40  ;;  %v2039_v23 = vmul.f32 %v4933_v50, %v896_v7  ;;  %v2040_v13 = vmul.f32 %v4933_v50, %v1151_v2  ;;  %v1153_v30 = vpop.f32.mrb[45].mxu1  ;;  %v5443_v40 = vpop.permute.xlu1 %2257 }
 0x17f   : > { %v2898_v28 = vadd.f32 %v2674_v49, %v2450_v43  ;;  %3120 = vst [vmem:[%s5005_s12 + $0x498] sm:$0xff] %v2895_v36  ;;  %v2041_v14 = vmul.f32 %v4933_v50, %v1153_v30  ;;  %v2454_v1 = vadd.f32 %v5425_v33, %v2038_v9  ;;  %6132 = vst [vmem:[#allocation17_spill] sm:$0xff] %v5443_v40  ;;  %v2685_v30 = vld [vmem:[%s4986_s10 + $0x508] sm:$0xff] }
 0x180   : > { %3121 = vst [vmem:[%s5005_s12 + $0x4a0] sm:$0xff] %v2896_v21  ;;  %3122 = vst [vmem:[%s5005_s12 + $0x4a8] sm:$0xff] %v2897_v57  ;;  %v2455_v55 = vadd.f32 %v5425_v33, %v2039_v23  ;;  %v2456_v25 = vadd.f32 %v5425_v33, %v2040_v13  ;;  %v900_v27 = vpop.f32.mrb[46].mxu0 }
 0x181   : > { %3123 = vst [vmem:[%s5005_s12 + $0x4b0] sm:$0xff] %v2898_v28  ;;  %v2457_v49 = vadd.f32 %v5425_v33, %v2041_v14  ;;  %v2902_v43 = vadd.f32 %v2678_v34, %v2454_v1  ;;  %v2045_v36 = vmul.f32 %v4939_v59, %v900_v27  ;;  %v902_v9 = vpop.f32.mrb[47].mxu0  ;;  %v1157_v7 = vpop.f32.mrb[46].mxu1  ;;  %v2686_v14 = vld [vmem:[%s4986_s10 + $0x510] sm:$0xff]  ;;  %v2687_v1 = vld [vmem:[%s4986_s10 + $0x518] sm:$0xff]  ;;  %v2688_v33 = vld [vmem:[%s4986_s10 + $0x520] sm:$0xff] }
 0x182   : > { %v2903_v2 = vadd.f32 %v2679_v58, %v2455_v55  ;;  %v2904_v21 = vadd.f32 %v2680_v11, %v2456_v25  ;;  %v2046_v57 = vmul.f32 %v4939_v59, %v902_v9  ;;  %v2047_v23 = vmul.f32 %v4939_v59, %v1157_v7  ;;  %v1159_v13 = vpop.f32.mrb[47].mxu1  ;;  %v5461_v25 = vpop.permute.xlu0 %2262 }
 0x183   : > { %v2905_v28 = vadd.f32 %v2681_v45, %v2457_v49  ;;  %3127 = vst [vmem:[%s5005_s12 + $0x4d0] sm:$0xff] %v2902_v43  ;;  %v2048_v34 = vmul.f32 %v4939_v59, %v1159_v13  ;;  %v2461_v27 = vadd.f32 %v5443_v40, %v2045_v36  ;;  %6133 = vst [vmem:[#allocation18_spill] sm:$0xff] %v5461_v25  ;;  %v2692_v13 = vld [vmem:[%s4986_s10 + $0x540] sm:$0xff] }
 0x184   : > { %3128 = vst [vmem:[%s5005_s12 + $0x4d8] sm:$0xff] %v2903_v2  ;;  %3129 = vst [vmem:[%s5005_s12 + $0x4e0] sm:$0xff] %v2904_v21  ;;  %v2462_v58 = vadd.f32 %v5443_v40, %v2046_v57  ;;  %v2463_v11 = vadd.f32 %v5443_v40, %v2047_v23  ;;  %v906_v55 = vpop.f32.mrb[48].mxu0 }
 0x185   : > { %3130 = vst [vmem:[%s5005_s12 + $0x4e8] sm:$0xff] %v2905_v28  ;;  %v2464_v45 = vadd.f32 %v5443_v40, %v2048_v34  ;;  %v2909_v49 = vadd.f32 %v2685_v30, %v2461_v27  ;;  %v2052_v43 = vmul.f32 %v4942_v60, %v906_v55  ;;  %v908_v36 = vpop.f32.mrb[49].mxu0  ;;  %v1163_v9 = vpop.f32.mrb[48].mxu1  ;;  %v2693_v34 = vld [vmem:[%s4986_s10 + $0x548] sm:$0xff]  ;;  %v2694_v27 = vld [vmem:[%s4986_s10 + $0x550] sm:$0xff]  ;;  %v2695_v40 = vld [vmem:[%s4986_s10 + $0x558] sm:$0xff] }
 0x186   : > { %v2910_v7 = vadd.f32 %v2686_v14, %v2462_v58  ;;  %v2911_v2 = vadd.f32 %v2687_v1, %v2463_v11  ;;  %v2053_v21 = vmul.f32 %v4942_v60, %v908_v36  ;;  %v2054_v57 = vmul.f32 %v4942_v60, %v1163_v9  ;;  %v1165_v23 = vpop.f32.mrb[49].mxu1  ;;  %v5479_v11 = vpop.permute.xlu1 %2267 }
 0x187   : > { %v2912_v28 = vadd.f32 %v2688_v33, %v2464_v45  ;;  %3134 = vst [vmem:[%s5005_s12 + $0x508] sm:$0xff] %v2909_v49  ;;  %v2055_v30 = vmul.f32 %v4942_v60, %v1165_v23  ;;  %v2468_v55 = vadd.f32 %v5461_v25, %v2052_v43  ;;  %6134 = vst [vmem:[#allocation19_spill] sm:$0xff] %v5479_v11  ;;  %v2699_v23 = vld [vmem:[%s4986_s10 + $0x578] sm:$0xff] }
 0x188   : > { %3135 = vst [vmem:[%s5005_s12 + $0x510] sm:$0xff] %v2910_v7  ;;  %3136 = vst [vmem:[%s5005_s12 + $0x518] sm:$0xff] %v2911_v2  ;;  %v2469_v14 = vadd.f32 %v5461_v25, %v2053_v21  ;;  %v2470_v1 = vadd.f32 %v5461_v25, %v2054_v57  ;;  %v912_v58 = vpop.f32.mrb[50].mxu0 }
 0x189   : > { %3137 = vst [vmem:[%s5005_s12 + $0x520] sm:$0xff] %v2912_v28  ;;  %v2471_v33 = vadd.f32 %v5461_v25, %v2055_v30  ;;  %v2916_v45 = vadd.f32 %v2692_v13, %v2468_v55  ;;  %v2059_v49 = vmul.f32 %v4948_v5, %v912_v58  ;;  %v914_v43 = vpop.f32.mrb[51].mxu0  ;;  %v1169_v36 = vpop.f32.mrb[50].mxu1  ;;  %v2700_v30 = vld [vmem:[%s4986_s10 + $0x580] sm:$0xff]  ;;  %v2701_v55 = vld [vmem:[%s4986_s10 + $0x588] sm:$0xff]  ;;  %v2702_v25 = vld [vmem:[%s4986_s10 + $0x590] sm:$0xff] }
 0x18a   : > { %v2917_v9 = vadd.f32 %v2693_v34, %v2469_v14  ;;  %v2918_v7 = vadd.f32 %v2694_v27, %v2470_v1  ;;  %v2060_v2 = vmul.f32 %v4948_v5, %v914_v43  ;;  %v2061_v21 = vmul.f32 %v4948_v5, %v1169_v36  ;;  %v1171_v57 = vpop.f32.mrb[51].mxu1  ;;  %v5497_v1 = vpop.permute.xlu0 %2272 }
 0x18b   : > { %v2919_v28 = vadd.f32 %v2695_v40, %v2471_v33  ;;  %3141 = vst [vmem:[%s5005_s12 + $0x540] sm:$0xff] %v2916_v45  ;;  %v2062_v13 = vmul.f32 %v4948_v5, %v1171_v57  ;;  %v2475_v58 = vadd.f32 %v5479_v11, %v2059_v49  ;;  %6135 = vst [vmem:[#allocation20_spill] sm:$0xff] %v5497_v1  ;;  %v2706_v57 = vld [vmem:[%s4986_s10 + $0x5b0] sm:$0xff] }
 0x18c   : > { %3142 = vst [vmem:[%s5005_s12 + $0x548] sm:$0xff] %v2917_v9  ;;  %3143 = vst [vmem:[%s5005_s12 + $0x550] sm:$0xff] %v2918_v7  ;;  %v2476_v34 = vadd.f32 %v5479_v11, %v2060_v2  ;;  %v2477_v27 = vadd.f32 %v5479_v11, %v2061_v21  ;;  %v918_v14 = vpop.f32.mrb[52].mxu0 }
 0x18d   : > { %3144 = vst [vmem:[%s5005_s12 + $0x558] sm:$0xff] %v2919_v28  ;;  %v2478_v40 = vadd.f32 %v5479_v11, %v2062_v13  ;;  %v2923_v33 = vadd.f32 %v2699_v23, %v2475_v58  ;;  %v2066_v45 = vmul.f32 %v4953_v8, %v918_v14  ;;  %v920_v49 = vpop.f32.mrb[53].mxu0  ;;  %v1175_v43 = vpop.f32.mrb[52].mxu1  ;;  %v2707_v13 = vld [vmem:[%s4986_s10 + $0x5b8] sm:$0xff]  ;;  %v2708_v58 = vld [vmem:[%s4986_s10 + $0x5c0] sm:$0xff]  ;;  %v2709_v11 = vld [vmem:[%s4986_s10 + $0x5c8] sm:$0xff] }
 0x18e   : > { %v2924_v36 = vadd.f32 %v2700_v30, %v2476_v34  ;;  %v2925_v9 = vadd.f32 %v2701_v55, %v2477_v27  ;;  %v2067_v7 = vmul.f32 %v4953_v8, %v920_v49  ;;  %v2068_v2 = vmul.f32 %v4953_v8, %v1175_v43  ;;  %v1177_v21 = vpop.f32.mrb[53].mxu1  ;;  %v5515_v27 = vpop.permute.xlu1 %2277 }
 0x18f   : > { %v2926_v28 = vadd.f32 %v2702_v25, %v2478_v40  ;;  %3148 = vst [vmem:[%s5005_s12 + $0x578] sm:$0xff] %v2923_v33  ;;  %v2069_v23 = vmul.f32 %v4953_v8, %v1177_v21  ;;  %v2482_v14 = vadd.f32 %v5497_v1, %v2066_v45  ;;  %6136 = vst [vmem:[#allocation21_spill] sm:$0xff] %v5515_v27  ;;  %v2713_v21 = vld [vmem:[%s4986_s10 + $0x5e8] sm:$0xff] }
 0x190   : > { %3149 = vst [vmem:[%s5005_s12 + $0x580] sm:$0xff] %v2924_v36  ;;  %3150 = vst [vmem:[%s5005_s12 + $0x588] sm:$0xff] %v2925_v9  ;;  %v2483_v30 = vadd.f32 %v5497_v1, %v2067_v7  ;;  %v2484_v55 = vadd.f32 %v5497_v1, %v2068_v2  ;;  %v924_v34 = vpop.f32.mrb[54].mxu0 }
 0x191   : > { %3151 = vst [vmem:[%s5005_s12 + $0x590] sm:$0xff] %v2926_v28  ;;  %v2485_v25 = vadd.f32 %v5497_v1, %v2069_v23  ;;  %v2930_v40 = vadd.f32 %v2706_v57, %v2482_v14  ;;  %v2073_v33 = vmul.f32 %v4959_v19, %v924_v34  ;;  %v926_v45 = vpop.f32.mrb[55].mxu0  ;;  %v1181_v49 = vpop.f32.mrb[54].mxu1  ;;  %v2714_v23 = vld [vmem:[%s4986_s10 + $0x5f0] sm:$0xff]  ;;  %v2715_v14 = vld [vmem:[%s4986_s10 + $0x5f8] sm:$0xff]  ;;  %v2716_v1 = vld [vmem:[%s4986_s10 + $0x600] sm:$0xff] }
 0x192   : > { %v2931_v43 = vadd.f32 %v2707_v13, %v2483_v30  ;;  %v2932_v36 = vadd.f32 %v2708_v58, %v2484_v55  ;;  %v2074_v9 = vmul.f32 %v4959_v19, %v926_v45  ;;  %v2075_v7 = vmul.f32 %v4959_v19, %v1181_v49  ;;  %v1183_v2 = vpop.f32.mrb[55].mxu1  ;;  %v5533_v55 = vpop.permute.xlu0 %2282 }
 0x193   : > { %v2933_v28 = vadd.f32 %v2709_v11, %v2485_v25  ;;  %3155 = vst [vmem:[%s5005_s12 + $0x5b0] sm:$0xff] %v2930_v40  ;;  %v2076_v57 = vmul.f32 %v4959_v19, %v1183_v2  ;;  %v2489_v34 = vadd.f32 %v5515_v27, %v2073_v33  ;;  %6137 = vst [vmem:[#allocation22_spill] sm:$0xff] %v5533_v55  ;;  %v2720_v2 = vld [vmem:[%s4986_s10 + $0x620] sm:$0xff] }
 0x194   : > { %3156 = vst [vmem:[%s5005_s12 + $0x5b8] sm:$0xff] %v2931_v43  ;;  %3157 = vst [vmem:[%s5005_s12 + $0x5c0] sm:$0xff] %v2932_v36  ;;  %v2490_v13 = vadd.f32 %v5515_v27, %v2074_v9  ;;  %v2491_v58 = vadd.f32 %v5515_v27, %v2075_v7  ;;  %v930_v30 = vpop.f32.mrb[56].mxu0 }
 0x195   : > { %3158 = vst [vmem:[%s5005_s12 + $0x5c8] sm:$0xff] %v2933_v28  ;;  %v2492_v11 = vadd.f32 %v5515_v27, %v2076_v57  ;;  %v2937_v25 = vadd.f32 %v2713_v21, %v2489_v34  ;;  %v2080_v40 = vmul.f32 %v4962_v20, %v930_v30  ;;  %v932_v33 = vpop.f32.mrb[57].mxu0  ;;  %v1187_v45 = vpop.f32.mrb[56].mxu1  ;;  %v2721_v57 = vld [vmem:[%s4986_s10 + $0x628] sm:$0xff]  ;;  %v2722_v34 = vld [vmem:[%s4986_s10 + $0x630] sm:$0xff]  ;;  %v2723_v27 = vld [vmem:[%s4986_s10 + $0x638] sm:$0xff] }
 0x196   : > { %v2938_v49 = vadd.f32 %v2714_v23, %v2490_v13  ;;  %v2939_v43 = vadd.f32 %v2715_v14, %v2491_v58  ;;  %v2081_v36 = vmul.f32 %v4962_v20, %v932_v33  ;;  %v2082_v9 = vmul.f32 %v4962_v20, %v1187_v45  ;;  %v1189_v7 = vpop.f32.mrb[57].mxu1  ;;  %v5551_v58 = vpop.permute.xlu1 %2287 }
 0x197   : > { %v2940_v28 = vadd.f32 %v2716_v1, %v2492_v11  ;;  %3162 = vst [vmem:[%s5005_s12 + $0x5e8] sm:$0xff] %v2937_v25  ;;  %v2083_v21 = vmul.f32 %v4962_v20, %v1189_v7  ;;  %v2496_v30 = vadd.f32 %v5533_v55, %v2080_v40  ;;  %6138 = vst [vmem:[#allocation23_spill] sm:$0xff] %v5551_v58  ;;  %v2727_v7 = vld [vmem:[%s4986_s10 + $0x658] sm:$0xff] }
 0x198   : > { %3163 = vst [vmem:[%s5005_s12 + $0x5f0] sm:$0xff] %v2938_v49  ;;  %3164 = vst [vmem:[%s5005_s12 + $0x5f8] sm:$0xff] %v2939_v43  ;;  %v2497_v23 = vadd.f32 %v5533_v55, %v2081_v36  ;;  %v2498_v14 = vadd.f32 %v5533_v55, %v2082_v9  ;;  %v936_v13 = vpop.f32.mrb[58].mxu0 }
 0x199   : > { %3165 = vst [vmem:[%s5005_s12 + $0x600] sm:$0xff] %v2940_v28  ;;  %v2499_v1 = vadd.f32 %v5533_v55, %v2083_v21  ;;  %v2944_v11 = vadd.f32 %v2720_v2, %v2496_v30  ;;  %v2087_v25 = vmul.f32 %v4968_v32, %v936_v13  ;;  %v938_v40 = vpop.f32.mrb[59].mxu0  ;;  %v1193_v33 = vpop.f32.mrb[58].mxu1  ;;  %v2728_v21 = vld [vmem:[%s4986_s10 + $0x660] sm:$0xff]  ;;  %v2729_v30 = vld [vmem:[%s4986_s10 + $0x668] sm:$0xff]  ;;  %v2730_v55 = vld [vmem:[%s4986_s10 + $0x670] sm:$0xff] }
 0x19a   : > { %v2945_v45 = vadd.f32 %v2721_v57, %v2497_v23  ;;  %v2946_v49 = vadd.f32 %v2722_v34, %v2498_v14  ;;  %v2088_v43 = vmul.f32 %v4968_v32, %v938_v40  ;;  %v2089_v36 = vmul.f32 %v4968_v32, %v1193_v33  ;;  %v1195_v9 = vpop.f32.mrb[59].mxu1  ;;  %v5569_v14 = vpop.permute.xlu0 %2292 }
 0x19b   : > { %v2947_v28 = vadd.f32 %v2723_v27, %v2499_v1  ;;  %3169 = vst [vmem:[%s5005_s12 + $0x620] sm:$0xff] %v2944_v11  ;;  %v2090_v2 = vmul.f32 %v4968_v32, %v1195_v9  ;;  %v2503_v13 = vadd.f32 %v5551_v58, %v2087_v25  ;;  %6139 = vst [vmem:[#allocation24_spill] sm:$0xff] %v5569_v14  ;;  %v2734_v9 = vld [vmem:[%s4986_s10 + $0x690] sm:$0xff] }
 0x19c   : > { %3170 = vst [vmem:[%s5005_s12 + $0x628] sm:$0xff] %v2945_v45  ;;  %3171 = vst [vmem:[%s5005_s12 + $0x630] sm:$0xff] %v2946_v49  ;;  %v2504_v57 = vadd.f32 %v5551_v58, %v2088_v43  ;;  %v2505_v34 = vadd.f32 %v5551_v58, %v2089_v36  ;;  %v942_v23 = vpop.f32.mrb[60].mxu0 }
 0x19d   : > { %3172 = vst [vmem:[%s5005_s12 + $0x638] sm:$0xff] %v2947_v28  ;;  %v2506_v27 = vadd.f32 %v5551_v58, %v2090_v2  ;;  %v2951_v1 = vadd.f32 %v2727_v7, %v2503_v13  ;;  %v2094_v11 = vmul.f32 %v4973_v35, %v942_v23  ;;  %v944_v25 = vpop.f32.mrb[61].mxu0  ;;  %v1199_v40 = vpop.f32.mrb[60].mxu1  ;;  %v2735_v2 = vld [vmem:[%s4986_s10 + $0x698] sm:$0xff]  ;;  %v2736_v13 = vld [vmem:[%s4986_s10 + $0x6a0] sm:$0xff]  ;;  %v2737_v58 = vld [vmem:[%s4986_s10 + $0x6a8] sm:$0xff] }
 0x19e   : > { %v2952_v33 = vadd.f32 %v2728_v21, %v2504_v57  ;;  %v2953_v45 = vadd.f32 %v2729_v30, %v2505_v34  ;;  %v2095_v49 = vmul.f32 %v4973_v35, %v944_v25  ;;  %v2096_v43 = vmul.f32 %v4973_v35, %v1199_v40  ;;  %v1201_v36 = vpop.f32.mrb[61].mxu1  ;;  %v5587_v34 = vpop.permute.xlu1 %2297 }
 0x19f   : > { %v2954_v28 = vadd.f32 %v2730_v55, %v2506_v27  ;;  %3176 = vst [vmem:[%s5005_s12 + $0x658] sm:$0xff] %v2951_v1  ;;  %v2097_v7 = vmul.f32 %v4973_v35, %v1201_v36  ;;  %v2510_v23 = vadd.f32 %v5569_v14, %v2094_v11  ;;  %v2741_v36 = vld [vmem:[%s4986_s10 + $0x6c8] sm:$0xff] }
 0x1a0   : > { %3177 = vst [vmem:[%s5005_s12 + $0x660] sm:$0xff] %v2952_v33  ;;  %3178 = vst [vmem:[%s5005_s12 + $0x668] sm:$0xff] %v2953_v45  ;;  %v2511_v21 = vadd.f32 %v5569_v14, %v2095_v49  ;;  %v2512_v30 = vadd.f32 %v5569_v14, %v2096_v43  ;;  %v948_v57 = vpop.f32.mrb[62].mxu0 }
 0x1a1   : > { %3179 = vst [vmem:[%s5005_s12 + $0x670] sm:$0xff] %v2954_v28  ;;  %v2513_v55 = vadd.f32 %v5569_v14, %v2097_v7  ;;  %v2958_v27 = vadd.f32 %v2734_v9, %v2510_v23  ;;  %v2101_v1 = vmul.f32 %v4980_v46, %v948_v57  ;;  %v950_v11 = vpop.f32.mrb[63].mxu0  ;;  %v1205_v25 = vpop.f32.mrb[62].mxu1  ;;  %v2742_v7 = vld [vmem:[%s4986_s10 + $0x6d0] sm:$0xff]  ;;  %v2743_v23 = vld [vmem:[%s4986_s10 + $0x6d8] sm:$0xff]  ;;  %v6141_v14 = vld [vmem:[#allocation11_spill] sm:$0xff] }
 0x1a2   : > { %v2959_v40 = vadd.f32 %v2735_v2, %v2511_v21  ;;  %v2960_v33 = vadd.f32 %v2736_v13, %v2512_v30  ;;  %v2102_v45 = vmul.f32 %v4980_v46, %v950_v11  ;;  %v2103_v49 = vmul.f32 %v4980_v46, %v1205_v25  ;;  %v1207_v43 = vpop.f32.mrb[63].mxu1  ;;  %v2744_v2 = vld [vmem:[%s4986_s10 + $0x6e0] sm:$0xff] }
 0x1a3   : > { %v2961_v28 = vadd.f32 %v2737_v58, %v2513_v55  ;;  %3183 = vst [vmem:[%s5005_s12 + $0x690] sm:$0xff] %v2958_v27  ;;  %v2104_v9 = vmul.f32 %v4980_v46, %v1207_v43  ;;  %v2517_v57 = vadd.f32 %v5587_v34, %v2101_v1  ;;  %v6140_v27 = vld [vmem:[#allocation9_spill] sm:$0xff] }
 0x1a4   : > { %3184 = vst [vmem:[%s5005_s12 + $0x698] sm:$0xff] %v2959_v40  ;;  %3185 = vst [vmem:[%s5005_s12 + $0x6a0] sm:$0xff] %v2960_v33  ;;  %v2518_v13 = vadd.f32 %v5587_v34, %v2102_v45  ;;  %v2519_v21 = vadd.f32 %v5587_v34, %v2103_v49  ;;  %v1276_v30 = vpop.f32.mrb[64].mxu0  ;;  %v2528_v45 = vld [vmem:[%s4986_s10 + $0x20] sm:$0xff] }
 0x1a5   : > { %3186 = vst [vmem:[%s5005_s12 + $0x6a8] sm:$0xff] %v2961_v28  ;;  %v2520_v58 = vadd.f32 %v5587_v34, %v2104_v9  ;;  %v2965_v55 = vadd.f32 %v2741_v36, %v2517_v57  ;;  %v1888_v11 = vmul.f32 %v6140_v27, %v1276_v30  ;;  %v1278_v1 = vpop.f32.mrb[65].mxu0  ;;  %v1533_v25 = vpop.f32.mrb[64].mxu1  ;;  %v2529_v36 = vld [vmem:[%s4986_s10 + $0x28] sm:$0xff]  ;;  %v2530_v57 = vld [vmem:[%s4986_s10 + $0x30] sm:$0xff] }
 0x1a6   : > { %v2966_v40 = vadd.f32 %v2742_v7, %v2518_v13  ;;  %v2967_v33 = vadd.f32 %v2743_v23, %v2519_v21  ;;  %v1889_v43 = vmul.f32 %v6140_v27, %v1278_v1  ;;  %v1890_v49 = vmul.f32 %v6140_v27, %v1533_v25  ;;  %v1535_v46 = vpop.f32.mrb[65].mxu1  ;;  %v2535_v27 = vld [vmem:[%s4986_s10 + $0x58] sm:$0xff] }
 0x1a7   : > { %v2968_v28 = vadd.f32 %v2744_v2, %v2520_v58  ;;  %3190 = vst [vmem:[%s5005_s12 + $0x6c8] sm:$0xff] %v2965_v55  ;;  %v2304_v9 = vadd.f32 %v6141_v14, %v1888_v11 }
 0x1a8   : > { %3191 = vst [vmem:[%s5005_s12 + $0x6d0] sm:$0xff] %v2966_v40  ;;  %3192 = vst [vmem:[%s5005_s12 + $0x6d8] sm:$0xff] %v2967_v33  ;;  %v2305_v7 = vadd.f32 %v6141_v14, %v1889_v43  ;;  %v2306_v23 = vadd.f32 %v6141_v14, %v1890_v49  ;;  %v1282_v13 = vpop.f32.mrb[66].mxu0  ;;  %v2537_v40 = vld [vmem:[%s4986_s10 + $0x68] sm:$0xff]  ;;  %v2536_v33 = vld [vmem:[%s4986_s10 + $0x60] sm:$0xff] }
 0x1a9   : > { %3193 = vst [vmem:[%s5005_s12 + $0x6e0] sm:$0xff] %v2968_v28  ;;  %v2752_v46 = vadd.f32 %v2528_v45, %v2304_v9  ;;  %v1895_v2 = vmul.f32 %v4837_v44, %v1282_v13  ;;  %v1538_v21 = vpop.f32.mrb[66].mxu1  ;;  %v1284_v30 = vpop.f32.mrb[67].mxu0 }
 0x1aa   : > { %v2753_v58 = vadd.f32 %v2529_v36, %v2305_v7  ;;  %v2754_v55 = vadd.f32 %v2530_v57, %v2306_v23  ;;  %v1897_v11 = vmul.f32 %v4837_v44, %v1538_v21  ;;  %v1896_v1 = vmul.f32 %v4837_v44, %v1284_v30  ;;  %v1540_v14 = vpop.f32.mrb[67].mxu1  ;;  %v2542_v23 = vld [vmem:[%s4986_s10 + $0x90] sm:$0xff]  ;;  %v2544_v21 = vld [vmem:[%s4986_s10 + $0xa0] sm:$0xff]  ;;  %v2543_v30 = vld [vmem:[%s4986_s10 + $0x98] sm:$0xff] }
 0x1ab   : > { %2976 = vst [vmem:[%s5005_s12 + $0x20] sm:$0xff] %v2752_v46  ;;  %v2311_v25 = vadd.f32 %v5010_v6, %v1895_v2 }
 0x1ac   : > { %2977 = vst [vmem:[%s5005_s12 + $0x28] sm:$0xff] %v2753_v58  ;;  %2979 = vst.msk [vmem:[%s5005_s12 + $0x30] sm:$0xff] %vm2978_vm0, %v2754_v55  ;;  %v2313_v45 = vadd.f32 %v5010_v6, %v1897_v11  ;;  %v2312_v43 = vadd.f32 %v5010_v6, %v1896_v1  ;;  %v1288_v49 = vpop.f32.mrb[68].mxu0 }
 0x1ad   : > { %v2759_v44 = vadd.f32 %v2535_v27, %v2311_v25  ;;  %v1902_v28 = vmul.f32 %v4834_v37, %v1288_v49  ;;  %v1543_v9 = vpop.f32.mrb[68].mxu1  ;;  %v1290_v36 = vpop.f32.mrb[69].mxu0 }
 0x1ae   : > { %v2761_v57 = vadd.f32 %v2537_v40, %v2313_v45  ;;  %v2760_v7 = vadd.f32 %v2536_v33, %v2312_v43  ;;  %v1904_v13 = vmul.f32 %v4834_v37, %v1543_v9  ;;  %v1903_v46 = vmul.f32 %v4834_v37, %v1290_v36  ;;  %v1545_v2 = vpop.f32.mrb[69].mxu1  ;;  %v2549_v33 = vld [vmem:[%s4986_s10 + $0xc8] sm:$0xff] }
 0x1af   : > { %2984 = vst [vmem:[%s5005_s12 + $0x58] sm:$0xff] %v2759_v44  ;;  %v2318_v6 = vadd.f32 %v5031_v51, %v1902_v28  ;;  %v2551_v44 = vld [vmem:[%s4986_s10 + $0xd8] sm:$0xff]  ;;  %v2550_v28 = vld [vmem:[%s4986_s10 + $0xd0] sm:$0xff] }
 0x1b0   : > { %2986 = vst.msk [vmem:[%s5005_s12 + $0x68] sm:$0xff] %vm2978_vm0, %v2761_v57  ;;  %2985 = vst [vmem:[%s5005_s12 + $0x60] sm:$0xff] %v2760_v7  ;;  %v2320_v58 = vadd.f32 %v5031_v51, %v1904_v13  ;;  %v2319_v55 = vadd.f32 %v5031_v51, %v1903_v46  ;;  %v1294_v27 = vpop.f32.mrb[70].mxu0 }
 0x1b1   : > { %v2766_v37 = vadd.f32 %v2542_v23, %v2318_v6  ;;  %v1909_v11 = vmul.f32 %v4845_v18, %v1294_v27  ;;  %v1548_v1 = vpop.f32.mrb[70].mxu1  ;;  %v1296_v14 = vpop.f32.mrb[71].mxu0  ;;  %v2556_v6 = vld [vmem:[%s4986_s10 + $0x100] sm:$0xff]  ;;  %v2557_v27 = vld [vmem:[%s4986_s10 + $0x108] sm:$0xff] }
 0x1b2   : > { %v2768_v25 = vadd.f32 %v2544_v21, %v2320_v58  ;;  %v2767_v40 = vadd.f32 %v2543_v30, %v2319_v55  ;;  %v1911_v45 = vmul.f32 %v4845_v18, %v1548_v1  ;;  %v1910_v43 = vmul.f32 %v4845_v18, %v1296_v14  ;;  %v1550_v49 = vpop.f32.mrb[71].mxu1  ;;  %v2558_v55 = vld [vmem:[%s4986_s10 + $0x110] sm:$0xff] }
 0x1b3   : > { %2991 = vst [vmem:[%s5005_s12 + $0x90] sm:$0xff] %v2766_v37  ;;  %v2325_v51 = vadd.f32 %v5053_v54, %v1909_v11 }
 0x1b4   : > { %2993 = vst.msk [vmem:[%s5005_s12 + $0xa0] sm:$0xff] %vm2978_vm0, %v2768_v25  ;;  %2992 = vst [vmem:[%s5005_s12 + $0x98] sm:$0xff] %v2767_v40  ;;  %v2327_v9 = vadd.f32 %v5053_v54, %v1911_v45  ;;  %v2326_v36 = vadd.f32 %v5053_v54, %v1910_v43  ;;  %v1300_v57 = vpop.f32.mrb[72].mxu0  ;;  %v2563_v43 = vld [vmem:[%s4986_s10 + $0x138] sm:$0xff] }
 0x1b5   : > { %v2773_v18 = vadd.f32 %v2549_v33, %v2325_v51  ;;  %v1916_v7 = vmul.f32 %v4849_v63, %v1300_v57  ;;  %v1553_v23 = vpop.f32.mrb[72].mxu1  ;;  %v1302_v13 = vpop.f32.mrb[73].mxu0 }
 0x1b6   : > { %v2775_v46 = vadd.f32 %v2551_v44, %v2327_v9  ;;  %v2774_v2 = vadd.f32 %v2550_v28, %v2326_v36  ;;  %v1918_v21 = vmul.f32 %v4849_v63, %v1553_v23  ;;  %v1917_v30 = vmul.f32 %v4849_v63, %v1302_v13  ;;  %v1555_v58 = vpop.f32.mrb[73].mxu1  ;;  %v2565_v28 = vld [vmem:[%s4986_s10 + $0x148] sm:$0xff]  ;;  %v2564_v9 = vld [vmem:[%s4986_s10 + $0x140] sm:$0xff] }
 0x1b7   : > { %2998 = vst [vmem:[%s5005_s12 + $0xc8] sm:$0xff] %v2773_v18  ;;  %v2332_v54 = vadd.f32 %v5075_v24, %v1916_v7 }
 0x1b8   : > { %3000 = vst.msk [vmem:[%s5005_s12 + $0xd8] sm:$0xff] %vm2978_vm0, %v2775_v46  ;;  %2999 = vst [vmem:[%s5005_s12 + $0xd0] sm:$0xff] %v2774_v2  ;;  %v2334_v37 = vadd.f32 %v5075_v24, %v1918_v21  ;;  %v2333_v11 = vadd.f32 %v5075_v24, %v1917_v30  ;;  %v1306_v1 = vpop.f32.mrb[74].mxu0 }
 0x1b9   : > { %v2780_v63 = vadd.f32 %v2556_v6, %v2332_v54  ;;  %v1923_v14 = vmul.f32 %v4859_v31, %v1306_v1  ;;  %v1558_v25 = vpop.f32.mrb[74].mxu1  ;;  %v1308_v40 = vpop.f32.mrb[75].mxu0  ;;  %v2570_v6 = vld [vmem:[%s4986_s10 + $0x170] sm:$0xff]  ;;  %v2572_v54 = vld [vmem:[%s4986_s10 + $0x180] sm:$0xff] }
 0x1ba   : > { %v2782_v33 = vadd.f32 %v2558_v55, %v2334_v37  ;;  %v2781_v45 = vadd.f32 %v2557_v27, %v2333_v11  ;;  %v1925_v49 = vmul.f32 %v4859_v31, %v1558_v25  ;;  %v1924_v51 = vmul.f32 %v4859_v31, %v1308_v40  ;;  %v1560_v44 = vpop.f32.mrb[75].mxu1  ;;  %v2571_v55 = vld [vmem:[%s4986_s10 + $0x178] sm:$0xff] }
 0x1bb   : > { %3005 = vst [vmem:[%s5005_s12 + $0x100] sm:$0xff] %v2780_v63  ;;  %v2339_v24 = vadd.f32 %v5097_v4, %v1923_v14  ;;  %v2578_v44 = vld [vmem:[%s4986_s10 + $0x1b0] sm:$0xff] }
 0x1bc   : > { %3007 = vst.msk [vmem:[%s5005_s12 + $0x110] sm:$0xff] %vm2978_vm0, %v2782_v33  ;;  %3006 = vst [vmem:[%s5005_s12 + $0x108] sm:$0xff] %v2781_v45  ;;  %v2341_v36 = vadd.f32 %v5097_v4, %v1925_v49  ;;  %v2340_v57 = vadd.f32 %v5097_v4, %v1924_v51  ;;  %v1312_v18 = vpop.f32.mrb[76].mxu0  ;;  %v2577_v33 = vld [vmem:[%s4986_s10 + $0x1a8] sm:$0xff]  ;;  %v2579_v51 = vld [vmem:[%s4986_s10 + $0x1b8] sm:$0xff] }
 0x1bd   : > { %v2787_v31 = vadd.f32 %v2563_v43, %v2339_v24  ;;  %v1930_v7 = vmul.f32 %v4862_v22, %v1312_v18  ;;  %v1563_v23 = vpop.f32.mrb[76].mxu1  ;;  %v1314_v13 = vpop.f32.mrb[77].mxu0 }
 0x1be   : > { %v2789_v46 = vadd.f32 %v2565_v28, %v2341_v36  ;;  %v2788_v2 = vadd.f32 %v2564_v9, %v2340_v57  ;;  %v1932_v21 = vmul.f32 %v4862_v22, %v1563_v23  ;;  %v1931_v30 = vmul.f32 %v4862_v22, %v1314_v13  ;;  %v1565_v58 = vpop.f32.mrb[77].mxu1  ;;  %v2584_v23 = vld [vmem:[%s4986_s10 + $0x1e0] sm:$0xff] }
 0x1bf   : > { %3012 = vst [vmem:[%s5005_s12 + $0x138] sm:$0xff] %v2787_v31  ;;  %v2346_v4 = vadd.f32 %v5119_v3, %v1930_v7 }
 0x1c0   : > { %3014 = vst.msk [vmem:[%s5005_s12 + $0x148] sm:$0xff] %vm2978_vm0, %v2789_v46  ;;  %3013 = vst [vmem:[%s5005_s12 + $0x140] sm:$0xff] %v2788_v2  ;;  %v2348_v27 = vadd.f32 %v5119_v3, %v1932_v21  ;;  %v2347_v37 = vadd.f32 %v5119_v3, %v1931_v30  ;;  %v1318_v11 = vpop.f32.mrb[78].mxu0  ;;  %v2585_v21 = vld [vmem:[%s4986_s10 + $0x1e8] sm:$0xff] }
 0x1c1   : > { %v2794_v22 = vadd.f32 %v2570_v6, %v2346_v4  ;;  %v1937_v1 = vmul.f32 %v4868_v41, %v1318_v11  ;;  %v1568_v63 = vpop.f32.mrb[78].mxu1  ;;  %v1320_v14 = vpop.f32.mrb[79].mxu0  ;;  %v2586_v6 = vld [vmem:[%s4986_s10 + $0x1f0] sm:$0xff] }
 0x1c2   : > { %v2796_v25 = vadd.f32 %v2572_v54, %v2348_v27  ;;  %v2795_v40 = vadd.f32 %v2571_v55, %v2347_v37  ;;  %v1939_v45 = vmul.f32 %v4868_v41, %v1568_v63  ;;  %v1938_v43 = vmul.f32 %v4868_v41, %v1320_v14  ;;  %v1570_v49 = vpop.f32.mrb[79].mxu1 }
 0x1c3   : > { %3019 = vst [vmem:[%s5005_s12 + $0x170] sm:$0xff] %v2794_v22  ;;  %v2353_v3 = vadd.f32 %v5141_v12, %v1937_v1  ;;  %v2591_v22 = vld [vmem:[%s4986_s10 + $0x218] sm:$0xff] }
 0x1c4   : > { %3021 = vst.msk [vmem:[%s5005_s12 + $0x180] sm:$0xff] %vm2978_vm0, %v2796_v25  ;;  %3020 = vst [vmem:[%s5005_s12 + $0x178] sm:$0xff] %v2795_v40  ;;  %v2355_v24 = vadd.f32 %v5141_v12, %v1939_v45  ;;  %v2354_v28 = vadd.f32 %v5141_v12, %v1938_v43  ;;  %v1324_v9 = vpop.f32.mrb[80].mxu0  ;;  %v2593_v25 = vld [vmem:[%s4986_s10 + $0x228] sm:$0xff]  ;;  %v2592_v40 = vld [vmem:[%s4986_s10 + $0x220] sm:$0xff] }
 0x1c5   : > { %v2801_v41 = vadd.f32 %v2577_v33, %v2353_v3  ;;  %v1944_v36 = vmul.f32 %v4871_v42, %v1324_v9  ;;  %v1573_v57 = vpop.f32.mrb[80].mxu1  ;;  %v1326_v18 = vpop.f32.mrb[81].mxu0 }
 0x1c6   : > { %v2803_v31 = vadd.f32 %v2579_v51, %v2355_v24  ;;  %v2802_v7 = vadd.f32 %v2578_v44, %v2354_v28  ;;  %v1946_v13 = vmul.f32 %v4871_v42, %v1573_v57  ;;  %v1945_v46 = vmul.f32 %v4871_v42, %v1326_v18  ;;  %v1575_v2 = vpop.f32.mrb[81].mxu1  ;;  %v2598_v28 = vld [vmem:[%s4986_s10 + $0x250] sm:$0xff]  ;;  %v2600_v57 = vld [vmem:[%s4986_s10 + $0x260] sm:$0xff]  ;;  %v2599_v18 = vld [vmem:[%s4986_s10 + $0x258] sm:$0xff] }
 0x1c7   : > { %3026 = vst [vmem:[%s5005_s12 + $0x1a8] sm:$0xff] %v2801_v41  ;;  %v2360_v12 = vadd.f32 %v5163_v56, %v1944_v36 }
 0x1c8   : > { %3028 = vst.msk [vmem:[%s5005_s12 + $0x1b8] sm:$0xff] %vm2978_vm0, %v2803_v31  ;;  %3027 = vst [vmem:[%s5005_s12 + $0x1b0] sm:$0xff] %v2802_v7  ;;  %v2362_v30 = vadd.f32 %v5163_v56, %v1946_v13  ;;  %v2361_v58 = vadd.f32 %v5163_v56, %v1945_v46  ;;  %v1330_v4 = vpop.f32.mrb[82].mxu0 }
 0x1c9   : > { %v2808_v42 = vadd.f32 %v2584_v23, %v2360_v12  ;;  %v1951_v54 = vmul.f32 %v4879_v52, %v1330_v4  ;;  %v1578_v55 = vpop.f32.mrb[82].mxu1  ;;  %v1332_v27 = vpop.f32.mrb[83].mxu0 }
 0x1ca   : > { %v2810_v37 = vadd.f32 %v2586_v6, %v2362_v30  ;;  %v2809_v11 = vadd.f32 %v2585_v21, %v2361_v58  ;;  %v1953_v1 = vmul.f32 %v4879_v52, %v1578_v55  ;;  %v1952_v63 = vmul.f32 %v4879_v52, %v1332_v27  ;;  %v1580_v14 = vpop.f32.mrb[83].mxu1  ;;  %v2605_v21 = vld [vmem:[%s4986_s10 + $0x288] sm:$0xff]  ;;  %v2606_v55 = vld [vmem:[%s4986_s10 + $0x290] sm:$0xff] }
 0x1cb   : > { %3033 = vst [vmem:[%s5005_s12 + $0x1e0] sm:$0xff] %v2808_v42  ;;  %v2367_v56 = vadd.f32 %v5185_v15, %v1951_v54  ;;  %v6142_v42 = vld [vmem:[#allocation2_spill] sm:$0xff]  ;;  %v2607_v54 = vld [vmem:[%s4986_s10 + $0x298] sm:$0xff] }
 0x1cc   : > { %3035 = vst.msk [vmem:[%s5005_s12 + $0x1f0] sm:$0xff] %vm2978_vm0, %v2810_v37  ;;  %3034 = vst [vmem:[%s5005_s12 + $0x1e8] sm:$0xff] %v2809_v11  ;;  %v2369_v33 = vadd.f32 %v5185_v15, %v1953_v1  ;;  %v2368_v45 = vadd.f32 %v5185_v15, %v1952_v63  ;;  %v1336_v43 = vpop.f32.mrb[84].mxu0 }
 0x1cd   : > { %v2815_v52 = vadd.f32 %v2591_v22, %v2367_v56  ;;  %v1958_v49 = vmul.f32 %v4882_v53, %v1336_v43  ;;  %v1583_v3 = vpop.f32.mrb[84].mxu1  ;;  %v1338_v51 = vpop.f32.mrb[85].mxu0  ;;  %v6143_v43 = vld [vmem:[#allocation3_spill] sm:$0xff] }
 0x1ce   : > { %v2817_v44 = vadd.f32 %v2593_v25, %v2369_v33  ;;  %v2816_v24 = vadd.f32 %v2592_v40, %v2368_v45  ;;  %v1960_v9 = vmul.f32 %v4882_v53, %v1583_v3  ;;  %v1959_v41 = vmul.f32 %v4882_v53, %v1338_v51  ;;  %v1585_v36 = vpop.f32.mrb[85].mxu1  ;;  %v2612_v25 = vld [vmem:[%s4986_s10 + $0x2c0] sm:$0xff]  ;;  %v2613_v3 = vld [vmem:[%s4986_s10 + $0x2c8] sm:$0xff] }
 0x1cf   : > { %3040 = vst [vmem:[%s5005_s12 + $0x218] sm:$0xff] %v2815_v52  ;;  %v2374_v15 = vadd.f32 %v5207_v48, %v1958_v49  ;;  %v2614_v49 = vld [vmem:[%s4986_s10 + $0x2d0] sm:$0xff] }
 0x1d0   : > { %3042 = vst.msk [vmem:[%s5005_s12 + $0x228] sm:$0xff] %vm2978_vm0, %v2817_v44  ;;  %3041 = vst [vmem:[%s5005_s12 + $0x220] sm:$0xff] %v2816_v24  ;;  %v2376_v31 = vadd.f32 %v5207_v48, %v1960_v9  ;;  %v2375_v7 = vadd.f32 %v5207_v48, %v1959_v41  ;;  %v1342_v23 = vpop.f32.mrb[86].mxu0 }
 0x1d1   : > { %v2822_v53 = vadd.f32 %v2598_v28, %v2374_v15  ;;  %v1965_v13 = vmul.f32 %v4887_v61, %v1342_v23  ;;  %v1588_v46 = vpop.f32.mrb[86].mxu1  ;;  %v1344_v2 = vpop.f32.mrb[87].mxu0  ;;  %v6144_v23 = vld [vmem:[#allocation4_spill] sm:$0xff] }
 0x1d2   : > { %v2824_v12 = vadd.f32 %v2600_v57, %v2376_v31  ;;  %v2823_v6 = vadd.f32 %v2599_v18, %v2375_v7  ;;  %v1967_v30 = vmul.f32 %v4887_v61, %v1588_v46  ;;  %v1966_v58 = vmul.f32 %v4887_v61, %v1344_v2  ;;  %v1590_v4 = vpop.f32.mrb[87].mxu1  ;;  %v2619_v57 = vld [vmem:[%s4986_s10 + $0x2f8] sm:$0xff]  ;;  %v2620_v46 = vld [vmem:[%s4986_s10 + $0x300] sm:$0xff] }
 0x1d3   : > { %3047 = vst [vmem:[%s5005_s12 + $0x250] sm:$0xff] %v2822_v53  ;;  %v2381_v48 = vadd.f32 %v6142_v42, %v1965_v13  ;;  %v2621_v13 = vld [vmem:[%s4986_s10 + $0x308] sm:$0xff] }
 0x1d4   : > { %3049 = vst.msk [vmem:[%s5005_s12 + $0x260] sm:$0xff] %vm2978_vm0, %v2824_v12  ;;  %3048 = vst [vmem:[%s5005_s12 + $0x258] sm:$0xff] %v2823_v6  ;;  %v2383_v27 = vadd.f32 %v6142_v42, %v1967_v30  ;;  %v2382_v37 = vadd.f32 %v6142_v42, %v1966_v58  ;;  %v1348_v11 = vpop.f32.mrb[88].mxu0 }
 0x1d5   : > { %v2829_v61 = vadd.f32 %v2605_v21, %v2381_v48  ;;  %v1972_v22 = vmul.f32 %v4890_v62, %v1348_v11  ;;  %v1593_v1 = vpop.f32.mrb[88].mxu1  ;;  %v1350_v63 = vpop.f32.mrb[89].mxu0  ;;  %v2626_v48 = vld [vmem:[%s4986_s10 + $0x330] sm:$0xff] }
 0x1d6   : > { %v2831_v14 = vadd.f32 %v2607_v54, %v2383_v27  ;;  %v2830_v56 = vadd.f32 %v2606_v55, %v2382_v37  ;;  %v1974_v40 = vmul.f32 %v4890_v62, %v1593_v1  ;;  %v1973_v33 = vmul.f32 %v4890_v62, %v1350_v63  ;;  %v1595_v45 = vpop.f32.mrb[89].mxu1  ;;  %v6145_v37 = vld [vmem:[#allocation5_spill] sm:$0xff] }
 0x1d7   : > { %3054 = vst [vmem:[%s5005_s12 + $0x288] sm:$0xff] %v2829_v61  ;;  %v2388_v52 = vadd.f32 %v6143_v43, %v1972_v22  ;;  %v2628_v61 = vld [vmem:[%s4986_s10 + $0x340] sm:$0xff]  ;;  %v2627_v22 = vld [vmem:[%s4986_s10 + $0x338] sm:$0xff] }
 0x1d8   : > { %3056 = vst.msk [vmem:[%s5005_s12 + $0x298] sm:$0xff] %vm2978_vm0, %v2831_v14  ;;  %3055 = vst [vmem:[%s5005_s12 + $0x290] sm:$0xff] %v2830_v56  ;;  %v2390_v51 = vadd.f32 %v6143_v43, %v1974_v40  ;;  %v2389_v44 = vadd.f32 %v6143_v43, %v1973_v33  ;;  %v1354_v24 = vpop.f32.mrb[90].mxu0  ;;  %v2633_v43 = vld [vmem:[%s4986_s10 + $0x368] sm:$0xff] }
 0x1d9   : > { %v2836_v62 = vadd.f32 %v2612_v25, %v2388_v52  ;;  %v1979_v28 = vmul.f32 %v4895_v0, %v1354_v24  ;;  %v1598_v9 = vpop.f32.mrb[90].mxu1  ;;  %v1356_v41 = vpop.f32.mrb[91].mxu0  ;;  %v2635_v24 = vld [vmem:[%s4986_s10 + $0x378] sm:$0xff] }
 0x1da   : > { %v2838_v36 = vadd.f32 %v2614_v49, %v2390_v51  ;;  %v2837_v15 = vadd.f32 %v2613_v3, %v2389_v44  ;;  %v1981_v18 = vmul.f32 %v4895_v0, %v1598_v9  ;;  %v1980_v31 = vmul.f32 %v4895_v0, %v1356_v41  ;;  %v1600_v7 = vpop.f32.mrb[91].mxu1  ;;  %v6146_v51 = vld [vmem:[#allocation6_spill] sm:$0xff] }
 0x1db   : > { %3061 = vst [vmem:[%s5005_s12 + $0x2c0] sm:$0xff] %v2836_v62  ;;  %v2395_v53 = vadd.f32 %v6144_v23, %v1979_v28  ;;  %v2634_v62 = vld [vmem:[%s4986_s10 + $0x370] sm:$0xff]  ;;  %v2640_v7 = vld [vmem:[%s4986_s10 + $0x3a0] sm:$0xff] }
 0x1dc   : > { %3063 = vst.msk [vmem:[%s5005_s12 + $0x2d0] sm:$0xff] %vm2978_vm0, %v2838_v36  ;;  %3062 = vst [vmem:[%s5005_s12 + $0x2c8] sm:$0xff] %v2837_v15  ;;  %v2397_v2 = vadd.f32 %v6144_v23, %v1981_v18  ;;  %v2396_v12 = vadd.f32 %v6144_v23, %v1980_v31  ;;  %v1360_v6 = vpop.f32.mrb[92].mxu0 }
 0x1dd   : > { %v2843_v0 = vadd.f32 %v2619_v57, %v2395_v53  ;;  %v1986_v21 = vmul.f32 %v4898_v10, %v1360_v6  ;;  %v1603_v30 = vpop.f32.mrb[92].mxu1  ;;  %v1362_v58 = vpop.f32.mrb[93].mxu0  ;;  %v2641_v6 = vld [vmem:[%s4986_s10 + $0x3a8] sm:$0xff] }
 0x1de   : > { %v2845_v4 = vadd.f32 %v2621_v13, %v2397_v2  ;;  %v2844_v42 = vadd.f32 %v2620_v46, %v2396_v12  ;;  %v1988_v54 = vmul.f32 %v4898_v10, %v1603_v30  ;;  %v1987_v55 = vmul.f32 %v4898_v10, %v1362_v58  ;;  %v1605_v27 = vpop.f32.mrb[93].mxu1  ;;  %v6147_v46 = vld [vmem:[#allocation7_spill] sm:$0xff]  ;;  %v2642_v12 = vld [vmem:[%s4986_s10 + $0x3b0] sm:$0xff] }
 0x1df   : > { %3068 = vst [vmem:[%s5005_s12 + $0x2f8] sm:$0xff] %v2843_v0  ;;  %v2402_v11 = vadd.f32 %v6145_v37, %v1986_v21 }
 0x1e0   : > { %3070 = vst.msk [vmem:[%s5005_s12 + $0x308] sm:$0xff] %vm2978_vm0, %v2845_v4  ;;  %3069 = vst [vmem:[%s5005_s12 + $0x300] sm:$0xff] %v2844_v42  ;;  %v2404_v1 = vadd.f32 %v6145_v37, %v1988_v54  ;;  %v2403_v63 = vadd.f32 %v6145_v37, %v1987_v55  ;;  %v1366_v14 = vpop.f32.mrb[94].mxu0  ;;  %v2647_v55 = vld [vmem:[%s4986_s10 + $0x3d8] sm:$0xff] }
 0x1e1   : > { %v2850_v10 = vadd.f32 %v2626_v48, %v2402_v11  ;;  %v1993_v56 = vmul.f32 %v4903_v16, %v1366_v14  ;;  %v1608_v25 = vpop.f32.mrb[94].mxu1  ;;  %v1368_v40 = vpop.f32.mrb[95].mxu0 }
 0x1e2   : > { %v2852_v33 = vadd.f32 %v2628_v61, %v2404_v1  ;;  %v2851_v45 = vadd.f32 %v2627_v22, %v2403_v63  ;;  %v1995_v52 = vmul.f32 %v4903_v16, %v1608_v25  ;;  %v1994_v49 = vmul.f32 %v4903_v16, %v1368_v40  ;;  %v1610_v3 = vpop.f32.mrb[95].mxu1  ;;  %v6148_v61 = vld [vmem:[#allocation8_spill] sm:$0xff]  ;;  %v2649_v1 = vld [vmem:[%s4986_s10 + $0x3e8] sm:$0xff]  ;;  %v2648_v63 = vld [vmem:[%s4986_s10 + $0x3e0] sm:$0xff] }
 0x1e3   : > { %3075 = vst [vmem:[%s5005_s12 + $0x330] sm:$0xff] %v2850_v10  ;;  %v2409_v44 = vadd.f32 %v6146_v51, %v1993_v56 }
 0x1e4   : > { %3077 = vst.msk [vmem:[%s5005_s12 + $0x340] sm:$0xff] %vm2978_vm0, %v2852_v33  ;;  %3076 = vst [vmem:[%s5005_s12 + $0x338] sm:$0xff] %v2851_v45  ;;  %v2411_v28 = vadd.f32 %v6146_v51, %v1995_v52  ;;  %v2410_v9 = vadd.f32 %v6146_v51, %v1994_v49  ;;  %v1372_v41 = vpop.f32.mrb[96].mxu0  ;;  %v2654_v52 = vld [vmem:[%s4986_s10 + $0x410] sm:$0xff] }
 0x1e5   : > { %v2857_v16 = vadd.f32 %v2633_v43, %v2409_v44  ;;  %v2000_v36 = vmul.f32 %v4906_v17, %v1372_v41  ;;  %v1613_v15 = vpop.f32.mrb[96].mxu1  ;;  %v1374_v57 = vpop.f32.mrb[97].mxu0  ;;  %v6149_v44 = vld [vmem:[#allocation12_spill] sm:$0xff] }
 0x1e6   : > { %v2859_v18 = vadd.f32 %v2635_v24, %v2411_v28  ;;  %v2858_v31 = vadd.f32 %v2634_v62, %v2410_v9  ;;  %v2002_v23 = vmul.f32 %v4906_v17, %v1613_v15  ;;  %v2001_v53 = vmul.f32 %v4906_v17, %v1374_v57  ;;  %v1615_v13 = vpop.f32.mrb[97].mxu1  ;;  %v2656_v62 = vld [vmem:[%s4986_s10 + $0x420] sm:$0xff]  ;;  %v2655_v28 = vld [vmem:[%s4986_s10 + $0x418] sm:$0xff] }
 0x1e7   : > { %3082 = vst [vmem:[%s5005_s12 + $0x368] sm:$0xff] %v2857_v16  ;;  %v2416_v2 = vadd.f32 %v6147_v46, %v2000_v36 }
 0x1e8   : > { %3084 = vst.msk [vmem:[%s5005_s12 + $0x378] sm:$0xff] %vm2978_vm0, %v2859_v18  ;;  %3083 = vst [vmem:[%s5005_s12 + $0x370] sm:$0xff] %v2858_v31  ;;  %v2418_v0 = vadd.f32 %v6147_v46, %v2002_v23  ;;  %v2417_v21 = vadd.f32 %v6147_v46, %v2001_v53  ;;  %v1378_v30 = vpop.f32.mrb[98].mxu0  ;;  %v6150_v46 = vld [vmem:[#allocation13_spill] sm:$0xff] }
 0x1e9   : > { %v2864_v17 = vadd.f32 %v2640_v7, %v2416_v2  ;;  %v2007_v58 = vmul.f32 %v4911_v26, %v1378_v30  ;;  %v1618_v4 = vpop.f32.mrb[98].mxu1  ;;  %v1380_v42 = vpop.f32.mrb[99].mxu0  ;;  %v2661_v7 = vld [vmem:[%s4986_s10 + $0x448] sm:$0xff] }
 0x1ea   : > { %v2866_v48 = vadd.f32 %v2642_v12, %v2418_v0  ;;  %v2865_v54 = vadd.f32 %v2641_v6, %v2417_v21  ;;  %v2009_v27 = vmul.f32 %v4911_v26, %v1618_v4  ;;  %v2008_v37 = vmul.f32 %v4911_v26, %v1380_v42  ;;  %v1620_v11 = vpop.f32.mrb[99].mxu1  ;;  %v2663_v12 = vld [vmem:[%s4986_s10 + $0x458] sm:$0xff]  ;;  %v2662_v6 = vld [vmem:[%s4986_s10 + $0x450] sm:$0xff] }
 0x1eb   : > { %3089 = vst [vmem:[%s5005_s12 + $0x3a0] sm:$0xff] %v2864_v17  ;;  %v2423_v22 = vadd.f32 %v6148_v61, %v2007_v58  ;;  %v6151_v11 = vld [vmem:[#allocation14_spill] sm:$0xff] }
 0x1ec   : > { %3091 = vst.msk [vmem:[%s5005_s12 + $0x3b0] sm:$0xff] %vm2978_vm0, %v2866_v48  ;;  %3090 = vst [vmem:[%s5005_s12 + $0x3a8] sm:$0xff] %v2865_v54  ;;  %v2425_v14 = vadd.f32 %v6148_v61, %v2009_v27  ;;  %v2424_v10 = vadd.f32 %v6148_v61, %v2008_v37  ;;  %v1384_v56 = vpop.f32.mrb[100].mxu0  ;;  %v2668_v54 = vld [vmem:[%s4986_s10 + $0x480] sm:$0xff] }
 0x1ed   : > { %v2871_v26 = vadd.f32 %v2647_v55, %v2423_v22  ;;  %v2014_v25 = vmul.f32 %v4914_v29, %v1384_v56  ;;  %v1623_v40 = vpop.f32.mrb[100].mxu1  ;;  %v1386_v33 = vpop.f32.mrb[101].mxu0  ;;  %v2670_v22 = vld [vmem:[%s4986_s10 + $0x490] sm:$0xff] }
 0x1ee   : > { %v2873_v45 = vadd.f32 %v2649_v1, %v2425_v14  ;;  %v2872_v43 = vadd.f32 %v2648_v63, %v2424_v10  ;;  %v2016_v49 = vmul.f32 %v4914_v29, %v1623_v40  ;;  %v2015_v3 = vmul.f32 %v4914_v29, %v1386_v33  ;;  %v1625_v51 = vpop.f32.mrb[101].mxu1  ;;  %v2669_v1 = vld [vmem:[%s4986_s10 + $0x488] sm:$0xff] }
 0x1ef   : > { %3096 = vst [vmem:[%s5005_s12 + $0x3d8] sm:$0xff] %v2871_v26  ;;  %v2430_v24 = vadd.f32 %v6149_v44, %v2014_v25 }
 0x1f0   : > { %3098 = vst.msk [vmem:[%s5005_s12 + $0x3e8] sm:$0xff] %vm2978_vm0, %v2873_v45  ;;  %3097 = vst [vmem:[%s5005_s12 + $0x3e0] sm:$0xff] %v2872_v43  ;;  %v2432_v9 = vadd.f32 %v6149_v44, %v2016_v49  ;;  %v2431_v41 = vadd.f32 %v6149_v44, %v2015_v3  ;;  %v1390_v16 = vpop.f32.mrb[102].mxu0  ;;  %v2675_v45 = vld [vmem:[%s4986_s10 + $0x4b8] sm:$0xff]  ;;  %v6152_v3 = vld [vmem:[#allocation15_spill] sm:$0xff] }
 0x1f1   : > { %v2878_v29 = vadd.f32 %v2654_v52, %v2430_v24  ;;  %v2021_v36 = vmul.f32 %v4919_v38, %v1390_v16  ;;  %v1628_v15 = vpop.f32.mrb[102].mxu1  ;;  %v1392_v57 = vpop.f32.mrb[103].mxu0  ;;  %v2677_v44 = vld [vmem:[%s4986_s10 + $0x4c8] sm:$0xff]  ;;  %v2676_v24 = vld [vmem:[%s4986_s10 + $0x4c0] sm:$0xff] }
 0x1f2   : > { %v2880_v18 = vadd.f32 %v2656_v62, %v2432_v9  ;;  %v2879_v31 = vadd.f32 %v2655_v28, %v2431_v41  ;;  %v2023_v23 = vmul.f32 %v4919_v38, %v1628_v15  ;;  %v2022_v53 = vmul.f32 %v4919_v38, %v1392_v57  ;;  %v1630_v13 = vpop.f32.mrb[103].mxu1  ;;  %v2682_v57 = vld [vmem:[%s4986_s10 + $0x4f0] sm:$0xff] }
 0x1f3   : > { %3103 = vst [vmem:[%s5005_s12 + $0x410] sm:$0xff] %v2878_v29  ;;  %v2437_v2 = vadd.f32 %v6150_v46, %v2021_v36  ;;  %v2684_v13 = vld [vmem:[%s4986_s10 + $0x500] sm:$0xff] }
 0x1f4   : > { %3105 = vst.msk [vmem:[%s5005_s12 + $0x420] sm:$0xff] %vm2978_vm0, %v2880_v18  ;;  %3104 = vst [vmem:[%s5005_s12 + $0x418] sm:$0xff] %v2879_v31  ;;  %v2439_v0 = vadd.f32 %v6150_v46, %v2023_v23  ;;  %v2438_v21 = vadd.f32 %v6150_v46, %v2022_v53  ;;  %v1396_v30 = vpop.f32.mrb[104].mxu0  ;;  %v6153_v23 = vld [vmem:[#allocation16_spill] sm:$0xff]  ;;  %v2683_v46 = vld [vmem:[%s4986_s10 + $0x4f8] sm:$0xff] }
 0x1f5   : > { %v2885_v38 = vadd.f32 %v2661_v7, %v2437_v2  ;;  %v2028_v17 = vmul.f32 %v4922_v39, %v1396_v30  ;;  %v1633_v58 = vpop.f32.mrb[104].mxu1  ;;  %v1398_v4 = vpop.f32.mrb[105].mxu0 }
 0x1f6   : > { %v2887_v42 = vadd.f32 %v2663_v12, %v2439_v0  ;;  %v2886_v48 = vadd.f32 %v2662_v6, %v2438_v21  ;;  %v2030_v55 = vmul.f32 %v4922_v39, %v1633_v58  ;;  %v2029_v27 = vmul.f32 %v4922_v39, %v1398_v4  ;;  %v1635_v37 = vpop.f32.mrb[105].mxu1  ;;  %v2689_v58 = vld [vmem:[%s4986_s10 + $0x528] sm:$0xff] }
 0x1f7   : > { %3110 = vst [vmem:[%s5005_s12 + $0x448] sm:$0xff] %v2885_v38  ;;  %v2444_v61 = vadd.f32 %v6151_v11, %v2028_v17  ;;  %v2690_v37 = vld [vmem:[%s4986_s10 + $0x530] sm:$0xff] }
 0x1f8   : > { %3112 = vst.msk [vmem:[%s5005_s12 + $0x458] sm:$0xff] %vm2978_vm0, %v2887_v42  ;;  %3111 = vst [vmem:[%s5005_s12 + $0x450] sm:$0xff] %v2886_v48  ;;  %v2446_v63 = vadd.f32 %v6151_v11, %v2030_v55  ;;  %v2445_v14 = vadd.f32 %v6151_v11, %v2029_v27  ;;  %v1402_v10 = vpop.f32.mrb[106].mxu0  ;;  %v2691_v27 = vld [vmem:[%s4986_s10 + $0x538] sm:$0xff] }
 0x1f9   : > { %v2892_v39 = vadd.f32 %v2668_v54, %v2444_v61  ;;  %v2035_v56 = vmul.f32 %v4928_v47, %v1402_v10  ;;  %v1638_v26 = vpop.f32.mrb[106].mxu1  ;;  %v1404_v25 = vpop.f32.mrb[107].mxu0  ;;  %v6154_v54 = vld [vmem:[#allocation17_spill] sm:$0xff] }
 0x1fa   : > { %v2894_v40 = vadd.f32 %v2670_v22, %v2446_v63  ;;  %v2893_v33 = vadd.f32 %v2669_v1, %v2445_v14  ;;  %v2037_v43 = vmul.f32 %v4928_v47, %v1638_v26  ;;  %v2036_v52 = vmul.f32 %v4928_v47, %v1404_v25  ;;  %v1640_v49 = vpop.f32.mrb[107].mxu1 }
 0x1fb   : > { %3117 = vst [vmem:[%s5005_s12 + $0x480] sm:$0xff] %v2892_v39  ;;  %v2451_v51 = vadd.f32 %v6152_v3, %v2035_v56  ;;  %v2696_v56 = vld [vmem:[%s4986_s10 + $0x560] sm:$0xff] }
 0x1fc   : > { %3119 = vst.msk [vmem:[%s5005_s12 + $0x490] sm:$0xff] %vm2978_vm0, %v2894_v40  ;;  %3118 = vst [vmem:[%s5005_s12 + $0x488] sm:$0xff] %v2893_v33  ;;  %v2453_v62 = vadd.f32 %v6152_v3, %v2037_v43  ;;  %v2452_v28 = vadd.f32 %v6152_v3, %v2036_v52  ;;  %v1408_v9 = vpop.f32.mrb[108].mxu0  ;;  %v6155_v33 = vld [vmem:[#allocation18_spill] sm:$0xff]  ;;  %v2698_v43 = vld [vmem:[%s4986_s10 + $0x570] sm:$0xff] }
 0x1fd   : > { %v2899_v47 = vadd.f32 %v2675_v45, %v2451_v51  ;;  %v2042_v41 = vmul.f32 %v4933_v50, %v1408_v9  ;;  %v1643_v16 = vpop.f32.mrb[108].mxu1  ;;  %v1410_v29 = vpop.f32.mrb[109].mxu0  ;;  %v2697_v52 = vld [vmem:[%s4986_s10 + $0x568] sm:$0xff] }
 0x1fe   : > { %v2901_v36 = vadd.f32 %v2677_v44, %v2453_v62  ;;  %v2900_v15 = vadd.f32 %v2676_v24, %v2452_v28  ;;  %v2044_v18 = vmul.f32 %v4933_v50, %v1643_v16  ;;  %v2043_v31 = vmul.f32 %v4933_v50, %v1410_v29  ;;  %v1645_v7 = vpop.f32.mrb[109].mxu1 }
 0x1ff   : > { %3124 = vst [vmem:[%s5005_s12 + $0x4b8] sm:$0xff] %v2899_v47  ;;  %v2458_v53 = vadd.f32 %v6153_v23, %v2042_v41  ;;  %v2703_v47 = vld [vmem:[%s4986_s10 + $0x598] sm:$0xff] }
 0x200   : > { %3126 = vst.msk [vmem:[%s5005_s12 + $0x4c8] sm:$0xff] %vm2978_vm0, %v2901_v36  ;;  %3125 = vst [vmem:[%s5005_s12 + $0x4c0] sm:$0xff] %v2900_v15  ;;  %v2460_v2 = vadd.f32 %v6153_v23, %v2044_v18  ;;  %v2459_v12 = vadd.f32 %v6153_v23, %v2043_v31  ;;  %v1414_v6 = vpop.f32.mrb[110].mxu0  ;;  %v6156_v36 = vld [vmem:[#allocation19_spill] sm:$0xff]  ;;  %v2704_v18 = vld [vmem:[%s4986_s10 + $0x5a0] sm:$0xff] }
 0x201   : > { %v2906_v50 = vadd.f32 %v2682_v57, %v2458_v53  ;;  %v2049_v0 = vmul.f32 %v4939_v59, %v1414_v6  ;;  %v1648_v21 = vpop.f32.mrb[110].mxu1  ;;  %v1416_v30 = vpop.f32.mrb[111].mxu0  ;;  %v2705_v57 = vld [vmem:[%s4986_s10 + $0x5a8] sm:$0xff]  ;;  %v2710_v6 = vld [vmem:[%s4986_s10 + $0x5d0] sm:$0xff] }
 0x202   : > { %v2908_v38 = vadd.f32 %v2684_v13, %v2460_v2  ;;  %v2907_v17 = vadd.f32 %v2683_v46, %v2459_v12  ;;  %v2051_v4 = vmul.f32 %v4939_v59, %v1648_v21  ;;  %v2050_v42 = vmul.f32 %v4939_v59, %v1416_v30  ;;  %v1650_v48 = vpop.f32.mrb[111].mxu1  ;;  %v6157_v30 = vld [vmem:[#allocation20_spill] sm:$0xff] }
 0x203   : > { %3131 = vst [vmem:[%s5005_s12 + $0x4f0] sm:$0xff] %v2906_v50  ;;  %v2465_v55 = vadd.f32 %v6154_v54, %v2049_v0 }
 0x204   : > { %3133 = vst.msk [vmem:[%s5005_s12 + $0x500] sm:$0xff] %vm2978_vm0, %v2908_v38  ;;  %3132 = vst [vmem:[%s5005_s12 + $0x4f8] sm:$0xff] %v2907_v17  ;;  %v2467_v11 = vadd.f32 %v6154_v54, %v2051_v4  ;;  %v2466_v61 = vadd.f32 %v6154_v54, %v2050_v42  ;;  %v1420_v22 = vpop.f32.mrb[112].mxu0  ;;  %v2712_v17 = vld [vmem:[%s4986_s10 + $0x5e0] sm:$0xff] }
 0x205   : > { %v2913_v59 = vadd.f32 %v2689_v58, %v2465_v55  ;;  %v2056_v1 = vmul.f32 %v4942_v60, %v1420_v22  ;;  %v1653_v63 = vpop.f32.mrb[112].mxu1  ;;  %v1422_v14 = vpop.f32.mrb[113].mxu0  ;;  %v2711_v58 = vld [vmem:[%s4986_s10 + $0x5d8] sm:$0xff] }
 0x206   : > { %v2915_v10 = vadd.f32 %v2691_v27, %v2467_v11  ;;  %v2914_v39 = vadd.f32 %v2690_v37, %v2466_v61  ;;  %v2058_v26 = vmul.f32 %v4942_v60, %v1653_v63  ;;  %v2057_v25 = vmul.f32 %v4942_v60, %v1422_v14  ;;  %v1655_v40 = vpop.f32.mrb[113].mxu1  ;;  %v2717_v61 = vld [vmem:[%s4986_s10 + $0x608] sm:$0xff]  ;;  %v6158_v63 = vld [vmem:[#allocation21_spill] sm:$0xff] }
 0x207   : > { %3138 = vst [vmem:[%s5005_s12 + $0x528] sm:$0xff] %v2913_v59  ;;  %v2472_v45 = vadd.f32 %v6155_v33, %v2056_v1 }
 0x208   : > { %3140 = vst.msk [vmem:[%s5005_s12 + $0x538] sm:$0xff] %vm2978_vm0, %v2915_v10  ;;  %3139 = vst [vmem:[%s5005_s12 + $0x530] sm:$0xff] %v2914_v39  ;;  %v2474_v49 = vadd.f32 %v6155_v33, %v2058_v26  ;;  %v2473_v3 = vadd.f32 %v6155_v33, %v2057_v25  ;;  %v1426_v51 = vpop.f32.mrb[114].mxu0  ;;  %v2719_v10 = vld [vmem:[%s4986_s10 + $0x618] sm:$0xff]  ;;  %v2718_v39 = vld [vmem:[%s4986_s10 + $0x610] sm:$0xff] }
 0x209   : > { %v2920_v60 = vadd.f32 %v2696_v56, %v2472_v45  ;;  %v2063_v44 = vmul.f32 %v4948_v5, %v1426_v51  ;;  %v1658_v24 = vpop.f32.mrb[114].mxu1  ;;  %v1428_v62 = vpop.f32.mrb[115].mxu0 }
 0x20a   : > { %v2922_v28 = vadd.f32 %v2698_v43, %v2474_v49  ;;  %v2921_v9 = vadd.f32 %v2697_v52, %v2473_v3  ;;  %v2065_v41 = vmul.f32 %v4948_v5, %v1658_v24  ;;  %v2064_v16 = vmul.f32 %v4948_v5, %v1428_v62  ;;  %v1660_v29 = vpop.f32.mrb[115].mxu1  ;;  %v2724_v49 = vld [vmem:[%s4986_s10 + $0x640] sm:$0xff]  ;;  %v2726_v62 = vld [vmem:[%s4986_s10 + $0x650] sm:$0xff] }
 0x20b   : > { %3145 = vst [vmem:[%s5005_s12 + $0x560] sm:$0xff] %v2920_v60  ;;  %v2479_v15 = vadd.f32 %v6156_v36, %v2063_v44  ;;  %v6159_v44 = vld [vmem:[#allocation22_spill] sm:$0xff] }
 0x20c   : > { %3147 = vst.msk [vmem:[%s5005_s12 + $0x570] sm:$0xff] %vm2978_vm0, %v2922_v28  ;;  %3146 = vst [vmem:[%s5005_s12 + $0x568] sm:$0xff] %v2921_v9  ;;  %v2481_v31 = vadd.f32 %v6156_v36, %v2065_v41  ;;  %v2480_v7 = vadd.f32 %v6156_v36, %v2064_v16  ;;  %v1432_v23 = vpop.f32.mrb[116].mxu0  ;;  %v2725_v28 = vld [vmem:[%s4986_s10 + $0x648] sm:$0xff] }
 0x20d   : > { %v2927_v5 = vadd.f32 %v2703_v47, %v2479_v15  ;;  %v2070_v53 = vmul.f32 %v4953_v8, %v1432_v23  ;;  %v1663_v13 = vpop.f32.mrb[116].mxu1  ;;  %v1434_v46 = vpop.f32.mrb[117].mxu0 }
 0x20e   : > { %v2929_v2 = vadd.f32 %v2705_v57, %v2481_v31  ;;  %v2928_v12 = vadd.f32 %v2704_v18, %v2480_v7  ;;  %v2072_v50 = vmul.f32 %v4953_v8, %v1663_v13  ;;  %v2071_v0 = vmul.f32 %v4953_v8, %v1434_v46  ;;  %v1665_v21 = vpop.f32.mrb[117].mxu1  ;;  %v2731_v18 = vld [vmem:[%s4986_s10 + $0x678] sm:$0xff]  ;;  %v2733_v13 = vld [vmem:[%s4986_s10 + $0x688] sm:$0xff]  ;;  %v2732_v46 = vld [vmem:[%s4986_s10 + $0x680] sm:$0xff] }
 0x20f   : > { %3152 = vst [vmem:[%s5005_s12 + $0x598] sm:$0xff] %v2927_v5  ;;  %v2486_v38 = vadd.f32 %v6157_v30, %v2070_v53  ;;  %v6160_v5 = vld [vmem:[#allocation23_spill] sm:$0xff] }
 0x210   : > { %3154 = vst.msk [vmem:[%s5005_s12 + $0x5a8] sm:$0xff] %vm2978_vm0, %v2929_v2  ;;  %3153 = vst [vmem:[%s5005_s12 + $0x5a0] sm:$0xff] %v2928_v12  ;;  %v2488_v4 = vadd.f32 %v6157_v30, %v2072_v50  ;;  %v2487_v42 = vadd.f32 %v6157_v30, %v2071_v0  ;;  %v1438_v48 = vpop.f32.mrb[118].mxu0 }
 0x211   : > { %v2934_v8 = vadd.f32 %v2710_v6, %v2486_v38  ;;  %v2077_v54 = vmul.f32 %v4959_v19, %v1438_v48  ;;  %v1668_v55 = vpop.f32.mrb[118].mxu1  ;;  %v1440_v27 = vpop.f32.mrb[119].mxu0  ;;  %v6161_v48 = vld [vmem:[#allocation24_spill] sm:$0xff] }
 0x212   : > { %v2936_v37 = vadd.f32 %v2712_v17, %v2488_v4  ;;  %v2935_v11 = vadd.f32 %v2711_v58, %v2487_v42  ;;  %v2079_v22 = vmul.f32 %v4959_v19, %v1668_v55  ;;  %v2078_v59 = vmul.f32 %v4959_v19, %v1440_v27  ;;  %v1670_v1 = vpop.f32.mrb[119].mxu1  ;;  %v2738_v17 = vld [vmem:[%s4986_s10 + $0x6b0] sm:$0xff]  ;;  %v2739_v55 = vld [vmem:[%s4986_s10 + $0x6b8] sm:$0xff] }
 0x213   : > { %3159 = vst [vmem:[%s5005_s12 + $0x5d0] sm:$0xff] %v2934_v8  ;;  %v2493_v14 = vadd.f32 %v6158_v63, %v2077_v54  ;;  %v2740_v54 = vld [vmem:[%s4986_s10 + $0x6c0] sm:$0xff] }
 0x214   : > { %3161 = vst.msk [vmem:[%s5005_s12 + $0x5e0] sm:$0xff] %vm2978_vm0, %v2936_v37  ;;  %3160 = vst [vmem:[%s5005_s12 + $0x5d8] sm:$0xff] %v2935_v11  ;;  %v2495_v56 = vadd.f32 %v6158_v63, %v2079_v22  ;;  %v2494_v26 = vadd.f32 %v6158_v63, %v2078_v59  ;;  %v1444_v25 = vpop.f32.mrb[120].mxu0 }
 0x215   : > { %v2941_v19 = vadd.f32 %v2717_v61, %v2493_v14  ;;  %v2084_v40 = vmul.f32 %v4962_v20, %v1444_v25  ;;  %v1673_v33 = vpop.f32.mrb[120].mxu1  ;;  %v1446_v45 = vpop.f32.mrb[121].mxu0  ;;  %v6162_v61 = vld [vmem:[#allocation10_spill] sm:$0xff] }
 0x216   : > { %v2943_v43 = vadd.f32 %v2719_v10, %v2495_v56  ;;  %v2942_v52 = vadd.f32 %v2718_v39, %v2494_v26  ;;  %v2086_v3 = vmul.f32 %v4962_v20, %v1673_v33  ;;  %v2085_v51 = vmul.f32 %v4962_v20, %v1446_v45  ;;  %v1675_v60 = vpop.f32.mrb[121].mxu1  ;;  %v2745_v10 = vld [vmem:[%s4986_s10 + $0x6e8] sm:$0xff] }
 0x217   : > { %3166 = vst [vmem:[%s5005_s12 + $0x608] sm:$0xff] %v2941_v19  ;;  %v2500_v24 = vadd.f32 %v6159_v44, %v2084_v40  ;;  %v2747_v19 = vld [vmem:[%s4986_s10 + $0x6f8] sm:$0xff]  ;;  %v2746_v40 = vld [vmem:[%s4986_s10 + $0x6f0] sm:$0xff] }
 0x218   : > { %3168 = vst.msk [vmem:[%s5005_s12 + $0x618] sm:$0xff] %vm2978_vm0, %v2943_v43  ;;  %3167 = vst [vmem:[%s5005_s12 + $0x610] sm:$0xff] %v2942_v52  ;;  %v2502_v9 = vadd.f32 %v6159_v44, %v2086_v3  ;;  %v2501_v47 = vadd.f32 %v6159_v44, %v2085_v51  ;;  %v1450_v41 = vpop.f32.mrb[122].mxu0 }
 0x219   : > { %v2948_v20 = vadd.f32 %v2724_v49, %v2500_v24  ;;  %v2091_v16 = vmul.f32 %v4968_v32, %v1450_v41  ;;  %v1678_v29 = vpop.f32.mrb[122].mxu1  ;;  %v1452_v36 = vpop.f32.mrb[123].mxu0 }
 0x21a   : > { %v2950_v15 = vadd.f32 %v2726_v62, %v2502_v9  ;;  %v2949_v57 = vadd.f32 %v2725_v28, %v2501_v47  ;;  %v2093_v31 = vmul.f32 %v4968_v32, %v1678_v29  ;;  %v2092_v7 = vmul.f32 %v4968_v32, %v1452_v36  ;;  %v1680_v23 = vpop.f32.mrb[123].mxu1 }
 0x21b   : > { %3173 = vst [vmem:[%s5005_s12 + $0x640] sm:$0xff] %v2948_v20  ;;  %v2507_v53 = vadd.f32 %v6160_v5, %v2091_v16 }
 0x21c   : > { %3175 = vst.msk [vmem:[%s5005_s12 + $0x650] sm:$0xff] %vm2978_vm0, %v2950_v15  ;;  %3174 = vst [vmem:[%s5005_s12 + $0x648] sm:$0xff] %v2949_v57  ;;  %v2509_v2 = vadd.f32 %v6160_v5, %v2093_v31  ;;  %v2508_v12 = vadd.f32 %v6160_v5, %v2092_v7  ;;  %v1456_v6 = vpop.f32.mrb[124].mxu0 }
 0x21d   : > { %v2955_v32 = vadd.f32 %v2731_v18, %v2507_v53  ;;  %v2098_v50 = vmul.f32 %v4973_v35, %v1456_v6  ;;  %v1683_v0 = vpop.f32.mrb[124].mxu1  ;;  %v1458_v21 = vpop.f32.mrb[125].mxu0 }
 0x21e   : > { %v2957_v30 = vadd.f32 %v2733_v13, %v2509_v2  ;;  %v2956_v38 = vadd.f32 %v2732_v46, %v2508_v12  ;;  %v2100_v58 = vmul.f32 %v4973_v35, %v1683_v0  ;;  %v2099_v4 = vmul.f32 %v4973_v35, %v1458_v21  ;;  %v1685_v42 = vpop.f32.mrb[125].mxu1 }
 0x21f   : > { %3180 = vst [vmem:[%s5005_s12 + $0x678] sm:$0xff] %v2955_v32  ;;  %v2514_v8 = vadd.f32 %v6161_v48, %v2098_v50 }
 0x220   : > { %3182 = vst.msk [vmem:[%s5005_s12 + $0x688] sm:$0xff] %vm2978_vm0, %v2957_v30  ;;  %3181 = vst [vmem:[%s5005_s12 + $0x680] sm:$0xff] %v2956_v38  ;;  %v2516_v27 = vadd.f32 %v6161_v48, %v2100_v58  ;;  %v2515_v37 = vadd.f32 %v6161_v48, %v2099_v4  ;;  %v1462_v11 = vpop.f32.mrb[126].mxu0 }
 0x221   : > { %v2962_v35 = vadd.f32 %v2738_v17, %v2514_v8  ;;  %v2105_v22 = vmul.f32 %v6162_v61, %v1462_v11  ;;  %v1688_v59 = vpop.f32.mrb[126].mxu1  ;;  %v1464_v1 = vpop.f32.mrb[127].mxu0 }
 0x222   : > { %v2964_v63 = vadd.f32 %v2740_v54, %v2516_v27  ;;  %v2963_v14 = vadd.f32 %v2739_v55, %v2515_v37  ;;  %v2107_v39 = vmul.f32 %v6162_v61, %v1688_v59  ;;  %v2106_v56 = vmul.f32 %v6162_v61, %v1464_v1  ;;  %v1690_v26 = vpop.f32.mrb[127].mxu1 }
 0x223   : > { %3187 = vst [vmem:[%s5005_s12 + $0x6b0] sm:$0xff] %v2962_v35  ;;  %v2521_v25 = vadd.f32 %v5587_v34, %v2105_v22 }
 0x224   : > { %3189 = vst.msk [vmem:[%s5005_s12 + $0x6c0] sm:$0xff] %vm2978_vm0, %v2964_v63  ;;  %3188 = vst [vmem:[%s5005_s12 + $0x6b8] sm:$0xff] %v2963_v14  ;;  %v2523_v33 = vadd.f32 %v5587_v34, %v2107_v39  ;;  %v2522_v45 = vadd.f32 %v5587_v34, %v2106_v56 }
 0x225   : > { %v2969_v43 = vadd.f32 %v2745_v10, %v2521_v25 }
 0x226   : > { %v2971_v52 = vadd.f32 %v2747_v19, %v2523_v33  ;;  %v2970_v49 = vadd.f32 %v2746_v40, %v2522_v45 }
 0x227   : > { %3194 = vst [vmem:[%s5005_s12 + $0x6e8] sm:$0xff] %v2969_v43 }
 0x228   : > { %3196 = vst.msk [vmem:[%s5005_s12 + $0x6f8] sm:$0xff] %vm2978_vm0, %v2971_v52  ;;  %3195 = vst [vmem:[%s5005_s12 + $0x6f0] sm:$0xff] %v2970_v49 }
 0x229 PF: > { %s15_s20 = sadd.s32 1, %s3681_s20   ;;  %s6163_s18 = smov %s3677_s19 }
 0x22a   : > { %p12_p5 = scmp.ge.s32.totalorder %s15_s20, 6   ;;  %s6164_s19 = smov %s6166_s21 }
 0x22c   :  { %14 = sbr.rel (!%p12_p5) target bundleno = 2 (0x2), region = 82 }

</bundles_post_ra>
